<compile_context>
chip_gen: v7x
topology: tpu7x:2x2x1
jax: 0.10.0
libtpu: 0.0.40
codegen_flags: <defaults>
</compile_context>

<pallas_src>
import functools
import math

import jax
import jax.numpy as jnp
from jax import lax
from jax.experimental import pallas as pl
from jax.experimental.pallas import tpu as pltpu

# v7x has 2 TensorCores: a parallel batch grid splits work; harmless on v5e/v6e.
_PARALLEL = pltpu.CompilerParams(dimension_semantics=("parallel",))


def _batch_grid(total):
    """2-way grid when the stacked batch splits evenly (v7x megacore), else 1."""
    g = 2 if (total % 2 == 0 and total >= 2) else 1
    return g, total // g


# ----------------------------------------------------------------------------
# small in-kernel helpers (no module-level jnp constants -> nothing captured)
# ----------------------------------------------------------------------------
def _leaky_relu(x):
    return jnp.where(x > 0, x, 0.2 * x)


def _bf16(x):
    return x.astype(jnp.bfloat16)


def _mm_w(x, w):
    # (..., K) @ (K, N): shared-weight matmul flattened over leading dims.
    return lax.dot_general(_bf16(x), _bf16(w),
                           dimension_numbers=(((x.ndim - 1,), (0,)), ((), ())),
                           preferred_element_type=jnp.float32)


def _bmm(a, b):
    # per-batch a @ b : (B,M,K) x (B,K,N) -> (B,M,N)
    return lax.dot_general(_bf16(a), _bf16(b),
                           dimension_numbers=(((2,), (1,)), ((0,), (0,))),
                           preferred_element_type=jnp.float32)


def _bmm_tt(a, b):
    # per-batch a^T @ b (contract axis 1 of both) -- transpose-free
    return lax.dot_general(_bf16(a), _bf16(b),
                           dimension_numbers=(((1,), (1,)), ((0,), (0,))),
                           preferred_element_type=jnp.float32)


def _bmm_nt(a, b):
    # per-batch a @ b^T (contract axis 2 of both) -- transpose-free
    return lax.dot_general(_bf16(a), _bf16(b),
                           dimension_numbers=(((2,), (2,)), ((0,), (0,))),
                           preferred_element_type=jnp.float32)


def _eye(n):
    r = lax.broadcasted_iota(jnp.int32, (n, n), 0)
    c = lax.broadcasted_iota(jnp.int32, (n, n), 1)
    return (r == c).astype(jnp.float32)


def _readout_math(x, mc, w):
    """H2MN ReadoutModule, batched.  x (Bb,M,D), mc (Bb,M,1) -> (Bb,1,D)."""
    xm = x * mc
    cnt = jnp.maximum(jnp.sum(mc, axis=1, keepdims=True), 1.0)
    mean = jnp.sum(xm, axis=1, keepdims=True) / cnt          # (Bb,1,D)
    t = jnp.tanh(_mm_w(mean, w))                             # (Bb,1,D)
    coefs = jax.nn.sigmoid(jnp.sum(x * t, axis=2, keepdims=True))  # (Bb,M,1)
    return jnp.sum(coefs * xm, axis=1, keepdims=True)        # (Bb,1,D)


def _hconv_pool_math(x, H, we_row, mc, theta, b, p_row):
    """Hypergraph conv + hyperedge-pool aggregation + pool score (batched).

    x (Bb,M,Din), H (Bb,M,E), we_row (Bb,1,E), mc (Bb,M,1),
    theta (Din,D), b (1,D), p_row (1,D)  ->  y_pool (Bb,E,D), score (Bb,E,1).
    Degree scalings are folded into the matmul epilogues (no (M,E) dv scale).
    """
    xt = _mm_w(x, theta)                                                 # (Bb,M,D)
    be_inv = 1.0 / jnp.maximum(jnp.sum(H, axis=1, keepdims=True), 1e-9)  # (Bb,1,E)
    dv_inv = 1.0 / jnp.maximum(jnp.sum(H * we_row, axis=2, keepdims=True), 1e-9)
    hty = _bmm_tt(H, xt)                                                 # (Bb,E,D)
    out = _leaky_relu(dv_inv * _bmm(H * (we_row * be_inv), hty) + b) * mc
    y_pool = _bmm_tt(H * be_inv, out)                                    # (Bb,E,D)
    score = jnp.sum(y_pool * p_row[None], axis=2, keepdims=True)         # (Bb,E,1)
    return y_pool, score


# ----------------------------------------------------------------------------
# Kernel 1: GCN conv0 + readout0 + k-hop hypergraph + hconv1 + pool1 score
# ----------------------------------------------------------------------------
def _front_kernel(x_ref, adj_ref, mc_ref, mr_ref, w0_ref, b0_ref, ro_ref,
                  th_ref, hb_ref, p_ref, r0_ref, h_ref, y_ref, s_ref, *, k):
    x = x_ref[...]            # (Bb, N, F)
    adj = adj_ref[...]        # (Bb, N, N)
    mc = mc_ref[...]          # (Bb, N, 1)
    mr = mr_ref[...]          # (Bb, 1, N)
    n = adj.shape[1]
    eye = _eye(n)[None]       # built once per block
    m2 = mc * mr

    # --- GCN conv0: D^-1/2 A D^-1/2 X W + b, leaky_relu, mask ---
    a = adj * m2 + eye * mc
    deg = jnp.sum(a, axis=2, keepdims=True)
    dinv = jnp.where(deg > 0, lax.rsqrt(deg), 0.0)
    xw = _mm_w(x, w0_ref[...])                               # (Bb, N, D)
    f = _leaky_relu(dinv * _bmm(a, dinv * xw) + b0_ref[...]) * mc

    # --- readout0 ---
    r0_ref[...] = _readout_math(f, mc, ro_ref[...])

    # --- k-hop hypergraph construction (start from A: skip the identity hop) ---
    # TODO(synk): 'RW' (random-walk) hyperedge construction not implemented;
    # dense 'NE'-style k-hop neighborhoods are used.
    ab = ((adj * m2 + eye) > 0).astype(jnp.float32)
    reach = ab
    for _ in range(k - 1):                                   # k static python int
        reach = (_bmm(ab, reach) > 0).astype(jnp.float32)
    H = reach * m2                                           # H[i,j]: node i in hyperedge j
    h_ref[...] = H

    # --- hypergraph conv1 + hyperedge-pool aggregation + pool1 score ---
    y_pool, score = _hconv_pool_math(f, H, mr, mc, th_ref[...], hb_ref[...],
                                     p_ref[...])
    y_ref[...] = y_pool
    s_ref[...] = score


def front_stage(feats, adj, mask, params, k):
    T, N, F = feats.shape
    D = params["conv0_w"].shape[1]
    G, Bb = _batch_grid(T)
    mr = jnp.transpose(mask, (0, 2, 1))
    p1 = params["pool1_p"]
    pnorm = (p1 / (jnp.linalg.norm(p1) + 1e-12)).reshape(1, D)
    r0, H, y_pool, score = pl.pallas_call(
        functools.partial(_front_kernel, k=k),
        grid=(G,),
        in_specs=[
            pl.BlockSpec((Bb, N, F), lambda i: (i, 0, 0)),
            pl.BlockSpec((Bb, N, N), lambda i: (i, 0, 0)),
            pl.BlockSpec((Bb, N, 1), lambda i: (i, 0, 0)),
            pl.BlockSpec((Bb, 1, N), lambda i: (i, 0, 0)),
            pl.BlockSpec((F, D), lambda i: (0, 0)),
            pl.BlockSpec((1, D), lambda i: (0, 0)),
            pl.BlockSpec((D, D), lambda i: (0, 0)),
            pl.BlockSpec((D, D), lambda i: (0, 0)),
            pl.BlockSpec((1, D), lambda i: (0, 0)),
            pl.BlockSpec((1, D), lambda i: (0, 0)),
        ],
        out_specs=[
            pl.BlockSpec((Bb, 1, D), lambda i: (i, 0, 0)),
            pl.BlockSpec((Bb, N, N), lambda i: (i, 0, 0)),
            pl.BlockSpec((Bb, N, D), lambda i: (i, 0, 0)),
            pl.BlockSpec((Bb, N, 1), lambda i: (i, 0, 0)),
        ],
        out_shape=(
            jax.ShapeDtypeStruct((T, 1, D), jnp.float32),
            jax.ShapeDtypeStruct((T, N, N), jnp.float32),
            jax.ShapeDtypeStruct((T, N, D), jnp.float32),
            jax.ShapeDtypeStruct((T, N, 1), jnp.float32),
        ),
        compiler_params=_PARALLEL,
    )(feats, adj, mask, mr, params["conv0_w"], params["conv0_b"].reshape(1, D),
      params["readout0_w"], params["conv1_w"], params["conv1_b"].reshape(1, D),
      pnorm)
    return r0.reshape(T, D), H, y_pool, score.reshape(T, N)


# ----------------------------------------------------------------------------
# Kernel 2 (per level): cross-graph bilinear attention + readout, fused
# ----------------------------------------------------------------------------
def _cross_readout_kernel(x1_ref, m1_ref, x2_ref, m2_ref, m2r_ref, w_ref,
                          ro_ref, o1_ref, o2_ref, s_ref):
    # TODO(synk): H2MN CrossGraphConvolution exact weighting may differ; this
    # implements bilinear cross-graph attention with masked softmax both ways.
    x1 = x1_ref[...]          # (Pb, E1, D)
    x2 = x2_ref[...]          # (Pb, E2, D)
    m1c = m1_ref[...]         # (Pb, E1, 1)
    m2c = m2_ref[...]         # (Pb, E2, 1)
    m2r = m2r_ref[...]        # (Pb, 1, E2)
    d = x1.shape[2]
    x1w = _mm_w(x1, w_ref[...])
    s = _bmm_nt(x1w, x2)                                     # (Pb,E1,E2) f32
    a12 = jax.nn.softmax(jnp.where(m2r > 0, s, -1e9), axis=2)
    o1 = _bmm(a12, x2) * m1c
    a21 = jax.nn.softmax(jnp.where(m1c > 0, s, -1e9), axis=1)
    o2 = _bmm_tt(a21, x1) * m2c
    o1_ref[...] = o1
    o2_ref[...] = o2
    ro_w = ro_ref[...]
    s_ref[:, :, 0:d] = _readout_math(o1, m1c, ro_w)
    s_ref[:, :, d:2 * d] = _readout_math(o2, m2c, ro_w)


def cross_readout(e_feat, new_mask, cross_w, ro_w):
    T, K, D = e_feat.shape
    B = T // 2
    x1, x2 = e_feat[:B], e_feat[B:]
    m1c = new_mask[:B, :, None]
    m2c = new_mask[B:, :, None]
    m2r = new_mask[B:, None, :]
    o1, o2, spair = pl.pallas_call(
        _cross_readout_kernel,
        grid=(B,),
        in_specs=[
            pl.BlockSpec((1, K, D), lambda i: (i, 0, 0)),
            pl.BlockSpec((1, K, 1), lambda i: (i, 0, 0)),
            pl.BlockSpec((1, K, D), lambda i: (i, 0, 0)),
            pl.BlockSpec((1, K, 1), lambda i: (i, 0, 0)),
            pl.BlockSpec((1, 1, K), lambda i: (i, 0, 0)),
            pl.BlockSpec((D, D), lambda i: (0, 0)),
            pl.BlockSpec((D, D), lambda i: (0, 0)),
        ],
        out_specs=[
            pl.BlockSpec((1, K, D), lambda i: (i, 0, 0)),
            pl.BlockSpec((1, K, D), lambda i: (i, 0, 0)),
            pl.BlockSpec((1, 1, 2 * D), lambda i: (i, 0, 0)),
        ],
        out_shape=(
            jax.ShapeDtypeStruct((B, K, D), jnp.float32),
            jax.ShapeDtypeStruct((B, K, D), jnp.float32),
            jax.ShapeDtypeStruct((B, 1, 2 * D), jnp.float32),
        ),
        compiler_params=_PARALLEL,
    )(x1, m1c, x2, m2c, m2r, cross_w, ro_w)
    return jnp.concatenate([o1, o2], axis=0), spair.reshape(B, 2 * D)


# ----------------------------------------------------------------------------
# Kernel 3 (levels 2,3): gram of selected incidence + hyperedge conv + pool
# ----------------------------------------------------------------------------
def _hconv_pool_kernel(x_ref, hs_ref, mc_ref, mr_ref, th_ref, hb_ref, p_ref,
                       sadj_ref, y_ref, s_ref):
    x = x_ref[...]            # (Bb, K, D)
    hs = hs_ref[...]          # (Bb, Mp, K) selected columns of prev incidence
    mc = mc_ref[...]          # (Bb, K, 1)
    mr = mr_ref[...]          # (Bb, 1, K)
    # selected-hyperedge overlap structure S = H_sel^T H_sel (masked)
    S = _bmm_tt(hs, hs) * (mc * mr)
    sadj_ref[...] = S
    # TODO(synk): exact H2MN HyperedgePool scoring uses its own attention; here
    # SAGPool-style projection on the normalized learnable vector p.
    y_pool, score = _hconv_pool_math(x, S, mr, mc, th_ref[...], hb_ref[...],
                                     p_ref[...])
    y_ref[...] = y_pool
    s_ref[...] = score


def hconv_pool_level(x, H_sel, new_mask, theta, bias, p_vec):
    T, K, D = x.shape
    Mp = H_sel.shape[1]
    G, Bb = _batch_grid(T)
    mc = new_mask[:, :, None]
    mr = new_mask[:, None, :]
    pnorm = (p_vec / (jnp.linalg.norm(p_vec) + 1e-12)).reshape(1, D)
    S, y_pool, score = pl.pallas_call(
        _hconv_pool_kernel,
        grid=(G,),
        in_specs=[
            pl.BlockSpec((Bb, K, D), lambda i: (i, 0, 0)),
            pl.BlockSpec((Bb, Mp, K), lambda i: (i, 0, 0)),
            pl.BlockSpec((Bb, K, 1), lambda i: (i, 0, 0)),
            pl.BlockSpec((Bb, 1, K), lambda i: (i, 0, 0)),
            pl.BlockSpec((D, D), lambda i: (0, 0)),
            pl.BlockSpec((1, D), lambda i: (0, 0)),
            pl.BlockSpec((1, D), lambda i: (0, 0)),
        ],
        out_specs=[
            pl.BlockSpec((Bb, K, K), lambda i: (i, 0, 0)),
            pl.BlockSpec((Bb, K, D), lambda i: (i, 0, 0)),
            pl.BlockSpec((Bb, K, 1), lambda i: (i, 0, 0)),
        ],
        out_shape=(
            jax.ShapeDtypeStruct((T, K, K), jnp.float32),
            jax.ShapeDtypeStruct((T, K, D), jnp.float32),
            jax.ShapeDtypeStruct((T, K, 1), jnp.float32),
        ),
        compiler_params=_PARALLEL,
    )(x, H_sel, mc, mr, theta, bias.reshape(1, D), pnorm)
    return S, y_pool, score.reshape(T, K)


# ----------------------------------------------------------------------------
# XLA glue: top-k hyperedge selection + gathers (data-dependent indexing)
# ----------------------------------------------------------------------------
def hyperedge_select(y_pool, score, S, mask_vec, ratio):
    # TODO(synk): could be hoisted in-kernel via PrefetchScalarGridSpec scalar
    # prefetch of the top-k indices; kept in XLA (tensors are a few KB).
    T, E, D = y_pool.shape
    M = S.shape[1]
    k_new = int(math.ceil(ratio * E))
    score = jnp.where(mask_vec > 0, score, -1e9)
    top_scores, idx = lax.top_k(score, k_new)                    # [T, k_new]
    new_mask = jnp.take_along_axis(mask_vec, idx, axis=1)
    gate = jnp.tanh(jnp.where(new_mask > 0, top_scores, 0.0))
    y_sel = jnp.take_along_axis(
        y_pool, jnp.broadcast_to(idx[:, :, None], (T, k_new, D)), axis=1)
    x_new = y_sel * gate[:, :, None] * new_mask[:, :, None]
    H_sel = jnp.take_along_axis(
        S, jnp.broadcast_to(idx[:, None, :], (T, M, k_new)), axis=2)
    return x_new, H_sel, new_mask


# ----------------------------------------------------------------------------
# Kernel 4: fused 4-layer MLP head (all weights resident in VMEM)
# ----------------------------------------------------------------------------
def _mlp_kernel(x_ref, w0_ref, b0_ref, w1_ref, b1_ref, w2_ref, b2_ref,
                w3_ref, b3_ref, o_ref):
    h = x_ref[...]
    h = jnp.maximum(_mm_w(h, w0_ref[...]) + b0_ref[...], 0.0)
    h = jnp.maximum(_mm_w(h, w1_ref[...]) + b1_ref[...], 0.0)
    h = jnp.maximum(_mm_w(h, w2_ref[...]) + b2_ref[...], 0.0)
    o_ref[...] = jax.nn.sigmoid(_mm_w(h, w3_ref[...]) + b3_ref[...])


def mlp_head(x, params):
    # dropout omitted: eval mode
    B = x.shape[0]
    return pl.pallas_call(
        _mlp_kernel,
        out_shape=jax.ShapeDtypeStruct((B, 1), jnp.float32),
    )(x,
      params["lin0_w"], params["lin0_b"].reshape(1, -1),
      params["lin1_w"], params["lin1_b"].reshape(1, -1),
      params["lin2_w"], params["lin2_b"].reshape(1, -1),
      params["lin3_w"], params["lin3_b"].reshape(1, -1))


# ----------------------------------------------------------------------------
# parameters + forward
# ----------------------------------------------------------------------------
def init_params(key, num_features, nhid):
    keys = jax.random.split(key, 32)
    i = iter(range(32))

    def w(shape):
        return jax.random.normal(keys[next(i)], shape, jnp.float32) * 0.1

    return {
        "conv0_w": w((num_features, nhid)), "conv0_b": jnp.zeros((nhid,), jnp.float32),
        "conv1_w": w((nhid, nhid)), "conv1_b": jnp.zeros((nhid,), jnp.float32),
        "conv2_w": w((nhid, nhid)), "conv2_b": jnp.zeros((nhid,), jnp.float32),
        "conv3_w": w((nhid, nhid)), "conv3_b": jnp.zeros((nhid,), jnp.float32),
        "cross1_w": w((nhid, nhid)), "cross2_w": w((nhid, nhid)), "cross3_w": w((nhid, nhid)),
        "pool1_p": w((nhid,)), "pool2_p": w((nhid,)), "pool3_p": w((nhid,)),
        "readout0_w": w((nhid, nhid)), "readout1_w": w((nhid, nhid)),
        "readout2_w": w((nhid, nhid)), "readout3_w": w((nhid, nhid)),
        "lin0_w": w((8 * nhid, 4 * nhid)), "lin0_b": jnp.zeros((4 * nhid,), jnp.float32),
        "lin1_w": w((4 * nhid, 2 * nhid)), "lin1_b": jnp.zeros((2 * nhid,), jnp.float32),
        "lin2_w": w((2 * nhid, nhid)), "lin2_b": jnp.zeros((nhid,), jnp.float32),
        "lin3_w": w((nhid, 1)), "lin3_b": jnp.zeros((1,), jnp.float32),
    }


def model_forward(params, feats1, adj1, mask1, feats2, adj2, mask2,
                  k=2, ratios=(0.8, 0.8, 0.8)):
    B = feats1.shape[0]
    # Graphs 1 & 2 share all stage weights -> stack along batch; each stage is
    # one pallas_call over the stacked 2B batch.
    feats = jnp.concatenate([feats1, feats2], axis=0)
    adj = jnp.concatenate([adj1, adj2], axis=0)
    mask = jnp.concatenate([mask1, mask2], axis=0)

    # fused: GCN conv0 + readout0 + k-hop hypergraph + hconv1 + pool1 score
    r0, H, y_cur, score_cur = front_stage(feats, adj, mask, params, k)
    scores = [jnp.concatenate([r0[:B], r0[B:]], axis=1)]

    S = H
    m_cur = jnp.squeeze(mask, -1)

    level_params = [
        ("cross1_w", "readout1_w", "conv2_w", "conv2_b", "pool2_p"),
        ("cross2_w", "readout2_w", "conv3_w", "conv3_b", "pool3_p"),
        ("cross3_w", "readout3_w", None, None, None),
    ]
    for lvl in range(3):
        cross_w, ro_w, next_cw, next_cb, next_p = level_params[lvl]
        # top-k hyperedge selection (XLA glue)
        x_new, H_sel, new_mask = hyperedge_select(y_cur, score_cur, S, m_cur,
                                                  ratios[lvl])
        # fused cross-graph attention + readout (one kernel per level)
        x_next, score_pair = cross_readout(x_new, new_mask,
                                           params[cross_w], params[ro_w])
        scores.append(score_pair)
        if lvl < 2:
            # fused gram + hyperedge conv + pool aggregation + score
            S, y_cur, score_cur = hconv_pool_level(
                x_next, H_sel, new_mask,
                params[next_cw], params[next_cb], params[next_p])
            m_cur = new_mask

    all_scores = jnp.concatenate(scores, axis=1)       # [B, 8*nhid]
    out = mlp_head(all_scores, params)                 # [B, 1]
    return out.reshape(-1)


# ----------------------------------------------------------------------------
# main
# ----------------------------------------------------------------------------
if __name__ == "__main__":
    B, N, F, NHID = 2, 16, 8, 32
    key = jax.random.PRNGKey(0)
    k_f1, k_f2, k_a1, k_a2, k_p = jax.random.split(key, 5)

    def rand_adj(k):
        a = (jax.random.uniform(k, (B, N, N)) < 0.3).astype(jnp.float32)
        a = jnp.maximum(a, jnp.transpose(a, (0, 2, 1)))
        return a * (1.0 - jnp.eye(N, dtype=jnp.float32)[None])

    feats1 = jax.random.normal(k_f1, (B, N, F), jnp.float32)
    feats2 = jax.random.normal(k_f2, (B, N, F), jnp.float32)
    adj1, adj2 = rand_adj(k_a1), rand_adj(k_a2)
    mask1 = jnp.ones((B, N, 1), jnp.float32)
    mask2 = jnp.ones((B, N, 1), jnp.float32)

    params = init_params(k_p, F, NHID)

    fwd = jax.jit(functools.partial(model_forward, k=2, ratios=(0.8, 0.8, 0.8)))
    out = fwd(params, feats1, adj1, mask1, feats2, adj2, mask2)
    out = jax.block_until_ready(out)
    assert out.shape == (B,)
    assert bool(jnp.all(jnp.isfinite(out)))
    print("KERNEL_OK")
</pallas_src>

<mosaic_0001>
module attributes {stable_mosaic.version = 11 : i64} {
  func.func private @main(%arg0: i32) attributes {dimension_semantics = [#tpu.dimension_semantics<core_parallel>], iteration_bounds = array<i64: 2>, tpu.core_type = #tpu.core_type<sc_scalar_subcore>, window_params = []} {
    return
  }
}

module attributes {stable_mosaic.version = 11 : i64} {
  func.func private @main(%arg0: i32) attributes {dimension_semantics = [#tpu.dimension_semantics<core_parallel>], iteration_bounds = array<i64: 2>, tpu.core_type = #tpu.core_type<sc_scalar_subcore>, window_params = []} {
    return
  }
}

module attributes {stable_mosaic.version = 11 : i64} {
  func.func @_front_kernel(%arg0: i32, %arg1: memref<2x16x8xf32, #tpu.memory_space<vmem>>, %arg2: memref<2x16x16xf32, #tpu.memory_space<vmem>>, %arg3: memref<2x16x1xf32, #tpu.memory_space<vmem>>, %arg4: memref<2x1x16xf32, #tpu.memory_space<vmem>>, %arg5: memref<8x32xf32, #tpu.memory_space<vmem>>, %arg6: memref<1x32xf32, #tpu.memory_space<vmem>>, %arg7: memref<32x32xf32, #tpu.memory_space<vmem>>, %arg8: memref<32x32xf32, #tpu.memory_space<vmem>>, %arg9: memref<1x32xf32, #tpu.memory_space<vmem>>, %arg10: memref<1x32xf32, #tpu.memory_space<vmem>>, %arg11: memref<2x1x32xf32, #tpu.memory_space<vmem>>, %arg12: memref<2x16x16xf32, #tpu.memory_space<vmem>>, %arg13: memref<2x16x32xf32, #tpu.memory_space<vmem>>, %arg14: memref<2x16x1xf32, #tpu.memory_space<vmem>>) attributes {dimension_semantics = [#tpu.dimension_semantics<parallel>], iteration_bounds = array<i64: 2>, scalar_prefetch = 0 : i64, scratch_operands = 0 : i64, tpu.core_type = #tpu.core_type<tc>, window_params = [{transform_indices = @transform_0, window_bounds = array<i64: 2, 16, 8>}, {transform_indices = @transform_1, window_bounds = array<i64: 2, 16, 16>}, {transform_indices = @transform_2, window_bounds = array<i64: 2, 16, 1>}, {transform_indices = @transform_3, window_bounds = array<i64: 2, 1, 16>}, {pipeline_mode = #tpu.pipeline_mode<synchronous>, transform_indices = @transform_4, window_bounds = array<i64: 8, 32>}, {pipeline_mode = #tpu.pipeline_mode<synchronous>, transform_indices = @transform_5, window_bounds = array<i64: 1, 32>}, {pipeline_mode = #tpu.pipeline_mode<synchronous>, transform_indices = @transform_6, window_bounds = array<i64: 32, 32>}, {pipeline_mode = #tpu.pipeline_mode<synchronous>, transform_indices = @transform_7, window_bounds = array<i64: 32, 32>}, {pipeline_mode = #tpu.pipeline_mode<synchronous>, transform_indices = @transform_8, window_bounds = array<i64: 1, 32>}, {pipeline_mode = #tpu.pipeline_mode<synchronous>, transform_indices = @transform_9, window_bounds = array<i64: 1, 32>}, {transform_indices = @transform_10, window_bounds = array<i64: 2, 1, 32>}, {transform_indices = @transform_11, window_bounds = array<i64: 2, 16, 16>}, {transform_indices = @transform_12, window_bounds = array<i64: 2, 16, 32>}, {transform_indices = @transform_13, window_bounds = array<i64: 2, 16, 1>}]} {
    %c0 = arith.constant 0 : index
    %c0_0 = arith.constant 0 : index
    %c0_1 = arith.constant 0 : index
    %0 = vector.load %arg1[%c0, %c0_0, %c0_1] : memref<2x16x8xf32, #tpu.memory_space<vmem>>, vector<2x16x8xf32>
    %c0_2 = arith.constant 0 : index
    %c0_3 = arith.constant 0 : index
    %c0_4 = arith.constant 0 : index
    %1 = vector.load %arg2[%c0_2, %c0_3, %c0_4] : memref<2x16x16xf32, #tpu.memory_space<vmem>>, vector<2x16x16xf32>
    %c0_5 = arith.constant 0 : index
    %c0_6 = arith.constant 0 : index
    %c0_7 = arith.constant 0 : index
    %2 = vector.load %arg3[%c0_5, %c0_6, %c0_7] : memref<2x16x1xf32, #tpu.memory_space<vmem>>, vector<2x16x1xf32>
    %c0_8 = arith.constant 0 : index
    %c0_9 = arith.constant 0 : index
    %c0_10 = arith.constant 0 : index
    %3 = vector.load %arg4[%c0_8, %c0_9, %c0_10] : memref<2x1x16xf32, #tpu.memory_space<vmem>>, vector<2x1x16xf32>
    %4 = tpu.iota {dimensions = array<i32: 0>} : vector<16x16xi32>
    %5 = tpu.iota {dimensions = array<i32: 1>} : vector<16x16xi32>
    %6 = arith.cmpi eq, %4, %5 : vector<16x16xi32>
    %7 = arith.extui %6 : vector<16x16xi1> to vector<16x16xi32>
    %8 = arith.sitofp %7 : vector<16x16xi32> to vector<16x16xf32>
    %9 = vector.shape_cast %8 : vector<16x16xf32> to vector<1x16x16xf32>
    %10 = vector.broadcast %2 : vector<2x16x1xf32> to vector<2x16x16xf32>
    %11 = vector.broadcast %3 : vector<2x1x16xf32> to vector<2x16x16xf32>
    %12 = arith.mulf %10, %11 : vector<2x16x16xf32>
    %13 = arith.mulf %1, %12 : vector<2x16x16xf32>
    %14 = vector.broadcast %9 : vector<1x16x16xf32> to vector<2x16x16xf32>
    %15 = vector.broadcast %2 : vector<2x16x1xf32> to vector<2x16x16xf32>
    %16 = arith.mulf %14, %15 : vector<2x16x16xf32>
    %17 = arith.addf %13, %16 : vector<2x16x16xf32>
    %cst = arith.constant dense<0.000000e+00> : vector<2x16xf32>
    %18 = vector.multi_reduction <add>, %17, %cst [2] : vector<2x16x16xf32> to vector<2x16xf32>
    %19 = vector.shape_cast %18 : vector<2x16xf32> to vector<2x16x1xf32>
    %cst_11 = arith.constant 0.000000e+00 : f32
    %20 = vector.broadcast %cst_11 : f32 to vector<2x16x1xf32>
    %21 = arith.cmpf ogt, %19, %20 : vector<2x16x1xf32>
    %22 = math.rsqrt %19 : vector<2x16x1xf32>
    %cst_12 = arith.constant 0.000000e+00 : f32
    %23 = vector.broadcast %cst_12 : f32 to vector<2x16x1xf32>
    %24 = arith.select %21, %22, %23 : vector<2x16x1xi1>, vector<2x16x1xf32>
    %c0_13 = arith.constant 0 : index
    %c0_14 = arith.constant 0 : index
    %25 = vector.load %arg5[%c0_13, %c0_14] : memref<8x32xf32, #tpu.memory_space<vmem>>, vector<8x32xf32>
    %26 = arith.truncf %0 : vector<2x16x8xf32> to vector<2x16x8xbf16>
    %27 = arith.truncf %25 : vector<8x32xf32> to vector<8x32xbf16>
    %cst_15 = arith.constant dense<0.000000e+00> : vector<2x16x32xf32>
    %28 = tpu.matmul %26, %27, %cst_15 {dimension_numbers = #tpu.dot_dimension_numbers<[2], [0], [0, 1], [1], [0, 0, 0, 1, 1, 1], [], []>} : vector<2x16x8xbf16>, vector<8x32xbf16>, vector<2x16x32xf32> -> vector<2x16x32xf32>
    %29 = vector.broadcast %24 : vector<2x16x1xf32> to vector<2x16x32xf32>
    %30 = arith.mulf %29, %28 : vector<2x16x32xf32>
    %31 = arith.truncf %17 : vector<2x16x16xf32> to vector<2x16x16xbf16>
    %32 = arith.truncf %30 : vector<2x16x32xf32> to vector<2x16x32xbf16>
    %cst_16 = arith.constant dense<0.000000e+00> : vector<2x16x32xf32>
    %33 = tpu.matmul %31, %32, %cst_16 {dimension_numbers = #tpu.dot_dimension_numbers<[2], [1], [1], [2], [0, 0, 0, 1, 1, 2], [0], [0]>} : vector<2x16x16xbf16>, vector<2x16x32xbf16>, vector<2x16x32xf32> -> vector<2x16x32xf32>
    %34 = vector.broadcast %24 : vector<2x16x1xf32> to vector<2x16x32xf32>
    %35 = arith.mulf %34, %33 : vector<2x16x32xf32>
    %c0_17 = arith.constant 0 : index
    %c0_18 = arith.constant 0 : index
    %36 = vector.load %arg6[%c0_17, %c0_18] : memref<1x32xf32, #tpu.memory_space<vmem>>, vector<1x32xf32>
    %37 = vector.shape_cast %36 : vector<1x32xf32> to vector<1x1x32xf32>
    %38 = vector.broadcast %37 : vector<1x1x32xf32> to vector<2x16x32xf32>
    %39 = arith.addf %35, %38 : vector<2x16x32xf32>
    %cst_19 = arith.constant 0.000000e+00 : f32
    %40 = vector.broadcast %cst_19 : f32 to vector<2x16x32xf32>
    %41 = arith.cmpf ogt, %39, %40 : vector<2x16x32xf32>
    %cst_20 = arith.constant 2.000000e-01 : f32
    %42 = vector.broadcast %cst_20 : f32 to vector<2x16x32xf32>
    %43 = arith.mulf %42, %39 : vector<2x16x32xf32>
    %44 = arith.select %41, %39, %43 : vector<2x16x32xi1>, vector<2x16x32xf32>
    %45 = vector.broadcast %2 : vector<2x16x1xf32> to vector<2x16x32xf32>
    %46 = arith.mulf %44, %45 : vector<2x16x32xf32>
    %c0_21 = arith.constant 0 : index
    %c0_22 = arith.constant 0 : index
    %47 = vector.load %arg7[%c0_21, %c0_22] : memref<32x32xf32, #tpu.memory_space<vmem>>, vector<32x32xf32>
    %48 = vector.broadcast %2 : vector<2x16x1xf32> to vector<2x16x32xf32>
    %49 = arith.mulf %46, %48 : vector<2x16x32xf32>
    %cst_23 = arith.constant dense<0.000000e+00> : vector<2x1xf32>
    %50 = vector.multi_reduction <add>, %2, %cst_23 [1] : vector<2x16x1xf32> to vector<2x1xf32>
    %51 = vector.shape_cast %50 : vector<2x1xf32> to vector<2x1x1xf32>
    %cst_24 = arith.constant 1.000000e+00 : f32
    %52 = vector.broadcast %cst_24 : f32 to vector<2x1x1xf32>
    %53 = arith.maximumf %51, %52 : vector<2x1x1xf32>
    %cst_25 = arith.constant dense<0.000000e+00> : vector<2x32xf32>
    %54 = vector.multi_reduction <add>, %49, %cst_25 [1] : vector<2x16x32xf32> to vector<2x32xf32>
    %55 = vector.shape_cast %54 : vector<2x32xf32> to vector<2x1x32xf32>
    %56 = vector.broadcast %53 : vector<2x1x1xf32> to vector<2x1x32xf32>
    %57 = arith.divf %55, %56 : vector<2x1x32xf32>
    %58 = arith.truncf %57 : vector<2x1x32xf32> to vector<2x1x32xbf16>
    %59 = arith.truncf %47 : vector<32x32xf32> to vector<32x32xbf16>
    %cst_26 = arith.constant dense<0.000000e+00> : vector<2x1x32xf32>
    %60 = tpu.matmul %58, %59, %cst_26 {dimension_numbers = #tpu.dot_dimension_numbers<[2], [0], [0, 1], [1], [0, 0, 0, 1, 1, 1], [], []>} : vector<2x1x32xbf16>, vector<32x32xbf16>, vector<2x1x32xf32> -> vector<2x1x32xf32>
    %61 = math.tanh %60 : vector<2x1x32xf32>
    %62 = vector.broadcast %61 : vector<2x1x32xf32> to vector<2x16x32xf32>
    %63 = arith.mulf %46, %62 : vector<2x16x32xf32>
    %cst_27 = arith.constant dense<0.000000e+00> : vector<2x16xf32>
    %64 = vector.multi_reduction <add>, %63, %cst_27 [2] : vector<2x16x32xf32> to vector<2x16xf32>
    %65 = vector.shape_cast %64 : vector<2x16xf32> to vector<2x16x1xf32>
    %66 = arith.negf %65 : vector<2x16x1xf32>
    %67 = math.exp %66 : vector<2x16x1xf32>
    %cst_28 = arith.constant 1.000000e+00 : f32
    %68 = vector.broadcast %cst_28 : f32 to vector<2x16x1xf32>
    %69 = arith.addf %68, %67 : vector<2x16x1xf32>
    %70 = arith.divf %68, %69 : vector<2x16x1xf32>
    %71 = vector.broadcast %70 : vector<2x16x1xf32> to vector<2x16x32xf32>
    %72 = arith.mulf %71, %49 : vector<2x16x32xf32>
    %cst_29 = arith.constant dense<0.000000e+00> : vector<2x32xf32>
    %73 = vector.multi_reduction <add>, %72, %cst_29 [1] : vector<2x16x32xf32> to vector<2x32xf32>
    %74 = vector.shape_cast %73 : vector<2x32xf32> to vector<2x1x32xf32>
    %c0_30 = arith.constant 0 : index
    %c0_31 = arith.constant 0 : index
    %c0_32 = arith.constant 0 : index
    %75 = vector.load %arg11[%c0_30, %c0_31, %c0_32] : memref<2x1x32xf32, #tpu.memory_space<vmem>>, vector<2x1x32xf32>
    tpu.vector_store %arg11[%c0_30, %c0_31, %c0_32], %74 {strides = array<i32>} : memref<2x1x32xf32, #tpu.memory_space<vmem>>, vector<2x1x32xf32>,
    %76 = arith.mulf %1, %12 : vector<2x16x16xf32>
    %77 = vector.broadcast %9 : vector<1x16x16xf32> to vector<2x16x16xf32>
    %78 = arith.addf %76, %77 : vector<2x16x16xf32>
    %cst_33 = arith.constant 0.000000e+00 : f32
    %79 = vector.broadcast %cst_33 : f32 to vector<2x16x16xf32>
    %80 = arith.cmpf ogt, %78, %79 : vector<2x16x16xf32>
    %81 = arith.extui %80 : vector<2x16x16xi1> to vector<2x16x16xi32>
    %82 = arith.sitofp %81 : vector<2x16x16xi32> to vector<2x16x16xf32>
    %83 = arith.truncf %82 : vector<2x16x16xf32> to vector<2x16x16xbf16>
    %84 = arith.truncf %82 : vector<2x16x16xf32> to vector<2x16x16xbf16>
    %cst_34 = arith.constant dense<0.000000e+00> : vector<2x16x16xf32>
    %85 = tpu.matmul %83, %84, %cst_34 {dimension_numbers = #tpu.dot_dimension_numbers<[2], [1], [1], [2], [0, 0, 0, 1, 1, 2], [0], [0]>} : vector<2x16x16xbf16>, vector<2x16x16xbf16>, vector<2x16x16xf32> -> vector<2x16x16xf32>
    %cst_35 = arith.constant 0.000000e+00 : f32
    %86 = vector.broadcast %cst_35 : f32 to vector<2x16x16xf32>
    %87 = arith.cmpf ogt, %85, %86 : vector<2x16x16xf32>
    %88 = arith.extui %87 : vector<2x16x16xi1> to vector<2x16x16xi32>
    %89 = arith.sitofp %88 : vector<2x16x16xi32> to vector<2x16x16xf32>
    %90 = arith.mulf %89, %12 : vector<2x16x16xf32>
    %c0_36 = arith.constant 0 : index
    %c0_37 = arith.constant 0 : index
    %c0_38 = arith.constant 0 : index
    %91 = vector.load %arg12[%c0_36, %c0_37, %c0_38] : memref<2x16x16xf32, #tpu.memory_space<vmem>>, vector<2x16x16xf32>
    tpu.vector_store %arg12[%c0_36, %c0_37, %c0_38], %90 {strides = array<i32>} : memref<2x16x16xf32, #tpu.memory_space<vmem>>, vector<2x16x16xf32>,
    %c0_39 = arith.constant 0 : index
    %c0_40 = arith.constant 0 : index
    %92 = vector.load %arg8[%c0_39, %c0_40] : memref<32x32xf32, #tpu.memory_space<vmem>>, vector<32x32xf32>
    %c0_41 = arith.constant 0 : index
    %c0_42 = arith.constant 0 : index
    %93 = vector.load %arg9[%c0_41, %c0_42] : memref<1x32xf32, #tpu.memory_space<vmem>>, vector<1x32xf32>
    %c0_43 = arith.constant 0 : index
    %c0_44 = arith.constant 0 : index
    %94 = vector.load %arg10[%c0_43, %c0_44] : memref<1x32xf32, #tpu.memory_space<vmem>>, vector<1x32xf32>
    %95 = arith.truncf %46 : vector<2x16x32xf32> to vector<2x16x32xbf16>
    %96 = arith.truncf %92 : vector<32x32xf32> to vector<32x32xbf16>
    %cst_45 = arith.constant dense<0.000000e+00> : vector<2x16x32xf32>
    %97 = tpu.matmul %95, %96, %cst_45 {dimension_numbers = #tpu.dot_dimension_numbers<[2], [0], [0, 1], [1], [0, 0, 0, 1, 1, 1], [], []>} : vector<2x16x32xbf16>, vector<32x32xbf16>, vector<2x16x32xf32> -> vector<2x16x32xf32>
    %cst_46 = arith.constant dense<0.000000e+00> : vector<2x16xf32>
    %98 = vector.multi_reduction <add>, %90, %cst_46 [1] : vector<2x16x16xf32> to vector<2x16xf32>
    %99 = vector.shape_cast %98 : vector<2x16xf32> to vector<2x1x16xf32>
    %cst_47 = arith.constant 9.99999971E-10 : f32
    %100 = vector.broadcast %cst_47 : f32 to vector<2x1x16xf32>
    %101 = arith.maximumf %99, %100 : vector<2x1x16xf32>
    %cst_48 = arith.constant 1.000000e+00 : f32
    %102 = vector.broadcast %cst_48 : f32 to vector<2x1x16xf32>
    %103 = arith.divf %102, %101 : vector<2x1x16xf32>
    %104 = vector.broadcast %3 : vector<2x1x16xf32> to vector<2x16x16xf32>
    %105 = arith.mulf %90, %104 : vector<2x16x16xf32>
    %cst_49 = arith.constant dense<0.000000e+00> : vector<2x16xf32>
    %106 = vector.multi_reduction <add>, %105, %cst_49 [2] : vector<2x16x16xf32> to vector<2x16xf32>
    %107 = vector.shape_cast %106 : vector<2x16xf32> to vector<2x16x1xf32>
    %cst_50 = arith.constant 9.99999971E-10 : f32
    %108 = vector.broadcast %cst_50 : f32 to vector<2x16x1xf32>
    %109 = arith.maximumf %107, %108 : vector<2x16x1xf32>
    %cst_51 = arith.constant 1.000000e+00 : f32
    %110 = vector.broadcast %cst_51 : f32 to vector<2x16x1xf32>
    %111 = arith.divf %110, %109 : vector<2x16x1xf32>
    %112 = arith.truncf %90 : vector<2x16x16xf32> to vector<2x16x16xbf16>
    %113 = arith.truncf %97 : vector<2x16x32xf32> to vector<2x16x32xbf16>
    %cst_52 = arith.constant dense<0.000000e+00> : vector<2x16x32xf32>
    %114 = tpu.matmul %112, %113, %cst_52 {dimension_numbers = #tpu.dot_dimension_numbers<[1], [1], [2], [2], [0, 0, 0, 2, 1, 2], [0], [0]>} : vector<2x16x16xbf16>, vector<2x16x32xbf16>, vector<2x16x32xf32> -> vector<2x16x32xf32>
    %115 = arith.mulf %3, %103 : vector<2x1x16xf32>
    %116 = vector.broadcast %115 : vector<2x1x16xf32> to vector<2x16x16xf32>
    %117 = arith.mulf %90, %116 : vector<2x16x16xf32>
    %118 = arith.truncf %117 : vector<2x16x16xf32> to vector<2x16x16xbf16>
    %119 = arith.truncf %114 : vector<2x16x32xf32> to vector<2x16x32xbf16>
    %cst_53 = arith.constant dense<0.000000e+00> : vector<2x16x32xf32>
    %120 = tpu.matmul %118, %119, %cst_53 {dimension_numbers = #tpu.dot_dimension_numbers<[2], [1], [1], [2], [0, 0, 0, 1, 1, 2], [0], [0]>} : vector<2x16x16xbf16>, vector<2x16x32xbf16>, vector<2x16x32xf32> -> vector<2x16x32xf32>
    %121 = vector.broadcast %111 : vector<2x16x1xf32> to vector<2x16x32xf32>
    %122 = arith.mulf %121, %120 : vector<2x16x32xf32>
    %123 = vector.shape_cast %93 : vector<1x32xf32> to vector<1x1x32xf32>
    %124 = vector.broadcast %123 : vector<1x1x32xf32> to vector<2x16x32xf32>
    %125 = arith.addf %122, %124 : vector<2x16x32xf32>
    %cst_54 = arith.constant 0.000000e+00 : f32
    %126 = vector.broadcast %cst_54 : f32 to vector<2x16x32xf32>
    %127 = arith.cmpf ogt, %125, %126 : vector<2x16x32xf32>
    %cst_55 = arith.constant 2.000000e-01 : f32
    %128 = vector.broadcast %cst_55 : f32 to vector<2x16x32xf32>
    %129 = arith.mulf %128, %125 : vector<2x16x32xf32>
    %130 = arith.select %127, %125, %129 : vector<2x16x32xi1>, vector<2x16x32xf32>
    %131 = vector.broadcast %2 : vector<2x16x1xf32> to vector<2x16x32xf32>
    %132 = arith.mulf %130, %131 : vector<2x16x32xf32>
    %133 = vector.broadcast %103 : vector<2x1x16xf32> to vector<2x16x16xf32>
    %134 = arith.mulf %90, %133 : vector<2x16x16xf32>
    %135 = arith.truncf %134 : vector<2x16x16xf32> to vector<2x16x16xbf16>
    %136 = arith.truncf %132 : vector<2x16x32xf32> to vector<2x16x32xbf16>
    %cst_56 = arith.constant dense<0.000000e+00> : vector<2x16x32xf32>
    %137 = tpu.matmul %135, %136, %cst_56 {dimension_numbers = #tpu.dot_dimension_numbers<[1], [1], [2], [2], [0, 0, 0, 2, 1, 2], [0], [0]>} : vector<2x16x16xbf16>, vector<2x16x32xbf16>, vector<2x16x32xf32> -> vector<2x16x32xf32>
    %138 = vector.shape_cast %94 : vector<1x32xf32> to vector<1x1x32xf32>
    %139 = vector.broadcast %138 : vector<1x1x32xf32> to vector<2x16x32xf32>
    %140 = arith.mulf %137, %139 : vector<2x16x32xf32>
    %cst_57 = arith.constant dense<0.000000e+00> : vector<2x16xf32>
    %141 = vector.multi_reduction <add>, %140, %cst_57 [2] : vector<2x16x32xf32> to vector<2x16xf32>
    %142 = vector.shape_cast %141 : vector<2x16xf32> to vector<2x16x1xf32>
    %c0_58 = arith.constant 0 : index
    %c0_59 = arith.constant 0 : index
    %c0_60 = arith.constant 0 : index
    %143 = vector.load %arg13[%c0_58, %c0_59, %c0_60] : memref<2x16x32xf32, #tpu.memory_space<vmem>>, vector<2x16x32xf32>
    tpu.vector_store %arg13[%c0_58, %c0_59, %c0_60], %137 {strides = array<i32>} : memref<2x16x32xf32, #tpu.memory_space<vmem>>, vector<2x16x32xf32>,
    %c0_61 = arith.constant 0 : index
    %c0_62 = arith.constant 0 : index
    %c0_63 = arith.constant 0 : index
    %144 = vector.load %arg14[%c0_61, %c0_62, %c0_63] : memref<2x16x1xf32, #tpu.memory_space<vmem>>, vector<2x16x1xf32>
    tpu.vector_store %arg14[%c0_61, %c0_62, %c0_63], %142 {strides = array<i32>} : memref<2x16x1xf32, #tpu.memory_space<vmem>>, vector<2x16x1xf32>,
    return
  }
  func.func @transform_0(%arg0: i32) -> (i32, i32, i32) {
    %c0_i32 = arith.constant 0 : i32
    %c0_i32_0 = arith.constant 0 : i32
    %c0_i32_1 = arith.constant 0 : i32
    return %arg0, %c0_i32, %c0_i32_0 : i32, i32, i32
  }
  func.func @transform_1(%arg0: i32) -> (i32, i32, i32) {
    %c0_i32 = arith.constant 0 : i32
    %c0_i32_0 = arith.constant 0 : i32
    %c0_i32_1 = arith.constant 0 : i32
    return %arg0, %c0_i32, %c0_i32_0 : i32, i32, i32
  }
  func.func @transform_2(%arg0: i32) -> (i32, i32, i32) {
    %c0_i32 = arith.constant 0 : i32
    %c0_i32_0 = arith.constant 0 : i32
    %c0_i32_1 = arith.constant 0 : i32
    return %arg0, %c0_i32, %c0_i32_0 : i32, i32, i32
  }
  func.func @transform_3(%arg0: i32) -> (i32, i32, i32) {
    %c0_i32 = arith.constant 0 : i32
    %c0_i32_0 = arith.constant 0 : i32
    %c0_i32_1 = arith.constant 0 : i32
    return %arg0, %c0_i32, %c0_i32_0 : i32, i32, i32
  }
  func.func @transform_4(%arg0: i32) -> (i32, i32) {
    %c0_i32 = arith.constant 0 : i32
    %c0_i32_0 = arith.constant 0 : i32
    %c0_i32_1 = arith.constant 0 : i32
    return %c0_i32, %c0_i32_0 : i32, i32
  }
  func.func @transform_5(%arg0: i32) -> (i32, i32) {
    %c0_i32 = arith.constant 0 : i32
    %c0_i32_0 = arith.constant 0 : i32
    %c0_i32_1 = arith.constant 0 : i32
    return %c0_i32, %c0_i32_0 : i32, i32
  }
  func.func @transform_6(%arg0: i32) -> (i32, i32) {
    %c0_i32 = arith.constant 0 : i32
    %c0_i32_0 = arith.constant 0 : i32
    %c0_i32_1 = arith.constant 0 : i32
    return %c0_i32, %c0_i32_0 : i32, i32
  }
  func.func @transform_7(%arg0: i32) -> (i32, i32) {
    %c0_i32 = arith.constant 0 : i32
    %c0_i32_0 = arith.constant 0 : i32
    %c0_i32_1 = arith.constant 0 : i32
    return %c0_i32, %c0_i32_0 : i32, i32
  }
  func.func @transform_8(%arg0: i32) -> (i32, i32) {
    %c0_i32 = arith.constant 0 : i32
    %c0_i32_0 = arith.constant 0 : i32
    %c0_i32_1 = arith.constant 0 : i32
    return %c0_i32, %c0_i32_0 : i32, i32
  }
  func.func @transform_9(%arg0: i32) -> (i32, i32) {
    %c0_i32 = arith.constant 0 : i32
    %c0_i32_0 = arith.constant 0 : i32
    %c0_i32_1 = arith.constant 0 : i32
    return %c0_i32, %c0_i32_0 : i32, i32
  }
  func.func @transform_10(%arg0: i32) -> (i32, i32, i32) {
    %c0_i32 = arith.constant 0 : i32
    %c0_i32_0 = arith.constant 0 : i32
    %c0_i32_1 = arith.constant 0 : i32
    return %arg0, %c0_i32, %c0_i32_0 : i32, i32, i32
  }
  func.func @transform_11(%arg0: i32) -> (i32, i32, i32) {
    %c0_i32 = arith.constant 0 : i32
    %c0_i32_0 = arith.constant 0 : i32
    %c0_i32_1 = arith.constant 0 : i32
    return %arg0, %c0_i32, %c0_i32_0 : i32, i32, i32
  }
  func.func @transform_12(%arg0: i32) -> (i32, i32, i32) {
    %c0_i32 = arith.constant 0 : i32
    %c0_i32_0 = arith.constant 0 : i32
    %c0_i32_1 = arith.constant 0 : i32
    return %arg0, %c0_i32, %c0_i32_0 : i32, i32, i32
  }
  func.func @transform_13(%arg0: i32) -> (i32, i32, i32) {
    %c0_i32 = arith.constant 0 : i32
    %c0_i32_0 = arith.constant 0 : i32
    %c0_i32_1 = arith.constant 0 : i32
    return %arg0, %c0_i32, %c0_i32_0 : i32, i32, i32
  }
}

module attributes {stable_mosaic.version = 11 : i64} {
  func.func @_hconv_pool_kernel(%arg0: i32, %arg1: memref<2x13x32xf32, #tpu.memory_space<vmem>>, %arg2: memref<2x16x13xf32, #tpu.memory_space<vmem>>, %arg3: memref<2x13x1xf32, #tpu.memory_space<vmem>>, %arg4: memref<2x1x13xf32, #tpu.memory_space<vmem>>, %arg5: memref<32x32xf32, #tpu.memory_space<vmem>>, %arg6: memref<1x32xf32, #tpu.memory_space<vmem>>, %arg7: memref<1x32xf32, #tpu.memory_space<vmem>>, %arg8: memref<2x13x13xf32, #tpu.memory_space<vmem>>, %arg9: memref<2x13x32xf32, #tpu.memory_space<vmem>>, %arg10: memref<2x13x1xf32, #tpu.memory_space<vmem>>) attributes {dimension_semantics = [#tpu.dimension_semantics<parallel>], iteration_bounds = array<i64: 2>, scalar_prefetch = 0 : i64, scratch_operands = 0 : i64, tpu.core_type = #tpu.core_type<tc>, window_params = [{transform_indices = @transform_0, window_bounds = array<i64: 2, 13, 32>}, {transform_indices = @transform_1, window_bounds = array<i64: 2, 16, 13>}, {transform_indices = @transform_2, window_bounds = array<i64: 2, 13, 1>}, {transform_indices = @transform_3, window_bounds = array<i64: 2, 1, 13>}, {pipeline_mode = #tpu.pipeline_mode<synchronous>, transform_indices = @transform_4, window_bounds = array<i64: 32, 32>}, {pipeline_mode = #tpu.pipeline_mode<synchronous>, transform_indices = @transform_5, window_bounds = array<i64: 1, 32>}, {pipeline_mode = #tpu.pipeline_mode<synchronous>, transform_indices = @transform_6, window_bounds = array<i64: 1, 32>}, {transform_indices = @transform_7, window_bounds = array<i64: 2, 13, 13>}, {transform_indices = @transform_8, window_bounds = array<i64: 2, 13, 32>}, {transform_indices = @transform_9, window_bounds = array<i64: 2, 13, 1>}]} {
    %c0 = arith.constant 0 : index
    %c0_0 = arith.constant 0 : index
    %c0_1 = arith.constant 0 : index
    %0 = vector.load %arg1[%c0, %c0_0, %c0_1] : memref<2x13x32xf32, #tpu.memory_space<vmem>>, vector<2x13x32xf32>
    %c0_2 = arith.constant 0 : index
    %c0_3 = arith.constant 0 : index
    %c0_4 = arith.constant 0 : index
    %1 = vector.load %arg2[%c0_2, %c0_3, %c0_4] : memref<2x16x13xf32, #tpu.memory_space<vmem>>, vector<2x16x13xf32>
    %c0_5 = arith.constant 0 : index
    %c0_6 = arith.constant 0 : index
    %c0_7 = arith.constant 0 : index
    %2 = vector.load %arg3[%c0_5, %c0_6, %c0_7] : memref<2x13x1xf32, #tpu.memory_space<vmem>>, vector<2x13x1xf32>
    %c0_8 = arith.constant 0 : index
    %c0_9 = arith.constant 0 : index
    %c0_10 = arith.constant 0 : index
    %3 = vector.load %arg4[%c0_8, %c0_9, %c0_10] : memref<2x1x13xf32, #tpu.memory_space<vmem>>, vector<2x1x13xf32>
    %4 = arith.truncf %1 : vector<2x16x13xf32> to vector<2x16x13xbf16>
    %5 = arith.truncf %1 : vector<2x16x13xf32> to vector<2x16x13xbf16>
    %cst = arith.constant dense<0.000000e+00> : vector<2x13x13xf32>
    %6 = tpu.matmul %4, %5, %cst {dimension_numbers = #tpu.dot_dimension_numbers<[1], [1], [2], [2], [0, 0, 0, 2, 1, 2], [0], [0]>} : vector<2x16x13xbf16>, vector<2x16x13xbf16>, vector<2x13x13xf32> -> vector<2x13x13xf32>
    %7 = vector.broadcast %2 : vector<2x13x1xf32> to vector<2x13x13xf32>
    %8 = vector.broadcast %3 : vector<2x1x13xf32> to vector<2x13x13xf32>
    %9 = arith.mulf %7, %8 : vector<2x13x13xf32>
    %10 = arith.mulf %6, %9 : vector<2x13x13xf32>
    %c0_11 = arith.constant 0 : index
    %c0_12 = arith.constant 0 : index
    %c0_13 = arith.constant 0 : index
    %11 = vector.load %arg8[%c0_11, %c0_12, %c0_13] : memref<2x13x13xf32, #tpu.memory_space<vmem>>, vector<2x13x13xf32>
    tpu.vector_store %arg8[%c0_11, %c0_12, %c0_13], %10 {strides = array<i32>} : memref<2x13x13xf32, #tpu.memory_space<vmem>>, vector<2x13x13xf32>,
    %c0_14 = arith.constant 0 : index
    %c0_15 = arith.constant 0 : index
    %12 = vector.load %arg5[%c0_14, %c0_15] : memref<32x32xf32, #tpu.memory_space<vmem>>, vector<32x32xf32>
    %c0_16 = arith.constant 0 : index
    %c0_17 = arith.constant 0 : index
    %13 = vector.load %arg6[%c0_16, %c0_17] : memref<1x32xf32, #tpu.memory_space<vmem>>, vector<1x32xf32>
    %c0_18 = arith.constant 0 : index
    %c0_19 = arith.constant 0 : index
    %14 = vector.load %arg7[%c0_18, %c0_19] : memref<1x32xf32, #tpu.memory_space<vmem>>, vector<1x32xf32>
    %15 = arith.truncf %0 : vector<2x13x32xf32> to vector<2x13x32xbf16>
    %16 = arith.truncf %12 : vector<32x32xf32> to vector<32x32xbf16>
    %cst_20 = arith.constant dense<0.000000e+00> : vector<2x13x32xf32>
    %17 = tpu.matmul %15, %16, %cst_20 {dimension_numbers = #tpu.dot_dimension_numbers<[2], [0], [0, 1], [1], [0, 0, 0, 1, 1, 1], [], []>} : vector<2x13x32xbf16>, vector<32x32xbf16>, vector<2x13x32xf32> -> vector<2x13x32xf32>
    %cst_21 = arith.constant dense<0.000000e+00> : vector<2x13xf32>
    %18 = vector.multi_reduction <add>, %10, %cst_21 [1] : vector<2x13x13xf32> to vector<2x13xf32>
    %19 = vector.shape_cast %18 : vector<2x13xf32> to vector<2x1x13xf32>
    %cst_22 = arith.constant 9.99999971E-10 : f32
    %20 = vector.broadcast %cst_22 : f32 to vector<2x1x13xf32>
    %21 = arith.maximumf %19, %20 : vector<2x1x13xf32>
    %cst_23 = arith.constant 1.000000e+00 : f32
    %22 = vector.broadcast %cst_23 : f32 to vector<2x1x13xf32>
    %23 = arith.divf %22, %21 : vector<2x1x13xf32>
    %24 = vector.broadcast %3 : vector<2x1x13xf32> to vector<2x13x13xf32>
    %25 = arith.mulf %10, %24 : vector<2x13x13xf32>
    %cst_24 = arith.constant dense<0.000000e+00> : vector<2x13xf32>
    %26 = vector.multi_reduction <add>, %25, %cst_24 [2] : vector<2x13x13xf32> to vector<2x13xf32>
    %27 = vector.shape_cast %26 : vector<2x13xf32> to vector<2x13x1xf32>
    %cst_25 = arith.constant 9.99999971E-10 : f32
    %28 = vector.broadcast %cst_25 : f32 to vector<2x13x1xf32>
    %29 = arith.maximumf %27, %28 : vector<2x13x1xf32>
    %cst_26 = arith.constant 1.000000e+00 : f32
    %30 = vector.broadcast %cst_26 : f32 to vector<2x13x1xf32>
    %31 = arith.divf %30, %29 : vector<2x13x1xf32>
    %32 = arith.truncf %10 : vector<2x13x13xf32> to vector<2x13x13xbf16>
    %33 = arith.truncf %17 : vector<2x13x32xf32> to vector<2x13x32xbf16>
    %cst_27 = arith.constant dense<0.000000e+00> : vector<2x13x32xf32>
    %34 = tpu.matmul %32, %33, %cst_27 {dimension_numbers = #tpu.dot_dimension_numbers<[1], [1], [2], [2], [0, 0, 0, 2, 1, 2], [0], [0]>} : vector<2x13x13xbf16>, vector<2x13x32xbf16>, vector<2x13x32xf32> -> vector<2x13x32xf32>
    %35 = arith.mulf %3, %23 : vector<2x1x13xf32>
    %36 = vector.broadcast %35 : vector<2x1x13xf32> to vector<2x13x13xf32>
    %37 = arith.mulf %10, %36 : vector<2x13x13xf32>
    %38 = arith.truncf %37 : vector<2x13x13xf32> to vector<2x13x13xbf16>
    %39 = arith.truncf %34 : vector<2x13x32xf32> to vector<2x13x32xbf16>
    %cst_28 = arith.constant dense<0.000000e+00> : vector<2x13x32xf32>
    %40 = tpu.matmul %38, %39, %cst_28 {dimension_numbers = #tpu.dot_dimension_numbers<[2], [1], [1], [2], [0, 0, 0, 1, 1, 2], [0], [0]>} : vector<2x13x13xbf16>, vector<2x13x32xbf16>, vector<2x13x32xf32> -> vector<2x13x32xf32>
    %41 = vector.broadcast %31 : vector<2x13x1xf32> to vector<2x13x32xf32>
    %42 = arith.mulf %41, %40 : vector<2x13x32xf32>
    %43 = vector.shape_cast %13 : vector<1x32xf32> to vector<1x1x32xf32>
    %44 = vector.broadcast %43 : vector<1x1x32xf32> to vector<2x13x32xf32>
    %45 = arith.addf %42, %44 : vector<2x13x32xf32>
    %cst_29 = arith.constant 0.000000e+00 : f32
    %46 = vector.broadcast %cst_29 : f32 to vector<2x13x32xf32>
    %47 = arith.cmpf ogt, %45, %46 : vector<2x13x32xf32>
    %cst_30 = arith.constant 2.000000e-01 : f32
    %48 = vector.broadcast %cst_30 : f32 to vector<2x13x32xf32>
    %49 = arith.mulf %48, %45 : vector<2x13x32xf32>
    %50 = arith.select %47, %45, %49 : vector<2x13x32xi1>, vector<2x13x32xf32>
    %51 = vector.broadcast %2 : vector<2x13x1xf32> to vector<2x13x32xf32>
    %52 = arith.mulf %50, %51 : vector<2x13x32xf32>
    %53 = vector.broadcast %23 : vector<2x1x13xf32> to vector<2x13x13xf32>
    %54 = arith.mulf %10, %53 : vector<2x13x13xf32>
    %55 = arith.truncf %54 : vector<2x13x13xf32> to vector<2x13x13xbf16>
    %56 = arith.truncf %52 : vector<2x13x32xf32> to vector<2x13x32xbf16>
    %cst_31 = arith.constant dense<0.000000e+00> : vector<2x13x32xf32>
    %57 = tpu.matmul %55, %56, %cst_31 {dimension_numbers = #tpu.dot_dimension_numbers<[1], [1], [2], [2], [0, 0, 0, 2, 1, 2], [0], [0]>} : vector<2x13x13xbf16>, vector<2x13x32xbf16>, vector<2x13x32xf32> -> vector<2x13x32xf32>
    %58 = vector.shape_cast %14 : vector<1x32xf32> to vector<1x1x32xf32>
    %59 = vector.broadcast %58 : vector<1x1x32xf32> to vector<2x13x32xf32>
    %60 = arith.mulf %57, %59 : vector<2x13x32xf32>
    %cst_32 = arith.constant dense<0.000000e+00> : vector<2x13xf32>
    %61 = vector.multi_reduction <add>, %60, %cst_32 [2] : vector<2x13x32xf32> to vector<2x13xf32>
    %62 = vector.shape_cast %61 : vector<2x13xf32> to vector<2x13x1xf32>
    %c0_33 = arith.constant 0 : index
    %c0_34 = arith.constant 0 : index
    %c0_35 = arith.constant 0 : index
    %63 = vector.load %arg9[%c0_33, %c0_34, %c0_35] : memref<2x13x32xf32, #tpu.memory_space<vmem>>, vector<2x13x32xf32>
    tpu.vector_store %arg9[%c0_33, %c0_34, %c0_35], %57 {strides = array<i32>} : memref<2x13x32xf32, #tpu.memory_space<vmem>>, vector<2x13x32xf32>,
    %c0_36 = arith.constant 0 : index
    %c0_37 = arith.constant 0 : index
    %c0_38 = arith.constant 0 : index
    %64 = vector.load %arg10[%c0_36, %c0_37, %c0_38] : memref<2x13x1xf32, #tpu.memory_space<vmem>>, vector<2x13x1xf32>
    tpu.vector_store %arg10[%c0_36, %c0_37, %c0_38], %62 {strides = array<i32>} : memref<2x13x1xf32, #tpu.memory_space<vmem>>, vector<2x13x1xf32>,
    return
  }
  func.func @transform_0(%arg0: i32) -> (i32, i32, i32) {
    %c0_i32 = arith.constant 0 : i32
    %c0_i32_0 = arith.constant 0 : i32
    %c0_i32_1 = arith.constant 0 : i32
    return %arg0, %c0_i32, %c0_i32_0 : i32, i32, i32
  }
  func.func @transform_1(%arg0: i32) -> (i32, i32, i32) {
    %c0_i32 = arith.constant 0 : i32
    %c0_i32_0 = arith.constant 0 : i32
    %c0_i32_1 = arith.constant 0 : i32
    return %arg0, %c0_i32, %c0_i32_0 : i32, i32, i32
  }
  func.func @transform_2(%arg0: i32) -> (i32, i32, i32) {
    %c0_i32 = arith.constant 0 : i32
    %c0_i32_0 = arith.constant 0 : i32
    %c0_i32_1 = arith.constant 0 : i32
    return %arg0, %c0_i32, %c0_i32_0 : i32, i32, i32
  }
  func.func @transform_3(%arg0: i32) -> (i32, i32, i32) {
    %c0_i32 = arith.constant 0 : i32
    %c0_i32_0 = arith.constant 0 : i32
    %c0_i32_1 = arith.constant 0 : i32
    return %arg0, %c0_i32, %c0_i32_0 : i32, i32, i32
  }
  func.func @transform_4(%arg0: i32) -> (i32, i32) {
    %c0_i32 = arith.constant 0 : i32
    %c0_i32_0 = arith.constant 0 : i32
    %c0_i32_1 = arith.constant 0 : i32
    return %c0_i32, %c0_i32_0 : i32, i32
  }
  func.func @transform_5(%arg0: i32) -> (i32, i32) {
    %c0_i32 = arith.constant 0 : i32
    %c0_i32_0 = arith.constant 0 : i32
    %c0_i32_1 = arith.constant 0 : i32
    return %c0_i32, %c0_i32_0 : i32, i32
  }
  func.func @transform_6(%arg0: i32) -> (i32, i32) {
    %c0_i32 = arith.constant 0 : i32
    %c0_i32_0 = arith.constant 0 : i32
    %c0_i32_1 = arith.constant 0 : i32
    return %c0_i32, %c0_i32_0 : i32, i32
  }
  func.func @transform_7(%arg0: i32) -> (i32, i32, i32) {
    %c0_i32 = arith.constant 0 : i32
    %c0_i32_0 = arith.constant 0 : i32
    %c0_i32_1 = arith.constant 0 : i32
    return %arg0, %c0_i32, %c0_i32_0 : i32, i32, i32
  }
  func.func @transform_8(%arg0: i32) -> (i32, i32, i32) {
    %c0_i32 = arith.constant 0 : i32
    %c0_i32_0 = arith.constant 0 : i32
    %c0_i32_1 = arith.constant 0 : i32
    return %arg0, %c0_i32, %c0_i32_0 : i32, i32, i32
  }
  func.func @transform_9(%arg0: i32) -> (i32, i32, i32) {
    %c0_i32 = arith.constant 0 : i32
    %c0_i32_0 = arith.constant 0 : i32
    %c0_i32_1 = arith.constant 0 : i32
    return %arg0, %c0_i32, %c0_i32_0 : i32, i32, i32
  }
}

module attributes {stable_mosaic.version = 11 : i64} {
  func.func @_cross_readout_kernel(%arg0: i32, %arg1: memref<1x13x32xf32, #tpu.memory_space<vmem>>, %arg2: memref<1x13x1xf32, #tpu.memory_space<vmem>>, %arg3: memref<1x13x32xf32, #tpu.memory_space<vmem>>, %arg4: memref<1x13x1xf32, #tpu.memory_space<vmem>>, %arg5: memref<1x1x13xf32, #tpu.memory_space<vmem>>, %arg6: memref<32x32xf32, #tpu.memory_space<vmem>>, %arg7: memref<32x32xf32, #tpu.memory_space<vmem>>, %arg8: memref<1x13x32xf32, #tpu.memory_space<vmem>>, %arg9: memref<1x13x32xf32, #tpu.memory_space<vmem>>, %arg10: memref<1x1x64xf32, #tpu.memory_space<vmem>>) attributes {dimension_semantics = [#tpu.dimension_semantics<parallel>], iteration_bounds = array<i64: 2>, scalar_prefetch = 0 : i64, scratch_operands = 0 : i64, tpu.core_type = #tpu.core_type<tc>, window_params = [{transform_indices = @transform_0, window_bounds = array<i64: 1, 13, 32>}, {transform_indices = @transform_1, window_bounds = array<i64: 1, 13, 1>}, {transform_indices = @transform_2, window_bounds = array<i64: 1, 13, 32>}, {transform_indices = @transform_3, window_bounds = array<i64: 1, 13, 1>}, {transform_indices = @transform_4, window_bounds = array<i64: 1, 1, 13>}, {pipeline_mode = #tpu.pipeline_mode<synchronous>, transform_indices = @transform_5, window_bounds = array<i64: 32, 32>}, {pipeline_mode = #tpu.pipeline_mode<synchronous>, transform_indices = @transform_6, window_bounds = array<i64: 32, 32>}, {transform_indices = @transform_7, window_bounds = array<i64: 1, 13, 32>}, {transform_indices = @transform_8, window_bounds = array<i64: 1, 13, 32>}, {transform_indices = @transform_9, window_bounds = array<i64: 1, 1, 64>}]} {
    %c0 = arith.constant 0 : index
    %c0_0 = arith.constant 0 : index
    %c0_1 = arith.constant 0 : index
    %0 = vector.load %arg1[%c0, %c0_0, %c0_1] : memref<1x13x32xf32, #tpu.memory_space<vmem>>, vector<1x13x32xf32>
    %c0_2 = arith.constant 0 : index
    %c0_3 = arith.constant 0 : index
    %c0_4 = arith.constant 0 : index
    %1 = vector.load %arg3[%c0_2, %c0_3, %c0_4] : memref<1x13x32xf32, #tpu.memory_space<vmem>>, vector<1x13x32xf32>
    %c0_5 = arith.constant 0 : index
    %c0_6 = arith.constant 0 : index
    %c0_7 = arith.constant 0 : index
    %2 = vector.load %arg2[%c0_5, %c0_6, %c0_7] : memref<1x13x1xf32, #tpu.memory_space<vmem>>, vector<1x13x1xf32>
    %c0_8 = arith.constant 0 : index
    %c0_9 = arith.constant 0 : index
    %c0_10 = arith.constant 0 : index
    %3 = vector.load %arg4[%c0_8, %c0_9, %c0_10] : memref<1x13x1xf32, #tpu.memory_space<vmem>>, vector<1x13x1xf32>
    %c0_11 = arith.constant 0 : index
    %c0_12 = arith.constant 0 : index
    %c0_13 = arith.constant 0 : index
    %4 = vector.load %arg5[%c0_11, %c0_12, %c0_13] : memref<1x1x13xf32, #tpu.memory_space<vmem>>, vector<1x1x13xf32>
    %c0_14 = arith.constant 0 : index
    %c0_15 = arith.constant 0 : index
    %5 = vector.load %arg6[%c0_14, %c0_15] : memref<32x32xf32, #tpu.memory_space<vmem>>, vector<32x32xf32>
    %6 = arith.truncf %0 : vector<1x13x32xf32> to vector<1x13x32xbf16>
    %7 = arith.truncf %5 : vector<32x32xf32> to vector<32x32xbf16>
    %cst = arith.constant dense<0.000000e+00> : vector<1x13x32xf32>
    %8 = tpu.matmul %6, %7, %cst {dimension_numbers = #tpu.dot_dimension_numbers<[2], [0], [0, 1], [1], [0, 0, 0, 1, 1, 1], [], []>} : vector<1x13x32xbf16>, vector<32x32xbf16>, vector<1x13x32xf32> -> vector<1x13x32xf32>
    %9 = arith.truncf %8 : vector<1x13x32xf32> to vector<1x13x32xbf16>
    %10 = arith.truncf %1 : vector<1x13x32xf32> to vector<1x13x32xbf16>
    %cst_16 = arith.constant dense<0.000000e+00> : vector<1x13x13xf32>
    %11 = tpu.matmul %9, %10, %cst_16 {dimension_numbers = #tpu.dot_dimension_numbers<[2], [2], [1], [1], [0, 0, 0, 1, 1, 1], [0], [0]>} : vector<1x13x32xbf16>, vector<1x13x32xbf16>, vector<1x13x13xf32> -> vector<1x13x13xf32>
    %cst_17 = arith.constant 0.000000e+00 : f32
    %12 = vector.broadcast %cst_17 : f32 to vector<1x1x13xf32>
    %13 = arith.cmpf ogt, %4, %12 : vector<1x1x13xf32>
    %cst_18 = arith.constant -1.000000e+09 : f32
    %14 = vector.shape_cast %13 : vector<1x1x13xi1> to vector<1x1x13xi1>
    %15 = vector.broadcast %14 : vector<1x1x13xi1> to vector<1x13x13xi1>
    %16 = vector.broadcast %cst_18 : f32 to vector<1x13x13xf32>
    %17 = arith.select %15, %11, %16 : vector<1x13x13xi1>, vector<1x13x13xf32>
    %cst_19 = arith.constant dense<0xFF800000> : vector<1x13xf32>
    %18 = vector.multi_reduction <maximumf>, %17, %cst_19 [2] : vector<1x13x13xf32> to vector<1x13xf32>
    %cst_20 = arith.constant 0xFF800000 : f32
    %19 = vector.broadcast %cst_20 : f32 to vector<1x13xf32>
    %20 = arith.maximumf %19, %18 : vector<1x13xf32>
    %21 = vector.shape_cast %20 : vector<1x13xf32> to vector<1x13x1xf32>
    %22 = vector.broadcast %21 : vector<1x13x1xf32> to vector<1x13x13xf32>
    %23 = arith.subf %17, %22 : vector<1x13x13xf32>
    %24 = math.exp %23 : vector<1x13x13xf32>
    %cst_21 = arith.constant dense<0.000000e+00> : vector<1x13xf32>
    %25 = vector.multi_reduction <add>, %24, %cst_21 [2] : vector<1x13x13xf32> to vector<1x13xf32>
    %26 = vector.shape_cast %25 : vector<1x13xf32> to vector<1x13x1xf32>
    %27 = vector.broadcast %26 : vector<1x13x1xf32> to vector<1x13x13xf32>
    %28 = arith.divf %24, %27 : vector<1x13x13xf32>
    %29 = arith.truncf %28 : vector<1x13x13xf32> to vector<1x13x13xbf16>
    %30 = arith.truncf %1 : vector<1x13x32xf32> to vector<1x13x32xbf16>
    %cst_22 = arith.constant dense<0.000000e+00> : vector<1x13x32xf32>
    %31 = tpu.matmul %29, %30, %cst_22 {dimension_numbers = #tpu.dot_dimension_numbers<[2], [1], [1], [2], [0, 0, 0, 1, 1, 2], [0], [0]>} : vector<1x13x13xbf16>, vector<1x13x32xbf16>, vector<1x13x32xf32> -> vector<1x13x32xf32>
    %32 = vector.broadcast %2 : vector<1x13x1xf32> to vector<1x13x32xf32>
    %33 = arith.mulf %31, %32 : vector<1x13x32xf32>
    %cst_23 = arith.constant 0.000000e+00 : f32
    %34 = vector.broadcast %cst_23 : f32 to vector<1x13x1xf32>
    %35 = arith.cmpf ogt, %2, %34 : vector<1x13x1xf32>
    %cst_24 = arith.constant -1.000000e+09 : f32
    %36 = vector.shape_cast %35 : vector<1x13x1xi1> to vector<1x13x1xi1>
    %37 = vector.broadcast %36 : vector<1x13x1xi1> to vector<1x13x13xi1>
    %38 = vector.broadcast %cst_24 : f32 to vector<1x13x13xf32>
    %39 = arith.select %37, %11, %38 : vector<1x13x13xi1>, vector<1x13x13xf32>
    %cst_25 = arith.constant dense<0xFF800000> : vector<1x13xf32>
    %40 = vector.multi_reduction <maximumf>, %39, %cst_25 [1] : vector<1x13x13xf32> to vector<1x13xf32>
    %cst_26 = arith.constant 0xFF800000 : f32
    %41 = vector.broadcast %cst_26 : f32 to vector<1x13xf32>
    %42 = arith.maximumf %41, %40 : vector<1x13xf32>
    %43 = vector.shape_cast %42 : vector<1x13xf32> to vector<1x1x13xf32>
    %44 = vector.broadcast %43 : vector<1x1x13xf32> to vector<1x13x13xf32>
    %45 = arith.subf %39, %44 : vector<1x13x13xf32>
    %46 = math.exp %45 : vector<1x13x13xf32>
    %cst_27 = arith.constant dense<0.000000e+00> : vector<1x13xf32>
    %47 = vector.multi_reduction <add>, %46, %cst_27 [1] : vector<1x13x13xf32> to vector<1x13xf32>
    %48 = vector.shape_cast %47 : vector<1x13xf32> to vector<1x1x13xf32>
    %49 = vector.broadcast %48 : vector<1x1x13xf32> to vector<1x13x13xf32>
    %50 = arith.divf %46, %49 : vector<1x13x13xf32>
    %51 = arith.truncf %50 : vector<1x13x13xf32> to vector<1x13x13xbf16>
    %52 = arith.truncf %0 : vector<1x13x32xf32> to vector<1x13x32xbf16>
    %cst_28 = arith.constant dense<0.000000e+00> : vector<1x13x32xf32>
    %53 = tpu.matmul %51, %52, %cst_28 {dimension_numbers = #tpu.dot_dimension_numbers<[1], [1], [2], [2], [0, 0, 0, 2, 1, 2], [0], [0]>} : vector<1x13x13xbf16>, vector<1x13x32xbf16>, vector<1x13x32xf32> -> vector<1x13x32xf32>
    %54 = vector.broadcast %3 : vector<1x13x1xf32> to vector<1x13x32xf32>
    %55 = arith.mulf %53, %54 : vector<1x13x32xf32>
    %c0_29 = arith.constant 0 : index
    %c0_30 = arith.constant 0 : index
    %c0_31 = arith.constant 0 : index
    %56 = vector.load %arg8[%c0_29, %c0_30, %c0_31] : memref<1x13x32xf32, #tpu.memory_space<vmem>>, vector<1x13x32xf32>
    tpu.vector_store %arg8[%c0_29, %c0_30, %c0_31], %33 {strides = array<i32>} : memref<1x13x32xf32, #tpu.memory_space<vmem>>, vector<1x13x32xf32>,
    %c0_32 = arith.constant 0 : index
    %c0_33 = arith.constant 0 : index
    %c0_34 = arith.constant 0 : index
    %57 = vector.load %arg9[%c0_32, %c0_33, %c0_34] : memref<1x13x32xf32, #tpu.memory_space<vmem>>, vector<1x13x32xf32>
    tpu.vector_store %arg9[%c0_32, %c0_33, %c0_34], %55 {strides = array<i32>} : memref<1x13x32xf32, #tpu.memory_space<vmem>>, vector<1x13x32xf32>,
    %c0_35 = arith.constant 0 : index
    %c0_36 = arith.constant 0 : index
    %58 = vector.load %arg7[%c0_35, %c0_36] : memref<32x32xf32, #tpu.memory_space<vmem>>, vector<32x32xf32>
    %59 = vector.broadcast %2 : vector<1x13x1xf32> to vector<1x13x32xf32>
    %60 = arith.mulf %33, %59 : vector<1x13x32xf32>
    %cst_37 = arith.constant dense<0.000000e+00> : vector<1x1xf32>
    %61 = vector.multi_reduction <add>, %2, %cst_37 [1] : vector<1x13x1xf32> to vector<1x1xf32>
    %62 = vector.shape_cast %61 : vector<1x1xf32> to vector<1x1x1xf32>
    %cst_38 = arith.constant 1.000000e+00 : f32
    %63 = vector.broadcast %cst_38 : f32 to vector<1x1x1xf32>
    %64 = arith.maximumf %62, %63 : vector<1x1x1xf32>
    %cst_39 = arith.constant dense<0.000000e+00> : vector<1x32xf32>
    %65 = vector.multi_reduction <add>, %60, %cst_39 [1] : vector<1x13x32xf32> to vector<1x32xf32>
    %66 = vector.shape_cast %65 : vector<1x32xf32> to vector<1x1x32xf32>
    %67 = vector.broadcast %64 : vector<1x1x1xf32> to vector<1x1x32xf32>
    %68 = arith.divf %66, %67 : vector<1x1x32xf32>
    %69 = arith.truncf %68 : vector<1x1x32xf32> to vector<1x1x32xbf16>
    %70 = arith.truncf %58 : vector<32x32xf32> to vector<32x32xbf16>
    %cst_40 = arith.constant dense<0.000000e+00> : vector<1x1x32xf32>
    %71 = tpu.matmul %69, %70, %cst_40 {dimension_numbers = #tpu.dot_dimension_numbers<[2], [0], [0, 1], [1], [0, 0, 0, 1, 1, 1], [], []>} : vector<1x1x32xbf16>, vector<32x32xbf16>, vector<1x1x32xf32> -> vector<1x1x32xf32>
    %72 = math.tanh %71 : vector<1x1x32xf32>
    %73 = vector.broadcast %72 : vector<1x1x32xf32> to vector<1x13x32xf32>
    %74 = arith.mulf %33, %73 : vector<1x13x32xf32>
    %cst_41 = arith.constant dense<0.000000e+00> : vector<1x13xf32>
    %75 = vector.multi_reduction <add>, %74, %cst_41 [2] : vector<1x13x32xf32> to vector<1x13xf32>
    %76 = vector.shape_cast %75 : vector<1x13xf32> to vector<1x13x1xf32>
    %77 = arith.negf %76 : vector<1x13x1xf32>
    %78 = math.exp %77 : vector<1x13x1xf32>
    %cst_42 = arith.constant 1.000000e+00 : f32
    %79 = vector.broadcast %cst_42 : f32 to vector<1x13x1xf32>
    %80 = arith.addf %79, %78 : vector<1x13x1xf32>
    %81 = arith.divf %79, %80 : vector<1x13x1xf32>
    %82 = vector.broadcast %81 : vector<1x13x1xf32> to vector<1x13x32xf32>
    %83 = arith.mulf %82, %60 : vector<1x13x32xf32>
    %cst_43 = arith.constant dense<0.000000e+00> : vector<1x32xf32>
    %84 = vector.multi_reduction <add>, %83, %cst_43 [1] : vector<1x13x32xf32> to vector<1x32xf32>
    %85 = vector.shape_cast %84 : vector<1x32xf32> to vector<1x1x32xf32>
    %c0_44 = arith.constant 0 : index
    %c0_45 = arith.constant 0 : index
    %c0_46 = arith.constant 0 : index
    %86 = vector.load %arg10[%c0_44, %c0_45, %c0_46] : memref<1x1x64xf32, #tpu.memory_space<vmem>>, vector<1x1x32xf32>
    tpu.vector_store %arg10[%c0_44, %c0_45, %c0_46], %85 {strides = array<i32>} : memref<1x1x64xf32, #tpu.memory_space<vmem>>, vector<1x1x32xf32>,
    %87 = vector.broadcast %3 : vector<1x13x1xf32> to vector<1x13x32xf32>
    %88 = arith.mulf %55, %87 : vector<1x13x32xf32>
    %cst_47 = arith.constant dense<0.000000e+00> : vector<1x1xf32>
    %89 = vector.multi_reduction <add>, %3, %cst_47 [1] : vector<1x13x1xf32> to vector<1x1xf32>
    %90 = vector.shape_cast %89 : vector<1x1xf32> to vector<1x1x1xf32>
    %cst_48 = arith.constant 1.000000e+00 : f32
    %91 = vector.broadcast %cst_48 : f32 to vector<1x1x1xf32>
    %92 = arith.maximumf %90, %91 : vector<1x1x1xf32>
    %cst_49 = arith.constant dense<0.000000e+00> : vector<1x32xf32>
    %93 = vector.multi_reduction <add>, %88, %cst_49 [1] : vector<1x13x32xf32> to vector<1x32xf32>
    %94 = vector.shape_cast %93 : vector<1x32xf32> to vector<1x1x32xf32>
    %95 = vector.broadcast %92 : vector<1x1x1xf32> to vector<1x1x32xf32>
    %96 = arith.divf %94, %95 : vector<1x1x32xf32>
    %97 = arith.truncf %96 : vector<1x1x32xf32> to vector<1x1x32xbf16>
    %98 = arith.truncf %58 : vector<32x32xf32> to vector<32x32xbf16>
    %cst_50 = arith.constant dense<0.000000e+00> : vector<1x1x32xf32>
    %99 = tpu.matmul %97, %98, %cst_50 {dimension_numbers = #tpu.dot_dimension_numbers<[2], [0], [0, 1], [1], [0, 0, 0, 1, 1, 1], [], []>} : vector<1x1x32xbf16>, vector<32x32xbf16>, vector<1x1x32xf32> -> vector<1x1x32xf32>
    %100 = math.tanh %99 : vector<1x1x32xf32>
    %101 = vector.broadcast %100 : vector<1x1x32xf32> to vector<1x13x32xf32>
    %102 = arith.mulf %55, %101 : vector<1x13x32xf32>
    %cst_51 = arith.constant dense<0.000000e+00> : vector<1x13xf32>
    %103 = vector.multi_reduction <add>, %102, %cst_51 [2] : vector<1x13x32xf32> to vector<1x13xf32>
    %104 = vector.shape_cast %103 : vector<1x13xf32> to vector<1x13x1xf32>
    %105 = arith.negf %104 : vector<1x13x1xf32>
    %106 = math.exp %105 : vector<1x13x1xf32>
    %cst_52 = arith.constant 1.000000e+00 : f32
    %107 = vector.broadcast %cst_52 : f32 to vector<1x13x1xf32>
    %108 = arith.addf %107, %106 : vector<1x13x1xf32>
    %109 = arith.divf %107, %108 : vector<1x13x1xf32>
    %110 = vector.broadcast %109 : vector<1x13x1xf32> to vector<1x13x32xf32>
    %111 = arith.mulf %110, %88 : vector<1x13x32xf32>
    %cst_53 = arith.constant dense<0.000000e+00> : vector<1x32xf32>
    %112 = vector.multi_reduction <add>, %111, %cst_53 [1] : vector<1x13x32xf32> to vector<1x32xf32>
    %113 = vector.shape_cast %112 : vector<1x32xf32> to vector<1x1x32xf32>
    %c0_54 = arith.constant 0 : index
    %c0_55 = arith.constant 0 : index
    %c32 = arith.constant 32 : index
    %114 = vector.load %arg10[%c0_54, %c0_55, %c32] : memref<1x1x64xf32, #tpu.memory_space<vmem>>, vector<1x1x32xf32>
    tpu.vector_store %arg10[%c0_54, %c0_55, %c32], %113 {strides = array<i32>} : memref<1x1x64xf32, #tpu.memory_space<vmem>>, vector<1x1x32xf32>,
    return
  }
  func.func @transform_0(%arg0: i32) -> (i32, i32, i32) {
    %c0_i32 = arith.constant 0 : i32
    %c0_i32_0 = arith.constant 0 : i32
    %c0_i32_1 = arith.constant 0 : i32
    return %arg0, %c0_i32, %c0_i32_0 : i32, i32, i32
  }
  func.func @transform_1(%arg0: i32) -> (i32, i32, i32) {
    %c0_i32 = arith.constant 0 : i32
    %c0_i32_0 = arith.constant 0 : i32
    %c0_i32_1 = arith.constant 0 : i32
    return %arg0, %c0_i32, %c0_i32_0 : i32, i32, i32
  }
  func.func @transform_2(%arg0: i32) -> (i32, i32, i32) {
    %c0_i32 = arith.constant 0 : i32
    %c0_i32_0 = arith.constant 0 : i32
    %c0_i32_1 = arith.constant 0 : i32
    return %arg0, %c0_i32, %c0_i32_0 : i32, i32, i32
  }
  func.func @transform_3(%arg0: i32) -> (i32, i32, i32) {
    %c0_i32 = arith.constant 0 : i32
    %c0_i32_0 = arith.constant 0 : i32
    %c0_i32_1 = arith.constant 0 : i32
    return %arg0, %c0_i32, %c0_i32_0 : i32, i32, i32
  }
  func.func @transform_4(%arg0: i32) -> (i32, i32, i32) {
    %c0_i32 = arith.constant 0 : i32
    %c0_i32_0 = arith.constant 0 : i32
    %c0_i32_1 = arith.constant 0 : i32
    return %arg0, %c0_i32, %c0_i32_0 : i32, i32, i32
  }
  func.func @transform_5(%arg0: i32) -> (i32, i32) {
    %c0_i32 = arith.constant 0 : i32
    %c0_i32_0 = arith.constant 0 : i32
    %c0_i32_1 = arith.constant 0 : i32
    return %c0_i32, %c0_i32_0 : i32, i32
  }
  func.func @transform_6(%arg0: i32) -> (i32, i32) {
    %c0_i32 = arith.constant 0 : i32
    %c0_i32_0 = arith.constant 0 : i32
    %c0_i32_1 = arith.constant 0 : i32
    return %c0_i32, %c0_i32_0 : i32, i32
  }
  func.func @transform_7(%arg0: i32) -> (i32, i32, i32) {
    %c0_i32 = arith.constant 0 : i32
    %c0_i32_0 = arith.constant 0 : i32
    %c0_i32_1 = arith.constant 0 : i32
    return %arg0, %c0_i32, %c0_i32_0 : i32, i32, i32
  }
  func.func @transform_8(%arg0: i32) -> (i32, i32, i32) {
    %c0_i32 = arith.constant 0 : i32
    %c0_i32_0 = arith.constant 0 : i32
    %c0_i32_1 = arith.constant 0 : i32
    return %arg0, %c0_i32, %c0_i32_0 : i32, i32, i32
  }
  func.func @transform_9(%arg0: i32) -> (i32, i32, i32) {
    %c0_i32 = arith.constant 0 : i32
    %c0_i32_0 = arith.constant 0 : i32
    %c0_i32_1 = arith.constant 0 : i32
    return %arg0, %c0_i32, %c0_i32_0 : i32, i32, i32
  }
}

module attributes {stable_mosaic.version = 11 : i64} {
  func.func @_cross_readout_kernel(%arg0: i32, %arg1: memref<1x11x32xf32, #tpu.memory_space<vmem>>, %arg2: memref<1x11x1xf32, #tpu.memory_space<vmem>>, %arg3: memref<1x11x32xf32, #tpu.memory_space<vmem>>, %arg4: memref<1x11x1xf32, #tpu.memory_space<vmem>>, %arg5: memref<1x1x11xf32, #tpu.memory_space<vmem>>, %arg6: memref<32x32xf32, #tpu.memory_space<vmem>>, %arg7: memref<32x32xf32, #tpu.memory_space<vmem>>, %arg8: memref<1x11x32xf32, #tpu.memory_space<vmem>>, %arg9: memref<1x11x32xf32, #tpu.memory_space<vmem>>, %arg10: memref<1x1x64xf32, #tpu.memory_space<vmem>>) attributes {dimension_semantics = [#tpu.dimension_semantics<parallel>], iteration_bounds = array<i64: 2>, scalar_prefetch = 0 : i64, scratch_operands = 0 : i64, tpu.core_type = #tpu.core_type<tc>, window_params = [{transform_indices = @transform_0, window_bounds = array<i64: 1, 11, 32>}, {transform_indices = @transform_1, window_bounds = array<i64: 1, 11, 1>}, {transform_indices = @transform_2, window_bounds = array<i64: 1, 11, 32>}, {transform_indices = @transform_3, window_bounds = array<i64: 1, 11, 1>}, {transform_indices = @transform_4, window_bounds = array<i64: 1, 1, 11>}, {pipeline_mode = #tpu.pipeline_mode<synchronous>, transform_indices = @transform_5, window_bounds = array<i64: 32, 32>}, {pipeline_mode = #tpu.pipeline_mode<synchronous>, transform_indices = @transform_6, window_bounds = array<i64: 32, 32>}, {transform_indices = @transform_7, window_bounds = array<i64: 1, 11, 32>}, {transform_indices = @transform_8, window_bounds = array<i64: 1, 11, 32>}, {transform_indices = @transform_9, window_bounds = array<i64: 1, 1, 64>}]} {
    %c0 = arith.constant 0 : index
    %c0_0 = arith.constant 0 : index
    %c0_1 = arith.constant 0 : index
    %0 = vector.load %arg1[%c0, %c0_0, %c0_1] : memref<1x11x32xf32, #tpu.memory_space<vmem>>, vector<1x11x32xf32>
    %c0_2 = arith.constant 0 : index
    %c0_3 = arith.constant 0 : index
    %c0_4 = arith.constant 0 : index
    %1 = vector.load %arg3[%c0_2, %c0_3, %c0_4] : memref<1x11x32xf32, #tpu.memory_space<vmem>>, vector<1x11x32xf32>
    %c0_5 = arith.constant 0 : index
    %c0_6 = arith.constant 0 : index
    %c0_7 = arith.constant 0 : index
    %2 = vector.load %arg2[%c0_5, %c0_6, %c0_7] : memref<1x11x1xf32, #tpu.memory_space<vmem>>, vector<1x11x1xf32>
    %c0_8 = arith.constant 0 : index
    %c0_9 = arith.constant 0 : index
    %c0_10 = arith.constant 0 : index
    %3 = vector.load %arg4[%c0_8, %c0_9, %c0_10] : memref<1x11x1xf32, #tpu.memory_space<vmem>>, vector<1x11x1xf32>
    %c0_11 = arith.constant 0 : index
    %c0_12 = arith.constant 0 : index
    %c0_13 = arith.constant 0 : index
    %4 = vector.load %arg5[%c0_11, %c0_12, %c0_13] : memref<1x1x11xf32, #tpu.memory_space<vmem>>, vector<1x1x11xf32>
    %c0_14 = arith.constant 0 : index
    %c0_15 = arith.constant 0 : index
    %5 = vector.load %arg6[%c0_14, %c0_15] : memref<32x32xf32, #tpu.memory_space<vmem>>, vector<32x32xf32>
    %6 = arith.truncf %0 : vector<1x11x32xf32> to vector<1x11x32xbf16>
    %7 = arith.truncf %5 : vector<32x32xf32> to vector<32x32xbf16>
    %cst = arith.constant dense<0.000000e+00> : vector<1x11x32xf32>
    %8 = tpu.matmul %6, %7, %cst {dimension_numbers = #tpu.dot_dimension_numbers<[2], [0], [0, 1], [1], [0, 0, 0, 1, 1, 1], [], []>} : vector<1x11x32xbf16>, vector<32x32xbf16>, vector<1x11x32xf32> -> vector<1x11x32xf32>
    %9 = arith.truncf %8 : vector<1x11x32xf32> to vector<1x11x32xbf16>
    %10 = arith.truncf %1 : vector<1x11x32xf32> to vector<1x11x32xbf16>
    %cst_16 = arith.constant dense<0.000000e+00> : vector<1x11x11xf32>
    %11 = tpu.matmul %9, %10, %cst_16 {dimension_numbers = #tpu.dot_dimension_numbers<[2], [2], [1], [1], [0, 0, 0, 1, 1, 1], [0], [0]>} : vector<1x11x32xbf16>, vector<1x11x32xbf16>, vector<1x11x11xf32> -> vector<1x11x11xf32>
    %cst_17 = arith.constant 0.000000e+00 : f32
    %12 = vector.broadcast %cst_17 : f32 to vector<1x1x11xf32>
    %13 = arith.cmpf ogt, %4, %12 : vector<1x1x11xf32>
    %cst_18 = arith.constant -1.000000e+09 : f32
    %14 = vector.shape_cast %13 : vector<1x1x11xi1> to vector<1x1x11xi1>
    %15 = vector.broadcast %14 : vector<1x1x11xi1> to vector<1x11x11xi1>
    %16 = vector.broadcast %cst_18 : f32 to vector<1x11x11xf32>
    %17 = arith.select %15, %11, %16 : vector<1x11x11xi1>, vector<1x11x11xf32>
    %cst_19 = arith.constant dense<0xFF800000> : vector<1x11xf32>
    %18 = vector.multi_reduction <maximumf>, %17, %cst_19 [2] : vector<1x11x11xf32> to vector<1x11xf32>
    %cst_20 = arith.constant 0xFF800000 : f32
    %19 = vector.broadcast %cst_20 : f32 to vector<1x11xf32>
    %20 = arith.maximumf %19, %18 : vector<1x11xf32>
    %21 = vector.shape_cast %20 : vector<1x11xf32> to vector<1x11x1xf32>
    %22 = vector.broadcast %21 : vector<1x11x1xf32> to vector<1x11x11xf32>
    %23 = arith.subf %17, %22 : vector<1x11x11xf32>
    %24 = math.exp %23 : vector<1x11x11xf32>
    %cst_21 = arith.constant dense<0.000000e+00> : vector<1x11xf32>
    %25 = vector.multi_reduction <add>, %24, %cst_21 [2] : vector<1x11x11xf32> to vector<1x11xf32>
    %26 = vector.shape_cast %25 : vector<1x11xf32> to vector<1x11x1xf32>
    %27 = vector.broadcast %26 : vector<1x11x1xf32> to vector<1x11x11xf32>
    %28 = arith.divf %24, %27 : vector<1x11x11xf32>
    %29 = arith.truncf %28 : vector<1x11x11xf32> to vector<1x11x11xbf16>
    %30 = arith.truncf %1 : vector<1x11x32xf32> to vector<1x11x32xbf16>
    %cst_22 = arith.constant dense<0.000000e+00> : vector<1x11x32xf32>
    %31 = tpu.matmul %29, %30, %cst_22 {dimension_numbers = #tpu.dot_dimension_numbers<[2], [1], [1], [2], [0, 0, 0, 1, 1, 2], [0], [0]>} : vector<1x11x11xbf16>, vector<1x11x32xbf16>, vector<1x11x32xf32> -> vector<1x11x32xf32>
    %32 = vector.broadcast %2 : vector<1x11x1xf32> to vector<1x11x32xf32>
    %33 = arith.mulf %31, %32 : vector<1x11x32xf32>
    %cst_23 = arith.constant 0.000000e+00 : f32
    %34 = vector.broadcast %cst_23 : f32 to vector<1x11x1xf32>
    %35 = arith.cmpf ogt, %2, %34 : vector<1x11x1xf32>
    %cst_24 = arith.constant -1.000000e+09 : f32
    %36 = vector.shape_cast %35 : vector<1x11x1xi1> to vector<1x11x1xi1>
    %37 = vector.broadcast %36 : vector<1x11x1xi1> to vector<1x11x11xi1>
    %38 = vector.broadcast %cst_24 : f32 to vector<1x11x11xf32>
    %39 = arith.select %37, %11, %38 : vector<1x11x11xi1>, vector<1x11x11xf32>
    %cst_25 = arith.constant dense<0xFF800000> : vector<1x11xf32>
    %40 = vector.multi_reduction <maximumf>, %39, %cst_25 [1] : vector<1x11x11xf32> to vector<1x11xf32>
    %cst_26 = arith.constant 0xFF800000 : f32
    %41 = vector.broadcast %cst_26 : f32 to vector<1x11xf32>
    %42 = arith.maximumf %41, %40 : vector<1x11xf32>
    %43 = vector.shape_cast %42 : vector<1x11xf32> to vector<1x1x11xf32>
    %44 = vector.broadcast %43 : vector<1x1x11xf32> to vector<1x11x11xf32>
    %45 = arith.subf %39, %44 : vector<1x11x11xf32>
    %46 = math.exp %45 : vector<1x11x11xf32>
    %cst_27 = arith.constant dense<0.000000e+00> : vector<1x11xf32>
    %47 = vector.multi_reduction <add>, %46, %cst_27 [1] : vector<1x11x11xf32> to vector<1x11xf32>
    %48 = vector.shape_cast %47 : vector<1x11xf32> to vector<1x1x11xf32>
    %49 = vector.broadcast %48 : vector<1x1x11xf32> to vector<1x11x11xf32>
    %50 = arith.divf %46, %49 : vector<1x11x11xf32>
    %51 = arith.truncf %50 : vector<1x11x11xf32> to vector<1x11x11xbf16>
    %52 = arith.truncf %0 : vector<1x11x32xf32> to vector<1x11x32xbf16>
    %cst_28 = arith.constant dense<0.000000e+00> : vector<1x11x32xf32>
    %53 = tpu.matmul %51, %52, %cst_28 {dimension_numbers = #tpu.dot_dimension_numbers<[1], [1], [2], [2], [0, 0, 0, 2, 1, 2], [0], [0]>} : vector<1x11x11xbf16>, vector<1x11x32xbf16>, vector<1x11x32xf32> -> vector<1x11x32xf32>
    %54 = vector.broadcast %3 : vector<1x11x1xf32> to vector<1x11x32xf32>
    %55 = arith.mulf %53, %54 : vector<1x11x32xf32>
    %c0_29 = arith.constant 0 : index
    %c0_30 = arith.constant 0 : index
    %c0_31 = arith.constant 0 : index
    %56 = vector.load %arg8[%c0_29, %c0_30, %c0_31] : memref<1x11x32xf32, #tpu.memory_space<vmem>>, vector<1x11x32xf32>
    tpu.vector_store %arg8[%c0_29, %c0_30, %c0_31], %33 {strides = array<i32>} : memref<1x11x32xf32, #tpu.memory_space<vmem>>, vector<1x11x32xf32>,
    %c0_32 = arith.constant 0 : index
    %c0_33 = arith.constant 0 : index
    %c0_34 = arith.constant 0 : index
    %57 = vector.load %arg9[%c0_32, %c0_33, %c0_34] : memref<1x11x32xf32, #tpu.memory_space<vmem>>, vector<1x11x32xf32>
    tpu.vector_store %arg9[%c0_32, %c0_33, %c0_34], %55 {strides = array<i32>} : memref<1x11x32xf32, #tpu.memory_space<vmem>>, vector<1x11x32xf32>,
    %c0_35 = arith.constant 0 : index
    %c0_36 = arith.constant 0 : index
    %58 = vector.load %arg7[%c0_35, %c0_36] : memref<32x32xf32, #tpu.memory_space<vmem>>, vector<32x32xf32>
    %59 = vector.broadcast %2 : vector<1x11x1xf32> to vector<1x11x32xf32>
    %60 = arith.mulf %33, %59 : vector<1x11x32xf32>
    %cst_37 = arith.constant dense<0.000000e+00> : vector<1x1xf32>
    %61 = vector.multi_reduction <add>, %2, %cst_37 [1] : vector<1x11x1xf32> to vector<1x1xf32>
    %62 = vector.shape_cast %61 : vector<1x1xf32> to vector<1x1x1xf32>
    %cst_38 = arith.constant 1.000000e+00 : f32
    %63 = vector.broadcast %cst_38 : f32 to vector<1x1x1xf32>
    %64 = arith.maximumf %62, %63 : vector<1x1x1xf32>
    %cst_39 = arith.constant dense<0.000000e+00> : vector<1x32xf32>
    %65 = vector.multi_reduction <add>, %60, %cst_39 [1] : vector<1x11x32xf32> to vector<1x32xf32>
    %66 = vector.shape_cast %65 : vector<1x32xf32> to vector<1x1x32xf32>
    %67 = vector.broadcast %64 : vector<1x1x1xf32> to vector<1x1x32xf32>
    %68 = arith.divf %66, %67 : vector<1x1x32xf32>
    %69 = arith.truncf %68 : vector<1x1x32xf32> to vector<1x1x32xbf16>
    %70 = arith.truncf %58 : vector<32x32xf32> to vector<32x32xbf16>
    %cst_40 = arith.constant dense<0.000000e+00> : vector<1x1x32xf32>
    %71 = tpu.matmul %69, %70, %cst_40 {dimension_numbers = #tpu.dot_dimension_numbers<[2], [0], [0, 1], [1], [0, 0, 0, 1, 1, 1], [], []>} : vector<1x1x32xbf16>, vector<32x32xbf16>, vector<1x1x32xf32> -> vector<1x1x32xf32>
    %72 = math.tanh %71 : vector<1x1x32xf32>
    %73 = vector.broadcast %72 : vector<1x1x32xf32> to vector<1x11x32xf32>
    %74 = arith.mulf %33, %73 : vector<1x11x32xf32>
    %cst_41 = arith.constant dense<0.000000e+00> : vector<1x11xf32>
    %75 = vector.multi_reduction <add>, %74, %cst_41 [2] : vector<1x11x32xf32> to vector<1x11xf32>
    %76 = vector.shape_cast %75 : vector<1x11xf32> to vector<1x11x1xf32>
    %77 = arith.negf %76 : vector<1x11x1xf32>
    %78 = math.exp %77 : vector<1x11x1xf32>
    %cst_42 = arith.constant 1.000000e+00 : f32
    %79 = vector.broadcast %cst_42 : f32 to vector<1x11x1xf32>
    %80 = arith.addf %79, %78 : vector<1x11x1xf32>
    %81 = arith.divf %79, %80 : vector<1x11x1xf32>
    %82 = vector.broadcast %81 : vector<1x11x1xf32> to vector<1x11x32xf32>
    %83 = arith.mulf %82, %60 : vector<1x11x32xf32>
    %cst_43 = arith.constant dense<0.000000e+00> : vector<1x32xf32>
    %84 = vector.multi_reduction <add>, %83, %cst_43 [1] : vector<1x11x32xf32> to vector<1x32xf32>
    %85 = vector.shape_cast %84 : vector<1x32xf32> to vector<1x1x32xf32>
    %c0_44 = arith.constant 0 : index
    %c0_45 = arith.constant 0 : index
    %c0_46 = arith.constant 0 : index
    %86 = vector.load %arg10[%c0_44, %c0_45, %c0_46] : memref<1x1x64xf32, #tpu.memory_space<vmem>>, vector<1x1x32xf32>
    tpu.vector_store %arg10[%c0_44, %c0_45, %c0_46], %85 {strides = array<i32>} : memref<1x1x64xf32, #tpu.memory_space<vmem>>, vector<1x1x32xf32>,
    %87 = vector.broadcast %3 : vector<1x11x1xf32> to vector<1x11x32xf32>
    %88 = arith.mulf %55, %87 : vector<1x11x32xf32>
    %cst_47 = arith.constant dense<0.000000e+00> : vector<1x1xf32>
    %89 = vector.multi_reduction <add>, %3, %cst_47 [1] : vector<1x11x1xf32> to vector<1x1xf32>
    %90 = vector.shape_cast %89 : vector<1x1xf32> to vector<1x1x1xf32>
    %cst_48 = arith.constant 1.000000e+00 : f32
    %91 = vector.broadcast %cst_48 : f32 to vector<1x1x1xf32>
    %92 = arith.maximumf %90, %91 : vector<1x1x1xf32>
    %cst_49 = arith.constant dense<0.000000e+00> : vector<1x32xf32>
    %93 = vector.multi_reduction <add>, %88, %cst_49 [1] : vector<1x11x32xf32> to vector<1x32xf32>
    %94 = vector.shape_cast %93 : vector<1x32xf32> to vector<1x1x32xf32>
    %95 = vector.broadcast %92 : vector<1x1x1xf32> to vector<1x1x32xf32>
    %96 = arith.divf %94, %95 : vector<1x1x32xf32>
    %97 = arith.truncf %96 : vector<1x1x32xf32> to vector<1x1x32xbf16>
    %98 = arith.truncf %58 : vector<32x32xf32> to vector<32x32xbf16>
    %cst_50 = arith.constant dense<0.000000e+00> : vector<1x1x32xf32>
    %99 = tpu.matmul %97, %98, %cst_50 {dimension_numbers = #tpu.dot_dimension_numbers<[2], [0], [0, 1], [1], [0, 0, 0, 1, 1, 1], [], []>} : vector<1x1x32xbf16>, vector<32x32xbf16>, vector<1x1x32xf32> -> vector<1x1x32xf32>
    %100 = math.tanh %99 : vector<1x1x32xf32>
    %101 = vector.broadcast %100 : vector<1x1x32xf32> to vector<1x11x32xf32>
    %102 = arith.mulf %55, %101 : vector<1x11x32xf32>
    %cst_51 = arith.constant dense<0.000000e+00> : vector<1x11xf32>
    %103 = vector.multi_reduction <add>, %102, %cst_51 [2] : vector<1x11x32xf32> to vector<1x11xf32>
    %104 = vector.shape_cast %103 : vector<1x11xf32> to vector<1x11x1xf32>
    %105 = arith.negf %104 : vector<1x11x1xf32>
    %106 = math.exp %105 : vector<1x11x1xf32>
    %cst_52 = arith.constant 1.000000e+00 : f32
    %107 = vector.broadcast %cst_52 : f32 to vector<1x11x1xf32>
    %108 = arith.addf %107, %106 : vector<1x11x1xf32>
    %109 = arith.divf %107, %108 : vector<1x11x1xf32>
    %110 = vector.broadcast %109 : vector<1x11x1xf32> to vector<1x11x32xf32>
    %111 = arith.mulf %110, %88 : vector<1x11x32xf32>
    %cst_53 = arith.constant dense<0.000000e+00> : vector<1x32xf32>
    %112 = vector.multi_reduction <add>, %111, %cst_53 [1] : vector<1x11x32xf32> to vector<1x32xf32>
    %113 = vector.shape_cast %112 : vector<1x32xf32> to vector<1x1x32xf32>
    %c0_54 = arith.constant 0 : index
    %c0_55 = arith.constant 0 : index
    %c32 = arith.constant 32 : index
    %114 = vector.load %arg10[%c0_54, %c0_55, %c32] : memref<1x1x64xf32, #tpu.memory_space<vmem>>, vector<1x1x32xf32>
    tpu.vector_store %arg10[%c0_54, %c0_55, %c32], %113 {strides = array<i32>} : memref<1x1x64xf32, #tpu.memory_space<vmem>>, vector<1x1x32xf32>,
    return
  }
  func.func @transform_0(%arg0: i32) -> (i32, i32, i32) {
    %c0_i32 = arith.constant 0 : i32
    %c0_i32_0 = arith.constant 0 : i32
    %c0_i32_1 = arith.constant 0 : i32
    return %arg0, %c0_i32, %c0_i32_0 : i32, i32, i32
  }
  func.func @transform_1(%arg0: i32) -> (i32, i32, i32) {
    %c0_i32 = arith.constant 0 : i32
    %c0_i32_0 = arith.constant 0 : i32
    %c0_i32_1 = arith.constant 0 : i32
    return %arg0, %c0_i32, %c0_i32_0 : i32, i32, i32
  }
  func.func @transform_2(%arg0: i32) -> (i32, i32, i32) {
    %c0_i32 = arith.constant 0 : i32
    %c0_i32_0 = arith.constant 0 : i32
    %c0_i32_1 = arith.constant 0 : i32
    return %arg0, %c0_i32, %c0_i32_0 : i32, i32, i32
  }
  func.func @transform_3(%arg0: i32) -> (i32, i32, i32) {
    %c0_i32 = arith.constant 0 : i32
    %c0_i32_0 = arith.constant 0 : i32
    %c0_i32_1 = arith.constant 0 : i32
    return %arg0, %c0_i32, %c0_i32_0 : i32, i32, i32
  }
  func.func @transform_4(%arg0: i32) -> (i32, i32, i32) {
    %c0_i32 = arith.constant 0 : i32
    %c0_i32_0 = arith.constant 0 : i32
    %c0_i32_1 = arith.constant 0 : i32
    return %arg0, %c0_i32, %c0_i32_0 : i32, i32, i32
  }
  func.func @transform_5(%arg0: i32) -> (i32, i32) {
    %c0_i32 = arith.constant 0 : i32
    %c0_i32_0 = arith.constant 0 : i32
    %c0_i32_1 = arith.constant 0 : i32
    return %c0_i32, %c0_i32_0 : i32, i32
  }
  func.func @transform_6(%arg0: i32) -> (i32, i32) {
    %c0_i32 = arith.constant 0 : i32
    %c0_i32_0 = arith.constant 0 : i32
    %c0_i32_1 = arith.constant 0 : i32
    return %c0_i32, %c0_i32_0 : i32, i32
  }
  func.func @transform_7(%arg0: i32) -> (i32, i32, i32) {
    %c0_i32 = arith.constant 0 : i32
    %c0_i32_0 = arith.constant 0 : i32
    %c0_i32_1 = arith.constant 0 : i32
    return %arg0, %c0_i32, %c0_i32_0 : i32, i32, i32
  }
  func.func @transform_8(%arg0: i32) -> (i32, i32, i32) {
    %c0_i32 = arith.constant 0 : i32
    %c0_i32_0 = arith.constant 0 : i32
    %c0_i32_1 = arith.constant 0 : i32
    return %arg0, %c0_i32, %c0_i32_0 : i32, i32, i32
  }
  func.func @transform_9(%arg0: i32) -> (i32, i32, i32) {
    %c0_i32 = arith.constant 0 : i32
    %c0_i32_0 = arith.constant 0 : i32
    %c0_i32_1 = arith.constant 0 : i32
    return %arg0, %c0_i32, %c0_i32_0 : i32, i32, i32
  }
}

module attributes {stable_mosaic.version = 11 : i64} {
  func.func @_hconv_pool_kernel(%arg0: i32, %arg1: memref<2x11x32xf32, #tpu.memory_space<vmem>>, %arg2: memref<2x13x11xf32, #tpu.memory_space<vmem>>, %arg3: memref<2x11x1xf32, #tpu.memory_space<vmem>>, %arg4: memref<2x1x11xf32, #tpu.memory_space<vmem>>, %arg5: memref<32x32xf32, #tpu.memory_space<vmem>>, %arg6: memref<1x32xf32, #tpu.memory_space<vmem>>, %arg7: memref<1x32xf32, #tpu.memory_space<vmem>>, %arg8: memref<2x11x11xf32, #tpu.memory_space<vmem>>, %arg9: memref<2x11x32xf32, #tpu.memory_space<vmem>>, %arg10: memref<2x11x1xf32, #tpu.memory_space<vmem>>) attributes {dimension_semantics = [#tpu.dimension_semantics<parallel>], iteration_bounds = array<i64: 2>, scalar_prefetch = 0 : i64, scratch_operands = 0 : i64, tpu.core_type = #tpu.core_type<tc>, window_params = [{transform_indices = @transform_0, window_bounds = array<i64: 2, 11, 32>}, {transform_indices = @transform_1, window_bounds = array<i64: 2, 13, 11>}, {transform_indices = @transform_2, window_bounds = array<i64: 2, 11, 1>}, {transform_indices = @transform_3, window_bounds = array<i64: 2, 1, 11>}, {pipeline_mode = #tpu.pipeline_mode<synchronous>, transform_indices = @transform_4, window_bounds = array<i64: 32, 32>}, {pipeline_mode = #tpu.pipeline_mode<synchronous>, transform_indices = @transform_5, window_bounds = array<i64: 1, 32>}, {pipeline_mode = #tpu.pipeline_mode<synchronous>, transform_indices = @transform_6, window_bounds = array<i64: 1, 32>}, {transform_indices = @transform_7, window_bounds = array<i64: 2, 11, 11>}, {transform_indices = @transform_8, window_bounds = array<i64: 2, 11, 32>}, {transform_indices = @transform_9, window_bounds = array<i64: 2, 11, 1>}]} {
    %c0 = arith.constant 0 : index
    %c0_0 = arith.constant 0 : index
    %c0_1 = arith.constant 0 : index
    %0 = vector.load %arg1[%c0, %c0_0, %c0_1] : memref<2x11x32xf32, #tpu.memory_space<vmem>>, vector<2x11x32xf32>
    %c0_2 = arith.constant 0 : index
    %c0_3 = arith.constant 0 : index
    %c0_4 = arith.constant 0 : index
    %1 = vector.load %arg2[%c0_2, %c0_3, %c0_4] : memref<2x13x11xf32, #tpu.memory_space<vmem>>, vector<2x13x11xf32>
    %c0_5 = arith.constant 0 : index
    %c0_6 = arith.constant 0 : index
    %c0_7 = arith.constant 0 : index
    %2 = vector.load %arg3[%c0_5, %c0_6, %c0_7] : memref<2x11x1xf32, #tpu.memory_space<vmem>>, vector<2x11x1xf32>
    %c0_8 = arith.constant 0 : index
    %c0_9 = arith.constant 0 : index
    %c0_10 = arith.constant 0 : index
    %3 = vector.load %arg4[%c0_8, %c0_9, %c0_10] : memref<2x1x11xf32, #tpu.memory_space<vmem>>, vector<2x1x11xf32>
    %4 = arith.truncf %1 : vector<2x13x11xf32> to vector<2x13x11xbf16>
    %5 = arith.truncf %1 : vector<2x13x11xf32> to vector<2x13x11xbf16>
    %cst = arith.constant dense<0.000000e+00> : vector<2x11x11xf32>
    %6 = tpu.matmul %4, %5, %cst {dimension_numbers = #tpu.dot_dimension_numbers<[1], [1], [2], [2], [0, 0, 0, 2, 1, 2], [0], [0]>} : vector<2x13x11xbf16>, vector<2x13x11xbf16>, vector<2x11x11xf32> -> vector<2x11x11xf32>
    %7 = vector.broadcast %2 : vector<2x11x1xf32> to vector<2x11x11xf32>
    %8 = vector.broadcast %3 : vector<2x1x11xf32> to vector<2x11x11xf32>
    %9 = arith.mulf %7, %8 : vector<2x11x11xf32>
    %10 = arith.mulf %6, %9 : vector<2x11x11xf32>
    %c0_11 = arith.constant 0 : index
    %c0_12 = arith.constant 0 : index
    %c0_13 = arith.constant 0 : index
    %11 = vector.load %arg8[%c0_11, %c0_12, %c0_13] : memref<2x11x11xf32, #tpu.memory_space<vmem>>, vector<2x11x11xf32>
    tpu.vector_store %arg8[%c0_11, %c0_12, %c0_13], %10 {strides = array<i32>} : memref<2x11x11xf32, #tpu.memory_space<vmem>>, vector<2x11x11xf32>,
    %c0_14 = arith.constant 0 : index
    %c0_15 = arith.constant 0 : index
    %12 = vector.load %arg5[%c0_14, %c0_15] : memref<32x32xf32, #tpu.memory_space<vmem>>, vector<32x32xf32>
    %c0_16 = arith.constant 0 : index
    %c0_17 = arith.constant 0 : index
    %13 = vector.load %arg6[%c0_16, %c0_17] : memref<1x32xf32, #tpu.memory_space<vmem>>, vector<1x32xf32>
    %c0_18 = arith.constant 0 : index
    %c0_19 = arith.constant 0 : index
    %14 = vector.load %arg7[%c0_18, %c0_19] : memref<1x32xf32, #tpu.memory_space<vmem>>, vector<1x32xf32>
    %15 = arith.truncf %0 : vector<2x11x32xf32> to vector<2x11x32xbf16>
    %16 = arith.truncf %12 : vector<32x32xf32> to vector<32x32xbf16>
    %cst_20 = arith.constant dense<0.000000e+00> : vector<2x11x32xf32>
    %17 = tpu.matmul %15, %16, %cst_20 {dimension_numbers = #tpu.dot_dimension_numbers<[2], [0], [0, 1], [1], [0, 0, 0, 1, 1, 1], [], []>} : vector<2x11x32xbf16>, vector<32x32xbf16>, vector<2x11x32xf32> -> vector<2x11x32xf32>
    %cst_21 = arith.constant dense<0.000000e+00> : vector<2x11xf32>
    %18 = vector.multi_reduction <add>, %10, %cst_21 [1] : vector<2x11x11xf32> to vector<2x11xf32>
    %19 = vector.shape_cast %18 : vector<2x11xf32> to vector<2x1x11xf32>
    %cst_22 = arith.constant 9.99999971E-10 : f32
    %20 = vector.broadcast %cst_22 : f32 to vector<2x1x11xf32>
    %21 = arith.maximumf %19, %20 : vector<2x1x11xf32>
    %cst_23 = arith.constant 1.000000e+00 : f32
    %22 = vector.broadcast %cst_23 : f32 to vector<2x1x11xf32>
    %23 = arith.divf %22, %21 : vector<2x1x11xf32>
    %24 = vector.broadcast %3 : vector<2x1x11xf32> to vector<2x11x11xf32>
    %25 = arith.mulf %10, %24 : vector<2x11x11xf32>
    %cst_24 = arith.constant dense<0.000000e+00> : vector<2x11xf32>
    %26 = vector.multi_reduction <add>, %25, %cst_24 [2] : vector<2x11x11xf32> to vector<2x11xf32>
    %27 = vector.shape_cast %26 : vector<2x11xf32> to vector<2x11x1xf32>
    %cst_25 = arith.constant 9.99999971E-10 : f32
    %28 = vector.broadcast %cst_25 : f32 to vector<2x11x1xf32>
    %29 = arith.maximumf %27, %28 : vector<2x11x1xf32>
    %cst_26 = arith.constant 1.000000e+00 : f32
    %30 = vector.broadcast %cst_26 : f32 to vector<2x11x1xf32>
    %31 = arith.divf %30, %29 : vector<2x11x1xf32>
    %32 = arith.truncf %10 : vector<2x11x11xf32> to vector<2x11x11xbf16>
    %33 = arith.truncf %17 : vector<2x11x32xf32> to vector<2x11x32xbf16>
    %cst_27 = arith.constant dense<0.000000e+00> : vector<2x11x32xf32>
    %34 = tpu.matmul %32, %33, %cst_27 {dimension_numbers = #tpu.dot_dimension_numbers<[1], [1], [2], [2], [0, 0, 0, 2, 1, 2], [0], [0]>} : vector<2x11x11xbf16>, vector<2x11x32xbf16>, vector<2x11x32xf32> -> vector<2x11x32xf32>
    %35 = arith.mulf %3, %23 : vector<2x1x11xf32>
    %36 = vector.broadcast %35 : vector<2x1x11xf32> to vector<2x11x11xf32>
    %37 = arith.mulf %10, %36 : vector<2x11x11xf32>
    %38 = arith.truncf %37 : vector<2x11x11xf32> to vector<2x11x11xbf16>
    %39 = arith.truncf %34 : vector<2x11x32xf32> to vector<2x11x32xbf16>
    %cst_28 = arith.constant dense<0.000000e+00> : vector<2x11x32xf32>
    %40 = tpu.matmul %38, %39, %cst_28 {dimension_numbers = #tpu.dot_dimension_numbers<[2], [1], [1], [2], [0, 0, 0, 1, 1, 2], [0], [0]>} : vector<2x11x11xbf16>, vector<2x11x32xbf16>, vector<2x11x32xf32> -> vector<2x11x32xf32>
    %41 = vector.broadcast %31 : vector<2x11x1xf32> to vector<2x11x32xf32>
    %42 = arith.mulf %41, %40 : vector<2x11x32xf32>
    %43 = vector.shape_cast %13 : vector<1x32xf32> to vector<1x1x32xf32>
    %44 = vector.broadcast %43 : vector<1x1x32xf32> to vector<2x11x32xf32>
    %45 = arith.addf %42, %44 : vector<2x11x32xf32>
    %cst_29 = arith.constant 0.000000e+00 : f32
    %46 = vector.broadcast %cst_29 : f32 to vector<2x11x32xf32>
    %47 = arith.cmpf ogt, %45, %46 : vector<2x11x32xf32>
    %cst_30 = arith.constant 2.000000e-01 : f32
    %48 = vector.broadcast %cst_30 : f32 to vector<2x11x32xf32>
    %49 = arith.mulf %48, %45 : vector<2x11x32xf32>
    %50 = arith.select %47, %45, %49 : vector<2x11x32xi1>, vector<2x11x32xf32>
    %51 = vector.broadcast %2 : vector<2x11x1xf32> to vector<2x11x32xf32>
    %52 = arith.mulf %50, %51 : vector<2x11x32xf32>
    %53 = vector.broadcast %23 : vector<2x1x11xf32> to vector<2x11x11xf32>
    %54 = arith.mulf %10, %53 : vector<2x11x11xf32>
    %55 = arith.truncf %54 : vector<2x11x11xf32> to vector<2x11x11xbf16>
    %56 = arith.truncf %52 : vector<2x11x32xf32> to vector<2x11x32xbf16>
    %cst_31 = arith.constant dense<0.000000e+00> : vector<2x11x32xf32>
    %57 = tpu.matmul %55, %56, %cst_31 {dimension_numbers = #tpu.dot_dimension_numbers<[1], [1], [2], [2], [0, 0, 0, 2, 1, 2], [0], [0]>} : vector<2x11x11xbf16>, vector<2x11x32xbf16>, vector<2x11x32xf32> -> vector<2x11x32xf32>
    %58 = vector.shape_cast %14 : vector<1x32xf32> to vector<1x1x32xf32>
    %59 = vector.broadcast %58 : vector<1x1x32xf32> to vector<2x11x32xf32>
    %60 = arith.mulf %57, %59 : vector<2x11x32xf32>
    %cst_32 = arith.constant dense<0.000000e+00> : vector<2x11xf32>
    %61 = vector.multi_reduction <add>, %60, %cst_32 [2] : vector<2x11x32xf32> to vector<2x11xf32>
    %62 = vector.shape_cast %61 : vector<2x11xf32> to vector<2x11x1xf32>
    %c0_33 = arith.constant 0 : index
    %c0_34 = arith.constant 0 : index
    %c0_35 = arith.constant 0 : index
    %63 = vector.load %arg9[%c0_33, %c0_34, %c0_35] : memref<2x11x32xf32, #tpu.memory_space<vmem>>, vector<2x11x32xf32>
    tpu.vector_store %arg9[%c0_33, %c0_34, %c0_35], %57 {strides = array<i32>} : memref<2x11x32xf32, #tpu.memory_space<vmem>>, vector<2x11x32xf32>,
    %c0_36 = arith.constant 0 : index
    %c0_37 = arith.constant 0 : index
    %c0_38 = arith.constant 0 : index
    %64 = vector.load %arg10[%c0_36, %c0_37, %c0_38] : memref<2x11x1xf32, #tpu.memory_space<vmem>>, vector<2x11x1xf32>
    tpu.vector_store %arg10[%c0_36, %c0_37, %c0_38], %62 {strides = array<i32>} : memref<2x11x1xf32, #tpu.memory_space<vmem>>, vector<2x11x1xf32>,
    return
  }
  func.func @transform_0(%arg0: i32) -> (i32, i32, i32) {
    %c0_i32 = arith.constant 0 : i32
    %c0_i32_0 = arith.constant 0 : i32
    %c0_i32_1 = arith.constant 0 : i32
    return %arg0, %c0_i32, %c0_i32_0 : i32, i32, i32
  }
  func.func @transform_1(%arg0: i32) -> (i32, i32, i32) {
    %c0_i32 = arith.constant 0 : i32
    %c0_i32_0 = arith.constant 0 : i32
    %c0_i32_1 = arith.constant 0 : i32
    return %arg0, %c0_i32, %c0_i32_0 : i32, i32, i32
  }
  func.func @transform_2(%arg0: i32) -> (i32, i32, i32) {
    %c0_i32 = arith.constant 0 : i32
    %c0_i32_0 = arith.constant 0 : i32
    %c0_i32_1 = arith.constant 0 : i32
    return %arg0, %c0_i32, %c0_i32_0 : i32, i32, i32
  }
  func.func @transform_3(%arg0: i32) -> (i32, i32, i32) {
    %c0_i32 = arith.constant 0 : i32
    %c0_i32_0 = arith.constant 0 : i32
    %c0_i32_1 = arith.constant 0 : i32
    return %arg0, %c0_i32, %c0_i32_0 : i32, i32, i32
  }
  func.func @transform_4(%arg0: i32) -> (i32, i32) {
    %c0_i32 = arith.constant 0 : i32
    %c0_i32_0 = arith.constant 0 : i32
    %c0_i32_1 = arith.constant 0 : i32
    return %c0_i32, %c0_i32_0 : i32, i32
  }
  func.func @transform_5(%arg0: i32) -> (i32, i32) {
    %c0_i32 = arith.constant 0 : i32
    %c0_i32_0 = arith.constant 0 : i32
    %c0_i32_1 = arith.constant 0 : i32
    return %c0_i32, %c0_i32_0 : i32, i32
  }
  func.func @transform_6(%arg0: i32) -> (i32, i32) {
    %c0_i32 = arith.constant 0 : i32
    %c0_i32_0 = arith.constant 0 : i32
    %c0_i32_1 = arith.constant 0 : i32
    return %c0_i32, %c0_i32_0 : i32, i32
  }
  func.func @transform_7(%arg0: i32) -> (i32, i32, i32) {
    %c0_i32 = arith.constant 0 : i32
    %c0_i32_0 = arith.constant 0 : i32
    %c0_i32_1 = arith.constant 0 : i32
    return %arg0, %c0_i32, %c0_i32_0 : i32, i32, i32
  }
  func.func @transform_8(%arg0: i32) -> (i32, i32, i32) {
    %c0_i32 = arith.constant 0 : i32
    %c0_i32_0 = arith.constant 0 : i32
    %c0_i32_1 = arith.constant 0 : i32
    return %arg0, %c0_i32, %c0_i32_0 : i32, i32, i32
  }
  func.func @transform_9(%arg0: i32) -> (i32, i32, i32) {
    %c0_i32 = arith.constant 0 : i32
    %c0_i32_0 = arith.constant 0 : i32
    %c0_i32_1 = arith.constant 0 : i32
    return %arg0, %c0_i32, %c0_i32_0 : i32, i32, i32
  }
}

module attributes {stable_mosaic.version = 11 : i64} {
  func.func @_mlp_kernel(%arg0: memref<2x256xf32, #tpu.memory_space<vmem>>, %arg1: memref<256x128xf32, #tpu.memory_space<vmem>>, %arg2: memref<1x128xf32, #tpu.memory_space<vmem>>, %arg3: memref<128x64xf32, #tpu.memory_space<vmem>>, %arg4: memref<1x64xf32, #tpu.memory_space<vmem>>, %arg5: memref<64x32xf32, #tpu.memory_space<vmem>>, %arg6: memref<1x32xf32, #tpu.memory_space<vmem>>, %arg7: memref<32x1xf32, #tpu.memory_space<vmem>>, %arg8: memref<1x1xf32, #tpu.memory_space<vmem>>, %arg9: memref<2x1xf32, #tpu.memory_space<vmem>>) attributes {dimension_semantics = [], scalar_prefetch = 0 : i64, scratch_operands = 0 : i64, tpu.core_type = #tpu.core_type<tc>} {
    %c0 = arith.constant 0 : index
    %c0_0 = arith.constant 0 : index
    %0 = vector.load %arg0[%c0, %c0_0] : memref<2x256xf32, #tpu.memory_space<vmem>>, vector<2x256xf32>
    %c0_1 = arith.constant 0 : index
    %c0_2 = arith.constant 0 : index
    %1 = vector.load %arg1[%c0_1, %c0_2] : memref<256x128xf32, #tpu.memory_space<vmem>>, vector<256x128xf32>
    %2 = arith.truncf %0 : vector<2x256xf32> to vector<2x256xbf16>
    %3 = arith.truncf %1 : vector<256x128xf32> to vector<256x128xbf16>
    %cst = arith.constant dense<0.000000e+00> : vector<2x128xf32>
    %4 = tpu.matmul %2, %3, %cst {dimension_numbers = #tpu.dot_dimension_numbers<[1], [0], [0], [1], [0, 0, 1, 1], [], []>} : vector<2x256xbf16>, vector<256x128xbf16>, vector<2x128xf32> -> vector<2x128xf32>
    %c0_3 = arith.constant 0 : index
    %c0_4 = arith.constant 0 : index
    %5 = vector.load %arg2[%c0_3, %c0_4] : memref<1x128xf32, #tpu.memory_space<vmem>>, vector<1x128xf32>
    %6 = vector.broadcast %5 : vector<1x128xf32> to vector<2x128xf32>
    %7 = arith.addf %4, %6 : vector<2x128xf32>
    %cst_5 = arith.constant 0.000000e+00 : f32
    %8 = vector.broadcast %cst_5 : f32 to vector<2x128xf32>
    %9 = arith.maximumf %7, %8 : vector<2x128xf32>
    %c0_6 = arith.constant 0 : index
    %c0_7 = arith.constant 0 : index
    %10 = vector.load %arg3[%c0_6, %c0_7] : memref<128x64xf32, #tpu.memory_space<vmem>>, vector<128x64xf32>
    %11 = arith.truncf %9 : vector<2x128xf32> to vector<2x128xbf16>
    %12 = arith.truncf %10 : vector<128x64xf32> to vector<128x64xbf16>
    %cst_8 = arith.constant dense<0.000000e+00> : vector<2x64xf32>
    %13 = tpu.matmul %11, %12, %cst_8 {dimension_numbers = #tpu.dot_dimension_numbers<[1], [0], [0], [1], [0, 0, 1, 1], [], []>} : vector<2x128xbf16>, vector<128x64xbf16>, vector<2x64xf32> -> vector<2x64xf32>
    %c0_9 = arith.constant 0 : index
    %c0_10 = arith.constant 0 : index
    %14 = vector.load %arg4[%c0_9, %c0_10] : memref<1x64xf32, #tpu.memory_space<vmem>>, vector<1x64xf32>
    %15 = vector.broadcast %14 : vector<1x64xf32> to vector<2x64xf32>
    %16 = arith.addf %13, %15 : vector<2x64xf32>
    %cst_11 = arith.constant 0.000000e+00 : f32
    %17 = vector.broadcast %cst_11 : f32 to vector<2x64xf32>
    %18 = arith.maximumf %16, %17 : vector<2x64xf32>
    %c0_12 = arith.constant 0 : index
    %c0_13 = arith.constant 0 : index
    %19 = vector.load %arg5[%c0_12, %c0_13] : memref<64x32xf32, #tpu.memory_space<vmem>>, vector<64x32xf32>
    %20 = arith.truncf %18 : vector<2x64xf32> to vector<2x64xbf16>
    %21 = arith.truncf %19 : vector<64x32xf32> to vector<64x32xbf16>
    %cst_14 = arith.constant dense<0.000000e+00> : vector<2x32xf32>
    %22 = tpu.matmul %20, %21, %cst_14 {dimension_numbers = #tpu.dot_dimension_numbers<[1], [0], [0], [1], [0, 0, 1, 1], [], []>} : vector<2x64xbf16>, vector<64x32xbf16>, vector<2x32xf32> -> vector<2x32xf32>
    %c0_15 = arith.constant 0 : index
    %c0_16 = arith.constant 0 : index
    %23 = vector.load %arg6[%c0_15, %c0_16] : memref<1x32xf32, #tpu.memory_space<vmem>>, vector<1x32xf32>
    %24 = vector.broadcast %23 : vector<1x32xf32> to vector<2x32xf32>
    %25 = arith.addf %22, %24 : vector<2x32xf32>
    %cst_17 = arith.constant 0.000000e+00 : f32
    %26 = vector.broadcast %cst_17 : f32 to vector<2x32xf32>
    %27 = arith.maximumf %25, %26 : vector<2x32xf32>
    %c0_18 = arith.constant 0 : index
    %c0_19 = arith.constant 0 : index
    %28 = vector.load %arg7[%c0_18, %c0_19] : memref<32x1xf32, #tpu.memory_space<vmem>>, vector<32x1xf32>
    %29 = arith.truncf %27 : vector<2x32xf32> to vector<2x32xbf16>
    %30 = arith.truncf %28 : vector<32x1xf32> to vector<32x1xbf16>
    %cst_20 = arith.constant dense<0.000000e+00> : vector<2x1xf32>
    %31 = tpu.matmul %29, %30, %cst_20 {dimension_numbers = #tpu.dot_dimension_numbers<[1], [0], [0], [1], [0, 0, 1, 1], [], []>} : vector<2x32xbf16>, vector<32x1xbf16>, vector<2x1xf32> -> vector<2x1xf32>
    %c0_21 = arith.constant 0 : index
    %c0_22 = arith.constant 0 : index
    %32 = vector.load %arg8[%c0_21, %c0_22] : memref<1x1xf32, #tpu.memory_space<vmem>>, vector<1x1xf32>
    %33 = vector.broadcast %32 : vector<1x1xf32> to vector<2x1xf32>
    %34 = arith.addf %31, %33 : vector<2x1xf32>
    %35 = arith.negf %34 : vector<2x1xf32>
    %36 = math.exp %35 : vector<2x1xf32>
    %cst_23 = arith.constant 1.000000e+00 : f32
    %37 = vector.broadcast %cst_23 : f32 to vector<2x1xf32>
    %38 = arith.addf %37, %36 : vector<2x1xf32>
    %39 = arith.divf %37, %38 : vector<2x1xf32>
    %c0_24 = arith.constant 0 : index
    %c0_25 = arith.constant 0 : index
    %40 = vector.load %arg9[%c0_24, %c0_25] : memref<2x1xf32, #tpu.memory_space<vmem>>, vector<2x1xf32>
    tpu.vector_store %arg9[%c0_24, %c0_25], %39 {strides = array<i32>} : memref<2x1xf32, #tpu.memory_space<vmem>>, vector<2x1xf32>,
    return
  }
}

module attributes {stable_mosaic.version = 11 : i64} {
  func.func @_cross_readout_kernel(%arg0: i32, %arg1: memref<1x9x32xf32, #tpu.memory_space<vmem>>, %arg2: memref<1x9x1xf32, #tpu.memory_space<vmem>>, %arg3: memref<1x9x32xf32, #tpu.memory_space<vmem>>, %arg4: memref<1x9x1xf32, #tpu.memory_space<vmem>>, %arg5: memref<1x1x9xf32, #tpu.memory_space<vmem>>, %arg6: memref<32x32xf32, #tpu.memory_space<vmem>>, %arg7: memref<32x32xf32, #tpu.memory_space<vmem>>, %arg8: memref<1x9x32xf32, #tpu.memory_space<vmem>>, %arg9: memref<1x9x32xf32, #tpu.memory_space<vmem>>, %arg10: memref<1x1x64xf32, #tpu.memory_space<vmem>>) attributes {dimension_semantics = [#tpu.dimension_semantics<parallel>], iteration_bounds = array<i64: 2>, scalar_prefetch = 0 : i64, scratch_operands = 0 : i64, tpu.core_type = #tpu.core_type<tc>, window_params = [{transform_indices = @transform_0, window_bounds = array<i64: 1, 9, 32>}, {transform_indices = @transform_1, window_bounds = array<i64: 1, 9, 1>}, {transform_indices = @transform_2, window_bounds = array<i64: 1, 9, 32>}, {transform_indices = @transform_3, window_bounds = array<i64: 1, 9, 1>}, {transform_indices = @transform_4, window_bounds = array<i64: 1, 1, 9>}, {pipeline_mode = #tpu.pipeline_mode<synchronous>, transform_indices = @transform_5, window_bounds = array<i64: 32, 32>}, {pipeline_mode = #tpu.pipeline_mode<synchronous>, transform_indices = @transform_6, window_bounds = array<i64: 32, 32>}, {transform_indices = @transform_7, window_bounds = array<i64: 1, 9, 32>}, {transform_indices = @transform_8, window_bounds = array<i64: 1, 9, 32>}, {transform_indices = @transform_9, window_bounds = array<i64: 1, 1, 64>}]} {
    %c0 = arith.constant 0 : index
    %c0_0 = arith.constant 0 : index
    %c0_1 = arith.constant 0 : index
    %0 = vector.load %arg1[%c0, %c0_0, %c0_1] : memref<1x9x32xf32, #tpu.memory_space<vmem>>, vector<1x9x32xf32>
    %c0_2 = arith.constant 0 : index
    %c0_3 = arith.constant 0 : index
    %c0_4 = arith.constant 0 : index
    %1 = vector.load %arg3[%c0_2, %c0_3, %c0_4] : memref<1x9x32xf32, #tpu.memory_space<vmem>>, vector<1x9x32xf32>
    %c0_5 = arith.constant 0 : index
    %c0_6 = arith.constant 0 : index
    %c0_7 = arith.constant 0 : index
    %2 = vector.load %arg2[%c0_5, %c0_6, %c0_7] : memref<1x9x1xf32, #tpu.memory_space<vmem>>, vector<1x9x1xf32>
    %c0_8 = arith.constant 0 : index
    %c0_9 = arith.constant 0 : index
    %c0_10 = arith.constant 0 : index
    %3 = vector.load %arg4[%c0_8, %c0_9, %c0_10] : memref<1x9x1xf32, #tpu.memory_space<vmem>>, vector<1x9x1xf32>
    %c0_11 = arith.constant 0 : index
    %c0_12 = arith.constant 0 : index
    %c0_13 = arith.constant 0 : index
    %4 = vector.load %arg5[%c0_11, %c0_12, %c0_13] : memref<1x1x9xf32, #tpu.memory_space<vmem>>, vector<1x1x9xf32>
    %c0_14 = arith.constant 0 : index
    %c0_15 = arith.constant 0 : index
    %5 = vector.load %arg6[%c0_14, %c0_15] : memref<32x32xf32, #tpu.memory_space<vmem>>, vector<32x32xf32>
    %6 = arith.truncf %0 : vector<1x9x32xf32> to vector<1x9x32xbf16>
    %7 = arith.truncf %5 : vector<32x32xf32> to vector<32x32xbf16>
    %cst = arith.constant dense<0.000000e+00> : vector<1x9x32xf32>
    %8 = tpu.matmul %6, %7, %cst {dimension_numbers = #tpu.dot_dimension_numbers<[2], [0], [0, 1], [1], [0, 0, 0, 1, 1, 1], [], []>} : vector<1x9x32xbf16>, vector<32x32xbf16>, vector<1x9x32xf32> -> vector<1x9x32xf32>
    %9 = arith.truncf %8 : vector<1x9x32xf32> to vector<1x9x32xbf16>
    %10 = arith.truncf %1 : vector<1x9x32xf32> to vector<1x9x32xbf16>
    %cst_16 = arith.constant dense<0.000000e+00> : vector<1x9x9xf32>
    %11 = tpu.matmul %9, %10, %cst_16 {dimension_numbers = #tpu.dot_dimension_numbers<[2], [2], [1], [1], [0, 0, 0, 1, 1, 1], [0], [0]>} : vector<1x9x32xbf16>, vector<1x9x32xbf16>, vector<1x9x9xf32> -> vector<1x9x9xf32>
    %cst_17 = arith.constant 0.000000e+00 : f32
    %12 = vector.broadcast %cst_17 : f32 to vector<1x1x9xf32>
    %13 = arith.cmpf ogt, %4, %12 : vector<1x1x9xf32>
    %cst_18 = arith.constant -1.000000e+09 : f32
    %14 = vector.shape_cast %13 : vector<1x1x9xi1> to vector<1x1x9xi1>
    %15 = vector.broadcast %14 : vector<1x1x9xi1> to vector<1x9x9xi1>
    %16 = vector.broadcast %cst_18 : f32 to vector<1x9x9xf32>
    %17 = arith.select %15, %11, %16 : vector<1x9x9xi1>, vector<1x9x9xf32>
    %cst_19 = arith.constant dense<0xFF800000> : vector<1x9xf32>
    %18 = vector.multi_reduction <maximumf>, %17, %cst_19 [2] : vector<1x9x9xf32> to vector<1x9xf32>
    %cst_20 = arith.constant 0xFF800000 : f32
    %19 = vector.broadcast %cst_20 : f32 to vector<1x9xf32>
    %20 = arith.maximumf %19, %18 : vector<1x9xf32>
    %21 = vector.shape_cast %20 : vector<1x9xf32> to vector<1x9x1xf32>
    %22 = vector.broadcast %21 : vector<1x9x1xf32> to vector<1x9x9xf32>
    %23 = arith.subf %17, %22 : vector<1x9x9xf32>
    %24 = math.exp %23 : vector<1x9x9xf32>
    %cst_21 = arith.constant dense<0.000000e+00> : vector<1x9xf32>
    %25 = vector.multi_reduction <add>, %24, %cst_21 [2] : vector<1x9x9xf32> to vector<1x9xf32>
    %26 = vector.shape_cast %25 : vector<1x9xf32> to vector<1x9x1xf32>
    %27 = vector.broadcast %26 : vector<1x9x1xf32> to vector<1x9x9xf32>
    %28 = arith.divf %24, %27 : vector<1x9x9xf32>
    %29 = arith.truncf %28 : vector<1x9x9xf32> to vector<1x9x9xbf16>
    %30 = arith.truncf %1 : vector<1x9x32xf32> to vector<1x9x32xbf16>
    %cst_22 = arith.constant dense<0.000000e+00> : vector<1x9x32xf32>
    %31 = tpu.matmul %29, %30, %cst_22 {dimension_numbers = #tpu.dot_dimension_numbers<[2], [1], [1], [2], [0, 0, 0, 1, 1, 2], [0], [0]>} : vector<1x9x9xbf16>, vector<1x9x32xbf16>, vector<1x9x32xf32> -> vector<1x9x32xf32>
    %32 = vector.broadcast %2 : vector<1x9x1xf32> to vector<1x9x32xf32>
    %33 = arith.mulf %31, %32 : vector<1x9x32xf32>
    %cst_23 = arith.constant 0.000000e+00 : f32
    %34 = vector.broadcast %cst_23 : f32 to vector<1x9x1xf32>
    %35 = arith.cmpf ogt, %2, %34 : vector<1x9x1xf32>
    %cst_24 = arith.constant -1.000000e+09 : f32
    %36 = vector.shape_cast %35 : vector<1x9x1xi1> to vector<1x9x1xi1>
    %37 = vector.broadcast %36 : vector<1x9x1xi1> to vector<1x9x9xi1>
    %38 = vector.broadcast %cst_24 : f32 to vector<1x9x9xf32>
    %39 = arith.select %37, %11, %38 : vector<1x9x9xi1>, vector<1x9x9xf32>
    %cst_25 = arith.constant dense<0xFF800000> : vector<1x9xf32>
    %40 = vector.multi_reduction <maximumf>, %39, %cst_25 [1] : vector<1x9x9xf32> to vector<1x9xf32>
    %cst_26 = arith.constant 0xFF800000 : f32
    %41 = vector.broadcast %cst_26 : f32 to vector<1x9xf32>
    %42 = arith.maximumf %41, %40 : vector<1x9xf32>
    %43 = vector.shape_cast %42 : vector<1x9xf32> to vector<1x1x9xf32>
    %44 = vector.broadcast %43 : vector<1x1x9xf32> to vector<1x9x9xf32>
    %45 = arith.subf %39, %44 : vector<1x9x9xf32>
    %46 = math.exp %45 : vector<1x9x9xf32>
    %cst_27 = arith.constant dense<0.000000e+00> : vector<1x9xf32>
    %47 = vector.multi_reduction <add>, %46, %cst_27 [1] : vector<1x9x9xf32> to vector<1x9xf32>
    %48 = vector.shape_cast %47 : vector<1x9xf32> to vector<1x1x9xf32>
    %49 = vector.broadcast %48 : vector<1x1x9xf32> to vector<1x9x9xf32>
    %50 = arith.divf %46, %49 : vector<1x9x9xf32>
    %51 = arith.truncf %50 : vector<1x9x9xf32> to vector<1x9x9xbf16>
    %52 = arith.truncf %0 : vector<1x9x32xf32> to vector<1x9x32xbf16>
    %cst_28 = arith.constant dense<0.000000e+00> : vector<1x9x32xf32>
    %53 = tpu.matmul %51, %52, %cst_28 {dimension_numbers = #tpu.dot_dimension_numbers<[1], [1], [2], [2], [0, 0, 0, 2, 1, 2], [0], [0]>} : vector<1x9x9xbf16>, vector<1x9x32xbf16>, vector<1x9x32xf32> -> vector<1x9x32xf32>
    %54 = vector.broadcast %3 : vector<1x9x1xf32> to vector<1x9x32xf32>
    %55 = arith.mulf %53, %54 : vector<1x9x32xf32>
    %c0_29 = arith.constant 0 : index
    %c0_30 = arith.constant 0 : index
    %c0_31 = arith.constant 0 : index
    %56 = vector.load %arg8[%c0_29, %c0_30, %c0_31] : memref<1x9x32xf32, #tpu.memory_space<vmem>>, vector<1x9x32xf32>
    tpu.vector_store %arg8[%c0_29, %c0_30, %c0_31], %33 {strides = array<i32>} : memref<1x9x32xf32, #tpu.memory_space<vmem>>, vector<1x9x32xf32>,
    %c0_32 = arith.constant 0 : index
    %c0_33 = arith.constant 0 : index
    %c0_34 = arith.constant 0 : index
    %57 = vector.load %arg9[%c0_32, %c0_33, %c0_34] : memref<1x9x32xf32, #tpu.memory_space<vmem>>, vector<1x9x32xf32>
    tpu.vector_store %arg9[%c0_32, %c0_33, %c0_34], %55 {strides = array<i32>} : memref<1x9x32xf32, #tpu.memory_space<vmem>>, vector<1x9x32xf32>,
    %c0_35 = arith.constant 0 : index
    %c0_36 = arith.constant 0 : index
    %58 = vector.load %arg7[%c0_35, %c0_36] : memref<32x32xf32, #tpu.memory_space<vmem>>, vector<32x32xf32>
    %59 = vector.broadcast %2 : vector<1x9x1xf32> to vector<1x9x32xf32>
    %60 = arith.mulf %33, %59 : vector<1x9x32xf32>
    %cst_37 = arith.constant dense<0.000000e+00> : vector<1x1xf32>
    %61 = vector.multi_reduction <add>, %2, %cst_37 [1] : vector<1x9x1xf32> to vector<1x1xf32>
    %62 = vector.shape_cast %61 : vector<1x1xf32> to vector<1x1x1xf32>
    %cst_38 = arith.constant 1.000000e+00 : f32
    %63 = vector.broadcast %cst_38 : f32 to vector<1x1x1xf32>
    %64 = arith.maximumf %62, %63 : vector<1x1x1xf32>
    %cst_39 = arith.constant dense<0.000000e+00> : vector<1x32xf32>
    %65 = vector.multi_reduction <add>, %60, %cst_39 [1] : vector<1x9x32xf32> to vector<1x32xf32>
    %66 = vector.shape_cast %65 : vector<1x32xf32> to vector<1x1x32xf32>
    %67 = vector.broadcast %64 : vector<1x1x1xf32> to vector<1x1x32xf32>
    %68 = arith.divf %66, %67 : vector<1x1x32xf32>
    %69 = arith.truncf %68 : vector<1x1x32xf32> to vector<1x1x32xbf16>
    %70 = arith.truncf %58 : vector<32x32xf32> to vector<32x32xbf16>
    %cst_40 = arith.constant dense<0.000000e+00> : vector<1x1x32xf32>
    %71 = tpu.matmul %69, %70, %cst_40 {dimension_numbers = #tpu.dot_dimension_numbers<[2], [0], [0, 1], [1], [0, 0, 0, 1, 1, 1], [], []>} : vector<1x1x32xbf16>, vector<32x32xbf16>, vector<1x1x32xf32> -> vector<1x1x32xf32>
    %72 = math.tanh %71 : vector<1x1x32xf32>
    %73 = vector.broadcast %72 : vector<1x1x32xf32> to vector<1x9x32xf32>
    %74 = arith.mulf %33, %73 : vector<1x9x32xf32>
    %cst_41 = arith.constant dense<0.000000e+00> : vector<1x9xf32>
    %75 = vector.multi_reduction <add>, %74, %cst_41 [2] : vector<1x9x32xf32> to vector<1x9xf32>
    %76 = vector.shape_cast %75 : vector<1x9xf32> to vector<1x9x1xf32>
    %77 = arith.negf %76 : vector<1x9x1xf32>
    %78 = math.exp %77 : vector<1x9x1xf32>
    %cst_42 = arith.constant 1.000000e+00 : f32
    %79 = vector.broadcast %cst_42 : f32 to vector<1x9x1xf32>
    %80 = arith.addf %79, %78 : vector<1x9x1xf32>
    %81 = arith.divf %79, %80 : vector<1x9x1xf32>
    %82 = vector.broadcast %81 : vector<1x9x1xf32> to vector<1x9x32xf32>
    %83 = arith.mulf %82, %60 : vector<1x9x32xf32>
    %cst_43 = arith.constant dense<0.000000e+00> : vector<1x32xf32>
    %84 = vector.multi_reduction <add>, %83, %cst_43 [1] : vector<1x9x32xf32> to vector<1x32xf32>
    %85 = vector.shape_cast %84 : vector<1x32xf32> to vector<1x1x32xf32>
    %c0_44 = arith.constant 0 : index
    %c0_45 = arith.constant 0 : index
    %c0_46 = arith.constant 0 : index
    %86 = vector.load %arg10[%c0_44, %c0_45, %c0_46] : memref<1x1x64xf32, #tpu.memory_space<vmem>>, vector<1x1x32xf32>
    tpu.vector_store %arg10[%c0_44, %c0_45, %c0_46], %85 {strides = array<i32>} : memref<1x1x64xf32, #tpu.memory_space<vmem>>, vector<1x1x32xf32>,
    %87 = vector.broadcast %3 : vector<1x9x1xf32> to vector<1x9x32xf32>
    %88 = arith.mulf %55, %87 : vector<1x9x32xf32>
    %cst_47 = arith.constant dense<0.000000e+00> : vector<1x1xf32>
    %89 = vector.multi_reduction <add>, %3, %cst_47 [1] : vector<1x9x1xf32> to vector<1x1xf32>
    %90 = vector.shape_cast %89 : vector<1x1xf32> to vector<1x1x1xf32>
    %cst_48 = arith.constant 1.000000e+00 : f32
    %91 = vector.broadcast %cst_48 : f32 to vector<1x1x1xf32>
    %92 = arith.maximumf %90, %91 : vector<1x1x1xf32>
    %cst_49 = arith.constant dense<0.000000e+00> : vector<1x32xf32>
    %93 = vector.multi_reduction <add>, %88, %cst_49 [1] : vector<1x9x32xf32> to vector<1x32xf32>
    %94 = vector.shape_cast %93 : vector<1x32xf32> to vector<1x1x32xf32>
    %95 = vector.broadcast %92 : vector<1x1x1xf32> to vector<1x1x32xf32>
    %96 = arith.divf %94, %95 : vector<1x1x32xf32>
    %97 = arith.truncf %96 : vector<1x1x32xf32> to vector<1x1x32xbf16>
    %98 = arith.truncf %58 : vector<32x32xf32> to vector<32x32xbf16>
    %cst_50 = arith.constant dense<0.000000e+00> : vector<1x1x32xf32>
    %99 = tpu.matmul %97, %98, %cst_50 {dimension_numbers = #tpu.dot_dimension_numbers<[2], [0], [0, 1], [1], [0, 0, 0, 1, 1, 1], [], []>} : vector<1x1x32xbf16>, vector<32x32xbf16>, vector<1x1x32xf32> -> vector<1x1x32xf32>
    %100 = math.tanh %99 : vector<1x1x32xf32>
    %101 = vector.broadcast %100 : vector<1x1x32xf32> to vector<1x9x32xf32>
    %102 = arith.mulf %55, %101 : vector<1x9x32xf32>
    %cst_51 = arith.constant dense<0.000000e+00> : vector<1x9xf32>
    %103 = vector.multi_reduction <add>, %102, %cst_51 [2] : vector<1x9x32xf32> to vector<1x9xf32>
    %104 = vector.shape_cast %103 : vector<1x9xf32> to vector<1x9x1xf32>
    %105 = arith.negf %104 : vector<1x9x1xf32>
    %106 = math.exp %105 : vector<1x9x1xf32>
    %cst_52 = arith.constant 1.000000e+00 : f32
    %107 = vector.broadcast %cst_52 : f32 to vector<1x9x1xf32>
    %108 = arith.addf %107, %106 : vector<1x9x1xf32>
    %109 = arith.divf %107, %108 : vector<1x9x1xf32>
    %110 = vector.broadcast %109 : vector<1x9x1xf32> to vector<1x9x32xf32>
    %111 = arith.mulf %110, %88 : vector<1x9x32xf32>
    %cst_53 = arith.constant dense<0.000000e+00> : vector<1x32xf32>
    %112 = vector.multi_reduction <add>, %111, %cst_53 [1] : vector<1x9x32xf32> to vector<1x32xf32>
    %113 = vector.shape_cast %112 : vector<1x32xf32> to vector<1x1x32xf32>
    %c0_54 = arith.constant 0 : index
    %c0_55 = arith.constant 0 : index
    %c32 = arith.constant 32 : index
    %114 = vector.load %arg10[%c0_54, %c0_55, %c32] : memref<1x1x64xf32, #tpu.memory_space<vmem>>, vector<1x1x32xf32>
    tpu.vector_store %arg10[%c0_54, %c0_55, %c32], %113 {strides = array<i32>} : memref<1x1x64xf32, #tpu.memory_space<vmem>>, vector<1x1x32xf32>,
    return
  }
  func.func @transform_0(%arg0: i32) -> (i32, i32, i32) {
    %c0_i32 = arith.constant 0 : i32
    %c0_i32_0 = arith.constant 0 : i32
    %c0_i32_1 = arith.constant 0 : i32
    return %arg0, %c0_i32, %c0_i32_0 : i32, i32, i32
  }
  func.func @transform_1(%arg0: i32) -> (i32, i32, i32) {
    %c0_i32 = arith.constant 0 : i32
    %c0_i32_0 = arith.constant 0 : i32
    %c0_i32_1 = arith.constant 0 : i32
    return %arg0, %c0_i32, %c0_i32_0 : i32, i32, i32
  }
  func.func @transform_2(%arg0: i32) -> (i32, i32, i32) {
    %c0_i32 = arith.constant 0 : i32
    %c0_i32_0 = arith.constant 0 : i32
    %c0_i32_1 = arith.constant 0 : i32
    return %arg0, %c0_i32, %c0_i32_0 : i32, i32, i32
  }
  func.func @transform_3(%arg0: i32) -> (i32, i32, i32) {
    %c0_i32 = arith.constant 0 : i32
    %c0_i32_0 = arith.constant 0 : i32
    %c0_i32_1 = arith.constant 0 : i32
    return %arg0, %c0_i32, %c0_i32_0 : i32, i32, i32
  }
  func.func @transform_4(%arg0: i32) -> (i32, i32, i32) {
    %c0_i32 = arith.constant 0 : i32
    %c0_i32_0 = arith.constant 0 : i32
    %c0_i32_1 = arith.constant 0 : i32
    return %arg0, %c0_i32, %c0_i32_0 : i32, i32, i32
  }
  func.func @transform_5(%arg0: i32) -> (i32, i32) {
    %c0_i32 = arith.constant 0 : i32
    %c0_i32_0 = arith.constant 0 : i32
    %c0_i32_1 = arith.constant 0 : i32
    return %c0_i32, %c0_i32_0 : i32, i32
  }
  func.func @transform_6(%arg0: i32) -> (i32, i32) {
    %c0_i32 = arith.constant 0 : i32
    %c0_i32_0 = arith.constant 0 : i32
    %c0_i32_1 = arith.constant 0 : i32
    return %c0_i32, %c0_i32_0 : i32, i32
  }
  func.func @transform_7(%arg0: i32) -> (i32, i32, i32) {
    %c0_i32 = arith.constant 0 : i32
    %c0_i32_0 = arith.constant 0 : i32
    %c0_i32_1 = arith.constant 0 : i32
    return %arg0, %c0_i32, %c0_i32_0 : i32, i32, i32
  }
  func.func @transform_8(%arg0: i32) -> (i32, i32, i32) {
    %c0_i32 = arith.constant 0 : i32
    %c0_i32_0 = arith.constant 0 : i32
    %c0_i32_1 = arith.constant 0 : i32
    return %arg0, %c0_i32, %c0_i32_0 : i32, i32, i32
  }
  func.func @transform_9(%arg0: i32) -> (i32, i32, i32) {
    %c0_i32 = arith.constant 0 : i32
    %c0_i32_0 = arith.constant 0 : i32
    %c0_i32_1 = arith.constant 0 : i32
    return %arg0, %c0_i32, %c0_i32_0 : i32, i32, i32
  }
}

</mosaic_0001>

<bundles_post_ra>
// kernel: model_forward.7
= control target key start
LH: loop header
LB: loop body
LE: loop exit
PB: predicated region body
PF: predicated region fallthrough
CT: control target
= control target key end

     0   :  { %s2882_s0 = inlined_call_operand.vmem [shape: f32[4,16,8], index: 0, kind: input, shape index: {}]   ;;  %s2883_s1 = inlined_call_operand.vmem [shape: f32[4,16,16], index: 1, kind: input, shape index: {}]   ;;  %s2884_s2 = inlined_call_operand.vmem [shape: f32[4,16,1], index: 2, kind: input, shape index: {}]   ;;  %s2885_s3 = inlined_call_operand.vmem [shape: f32[4,1,16], index: 3, kind: input, shape index: {}]   ;;  %s2886_s4 = inlined_call_operand.vmem [shape: f32[8,32], index: 4, kind: input, shape index: {}]   ;;  %s2887_s5 = inlined_call_operand.vmem [shape: f32[1,32], index: 5, kind: input, shape index: {}]   ;;  %s2888_s6 = inlined_call_operand.vmem [shape: f32[32,32], index: 6, kind: input, shape index: {}]   ;;  %s2889_s7 = inlined_call_operand.vmem [shape: f32[32,32], index: 7, kind: input, shape index: {}]   ;;  %s2890_s8 = inlined_call_operand.vmem [shape: f32[1,32], index: 8, kind: input, shape index: {}]   ;;  %s2891_s9 = inlined_call_operand.vmem [shape: f32[1,32], index: 9, kind: input, shape index: {}]   ;;  %s2892_s10 = inlined_call_operand.vmem [shape: f32[4,1,32], index: 10, kind: output, shape index: {0}]   ;;  %s2893_s11 = inlined_call_operand.vmem [shape: f32[4,16,16], index: 11, kind: output, shape index: {1}]   ;;  %s2894_s12 = inlined_call_operand.hbm [shape: f32[4,16,32], index: 12, kind: output, shape index: {2}]   ;;  %s2895_s13 = inlined_call_operand.vmem [shape: f32[4,16,1], index: 13, kind: output, shape index: {3}]  }
   0x1   :  { %2896 = sst [smem:[#allocation5_spill]] %s2882_s0 }
   0x2   :  { %2897 = sst [smem:[#allocation6_spill]] %s2883_s1 }
   0x3   :  { %2898 = sst [smem:[#allocation7_spill]] %s2884_s2 }
   0x4   :  { %2899 = sst [smem:[#allocation8_spill]] %s2885_s3 }
   0x5   :  { %19 = vsyncpa [#allocation3], 0 }
   0x6   :  { %21 = vsyncpa [#allocation3 + $0x1], 0  ;;  %s2359_s25 = smov 0   ;;  %s2361_s26 = smov 0  }
   0x7   :  { %s2363_s27 = smov 0   ;;  %s2365_s28 = smov 0  }
   0x8 LB: > { %s2380_s29 = sadd.s32 4294967295, %s2279_s28   ;;  %s1941_s30 = sadd.s32 4294967294, %s2279_s28   ;;  %s2279_s28 = sphi %s2365_s28, %s2913_s28   ;;  %s2275_s27 = sphi %s2363_s27, %s2912_s27   ;;  %s2271_s26 = sphi %s2361_s26, %s2911_s26   ;;  %s2267_s25 = sphi %s2359_s25, %s2910_s25  }
   0x9   : > { %s2384_s14 = sadd.s32 1, %s2279_s28   ;;  %s316_s15 = sadd.s32 1, %s2275_s27 }
   0xa   : > { %s313_s16 = ssub.s32 %s2279_s28, %s2384_s14  ;;  %p326_p0 = scmp.ne.s32.totalorder %s2275_s27, %s2271_s26 }
   0xb   : > { %p314_p1 = scmp.eq.s32.totalorder %s313_s16, 0  ;;  %p327_p2 = scmp.eq.s32.totalorder %s2380_s29, 1 }
   0xc   : > { %p332_p3 = scmp.ne.s32.totalorder %s2271_s26, %s2267_s25  ;;  %p333_p4 = scmp.eq.s32.totalorder %s1941_s30, 1 }
   0xd   : > { %s2395_s17 = scalar_select %p314_p1, %s2275_s27, %s316_s15  }
   0xe   : > { %p2397_p5 = por %p327_p2, %p326_p0  ;;  %p2401_p6 = por %p333_p4, %p332_p3 }
   0xf   : > { %p1944_p7 = scmp.ge.s32.totalorder %s2279_s28, 1  ;;  %p433_p8 = scmp.lt.s32.totalorder %s2279_s28, 3 }
  0x11   : > { %p434_p9 = pnand %p1944_p7, %p433_p8 }
  0x12   : > { %s1946_s20 = sshll.u32 (!%p434_p9), %s2380_s29, 1  ;;  %v655_v0 = vld [vmem:[%s2886_s4] sm:$0xff] (!%p434_p9)  ;;  %vm666_vm0 = vcmask (!%p434_p9), 1043456   ;;  %v2281_v1 = vmov (!%p434_p9), 0   ;;  %vm854_vm1 = vcmask (!%p434_p9), 7168   ;;  %s2902_s2 = sld [smem:[#allocation7_spill]] (!%p434_p9)  ;;  %v571_v21 = vlaneseq (!%p434_p9) }
  0x13   : > { %437 = sbr.rel (%p434_p9) target bundleno = 1722 (0x6ba), region = 60  ;;  %2172 = vset.pattern.permute.xlu1 (!%p434_p9), %v2281_v1  ;;  %2171 = vset.pattern.permute.xlu0 (!%p434_p9), %v2281_v1  ;;  %p511_p10 = scmp.lt.s32.totalorder (!%p434_p9), %s1946_s20, 3  ;;  %v658_v2 = vpack.c.bf16 (!%p434_p9), %v655_v0, %v655_v0  ;;  %vm659_vm2 = vcmask (!%p434_p9), 64512   ;;  %v2282_v7 = vmov (!%p434_p9), 0.0   ;;  %vm630_vm5 = vcmask (!%p434_p9), 130048  }
  0x14   : > { %s2903_s0 = sld [smem:[#allocation5_spill]] (!%p434_p9)  ;;  %2048 = vmatprep.subr.bf16.mxu1 (!%p434_p9), %v2282_v7  ;;  %v2434_v22 = vshrl.u32 (!%p434_p9), %v571_v21, 7  ;;  %s2904_s3 = sld [smem:[#allocation8_spill]] (!%p434_p9)  ;;  %v575_v23 = vand.u32 (!%p434_p9), 127, %v571_v21  ;;  %vm2283_vm12 = vmmov (!%p434_p9), 0  }
  0x15   : > { %2124 = vmatprep.subr.msk.bf16.mxu0 (!%p434_p9), %vm666_vm0, %v658_v2  ;;  %v668_v3 = vsel (!%p434_p9), %vm666_vm0, %v658_v2, 0  ;;  %s2905_s1 = sld [smem:[#allocation6_spill]] (!%p434_p9)  ;;  %2050 = vmatprep.mubr.msk.bf16.mxu1 (!%p434_p9), %vm2283_vm12, %v2282_v7  ;;  %s499_s30 = sand.u32 (!%p434_p9), 1, %s2271_s26  }
  0x16   : > { %2043 = vmatpush3.bf16.msra.mxu0 (!%p434_p9), %v668_v3  ;;  %v2441_v24 = vsub.s32 (!%p434_p9), 0, %v2434_v22  ;;  %vm576_vm3 = vcmp.eq.s32.totalorder (!%p434_p9), %v2434_v22, %v575_v23  ;;  %v573_v28 = vadd.s32 (!%p434_p9), 8, %v2434_v22 }
  0x17   : > { %2054 = vmatprep.subr.bf16.mxu0 (!%p434_p9), %v2282_v7  ;;  %v1963_v33 = vsel (!%p434_p9), %vm576_vm3, 1.0, %v2282_v7 }
  0x18   : > { %vm577_vm4 = vcmp.eq.s32.totalorder (!%p434_p9), %v573_v28, %v575_v23 }
  0x19   : > { %v1964_v45 = vsel (!%p434_p9), %vm577_vm4, 1.0, %v2282_v7 }
  0x1a   : > { %s2915_s20 = smov (!%p511_p10, %s1946_s20), 3 }
  0x1b   : > { %s2414_s23 = sshll.u32 %s2915_s20, 4 }
  0x1c   : > { %s529_s15 = scalar_lea.vmem %s2902_s2, %s2414_s23  ;;  %s515_s22 = scalar_lea.vmem %s2903_s0, %s2414_s23 }
  0x1d   : > { %v567_v4 = vld [vmem:[%s529_s15 + $0x10] sm:$0xff]  ;;  %v565_v5 = vld [vmem:[%s529_s15] sm:$0xff]  ;;  %v568_v6 = vld [vmem:[%s529_s15 + $0x18] sm:$0xff]  ;;  %s2620_s21 = scalar_lea.vmem %s2893_s11, %s2414_s23 }
  0x1e   : > { %594 = vperm.xlu1 %2172, %v567_v4   ;;  %v864_v8 = vsel %vm854_vm1, %v567_v4, 0.0  ;;  %584 = vperm.xlu0 %2171, %v565_v5   ;;  %v855_v9 = vsel %vm854_vm1, %v565_v5, 0.0  ;;  %v865_v10 = vsel %vm854_vm1, %v568_v6, 0.0  ;;  %v566_v11 = vld [vmem:[%s529_s15 + $0x8] sm:$0xff]  ;;  %v557_v12 = vld [vmem:[%s515_s22] sm:$0xff]  ;;  %v559_v17 = vld [vmem:[%s515_s22 + $0x10] sm:$0xff]  ;;  %s534_s15 = scalar_lea.vmem %s2904_s3, %s2915_s20 }
  0x1f   : > { %v558_v13 = vld [vmem:[%s515_s22 + $0x8] sm:$0xff]  ;;  %v2429_v14 = vadd.f32 %v865_v10, %v864_v8  ;;  %v856_v15 = vsel %vm854_vm1, %v566_v11, 0.0  ;;  %v560_v18 = vld [vmem:[%s515_s22 + $0x18] sm:$0xff]  ;;  %v2443_v25 = vld [vmem:[%s534_s15] sm:$0x1]  ;;  %s522_s22 = scalar_lea.vmem %s2905_s1, %s2414_s23  ;;  %s2837_s1 = scalar_lea.sflag [#allocation3], %s499_s30 }
  0x20   : > { %v656_v16 = vpack.c.bf16 %v558_v13, %v557_v12  ;;  %v857_v19 = vadd.f32 %v856_v15, %v855_v9  ;;  %v657_v20 = vpack.c.bf16 %v560_v18, %v559_v17  ;;  %v2445_v26 = vld [vmem:[%s534_s15 + $0x1] sm:$0x1]  ;;  %v2454_v27 = vrot.slane %v2443_v25, %v2441_v24  ;;  %v563_v34 = vld [vmem:[%s522_s22 + $0x10] sm:$0xff]  ;;  %v562_v44 = vld [vmem:[%s522_s22 + $0x8] sm:$0xff]  ;;  %s1945_s15 = sshll.u32 %s499_s30, 5 }
  0x21   : > { %v2459_v29 = vrot.slane %v2445_v26, %v2441_v24  ;;  %v561_v32 = vld [vmem:[%s522_s22] sm:$0xff]  ;;  %v564_v50 = vld [vmem:[%s522_s22 + $0x18] sm:$0xff]  ;;  %v867_v62 = vrot.slane %v2429_v14, 4  ;;  %v848_v9 = vld [vmem:[%s2888_s6 + $0x10] sm:$0xff]  ;;  %s539_s22 = scalar_lea.vmem %s2892_s10, %s2915_s20  ;;  %s2802_s0 = scalar_lea.vmem [#allocation2], %s1945_s15 }
  0x22   : > { %2044 = vmatprep.mubr.msk.bf16.mxu0 %vm659_vm2, %v656_v16  ;;  %599 = vperm.xlu1 %2172, %v568_v6   ;;  %v858_v35 = vrot.slane %v857_v19, 4  ;;  %s2820_s20 = scalar_lea.vmem %s2895_s13, %s2414_s23  ;;  %s1770_s24 = sshll.u32 %s2802_s0, 4  ;;  %s2827_s24 = int_to_ptr.vmem [resolvable:$true] %s1770_s24 }
  0x23   : > { %589 = vperm.xlu0 %2171, %v566_v11   ;;  %2045 = vmatmul.mubr.msk.bf16.vlgmr.msra.gmra.mrb[0].mxu0 %vm659_vm2, %v657_v20  ;;  %v868_v15 = vadd.f32 %v867_v62, %v2429_v14  ;;  %s2011_s15 = sshll.u32 %s2380_s29, 9 }
  0x24   : > { %v859_v46 = vadd.f32 %v858_v35, %v857_v19  ;;  %2056 = vmatprep.mubr.msk.bf16.mxu0 %vm2283_vm12, %v2282_v7  ;;  %s2833_s23 = scalar_lea.hbm %s2894_s12, %s2011_s15 }
  0x25   : > { %v869_v19 = vrot.slane %v868_v15, 2 }
  0x26   : > { %v860_v59 = vrot.slane %v859_v46, 2 }
  0x27   : > { %v870_v21 = vadd.f32 %v869_v19, %v868_v15 }
  0x28   : > { %v861_v10 = vadd.f32 %v860_v59, %v859_v46 }
  0x29   : > { %v871_v28 = vrot.slane %v870_v21, 1 }
  0x2a   : > { %v862_v18 = vrot.slane %v861_v10, 1 }
  0x2c   : > { %v863_v20 = vadd.f32 %v862_v18, %v861_v10  ;;  %v849_v10 = vld [vmem:[%s2888_s6 + $0x18] sm:$0xff] }
  0x2e   : > { %v873_v23 = vmax.f32 %v863_v20, 1.0 }
  0x9d   : > { %v2461_v30 = vpop.permute.xlu1 %594  ;;  %v2463_v31 = vpop.permute.xlu0 %584 }
  0x9e   : > { %v2468_v36 = vmul.f32 %v2454_v27, %v2463_v31  ;;  %v2472_v37 = vmul.f32 %v2459_v29, %v2461_v30  ;;  %v624_v38 = vmul.f32 %v1963_v33, %v2461_v30  ;;  %v622_v40 = vmul.f32 %v1963_v33, %v2463_v31 }
  0xa0   : > { %v618_v39 = vmul.f32 %v2468_v36, %v561_v32  ;;  %v620_v41 = vmul.f32 %v2472_v37, %v563_v34  ;;  %v872_v32 = vadd.f32 %v871_v28, %v870_v21 }
  0xa1   : > { %v2478_v42 = vpop.permute.xlu1 %599 }
  0xa2   : > { %v2480_v43 = vpop.permute.xlu0 %589  ;;  %v2483_v47 = vadd.f32 %v622_v40, %v618_v39  ;;  %v1066_v48 = vadd.f32 %v1963_v33, %v618_v39  ;;  %v2489_v51 = vadd.f32 %v624_v38, %v620_v41  ;;  %v1068_v52 = vadd.f32 %v1963_v33, %v620_v41 }
  0xa3   : > { %v2487_v49 = vmul.f32 %v2454_v27, %v2480_v43  ;;  %v2493_v53 = vmul.f32 %v2459_v29, %v2478_v42  ;;  %v623_v56 = vmul.f32 %v1964_v45, %v2480_v43  ;;  %v625_v58 = vmul.f32 %v1964_v45, %v2478_v42 }
  0xa4   : > { %v631_v54 = vsel %vm630_vm5, %v2483_v47, 0.0  ;;  %vm1072_vm6 = vcmp.gt.f32.partialorder %v1068_v52, 0.0  ;;  %vm1070_vm7 = vcmp.gt.f32.partialorder %v1066_v48, 0.0  ;;  %v637_v63 = vsel %vm630_vm5, %v2489_v51, 0.0 }
  0xa5   : > { %v619_v55 = vmul.f32 %v2487_v49, %v562_v44  ;;  %632 = vadd.xlane.f32.xlu0 %v631_v54  ;;  %v621_v57 = vmul.f32 %v2493_v53, %v564_v50  ;;  %v2514_v4 = vsel %vm1072_vm6, 1.0, %v2282_v7  ;;  %v2519_v6 = vsel %vm1070_vm7, 1.0, %v2282_v7 }
  0xa6   : > { %v874_v33 = vmax.f32 %v872_v32, 1.0 }
  0xa7   : > { %v2501_v60 = vadd.f32 %v623_v56, %v619_v55  ;;  %v1067_v61 = vadd.f32 %v1964_v45, %v619_v55  ;;  %v2506_v0 = vadd.f32 %v625_v58, %v621_v57  ;;  %v1069_v1 = vadd.f32 %v1964_v45, %v621_v57 }
  0xa9   : > { %v634_v2 = vsel %vm630_vm5, %v2501_v60, 0.0  ;;  %v723_v3 = vpack.c.bf16 %v2501_v60, %v2483_v47  ;;  %vm1071_vm8 = vcmp.gt.f32.partialorder %v1067_v61, 0.0  ;;  %638 = vadd.xlane.f32.xlu0 %v637_v63  ;;  %v724_v5 = vpack.c.bf16 %v2506_v0, %v2489_v51  ;;  %v1192_v47 = vld [vmem:[%s2889_s7] sm:$0xff]  ;;  %v1193_v60 = vld [vmem:[%s2889_s7 + $0x8] sm:$0xff] }
  0xaa   : > { %635 = vadd.xlane.f32.xlu1 %v634_v2  ;;  %v2522_v8 = vsel %vm1071_vm8, 1.0, %v2282_v7  ;;  %vm2524_vm9 = vmpackc.low %vm1071_vm8, %vm1070_vm7  ;;  %vm1073_vm10 = vcmp.gt.f32.partialorder %v1069_v1, 0.0  ;;  %v640_v17 = vsel %vm630_vm5, %v2506_v0, 0.0  ;;  %v2284_v63 = vmov 1.0|1.0   ;;  %v1194_v1 = vld [vmem:[%s2889_s7 + $0x10] sm:$0xff] }
  0xab   : > { %v1082_v11 = vpack.c.bf16 %v2522_v8, %v2519_v6  ;;  %v2531_v12 = vsel %vm1073_vm10, 1.0, %v2282_v7  ;;  %vm2534_vm11 = vmpackc.low %vm1073_vm10, %vm1072_vm6  ;;  %v1200_v0 = vpack.c.bf16 %v1193_v60, %v1192_v47  ;;  %v1195_v2 = vld [vmem:[%s2889_s7 + $0x18] sm:$0xff]  ;;  %v847_v6 = vld [vmem:[%s2888_s6 + $0x8] sm:$0xff]  ;;  %vm875_vm6 = vcmask 261120  }
  0xac   : > { %v1083_v16 = vpack.c.bf16 %v2531_v12, %v2514_v4  ;;  %vm916_vm10 = vcmask 1041409  }
  0xad   : > { %641 = vadd.xlane.f32.xlu0 %v640_v17  ;;  %v1969_v17 = vld [vmem:[%s2887_s5] ss:$0 sm:$0xff] }
  0xbb   : > { %896 = vperm.xlu1 %2172, %v873_v23  }
  0xc3   : > { %901 = vperm.xlu0 %2171, %v874_v33  }
  0xf6   : > { %v2046_v14 = vpop.f32.mrb[0].mxu0 }
  0xf7   : > { %v704_v34 = vpop.f32.mrb[1].mxu0 }
  0xf8   : > { %v2047_v35 = vpop.f32.mrb[2].mxu0 }
  0xf9   : > { %v707_v38 = vpop.f32.mrb[3].mxu0 }
 0x132   : > { %v633_v39 = vpop.xlane.xlu0 %632 }
 0x133   : > { %2173 = vrsqrt.f32 %v633_v39  ;;  %vm643_vm13 = vcmp.gt.f32.partialorder %v633_v39, 0.0 }
 0x136   : > { %v639_v41 = vpop.xlane.xlu0 %638 }
 0x137   : > { %v636_v40 = vpop.xlane.xlu1 %635  ;;  %vm645_vm15 = vcmp.gt.f32.partialorder %v639_v41, 0.0 }
 0x138   : > { %2175 = vrsqrt.f32 %v636_v40  ;;  %vm644_vm14 = vcmp.gt.f32.partialorder %v636_v40, 0.0 }
 0x139   : > { %2177 = vrsqrt.f32 %v639_v41 }
 0x13a   : > { %v642_v44 = vpop.xlane.xlu0 %641 }
 0x13b   : > { %2179 = vrsqrt.f32 %v642_v44  ;;  %vm646_vm0 = vcmp.gt.f32.partialorder %v642_v44, 0.0 }
 0x13d   : > { %v2174_v45 = vpop.eup %2173 }
 0x13e   : > { %v651_v46 = vsel %vm643_vm13, %v2174_v45, 0.0 }
 0x13f   : > { %v719_v52 = vmul.f32 %v704_v34, %v651_v46 }
 0x142   : > { %v2176_v48 = vpop.eup %2175 }
 0x143   : > { %v2178_v50 = vpop.eup %2177  ;;  %v652_v51 = vsel %vm644_vm14, %v2176_v48, 0.0  ;;  %vm1063_vm14 = vcmask 253952  }
 0x144   : > { %v720_v54 = vmul.f32 %v707_v38, %v652_v51  ;;  %v653_v55 = vsel %vm645_vm15, %v2178_v50, 0.0 }
 0x145   : > { %v2180_v57 = vpop.eup %2179  ;;  %v721_v59 = vmul.f32 %v2046_v14, %v653_v55 }
 0x146   : > { %v725_v56 = vpack.c.bf16 %v720_v54, %v719_v52  ;;  %v654_v58 = vsel %vm646_vm0, %v2180_v57, 0.0 }
 0x147   : > { %v722_v61 = vmul.f32 %v2047_v35, %v654_v58 }
 0x148   : > { %2049 = vmatpush3.bf16.msra.mxu1 %v725_v56 }
 0x149   : > { %2060 = vmatprep.subr.bf16.mxu1 %v2282_v7  ;;  %v726_v62 = vpack.c.bf16 %v722_v61, %v721_v59 }
 0x14b   : > { %2051 = vmatmul.mubr.msk.bf16.vlgmr.msra.gmra.mrb[0].mxu1 %vm630_vm5, %v723_v3  ;;  %2055 = vmatpush3.bf16.msra.mxu0 %v726_v62  ;;  %v1201_v3 = vpack.c.bf16 %v1195_v2, %v1194_v1 }
 0x14c   : > { %2064 = vmatprep.mubr.msk.bf16.mxu1 %vm2283_vm12, %v2282_v7  ;;  %2068 = vmatprep.subr.bf16.mxu0 %v2282_v7 }
 0x14e   : > { %2057 = vmatmul.mubr.msk.bf16.vlgmr.msra.gmra.mrb[4].mxu0 %vm630_vm5, %v724_v5  ;;  %v846_v5 = vld [vmem:[%s2888_s6] sm:$0xff] }
 0x14f   : > { %2069 = vmatpush3.bf16.msk.msra.mxu0 %vm2524_vm9, %v2284_v63  ;;  %2070 = vmatprep.mubr.msk.bf16.mxu0 %vm2283_vm12, %v2282_v7  ;;  %v910_v8 = vpack.c.bf16 %v847_v6, %v846_v5  ;;  %v897_v6 = vpop.permute.xlu1 %896 }
 0x150   : > { %2080 = vmatprep.subr.bf16.mxu0 %v1200_v0  ;;  %2181 = vrcp.f32 %v897_v6 }
 0x151   : > { %2061 = vmatpush3.bf16.msra.mxu1 %v910_v8 }
 0x152   : > { %2062 = vmatprep.subr.bf16.mxu1 %v2282_v7 }
 0x156   : > { %2071 = vmatmul.mubr.msk.bf16.vlgmr.msra.gmra.mrb[8].mxu0 %vm630_vm5, %v1082_v11  ;;  %v911_v11 = vpack.c.bf16 %v849_v10, %v848_v9 }
 0x157   : > { %2081 = vmatpush3.bf16.msra.mxu0 %v1200_v0 }
 0x158   : > { %2082 = vmatprep.subr.bf16.mxu0 %v1201_v3  ;;  %2063 = vmatpush3.bf16.msra.mxu1 %v911_v11 }
 0x159   : > { %2074 = vmatprep.subr.bf16.mxu1 %v2282_v7 }
 0x15b   : > { %2083 = vmatpush3.bf16.msra.mxu0 %v1201_v3 }
 0x15c   : > { %2094 = vmatprep.subr.bf16.mxu0 %v2282_v7 }
 0x21e   : > { %v764_v15 = vpop.f32.mrb[0].mxu1 }
 0x21f   : > { %v815_v18 = vmul.f32 %v764_v15, %v651_v46  ;;  %v2052_v19 = vpop.f32.mrb[1].mxu1 }
 0x220   : > { %v767_v20 = vpop.f32.mrb[2].mxu1 }
 0x221   : > { %v826_v21 = vadd.f32 %v1969_v17, %v815_v18  ;;  %v816_v23 = vmul.f32 %v767_v20, %v652_v51  ;;  %v2053_v28 = vpop.f32.mrb[3].mxu1  ;;  %v808_v14 = vpop.f32.mrb[4].mxu0 }
 0x222   : > { %v817_v34 = vmul.f32 %v808_v14, %v653_v55  ;;  %v2058_v35 = vpop.f32.mrb[5].mxu0 }
 0x223   : > { %vm830_vm2 = vcmp.gt.f32.partialorder %v826_v21, 0.0  ;;  %v834_v32 = vmul.f32 0.2, %v826_v21  ;;  %v827_v33 = vadd.f32 %v1969_v17, %v816_v23  ;;  %v811_v40 = vpop.f32.mrb[6].mxu0 }
 0x224   : > { %v828_v44 = vadd.f32 %v1969_v17, %v817_v34  ;;  %v818_v45 = vmul.f32 %v811_v40, %v654_v58  ;;  %v2059_v46 = vpop.f32.mrb[7].mxu0 }
 0x225   : > { %v838_v38 = vsel %vm830_vm2, %v826_v21, %v834_v32  ;;  %vm831_vm3 = vcmp.gt.f32.partialorder %v827_v33, 0.0  ;;  %v835_v39 = vmul.f32 0.2, %v827_v33  ;;  %v902_v32 = vpop.permute.xlu0 %901 }
 0x226   : > { %v2593_v41 = vmul.f32 %v838_v38, %v2463_v31  ;;  %vm832_vm4 = vcmp.gt.f32.partialorder %v828_v44, 0.0  ;;  %v836_v52 = vmul.f32 0.2, %v828_v44  ;;  %v829_v54 = vadd.f32 %v1969_v17, %v818_v45 }
 0x227   : > { %v839_v48 = vsel %vm831_vm3, %v827_v33, %v835_v39  ;;  %2183 = vrcp.f32 %v902_v32 }
 0x228   : > { %v2597_v50 = vmul.f32 %v2593_v41, %v2463_v31  ;;  %v2600_v51 = vmul.f32 %v839_v48, %v2480_v43  ;;  %v840_v56 = vsel %vm832_vm4, %v828_v44, %v836_v52  ;;  %vm833_vm7 = vcmp.gt.f32.partialorder %v829_v54, 0.0 }
 0x229   : > { %v2609_v58 = vmul.f32 %v840_v56, %v2461_v30  ;;  %v837_v59 = vmul.f32 0.2, %v829_v54  ;;  %v1121_v61 = vpop.f32.mrb[8].mxu0 }
 0x22a   : > { %v2604_v55 = vmul.f32 %v2600_v51, %v2480_v43  ;;  %v1198_v57 = vpack.c.bf16 %v2600_v51, %v2593_v41  ;;  %v876_v62 = vsel %vm875_vm6, %v2597_v50, 0.0  ;;  %vm1172_vm8 = vcmp.gt.f32.partialorder %v1121_v61, 0.0  ;;  %v2072_v60 = vpop.f32.mrb[9].mxu0 }
 0x22b   : > { %v2624_v1 = vmul.f32 %v2609_v58, %v2461_v30  ;;  %v841_v2 = vsel %vm833_vm7, %v829_v54, %v837_v59  ;;  %v1985_v3 = vsel %vm1172_vm8, 1.0, %v2282_v7  ;;  %v1124_v5 = vpop.f32.mrb[10].mxu0  ;;  %v2182_v54 = vpop.eup %2181 }
 0x22c   : > { %v877_v47 = vsel %vm875_vm6, %v2604_v55, 0.0  ;;  %2084 = vmatprep.mubr.msk.bf16.mxu0 %vm875_vm6, %v1198_v57  ;;  %v2628_v8 = vmul.f32 %v841_v2, %v2478_v42  ;;  %v2631_v9 = vmul.f32 %v1985_v3, %v2468_v36  ;;  %vm1173_vm9 = vcmp.gt.f32.partialorder %v1124_v5, 0.0  ;;  %v2073_v10 = vpop.f32.mrb[11].mxu0 }
 0x22d   : > { %v878_v0 = vadd.f32 %v877_v47, %v876_v62  ;;  %v1986_v15 = vsel %vm1173_vm9, 1.0, %v2282_v7  ;;  %v885_v20 = vsel %vm875_vm6, %v2624_v1, 0.0 }
 0x22e   : > { %v2636_v17 = vmul.f32 %v2628_v8, %v2478_v42  ;;  %1188 = vst.msk [vmem:[%s2620_s21] sm:$0xff] %vm630_vm5, %v2631_v9  ;;  %v2642_v18 = vmul.f32 %v1986_v15, %v2487_v49  ;;  %v1199_v19 = vpack.c.bf16 %v2628_v8, %v2609_v58  ;;  %v1257_v23 = vsel %vm630_vm5, %v2631_v9, 0.0 }
 0x22f   : > { %v879_v11 = vrot.slane %v878_v0, 4  ;;  %v1281_v59 = vmul.f32 %v2631_v9, %v2454_v27 }
 0x230   : > { %v886_v21 = vsel %vm875_vm6, %v2636_v17, 0.0  ;;  %1189 = vst.msk [vmem:[%s2620_s21 + $0x8] sm:$0xff] %vm630_vm5, %v2642_v18  ;;  %v1258_v49 = vsel %vm630_vm5, %v2642_v18, 0.0  ;;  %2085 = vmatmul.mubr.msk.bf16.vlgmr.msra.gmra.mrb[12].mxu0 %vm875_vm6, %v1199_v19  ;;  %v1309_v28 = vpack.c.bf16 %v2642_v18, %v2631_v9 }
 0x231   : > { %v880_v36 = vadd.f32 %v879_v11, %v878_v0  ;;  %v887_v14 = vadd.f32 %v886_v21, %v885_v20  ;;  %v1259_v34 = vadd.f32 %v1258_v49, %v1257_v23  ;;  %2096 = vmatprep.mubr.msk.bf16.mxu0 %vm2283_vm12, %v2282_v7  ;;  %v2184_v2 = vpop.eup %2183  ;;  %v1285_v3 = vsel %vm630_vm5, %v1281_v59, 0.0 }
 0x232   : > { %1313 = vxpose.xlu1.c.b16.start.end [1/1] (short) (narrow) %v1309_v28, 16 }
 0x233   : > { %v881_v33 = vrot.slane %v880_v36, 2  ;;  %v888_v38 = vrot.slane %v887_v14, 4  ;;  %v1260_v39 = vrot.slane %v1259_v34, 4 }
 0x235   : > { %v882_v35 = vadd.f32 %v881_v33, %v880_v36  ;;  %v889_v44 = vadd.f32 %v888_v38, %v887_v14  ;;  %v1261_v45 = vadd.f32 %v1260_v39, %v1259_v34 }
 0x237   : > { %v883_v40 = vrot.slane %v882_v35, 1  ;;  %v890_v46 = vrot.slane %v889_v44, 2  ;;  %v1262_v48 = vrot.slane %v1261_v45, 2 }
 0x239   : > { %v884_v52 = vadd.f32 %v883_v40, %v882_v35  ;;  %v891_v56 = vadd.f32 %v890_v46, %v889_v44  ;;  %v1263_v57 = vadd.f32 %v1262_v48, %v1261_v45 }
 0x23b   : > { %v892_v61 = vrot.slane %v891_v56, 1  ;;  %v1264_v62 = vrot.slane %v1263_v57, 1  ;;  %v905_v47 = vmul.f32 %v2182_v54, %v884_v52 }
 0x23d   : > { %v1265_v60 = vadd.f32 %v1264_v62, %v1263_v57  ;;  %v893_v0 = vadd.f32 %v892_v61, %v891_v56  ;;  %v908_v10 = vpack.c.bf16 %v905_v47, %v905_v47 }
 0x23f   : > { %v1275_v5 = vmax.f32 %v1265_v60, 1e-09  ;;  %1286 = vadd.xlane.f32.xlu1 %v1285_v3  ;;  %v907_v6 = vmul.f32 %v2184_v2, %v893_v0  ;;  %v914_v15 = vunpack.c.l.b16 %v908_v10 }
 0x241   : > { %2185 = vrcp.f32 %v1275_v5  ;;  %v909_v11 = vpack.c.bf16 %v907_v6, %v907_v6 }
 0x243   : > { %v915_v19 = vunpack.c.l.b16 %v909_v11 }
 0x245   : > { %v917_v36 = vsel %vm916_vm10, %v915_v19, %v914_v15 }
 0x246   : > { %v918_v20 = vpack.c.b16 %v917_v36, %v917_v36 }
 0x248   : > { %2065 = vmatmul.mubr.msk.bf16.vlgmr.msra.gmra.mrb[4].mxu1 %vm875_vm6, %v918_v20  ;;  %v2285_v20 = vmov 1966171168  }
 0x249   : > { %2075 = vmatpush3.bf16.msk.msra.mxu1 %vm2534_vm11, %v2284_v63  ;;  %2076 = vmatprep.mubr.msk.bf16.mxu1 %vm2283_vm12, %v2282_v7 }
 0x24a   : > { %2088 = vmatprep.subr.bf16.mxu1 %v2282_v7 }
 0x24b   : > { %v2186_v21 = vpop.eup %2185 }
 0x24c   : > { %v2673_v23 = vmul.f32 %v2186_v21, %v2631_v9  ;;  %v2676_v49 = vmul.f32 %v2186_v21, %v2642_v18  ;;  %v1433_v28 = vmul.f32 %v2186_v21, %v2443_v25  ;;  %v964_v21 = vunpack.c.l.s4 %v2285_v20 }
 0x24e   : > { %v1577_v32 = vpack.c.bf16 %v2676_v49, %v2673_v23  ;;  %v1440_v13 = vrot.slane %v1433_v28, %v2441_v24 }
 0x250   : > { %2077 = vmatmul.mubr.msk.bf16.vlgmr.msra.gmra.mrb[8].mxu1 %vm630_vm5, %v1083_v16  ;;  %v2687_v63 = vmul.f32 %v1440_v13, %v2631_v9  ;;  %v2690_v33 = vmul.f32 %v1440_v13, %v2642_v18  ;;  %v965_v13 = vunpack.c.0.s8 %v964_v21 }
 0x251   : > { %2090 = vmatprep.mubr.msk.bf16.mxu1 %vm2283_vm12, %v2282_v7 }
 0x252   : > { %v1451_v25 = vpack.c.bf16 %v2690_v33, %v2687_v63 }
 0x298   : > { %v1321_v12 = vpop.trf.xlu1 }
 0x303   : > { %v2086_v14 = vpop.f32.mrb[12].mxu0 }
 0x304   : > { %v1242_v34 = vpop.f32.mrb[13].mxu0 }
 0x305   : > { %v2087_v35 = vpop.f32.mrb[14].mxu0 }
 0x306   : > { %v1312_v38 = vpack.c.bf16 %v2087_v35, %v2086_v14  ;;  %v1245_v39 = vpop.f32.mrb[15].mxu0  ;;  %v968_v14 = vsub.s32 %v965_v13, %v2434_v22 }
 0x307   : > { %v1311_v4 = vpack.c.bf16 %v1245_v39, %v1242_v34 }
 0x308   : > { %2095 = vmatpush3.bf16.msra.mxu0 %v1312_v38 }
 0x309   : > { %2089 = vmatpush3.bf16.msra.mxu1 %v1311_v4  ;;  %2106 = vmatprep.subr.bf16.mxu0 %v2282_v7 }
 0x30a   : > { %2100 = vmatprep.subr.bf16.mxu1 %v2282_v7 }
 0x30c   : > { %2091 = vmatmul.mubr.msk.bf16.vlgmr.msra.gmra.mrb[12].mxu1 %vm630_vm5, %v1321_v12 }
 0x30d   : > { %2102 = vmatprep.mubr.msk.bf16.mxu1 %vm2283_vm12, %v2282_v7 }
 0x31b   : > { %v956_v16 = vpop.f32.mrb[4].mxu1 }
 0x31c   : > { %v2066_v9 = vpop.f32.mrb[5].mxu1  ;;  %v969_v38 = vrot.slane %v956_v16, %v968_v14 }
 0x31d   : > { %v959_v40 = vpop.f32.mrb[6].mxu1 }
 0x31e   : > { %v2067_v44 = vpop.f32.mrb[7].mxu1  ;;  %v970_v9 = vcombine.high %v969_v38, %v969_v38  ;;  %v977_v40 = vrot.slane %v969_v38, %v968_v14 }
 0x323   : > { %v1165_v45 = vpop.f32.mrb[8].mxu1 }
 0x324   : > { %vm1174_vm11 = vcmp.gt.f32.partialorder %v1165_v45, 0.0  ;;  %v2078_v46 = vpop.f32.mrb[9].mxu1  ;;  %v984_v45 = vrot.slane %v970_v9, %v968_v14 }
 0x325   : > { %v1987_v48 = vsel %vm1174_vm11, 1.0, %v2282_v7  ;;  %v1168_v52 = vpop.f32.mrb[10].mxu1 }
 0x326   : > { %v1186_v54 = vmul.f32 %v1987_v48, %v2472_v37  ;;  %vm1175_vm13 = vcmp.gt.f32.partialorder %v1168_v52, 0.0  ;;  %v2079_v56 = vpop.f32.mrb[11].mxu1 }
 0x327   : > { %v1988_v57 = vsel %vm1175_vm13, 1.0, %v2282_v7 }
 0x328   : > { %1190 = vst.msk [vmem:[%s2620_s21 + $0x10] sm:$0xff] %vm630_vm5, %v1186_v54  ;;  %v1187_v59 = vmul.f32 %v1988_v57, %v2493_v53  ;;  %v1283_v61 = vmul.f32 %v1186_v54, %v2459_v29  ;;  %v1266_v62 = vsel %vm630_vm5, %v1186_v54, 0.0  ;;  %v1282_v53 = vmul.f32 %v2642_v18, %v2454_v27 }
 0x32a   : > { %1191 = vst.msk [vmem:[%s2620_s21 + $0x18] sm:$0xff] %vm630_vm5, %v1187_v59  ;;  %v1267_v47 = vsel %vm630_vm5, %v1187_v59, 0.0  ;;  %v1291_v60 = vsel %vm630_vm5, %v1283_v61, 0.0  ;;  %v1310_v0 = vpack.c.bf16 %v1187_v59, %v1186_v54  ;;  %v1288_v15 = vsel %vm630_vm5, %v1282_v53, 0.0 }
 0x32b   : > { %v1268_v37 = vadd.f32 %v1267_v47, %v1266_v62  ;;  %1292 = vadd.xlane.f32.xlu1 %v1291_v60  ;;  %v1284_v19 = vmul.f32 %v1187_v59, %v2459_v29 }
 0x32c   : > { %1373 = vxpose.xlu0.c.b16.start.end [1/1] (short) (narrow) %v1310_v0, 16 }
 0x32d   : > { %v1269_v2 = vrot.slane %v1268_v37, 4  ;;  %v1294_v28 = vsel %vm630_vm5, %v1284_v19, 0.0 }
 0x32f   : > { %v1270_v3 = vadd.f32 %v1269_v2, %v1268_v37 }
 0x331   : > { %v1271_v5 = vrot.slane %v1270_v3, 2 }
 0x333   : > { %v1272_v6 = vadd.f32 %v1271_v5, %v1270_v3 }
 0x335   : > { %v1273_v10 = vrot.slane %v1272_v6, 1 }
 0x337   : > { %v1274_v11 = vadd.f32 %v1273_v10, %v1272_v6 }
 0x339   : > { %v1276_v36 = vmax.f32 %v1274_v11, 1e-09  ;;  %1289 = vadd.xlane.f32.xlu0 %v1288_v15 }
 0x33b   : > { %2187 = vrcp.f32 %v1276_v36 }
 0x33c   : > { %2189 = vtanh.f32 %v977_v40 }
 0x33d   : > { %1295 = vadd.xlane.f32.xlu0 %v1294_v28  ;;  %2191 = vtanh.f32 %v984_v45 }
 0x345   : > { %v2188_v34 = vpop.eup %2187 }
 0x346   : > { %v1575_v35 = vmul.f32 %v2188_v34, %v1186_v54  ;;  %v1576_v27 = vmul.f32 %v2188_v34, %v1187_v59  ;;  %v1434_v18 = vmul.f32 %v2188_v34, %v2445_v26  ;;  %v2190_v22 = vpop.eup %2189 }
 0x347   : > { %v994_v26 = vrot.slane %v2190_v22, %v2441_v24  ;;  %v2192_v16 = vpop.eup %2191 }
 0x348   : > { %v1578_v39 = vpack.c.bf16 %v1576_v27, %v1575_v35  ;;  %v1444_v29 = vrot.slane %v1434_v18, %v2441_v24  ;;  %v998_v48 = vrot.slane %v2192_v16, %v2441_v24 }
 0x349   : > { %v1001_v46 = vmul.f32 %v994_v26, %v2593_v41  ;;  %v1002_v23 = vmul.f32 %v994_v26, %v2600_v51  ;;  %v2744_v51 = vpop.xlane.xlu1 %1286 }
 0x34a   : > { %v2721_v4 = vmul.f32 %v1444_v29, %v1186_v54  ;;  %v2723_v12 = vmul.f32 %v1444_v29, %v1187_v59  ;;  %v1003_v54 = vmul.f32 %v998_v48, %v2609_v58 }
 0x34b   : > { %v1005_v52 = vsel %vm875_vm6, %v1001_v46, 0.0  ;;  %v1008_v49 = vsel %vm875_vm6, %v1002_v23, 0.0 }
 0x34c   : > { %v1452_v44 = vpack.c.bf16 %v2723_v12, %v2721_v4  ;;  %v1011_v56 = vsel %vm875_vm6, %v1003_v54, 0.0 }
 0x358   : > { %1581 = vxpose.xlu1.c.b16.start.end [1/1] (short) (narrow) %v1577_v32, 16  ;;  %v1004_v32 = vmul.f32 %v998_v48, %v2628_v8 }
 0x35a   : > { %v1014_v41 = vsel %vm875_vm6, %v1004_v32, 0.0 }
 0x365   : > { %1006 = vadd.xlane.f32.xlu1 %v1005_v52 }
 0x369   : > { %1012 = vadd.xlane.f32.xlu1 %v1011_v56 }
 0x36a   : > { %1641 = vxpose.xlu0.c.b16.start.end [1/1] (short) (narrow) %v1578_v39, 16 }
 0x377   : > { %1009 = vadd.xlane.f32.xlu0 %v1008_v49 }
 0x37b   : > { %1015 = vadd.xlane.f32.xlu0 %v1014_v41 }
 0x392   : > { %v1381_v24 = vpop.trf.xlu0 }
 0x393   : > { %2097 = vmatmul.mubr.msk.bf16.vlgmr.msra.gmra.mrb[16].mxu0 %vm630_vm5, %v1381_v24 }
 0x394   : > { %2108 = vmatprep.mubr.msk.bf16.mxu0 %vm2283_vm12, %v2282_v7 }
 0x3b8   : > { %v2752_v8 = vpop.xlane.xlu1 %1292 }
 0x3be   : > { %v2754_v47 = vpop.trf.xlu1 }
 0x3c6   : > { %v2756_v60 = vpop.xlane.xlu0 %1289 }
 0x3ca   : > { %v2758_v37 = vpop.xlane.xlu0 %1295 }
 0x3d0   : > { %v2760_v6 = vpop.trf.xlu0 }
 0x3df   : > { %v1366_v58 = vpop.f32.mrb[12].mxu1 }
 0x3e0   : > { %v2092_v57 = vpop.f32.mrb[13].mxu1 }
 0x3e1   : > { %v1369_v59 = vpop.f32.mrb[14].mxu1 }
 0x3e2   : > { %v1453_v61 = vpack.c.bf16 %v1369_v59, %v1366_v58  ;;  %v2093_v62 = vpop.f32.mrb[15].mxu1  ;;  %v1297_v59 = vmax.f32 %v2744_v51, 1e-09 }
 0x3e4   : > { %2101 = vmatpush3.bf16.msra.mxu1 %v1453_v61  ;;  %v1298_v61 = vmax.f32 %v2756_v60, 1e-09 }
 0x3e5   : > { %2112 = vmatprep.subr.bf16.mxu1 %v2282_v7 }
 0x3e7   : > { %2103 = vmatmul.mubr.msk.bf16.vlgmr.msra.gmra.mrb[16].mxu1 %vm630_vm5, %v1451_v25 }
 0x3e8   : > { %2114 = vmatprep.mubr.msk.bf16.mxu1 %vm2283_vm12, %v2282_v7 }
 0x3f2   : > { %v1007_v0 = vpop.xlane.xlu1 %1006 }
 0x3f3   : > { %v1971_v2 = vmul.f32 -1.442695, %v1007_v0  ;;  %v1995_v0 = vld [vmem:[%s2890_s8] ss:$0 sm:$0xff] }
 0x3f5   : > { %2193 = vpow2.f32 %v1971_v2 }
 0x3f6   : > { %v1013_v3 = vpop.xlane.xlu1 %1012 }
 0x3f7   : > { %v1973_v5 = vmul.f32 -1.442695, %v1013_v3 }
 0x3f9   : > { %2195 = vpow2.f32 %v1973_v5 }
 0x3ff   : > { %v2194_v53 = vpop.eup %2193 }
 0x400   : > { %v1029_v15 = vadd.f32 1.0, %v2194_v53 }
 0x403   : > { %v2196_v11 = vpop.eup %2195 }
 0x404   : > { %v1010_v63 = vpop.xlane.xlu0 %1009  ;;  %v1031_v19 = vadd.f32 1.0, %v2196_v11 }
 0x405   : > { %v1972_v33 = vmul.f32 -1.442695, %v1010_v63 }
 0x407   : > { %2197 = vpow2.f32 %v1972_v33 }
 0x408   : > { %v1016_v25 = vpop.xlane.xlu0 %1015 }
 0x409   : > { %v1974_v10 = vmul.f32 -1.442695, %v1016_v25 }
 0x40b   : > { %2199 = vpow2.f32 %v1974_v10 }
 0x40c   : > { %2201 = vrcp.f32 %v1029_v15 }
 0x40d   : > { %2203 = vrcp.f32 %v1031_v19  ;;  %v1299_v19 = vmax.f32 %v2752_v8, 1e-09 }
 0x411   : > { %v2198_v36 = vpop.eup %2197 }
 0x412   : > { %v1030_v20 = vadd.f32 1.0, %v2198_v36  ;;  %v1300_v36 = vmax.f32 %v2758_v37, 1e-09 }
 0x414   : > { %2205 = vrcp.f32 %v1030_v20 }
 0x415   : > { %v2200_v21 = vpop.eup %2199 }
 0x416   : > { %v1032_v28 = vadd.f32 1.0, %v2200_v21  ;;  %v2202_v13 = vpop.eup %2201 }
 0x417   : > { %v2204_v14 = vpop.eup %2203  ;;  %v1041_v34 = vmul.f32 %v2202_v13, %v2597_v50 }
 0x418   : > { %2207 = vrcp.f32 %v1032_v28  ;;  %v1043_v38 = vmul.f32 %v2204_v14, %v2624_v1 }
 0x419   : > { %v1045_v18 = vsel %vm875_vm6, %v1041_v34, 0.0  ;;  %2209 = vrcp.f32 %v1297_v59 }
 0x41a   : > { %v1054_v22 = vsel %vm875_vm6, %v1043_v38, 0.0  ;;  %2211 = vrcp.f32 %v1298_v61 }
 0x41b   : > { %2213 = vrcp.f32 %v1299_v19 }
 0x41c   : > { %2215 = vrcp.f32 %v1300_v36 }
 0x41e   : > { %v2206_v35 = vpop.eup %2205 }
 0x41f   : > { %v1042_v27 = vmul.f32 %v2206_v35, %v2604_v55 }
 0x421   : > { %v1046_v39 = vsel %vm875_vm6, %v1042_v27, 0.0 }
 0x422   : > { %v2208_v29 = vpop.eup %2207  ;;  %v1047_v9 = vadd.f32 %v1046_v39, %v1045_v18 }
 0x423   : > { %v1044_v40 = vmul.f32 %v2208_v29, %v2636_v17  ;;  %v2210_v62 = vpop.eup %2209 }
 0x424   : > { %v1048_v45 = vrot.slane %v1047_v9, 4  ;;  %v2212_v4 = vpop.eup %2211 }
 0x425   : > { %v1055_v26 = vsel %vm875_vm6, %v1044_v40, 0.0  ;;  %v2214_v20 = vpop.eup %2213 }
 0x426   : > { %v1049_v50 = vadd.f32 %v1048_v45, %v1047_v9  ;;  %v1056_v16 = vadd.f32 %v1055_v26, %v1054_v22  ;;  %v2216_v14 = vpop.eup %2215  ;;  %v1998_v9 = vld [vmem:[%s2891_s9] ss:$0 sm:$0xff] }
 0x428   : > { %v1050_v46 = vrot.slane %v1049_v50, 2  ;;  %v1057_v55 = vrot.slane %v1056_v16, 4 }
 0x42a   : > { %v1051_v48 = vadd.f32 %v1050_v46, %v1049_v50  ;;  %v1058_v52 = vadd.f32 %v1057_v55, %v1056_v16 }
 0x42c   : > { %v1052_v54 = vrot.slane %v1051_v48, 1  ;;  %v1059_v1 = vrot.slane %v1058_v52, 2 }
 0x42e   : > { %v1053_v56 = vadd.f32 %v1052_v54, %v1051_v48  ;;  %v1060_v17 = vadd.f32 %v1059_v1, %v1058_v52 }
 0x430   : > { %1064 = vst.msk [vmem:[%s539_s22] sm:$0x1] %vm1063_vm14, %v1053_v56  ;;  %v1061_v23 = vrot.slane %v1060_v17, 1 }
 0x432   : > { %v1062_v49 = vadd.f32 %v1061_v23, %v1060_v17 }
 0x434   : > { %1065 = vst.msk [vmem:[%s539_s22 + $0x1] sm:$0x1] %vm1063_vm14, %v1062_v49  ;;  %s2217_s22 = scalar_lea.vmem %s2827_s24, 512 }
 0x435   : > { %p2218_p11 = scmp.ne.s32.totalorder %s2827_s24, %s2217_s22 }
 0x437   : > { %p2219_p12 = pnand %p2218_p11, %p2397_p5 }
 0x439   : > { %p2220_p13 = pneg %p2219_p12 }
 0x466   : > { %v1426_v32 = vpop.f32.mrb[16].mxu0 }
 0x467   : > { %v2098_v41 = vpop.f32.mrb[17].mxu0 }
 0x468   : > { %v1429_v24 = vpop.f32.mrb[18].mxu0 }
 0x469   : > { %v1454_v58 = vpack.c.bf16 %v1429_v24, %v1426_v32  ;;  %v2099_v57 = vpop.f32.mrb[19].mxu0 }
 0x46b   : > { %2107 = vmatpush3.bf16.msra.mxu0 %v1454_v58 }
 0x46c   : > { %2118 = vmatprep.subr.bf16.mxu0 %v2282_v7 }
 0x46e   : > { %2109 = vmatmul.mubr.msk.bf16.vlgmr.msra.gmra.mrb[20].mxu0 %vm630_vm5, %v1452_v44 }
 0x46f   : > { %2120 = vmatprep.mubr.msk.bf16.mxu0 %vm2283_vm12, %v2282_v7 }
 0x4ba   : > { %v1492_v2 = vpop.f32.mrb[16].mxu1 }
 0x4bb   : > { %v1543_v3 = vmul.f32 %v2210_v62, %v1492_v2  ;;  %v2104_v5 = vpop.f32.mrb[17].mxu1 }
 0x4bc   : > { %v1495_v12 = vpop.f32.mrb[18].mxu1 }
 0x4bd   : > { %v1553_v44 = vadd.f32 %v1995_v0, %v1543_v3  ;;  %v1544_v63 = vmul.f32 %v2212_v4, %v1495_v12  ;;  %v2105_v33 = vpop.f32.mrb[19].mxu1 }
 0x4bf   : > { %vm1557_vm12 = vcmp.gt.f32.partialorder %v1553_v44, 0.0  ;;  %v1561_v7 = vmul.f32 0.2, %v1553_v44  ;;  %v1554_v51 = vadd.f32 %v1995_v0, %v1544_v63 }
 0x4c1   : > { %v1565_v25 = vsel %vm1557_vm12, %v1553_v44, %v1561_v7  ;;  %vm1558_vm15 = vcmp.gt.f32.partialorder %v1554_v51, 0.0  ;;  %v1562_v60 = vmul.f32 0.2, %v1554_v51 }
 0x4c2   : > { %v1569_v10 = vmul.f32 %v1565_v25, %v2463_v31 }
 0x4c3   : > { %v1566_v53 = vsel %vm1558_vm15, %v1554_v51, %v1562_v60 }
 0x4c4   : > { %v1570_v11 = vmul.f32 %v1566_v53, %v2480_v43 }
 0x4c6   : > { %v1579_v15 = vpack.c.bf16 %v1570_v11, %v1569_v10 }
 0x4c8   : > { %2113 = vmatpush3.bf16.msra.mxu1 %v1579_v15 }
 0x4cb   : > { %2115 = vmatmul.mubr.msk.bf16.vlgmr.msra.gmra.mrb[20].mxu1 %vm630_vm5, %v2754_v47 }
 0x541   : > { %v1536_v21 = vpop.f32.mrb[20].mxu0 }
 0x542   : > { %v1545_v28 = vmul.f32 %v2214_v20, %v1536_v21  ;;  %v2110_v13 = vpop.f32.mrb[21].mxu0 }
 0x543   : > { %v1539_v34 = vpop.f32.mrb[22].mxu0 }
 0x544   : > { %v1555_v31 = vadd.f32 %v1995_v0, %v1545_v28  ;;  %v1546_v43 = vmul.f32 %v2216_v14, %v1539_v34  ;;  %v2111_v35 = vpop.f32.mrb[23].mxu0 }
 0x546   : > { %vm1559_vm0 = vcmp.gt.f32.partialorder %v1555_v31, 0.0  ;;  %v1563_v27 = vmul.f32 0.2, %v1555_v31  ;;  %v1556_v47 = vadd.f32 %v1995_v0, %v1546_v43 }
 0x548   : > { %v1567_v18 = vsel %vm1559_vm0, %v1555_v31, %v1563_v27  ;;  %vm1560_vm2 = vcmp.gt.f32.partialorder %v1556_v47, 0.0  ;;  %v1564_v8 = vmul.f32 0.2, %v1556_v47 }
 0x549   : > { %v1571_v38 = vmul.f32 %v1567_v18, %v2461_v30 }
 0x54a   : > { %v1568_v37 = vsel %vm1560_vm2, %v1556_v47, %v1564_v8 }
 0x54b   : > { %v1572_v39 = vmul.f32 %v1568_v37, %v2478_v42 }
 0x54d   : > { %v1580_v29 = vpack.c.bf16 %v1572_v39, %v1571_v38 }
 0x54f   : > { %2119 = vmatpush3.bf16.msra.mxu0 %v1580_v29 }
 0x552   : > { %2121 = vmatmul.mubr.msk.bf16.vlgmr.msra.gmra.mrb[24].mxu0 %vm630_vm5, %v2760_v6 }
 0x59e   : > { %v1634_v40 = vpop.f32.mrb[20].mxu1 }
 0x59f   : > { %1723 = vst.msk [vmem:[%s2802_s0] sm:$0xff] %vm875_vm6, %v1634_v40  ;;  %v2116_v30 = vpop.f32.mrb[21].mxu1  ;;  %v1707_v45 = vmul.f32 %v1998_v9, %v1634_v40 }
 0x5a0   : > { %v1637_v42 = vpop.f32.mrb[22].mxu1 }
 0x5a1   : > { %v1708_v6 = vmul.f32 %v1998_v9, %v1637_v42  ;;  %1724 = vst.msk [vmem:[%s2802_s0 + $0x8] sm:$0xff] %vm875_vm6, %v1637_v42  ;;  %v2117_v22 = vpop.f32.mrb[23].mxu1  ;;  %v1711_v26 = vsel %vm875_vm6, %v1707_v45, 0.0 }
 0x5a2   : > { %1712 = vadd.xlane.f32.xlu1 %v1711_v26 }
 0x5a3   : > { %v1714_v50 = vsel %vm875_vm6, %v1708_v6, 0.0 }
 0x5a4   : > { %1715 = vadd.xlane.f32.xlu0 %v1714_v50 }
 0x625   : > { %v1694_v16 = vpop.f32.mrb[24].mxu0 }
 0x626   : > { %v1709_v46 = vmul.f32 %v1998_v9, %v1694_v16  ;;  %1725 = vst.msk [vmem:[%s2802_s0 + $0x10] sm:$0xff] %vm875_vm6, %v1694_v16  ;;  %v2122_v55 = vpop.f32.mrb[25].mxu0 }
 0x627   : > { %v1697_v48 = vpop.f32.mrb[26].mxu0 }
 0x628   : > { %v1710_v52 = vmul.f32 %v1998_v9, %v1697_v48  ;;  %1726 = vst.msk [vmem:[%s2802_s0 + $0x18] sm:$0xff] %vm875_vm6, %v1697_v48  ;;  %v2123_v54 = vpop.f32.mrb[27].mxu0  ;;  %v1717_v1 = vsel %vm875_vm6, %v1709_v46, 0.0  ;;  %s2286_s0 = smov [#allocation2]  }
 0x629   : > { %1718 = vadd.xlane.f32.xlu1 %v1717_v1  ;;  %s2221_s2 = sshll.u32 %s2286_s0, 4  ;;  %s2222_s2 = int_to_ptr.vmem [resolvable:$false] %s2221_s2 }
 0x62a   : > { %v1720_v56 = vsel %vm875_vm6, %v1710_v52, 0.0  ;;  %s2223_s3 = scalar_lea.vmem %s2222_s2, 1024  ;;  %p2224_p0 = scmp.lt.s32.totalorder %s2827_s24, %s2222_s2 }
 0x62b   : > { %1721 = vadd.xlane.f32.xlu0 %v1720_v56  ;;  %p2225_p1 = scmp.lt.s32.totalorder %s2223_s3, %s2217_s22 }
 0x62d   : > { %p2226_p2 = por %p2225_p1, %p2224_p0 }
 0x62f   : > { %v1713_v17 = vpop.xlane.xlu1 %1712  ;;  %p2227_p3 = pnand %p2226_p2, %p2220_p13 }
 0x630   : > { %1727 = vst.msk [vmem:[%s2820_s20] sm:$0xff] %vm854_vm1, %v1713_v17 }
 0x631   : > { %v1716_v23 = vpop.xlane.xlu0 %1715 }
 0x632   : > { %1728 = vst.msk [vmem:[%s2820_s20 + $0x8] sm:$0xff] %vm854_vm1, %v1716_v23 }
 0x633   : > { %2230 = shalt.err (!%p2227_p3)
}
 0x634   : > { %s2231_s29 = scalar_lea.hbm %s2833_s23, 512  ;;  %s2235_s16 = scalar_lea.hbm %s2894_s12, 1024 }
 0x635   : > { %p2232_p4 = scmp.ne.s32.totalorder %s2833_s23, %s2231_s29  ;;  %p2236_p9 = scmp.lt.u32.totalorder %s2833_s23, %s2894_s12 }
 0x636   : > { %p2237_p10 = scmp.lt.u32.totalorder %s2235_s16, %s2231_s29  ;;  %p2239_p12 = scmp.lt.u32.totalorder %s2231_s29, %s2833_s23 }
 0x637   : > { %p2233_p7 = pnand %p2232_p4, %p2397_p5 }
 0x638   : > { %p2238_p11 = por %p2237_p10, %p2236_p9 }
 0x639   : > { %p2234_p8 = pneg %p2233_p7 }
 0x63a   : > { %p2240_p13 = por %p2239_p12, %p2238_p11 }
 0x63c   : > { %p2241_p0 = pnand %p2240_p13, %p2234_p8 }
 0x63e   : > { %2244 = shalt.err (!%p2241_p0)
}
 0x63f   : > { %s2287_s3 = smov 128   ;;  %s2288_s22 = smov 8  }
 0x640   : > { %2125 = dma.vmem_to_hbm [thread:$0]  (%p2397_p5), %s2827_s24, 512, %s2833_s23, %s2837_s1, %s2287_s3, %s2287_s3, %s2288_s22  }
 0x6b6   : > { %v1719_v49 = vpop.xlane.xlu1 %1718 }
 0x6b7   : > { %1729 = vst.msk [vmem:[%s2820_s20 + $0x10] sm:$0xff] %vm854_vm1, %v1719_v49 }
 0x6b8   : > { %v1722_v32 = vpop.xlane.xlu0 %1721 }
 0x6b9   : > { %1730 = vst.msk [vmem:[%s2820_s20 + $0x18] sm:$0xff] %vm854_vm1, %v1722_v32 }
 0x6ba PF: > { %p2131_p1 = scmp.ge.s32.totalorder %s2279_s28, 2  ;;  %s1805_s0 = sand.u32 1, %s2267_s25  }
 0x6bb   : > { %s1806_s29 = scalar_lea.sflag [#allocation3], %s1805_s0 }
 0x6bc   : > { %p2128_p2 = pnand %p2131_p1, %p2401_p6 }
 0x6be   : > { %2262 = dma.done.wait (!%p2128_p2), %s1806_s29, 512  }
 0x6bf   : > { %2264 = vsyncadd (!%p2128_p2), %s1806_s29, 4294966784  ;;  %p24_p5 = scmp.ge.s32.totalorder %s2384_s14, 4   ;;  %s2910_s25 = smov %s2271_s26 }
 0x6c0   : > { %s2911_s26 = smov %s2275_s27  ;;  %s2912_s27 = smov %s2395_s17 }
 0x6c1   : > { %s2913_s28 = smov %s2384_s14  ;;  %26 = sbr.rel (!%p24_p5) target bundleno = 8 (0x8), region = 140 }
 0x6c8   :  { %1820 = vsyncpa [#allocation3], 1 }
 0x6c9   :  { %1822 = vsyncpa [#allocation3 + $0x1], 1 }

// kernel: model_forward.9
= control target key start
LH: loop header
LB: loop body
LE: loop exit
PB: predicated region body
PF: predicated region fallthrough
CT: control target
= control target key end

     0   :  { %15 = vsyncpa [#allocation3], 0  ;;  %s2635_s0 = inlined_call_operand.vmem [shape: f32[4,13,32], index: 0, kind: input, shape index: {}]   ;;  %s2636_s1 = inlined_call_operand.vmem [shape: f32[4,16,13], index: 1, kind: input, shape index: {}]   ;;  %s2637_s2 = inlined_call_operand.vmem [shape: f32[4,13,1], index: 2, kind: input, shape index: {}]   ;;  %s2638_s3 = inlined_call_operand.vmem [shape: f32[4,1,13], index: 3, kind: input, shape index: {}]   ;;  %s2639_s4 = inlined_call_operand.vmem [shape: f32[32,32], index: 4, kind: input, shape index: {}]   ;;  %s2640_s5 = inlined_call_operand.vmem [shape: f32[1,32], index: 5, kind: input, shape index: {}]   ;;  %s2641_s6 = inlined_call_operand.vmem [shape: f32[1,32], index: 6, kind: input, shape index: {}]   ;;  %s2642_s7 = inlined_call_operand.vmem [shape: f32[4,13,13], index: 7, kind: output, shape index: {0}]   ;;  %s2643_s8 = inlined_call_operand.hbm [shape: f32[4,13,32], index: 8, kind: output, shape index: {1}]   ;;  %s2644_s9 = inlined_call_operand.vmem [shape: f32[4,13,1], index: 9, kind: output, shape index: {2}]  }
   0x1   :  { %17 = vsyncpa [#allocation3 + $0x1], 0  ;;  %s2263_s30 = smov 0   ;;  %s2265_s10 = smov 0  }
   0x2   :  { %s2267_s11 = smov 0   ;;  %s2269_s12 = smov 0  }
   0x3 LB: > { %s2284_s13 = sadd.s32 4294967295, %s2203_s12   ;;  %s1946_s14 = sadd.s32 4294967294, %s2203_s12   ;;  %s2203_s12 = sphi %s2269_s12, %s2650_s12   ;;  %s2199_s11 = sphi %s2267_s11, %s2649_s11   ;;  %s2195_s10 = sphi %s2265_s10, %s2648_s10   ;;  %s2191_s30 = sphi %s2263_s30, %s2647_s30  }
   0x4   : > { %s2288_s15 = sadd.s32 1, %s2203_s12   ;;  %s223_s16 = sadd.s32 1, %s2199_s11 }
   0x5   : > { %s220_s17 = ssub.s32 %s2203_s12, %s2288_s15  ;;  %p233_p0 = scmp.ne.s32.totalorder %s2199_s11, %s2195_s10 }
   0x6   : > { %p221_p1 = scmp.eq.s32.totalorder %s220_s17, 0  ;;  %p234_p2 = scmp.eq.s32.totalorder %s2284_s13, 1 }
   0x7   : > { %p239_p3 = scmp.ne.s32.totalorder %s2195_s10, %s2191_s30  ;;  %p240_p4 = scmp.eq.s32.totalorder %s1946_s14, 1 }
   0x8   : > { %s2299_s18 = scalar_select %p221_p1, %s2199_s11, %s223_s16  }
   0x9   : > { %p2301_p5 = por %p234_p2, %p233_p0  ;;  %p2305_p6 = por %p240_p4, %p239_p3 }
   0xa   : > { %p1949_p7 = scmp.ge.s32.totalorder %s2203_s12, 1  ;;  %p331_p8 = scmp.lt.s32.totalorder %s2203_s12, 3 }
   0xc   : > { %p332_p9 = pnand %p1949_p7, %p331_p8 }
   0xd   : > { %s1951_s21 = sshll.u32 (!%p332_p9), %s2284_s13, 1  ;;  %v2205_v0 = vmov (!%p332_p9), 0.0   ;;  %vm2206_vm0 = vmmov (!%p332_p9), 0   ;;  %v2207_v1 = vmov (!%p332_p9), 0   ;;  %v621_v2 = vld [vmem:[%s2639_s4] sm:$0xff] (!%p332_p9)  ;;  %v622_v3 = vld [vmem:[%s2639_s4 + $0x8] sm:$0xff] (!%p332_p9)  ;;  %v597_v15 = vlaneseq (!%p332_p9) }
   0xe   : > { %335 = sbr.rel (%p332_p9) target bundleno = 1267 (0x4f3), region = 48  ;;  %p397_p10 = scmp.lt.s32.totalorder (!%p332_p9), %s1951_s21, 3  ;;  %2025 = vmatprep.subr.bf16.mxu0 (!%p332_p9), %v2205_v0  ;;  %2027 = vmatprep.mubr.msk.bf16.mxu0 (!%p332_p9), %vm2206_vm0, %v2205_v0  ;;  %v2333_v7 = vpack.c.bf16 (!%p332_p9), %v622_v3, %v621_v2  ;;  %v2208_v16 = vmov (!%p332_p9), 1966171168   ;;  %vm470_vm1 = vcmask (!%p332_p9), 130048   ;;  %vm856_vm2 = vcmask (!%p332_p9), 261120  }
   0xf   : > { %2031 = vmatprep.subr.bf16.mxu1 (!%p332_p9), %v2205_v0  ;;  %2033 = vmatprep.mubr.msk.bf16.mxu1 (!%p332_p9), %vm2206_vm0, %v2205_v0  ;;  %v635_v17 = vunpack.c.l.s4 (!%p332_p9), %v2208_v16  ;;  %v2345_v18 = vshrl.u32 (!%p332_p9), %v597_v15, 7  ;;  %v623_v16 = vld [vmem:[%s2639_s4 + $0x10] sm:$0xff] (!%p332_p9)  ;;  %vm615_vm3 = vcmask (!%p332_p9), 105472   ;;  %vm617_vm4 = vcmask (!%p332_p9), 102400   ;;  %s385_s27 = sand.u32 (!%p332_p9), 1, %s2195_s10  }
  0x10   : > { %2127 = vset.pattern.permute.xlu1 (!%p332_p9), %v2207_v1  ;;  %vm1340_vm5 = vcmask (!%p332_p9), 1045504   ;;  %vm1341_vm6 = vcmask (!%p332_p9), 1046528   ;;  %s1950_s28 = sshll.u32 (!%p332_p9), %s385_s27, 5  ;;  %vm1744_vm11 = vcmask (!%p332_p9), 258048   ;;  %s2590_s25 = scalar_lea.sflag (!%p332_p9), [#allocation3], %s385_s27 }
  0x11   : > { %v636_v19 = vunpack.c.0.s8 (!%p332_p9), %v635_v17  ;;  %v624_v17 = vld [vmem:[%s2639_s4 + $0x18] sm:$0xff] (!%p332_p9)  ;;  %s387_s16 = scalar_lea.vmem (!%p332_p9), [#allocation2], %s1950_s28 }
  0x13   : > { %v2348_v24 = vsub.s32 (!%p332_p9), %v636_v19, %v2345_v18 }
  0x15   : > { %s2652_s21 = smov (!%p397_p10, %s1951_s21), 3 }
  0x16   : > { %s2327_s26 = sshll.u32 %s2652_s21, 4 }
  0x17   : > { %s408_s29 = scalar_lea.vmem %s2636_s1, %s2327_s26  ;;  %s415_s17 = scalar_lea.vmem %s2637_s2, %s2327_s26 }
  0x18   : > { %v442_v4 = vld [vmem:[%s408_s29] sm:$0xff]  ;;  %v443_v5 = vld [vmem:[%s408_s29 + $0x8] sm:$0xff]  ;;  %v444_v6 = vld [vmem:[%s408_s29 + $0x10] sm:$0xff]  ;;  %s401_s24 = scalar_lea.vmem %s2635_s0, %s2327_s26  ;;  %s2415_s23 = scalar_lea.vmem %s2642_s7, %s2327_s26 }
  0x19   : > { %v452_v8 = vpack.c.bf16 %v443_v5, %v442_v4  ;;  %v445_v9 = vld [vmem:[%s408_s29 + $0x18] sm:$0xff]  ;;  %v446_v11 = vld [vmem:[%s415_s17] sm:$0xff]  ;;  %v447_v12 = vld [vmem:[%s415_s17 + $0x8] sm:$0x1f]  ;;  %s2210_s29 = smov [#allocation2]  }
  0x1a   : > { %v453_v10 = vpack.c.bf16 %v445_v9, %v444_v6  ;;  %577 = vperm.xlu1 %2127, %v446_v11   ;;  %v449_v13 = vld [vmem:[%s415_s17 + $0x18] sm:$0x1f]  ;;  %v448_v14 = vld [vmem:[%s415_s17 + $0x10] sm:$0xff]  ;;  %v439_v22 = vld [vmem:[%s401_s24 + $0x8] sm:$0x1f]  ;;  %s420_s17 = scalar_lea.vmem %s2638_s3, %s2652_s21  ;;  %s2004_s21 = sshll.u32 %s2284_s13, 9 }
  0x1b   : > { %454 = vxpose.xlu0.c.b16.start.end [1/1] (short) (narrow) %v452_v8, 16  ;;  %2026 = vmatpush3.bf16.msra.mxu0 %v452_v8  ;;  %v440_v20 = vld [vmem:[%s401_s24 + $0x10] sm:$0xff]  ;;  %v441_v21 = vld [vmem:[%s401_s24 + $0x18] sm:$0x1f]  ;;  %v1969_v25 = vpack.c.bf16 %v439_v22, %v439_v22  ;;  %v438_v26 = vld [vmem:[%s401_s24] sm:$0xff]  ;;  %s2586_s24 = scalar_lea.hbm %s2643_s8, %s2004_s21  ;;  %s2145_s14 = sshll.u32 %s2210_s29, 4  ;;  %s2146_s14 = int_to_ptr.vmem [resolvable:$false] %s2145_s14 }
  0x1c   : > { %2032 = vmatpush3.bf16.msra.mxu1 %v453_v10  ;;  %2037 = vmatprep.subr.bf16.mxu0 %v2333_v7  ;;  %v628_v23 = vpack.c.bf16 %v441_v21, %v440_v20  ;;  %v627_v28 = vpack.c.bf16 %v439_v22, %v438_v26  ;;  %v1970_v30 = vpack.c.bf16 %v441_v21, %v441_v21 }
  0x1d   : > { %2045 = vmatprep.subr.bf16.mxu1 %v2205_v0  ;;  %v647_v29 = vrot.slane %v1969_v25, %v2348_v24  ;;  %v630_v22 = vpack.c.bf16 %v624_v17, %v623_v16 }
  0x1e   : > { %582 = vperm.xlu1 %2127, %v447_v12   ;;  %v688_v27 = vrot.slane %v628_v23, %v2348_v24  ;;  %v640_v32 = vrot.slane %v627_v28, %v2348_v24  ;;  %v695_v35 = vrot.slane %v1970_v30, %v2348_v24  ;;  %v2396_v30 = vld [vmem:[%s420_s17] sm:$0x1] }
  0x1f   : > { %515 = vxpose.xlu0.c.b16.start.end [1/1] (short) (narrow) %v453_v10, 16  ;;  %v663_v33 = vrot.slane %v647_v29, %v2348_v24  ;;  %v649_v38 = vcombine.high %v647_v29, %v647_v29  ;;  %v2394_v29 = vsub.s32 0, %v2345_v18 }
  0x20   : > { %v696_v31 = vcombine.high %v688_v27, %v688_v27  ;;  %v704_v34 = vrot.slane %v688_v27, %v2348_v24  ;;  %v648_v37 = vcombine.high %v640_v32, %v640_v32  ;;  %v697_v41 = vcombine.high %v695_v35, %v695_v35 }
  0x21   : > { %v679_v39 = vcombine.high %v663_v33, %v663_v33  ;;  %v656_v42 = vrot.slane %v640_v32, %v2348_v24  ;;  %v711_v43 = vrot.slane %v695_v35, %v2348_v24  ;;  %v677_v47 = vrot.slane %v649_v38, %v2348_v24 }
  0x22   : > { %592 = vperm.xlu1 %2127, %v449_v13   ;;  %v718_v36 = vrot.slane %v696_v31, %v2348_v24  ;;  %v743_v40 = vunpack.i.h.s16 %v704_v34  ;;  %v726_v44 = vcombine.high %v704_v34, %v704_v34  ;;  %v670_v46 = vrot.slane %v648_v37, %v2348_v24 }
  0x23   : > { %v1971_v48 = vpack.i.b16 %v704_v34, %v679_v39  ;;  %v725_v50 = vrot.slane %v697_v41, %v2348_v24  ;;  %v751_v54 = vunpack.i.h.s16 %v711_v43  ;;  %v770_v57 = vcombine.low %v663_v33, %v677_v47  ;;  %v2402_v33 = vld [vmem:[%s420_s17 + $0x1] sm:$0x1]  ;;  %s1795_s17 = sshll.u32 %s387_s16, 4  ;;  %s2580_s17 = int_to_ptr.vmem [resolvable:$true] %s1795_s17 }
  0x24   : > { %v728_v45 = vcombine.high %v718_v36, %v718_v36  ;;  %v1972_v49 = vpack.i.b16 %v718_v36, %v743_v40  ;;  %v745_v51 = vunpack.i.h.s16 %v718_v36  ;;  %v747_v52 = vunpack.i.h.s16 %v726_v44  ;;  %s2141_s28 = scalar_lea.vmem %s2580_s17, 512  ;;  %p2148_p0 = scmp.lt.s32.totalorder %s2580_s17, %s2146_s14 }
  0x25   : > { %v768_v55 = vcombine.low %v656_v42, %v670_v46  ;;  %v1978_v56 = vcombine.high %v656_v42, %v670_v46  ;;  %v1976_v62 = vpack.i.b16 %v725_v50, %v751_v54  ;;  %v792_v2 = vrot.slane %v770_v57, %v2348_v24  ;;  %p2142_p11 = scmp.ne.s32.totalorder %s2580_s17, %s2141_s28 }
  0x26   : > { %v749_v53 = vunpack.i.h.s16 %v728_v45  ;;  %v771_v58 = vcombine.low %v1971_v48, %v1972_v49  ;;  %v1973_v59 = vpack.i.b16 %v726_v44, %v745_v51  ;;  %v1974_v60 = vpack.i.b16 %v728_v45, %v747_v52 }
  0x27   : > { %v778_v63 = vrot.slane %v768_v55, %v2348_v24  ;;  %v727_v4 = vcombine.high %v711_v43, %v711_v43  ;;  %v753_v5 = vunpack.i.h.s16 %v725_v50  ;;  %v600_v31 = vrot.slane %v2396_v30, %v2394_v29  ;;  %p2143_p12 = pnand %p2142_p11, %p2301_p5 }
  0x28   : > { %2128 = vset.pattern.permute.xlu0 %v2207_v1  ;;  %v1975_v61 = vpack.i.b16 %v711_v43, %v749_v53  ;;  %v785_v1 = vrot.slane %v1978_v56, %v2348_v24  ;;  %v799_v3 = vrot.slane %v771_v58, %v2348_v24  ;;  %v817_v6 = vcombine.low %v1973_v59, %v1974_v60 }
  0x29   : > { %587 = vperm.xlu0 %2128, %v448_v14   ;;  %v1977_v11 = vpack.i.b16 %v727_v4, %v753_v5  ;;  %v2409_v36 = vrot.slane %v2402_v33, %v2394_v29  ;;  %p2144_p13 = pneg %p2143_p12 }
  0x2a   : > { %v818_v8 = vcombine.low %v1975_v61, %v1976_v62  ;;  %v800_v9 = vcombine.low %v778_v63, %v785_v1  ;;  %v801_v10 = vcombine.low %v792_v2, %v799_v3  ;;  %v825_v12 = vrot.slane %v817_v6, %v2348_v24 }
  0x2b   : > { %v839_v19 = vrot.slane %v1977_v11, %v2348_v24 }
  0x2c   : > { %v832_v13 = vrot.slane %v818_v8, %v2348_v24  ;;  %v808_v14 = vrot.slane %v800_v9, %v2348_v24  ;;  %v815_v15 = vrot.slane %v801_v10, %v2348_v24 }
  0x2d   : > { %v854_v26 = vrot.slane %v839_v19, %v2348_v24 }
  0x2e   : > { %v840_v20 = vcombine.low %v825_v12, %v832_v13  ;;  %v816_v21 = vcombine.low %v808_v14, %v815_v15 }
  0x30   : > { %v847_v25 = vrot.slane %v840_v20, %v2348_v24 }
  0x32   : > { %v855_v28 = vcombine.low %v847_v25, %v854_v26 }
  0x81   : > { %v462_v23 = vpop.trf.xlu0 }
  0x82   : > { %2028 = vmatmul.mubr.msk.bf16.vlgmr.msra.gmra.mrb[0].mxu0 %vm470_vm1, %v462_v23 }
  0x83   : > { %2038 = vmatpush3.bf16.msra.mxu0 %v2333_v7  ;;  %2041 = vmatprep.mubr.msk.bf16.mxu0 %vm856_vm2, %v816_v21 }
  0x84   : > { %2039 = vmatprep.subr.bf16.mxu0 %v630_v22 }
  0x85   : > { %v523_v27 = vpop.trf.xlu0 }
  0x86   : > { %2034 = vmatmul.mubr.msk.bf16.vlgmr.msra.gmra.mrb[0].mxu1 %vm470_vm1, %v523_v27 }
  0x87   : > { %2040 = vmatpush3.bf16.msra.mxu0 %v630_v22  ;;  %2047 = vmatprep.mubr.msk.bf16.mxu1 %vm2206_vm0, %v2205_v0 }
  0x88   : > { %2051 = vmatprep.subr.bf16.mxu0 %v2205_v0 }
  0x8a   : > { %2042 = vmatmul.mubr.msk.bf16.vlgmr.msra.gmra.mrb[4].mxu0 %vm856_vm2, %v855_v28 }
  0x8b   : > { %2053 = vmatprep.mubr.msk.bf16.mxu0 %vm2206_vm0, %v2205_v0 }
  0x99   : > { %v2391_v7 = vpop.permute.xlu1 %577 }
  0x9a   : > { %v607_v35 = vmul.f32 %v600_v31, %v2391_v7 }
  0x9d   : > { %v2400_v32 = vpop.permute.xlu1 %582 }
  0x9e   : > { %v608_v37 = vmul.f32 %v600_v31, %v2400_v32 }
  0xa1   : > { %v2418_v38 = vpop.permute.xlu1 %592 }
  0xa2   : > { %v610_v45 = vmul.f32 %v2409_v36, %v2418_v38 }
  0xa8   : > { %v2404_v34 = vpop.permute.xlu0 %587 }
  0xa9   : > { %v609_v41 = vmul.f32 %v2409_v36, %v2404_v34 }
 0x155   : > { %v508_v18 = vpop.f32.mrb[0].mxu0 }
 0x156   : > { %v2420_v39 = vmul.f32 %v607_v35, %v508_v18  ;;  %v2029_v40 = vpop.f32.mrb[1].mxu0 }
 0x157   : > { %v511_v42 = vpop.f32.mrb[2].mxu0 }
 0x158   : > { %616 = vst.msk [vmem:[%s2415_s23] sm:$0xff] %vm615_vm3, %v2420_v39  ;;  %v2427_v43 = vmul.f32 %v608_v37, %v511_v42  ;;  %v2030_v44 = vpop.f32.mrb[3].mxu0  ;;  %v1085_v47 = vsel %vm615_vm3, %v2420_v39, 0.0  ;;  %v1109_v56 = vmul.f32 %v2420_v39, %v600_v31 }
 0x159   : > { %v568_v46 = vpop.f32.mrb[0].mxu1 }
 0x15a   : > { %v2433_v48 = vmul.f32 %v609_v41, %v568_v46  ;;  %v2035_v49 = vpop.f32.mrb[1].mxu1  ;;  %v1137_v50 = vpack.c.bf16 %v2427_v43, %v2420_v39  ;;  %618 = vst.msk [vmem:[%s2415_s23 + $0x8] sm:$0x1f] %vm617_vm4, %v2427_v43  ;;  %v1086_v51 = vsel %vm617_vm4, %v2427_v43, 0.0  ;;  %v1110_v62 = vmul.f32 %v2427_v43, %v600_v31 }
 0x15b   : > { %v571_v52 = vpop.f32.mrb[2].mxu1  ;;  %v1087_v53 = vadd.f32 %v1086_v51, %v1085_v47  ;;  %v1113_v6 = vsel %vm615_vm3, %v1109_v56, 0.0 }
 0x15c   : > { %619 = vst.msk [vmem:[%s2415_s23 + $0x10] sm:$0xff] %vm615_vm3, %v2433_v48  ;;  %v2445_v54 = vmul.f32 %v610_v45, %v571_v52  ;;  %v2036_v55 = vpop.f32.mrb[3].mxu1  ;;  %1321 = vxpose.xlu1.c.b16.start.end [1/1] (short) (narrow) %v1137_v50, 16  ;;  %v1094_v59 = vsel %vm615_vm3, %v2433_v48, 0.0  ;;  %v1116_v15 = vsel %vm617_vm4, %v1110_v62, 0.0  ;;  %v1111_v25 = vmul.f32 %v2433_v48, %v2409_v36 }
 0x15d   : > { %v1088_v57 = vrot.slane %v1087_v53, 4  ;;  %v2043_v58 = vpop.f32.mrb[4].mxu0 }
 0x15e   : > { %v1138_v60 = vpack.c.bf16 %v2445_v54, %v2433_v48  ;;  %v1095_v61 = vsel %vm617_vm4, %v2445_v54, 0.0  ;;  %620 = vst.msk [vmem:[%s2415_s23 + $0x18] sm:$0x1f] %vm617_vm4, %v2445_v54  ;;  %v897_v63 = vpop.f32.mrb[5].mxu0  ;;  %v1014_v3 = vcombine.high %v2043_v58, %v2043_v58  ;;  %v1021_v4 = vrot.slane %v2043_v58, %v2348_v24 }
 0x15f   : > { %v1096_v1 = vadd.f32 %v1095_v61, %v1094_v59  ;;  %v1089_v2 = vadd.f32 %v1088_v57, %v1087_v53  ;;  %v2044_v5 = vpop.f32.mrb[6].mxu0  ;;  %v916_v8 = vcombine.high %v897_v63, %v897_v63  ;;  %v923_v9 = vrot.slane %v897_v63, %v2348_v24 }
 0x160   : > { %1388 = vxpose.xlu0.c.b16.start.end [1/1] (short) (narrow) %v1138_v60, 16  ;;  %v2461_v10 = vpop.f32.mrb[7].mxu0  ;;  %v1028_v13 = vrot.slane %v1014_v3, %v2348_v24  ;;  %v1029_v14 = vcombine.high %v1021_v4, %v1021_v4  ;;  %v2466_v16 = vrot.slane %v1021_v4, %v2348_v24  ;;  %v1112_v18 = vmul.f32 %v2445_v54, %v2409_v36 }
 0x161   : > { %v1097_v11 = vrot.slane %v1096_v1, 4  ;;  %v1090_v12 = vrot.slane %v1089_v2, 2  ;;  %v930_v17 = vrot.slane %v916_v8, %v2348_v24  ;;  %v931_v19 = vcombine.high %v923_v9, %v923_v9 }
 0x162   : > { %v1030_v22 = vcombine.high %v1028_v13, %v1028_v13  ;;  %v1044_v23 = vrot.slane %v1028_v13, %v2348_v24  ;;  %v1051_v26 = vrot.slane %v1029_v14, %v2348_v24  ;;  %v939_v28 = vrot.slane %v923_v9, %v2348_v24 }
 0x163   : > { %v1098_v20 = vadd.f32 %v1097_v11, %v1096_v1  ;;  %v1091_v21 = vadd.f32 %v1090_v12, %v1089_v2  ;;  %v932_v27 = vcombine.high %v930_v17, %v930_v17  ;;  %v946_v37 = vrot.slane %v930_v17, %v2348_v24 }
 0x164   : > { %v1058_v40 = vrot.slane %v1030_v22, %v2348_v24  ;;  %v1060_v41 = vcombine.high %v1044_v23, %v1044_v23  ;;  %v953_v42 = vrot.slane %v931_v19, %v2348_v24  ;;  %v1059_v47 = vcombine.high %v2466_v16, %v2466_v16 }
 0x165   : > { %v1099_v31 = vrot.slane %v1098_v20, 2  ;;  %v1092_v35 = vrot.slane %v1091_v21, 1  ;;  %v960_v44 = vrot.slane %v932_v27, %v2348_v24  ;;  %v1061_v49 = vcombine.high %v1051_v26, %v1051_v26 }
 0x166   : > { %v1119_v50 = vsel %vm615_vm3, %v1111_v25, 0.0  ;;  %v1139_v51 = vcombine.low %v939_v28, %v953_v42  ;;  %v1981_v52 = vcombine.high %v939_v28, %v953_v42  ;;  %v1069_v36 = vrot.slane %v2044_v5, %v2348_v24 }
 0x167   : > { %v1100_v45 = vadd.f32 %v1099_v31, %v1098_v20  ;;  %v1093_v46 = vadd.f32 %v1092_v35, %v1091_v21  ;;  %v1141_v56 = vcombine.low %v946_v37, %v960_v44  ;;  %v1982_v57 = vcombine.high %v946_v37, %v960_v44 }
 0x168   : > { %v1122_v58 = vsel %vm617_vm4, %v1112_v18, 0.0  ;;  %v1276_v59 = vcombine.low %v1058_v40, %v1060_v41  ;;  %v1062_v60 = vcombine.high %v1058_v40, %v1058_v40  ;;  %v1070_v61 = vcombine.high %v1069_v36, %v1069_v36 }
 0x169   : > { %v1101_v53 = vrot.slane %v1100_v45, 1  ;;  %1117 = vadd.xlane.f32.xlu1 %v1116_v15  ;;  %v1103_v55 = vmax.f32 %v1093_v46, 1e-09  ;;  %v1229_v63 = vcombine.low %v1051_v26, %v1059_v47  ;;  %v1230_v1 = vcombine.low %v1061_v49, %v1044_v23 }
 0x16a   : > { %v1149_v2 = vrot.slane %v1139_v51, %v2348_v24  ;;  %v1156_v3 = vrot.slane %v1981_v52, %v2348_v24  ;;  %v1077_v4 = vrot.slane %v1069_v36, %v2348_v24  ;;  %v1084_v5 = vrot.slane %v1070_v61, %v2348_v24 }
 0x16b   : > { %v1102_v62 = vadd.f32 %v1101_v53, %v1100_v45  ;;  %2129 = vrcp.f32 %v1103_v55  ;;  %v1163_v9 = vrot.slane %v1141_v56, %v2348_v24  ;;  %v1170_v11 = vrot.slane %v1982_v57, %v2348_v24 }
 0x16c   : > { %v965_v12 = vcombine.high %v2461_v10, %v2461_v10  ;;  %v1277_v13 = vcombine.low %v1062_v60, %v1077_v4  ;;  %v1284_v14 = vrot.slane %v1276_v59, %v2348_v24  ;;  %v1298_v15 = vrot.slane %v1084_v5, %v2348_v24 }
 0x16d   : > { %v1104_v8 = vmax.f32 %v1102_v62, 1e-09  ;;  %1114 = vadd.xlane.f32.xlu0 %v1113_v6  ;;  %1123 = vadd.xlane.f32.xlu1 %v1122_v58  ;;  %v972_v17 = vrot.slane %v2461_v10, %v2348_v24  ;;  %v1251_v19 = vrot.slane %v1229_v63, %v2348_v24  ;;  %v1258_v6 = vrot.slane %v1230_v1, %v2348_v24 }
 0x16e   : > { %v979_v20 = vrot.slane %v965_v12, %v2348_v24  ;;  %v1171_v21 = vcombine.low %v1149_v2, %v1156_v3  ;;  %v1291_v22 = vrot.slane %v1277_v13, %v2348_v24  ;;  %v1172_v26 = vcombine.low %v1163_v9, %v1170_v11 }
 0x16f   : > { %2131 = vrcp.f32 %v1104_v8  ;;  %v980_v23 = vcombine.high %v972_v17, %v972_v17  ;;  %v988_v25 = vrot.slane %v972_v17, %v2348_v24  ;;  %v1313_v10 = vrot.slane %v1298_v15, %v2348_v24 }
 0x170   : > { %v981_v27 = vcombine.high %v979_v20, %v979_v20  ;;  %v995_v28 = vrot.slane %v979_v20, %v2348_v24  ;;  %v1299_v31 = vcombine.low %v1284_v14, %v1291_v22  ;;  %v1260_v18 = vcombine.low %v1251_v19, %v1258_v6 }
 0x171   : > { %1120 = vadd.xlane.f32.xlu0 %v1119_v50  ;;  %v1002_v35 = vrot.slane %v980_v23, %v2348_v24  ;;  %v1179_v41 = vrot.slane %v1171_v21, %v2348_v24  ;;  %v1186_v51 = vrot.slane %v1172_v26, %v2348_v24  ;;  %v2209_v61 = vmov 65535  }
 0x172   : > { %v1009_v37 = vrot.slane %v981_v27, %v2348_v24  ;;  %v1011_v40 = vcombine.high %v995_v28, %v995_v28  ;;  %v1306_v42 = vrot.slane %v1299_v31, %v2348_v24  ;;  %v1210_v49 = vrot.slane %v995_v28, %v2348_v24 }
 0x173   : > { %v1188_v44 = vcombine.low %v988_v25, %v1002_v35  ;;  %v1983_v45 = vcombine.high %v988_v25, %v1002_v35  ;;  %v1342_v62 = vsel %vm1340_vm5, 4294967295, %v2209_v61  ;;  %v1274_v63 = vrot.slane %v1260_v18, %v2348_v24 }
 0x174   : > { %v1013_v47 = vcombine.high %v1009_v37, %v1009_v37  ;;  %v1227_v50 = vcombine.low %v1009_v37, %v1011_v40  ;;  %v1314_v53 = vcombine.low %v1306_v42, %v1313_v10  ;;  %v1225_v3 = vrot.slane %v1210_v49, %v2348_v24 }
 0x175   : > { %v2130_v46 = vpop.eup %2129  ;;  %v1196_v55 = vrot.slane %v1188_v44, %v2348_v24  ;;  %v1203_v56 = vrot.slane %v1983_v45, %v2348_v24  ;;  %v2531_v21 = vsel %vm1341_vm6, %v1342_v62, 0 }
 0x176   : > { %v1597_v52 = vmul.f32 %v2130_v46, %v2420_v39  ;;  %v1598_v36 = vmul.f32 %v2130_v46, %v2427_v43  ;;  %v1228_v57 = vcombine.low %v1013_v47, %v2466_v16  ;;  %v1237_v58 = vrot.slane %v1227_v50, %v2348_v24 }
 0x177   : > { %v1451_v59 = vmul.f32 %v2130_v46, %v2396_v30  ;;  %v1211_v2 = vcombine.low %v1196_v55, %v1203_v56  ;;  %v1187_v30 = vcombine.low %v1179_v41, %v1186_v51  ;;  %v1988_v55 = vld [vmem:[%s2640_s5] ss:$0 sm:$0xff] }
 0x178   : > { %v1601_v60 = vpack.c.bf16 %v1598_v36, %v1597_v52  ;;  %v1244_v4 = vrot.slane %v1228_v57, %v2348_v24 }
 0x179   : > { %v2132_v1 = vpop.eup %2131  ;;  %v1458_v5 = vrot.slane %v1451_v59, %v2394_v29  ;;  %v1218_v11 = vrot.slane %v1211_v2, %v2348_v24 }
 0x17a   : > { %v1599_v16 = vmul.f32 %v2132_v1, %v2433_v48  ;;  %v1600_v8 = vmul.f32 %v2132_v1, %v2445_v54  ;;  %v1452_v9 = vmul.f32 %v2132_v1, %v2402_v33  ;;  %v1259_v12 = vcombine.low %v1237_v58, %v1244_v4 }
 0x17b   : > { %v1465_v13 = vmul.f32 %v1458_v5, %v2420_v39  ;;  %v1466_v14 = vmul.f32 %v1458_v5, %v2427_v43  ;;  %v1226_v19 = vcombine.low %v1218_v11, %v1225_v3 }
 0x17c   : > { %v1602_v15 = vpack.c.bf16 %v1600_v8, %v1599_v16  ;;  %v1462_v17 = vrot.slane %v1452_v9, %v2394_v29  ;;  %v1267_v6 = vrot.slane %v1259_v12, %v2348_v24 }
 0x17d   : > { %v1469_v20 = vpack.c.bf16 %v1466_v14, %v1465_v13  ;;  %v1319_v23 = vpack.c.bf16 %v1226_v19, %v1187_v30 }
 0x17e   : > { %v1467_v22 = vmul.f32 %v1462_v17, %v2433_v48  ;;  %v1468_v33 = vmul.f32 %v1462_v17, %v2445_v54  ;;  %v1275_v25 = vcombine.low %v1267_v6, %v1274_v63 }
 0x17f   : > { %v1345_v39 = vand.u32 %v2531_v21, %v1319_v23 }
 0x180   : > { %v1470_v26 = vpack.c.bf16 %v1468_v33, %v1467_v22  ;;  %v1320_v43 = vpack.c.bf16 %v1314_v53, %v1275_v25 }
 0x181   : > { %2046 = vmatpush3.bf16.msra.mxu1 %v1345_v39 }
 0x182   : > { %v1408_v29 = vand.u32 %v2531_v21, %v1320_v43  ;;  %2057 = vmatprep.subr.bf16.mxu1 %v2205_v0 }
 0x184   : > { %2052 = vmatpush3.bf16.msra.mxu0 %v1408_v29 }
 0x185   : > { %2063 = vmatprep.subr.bf16.mxu0 %v2205_v0 }
 0x19a   : > { %1668 = vxpose.xlu1.c.b16.start.end [1/1] (short) (narrow) %v1602_v15, 16 }
 0x19e   : > { %1605 = vxpose.xlu0.c.b16.start.end [1/1] (short) (narrow) %v1601_v60, 16 }
 0x1c2   : > { %v1329_v24 = vpop.trf.xlu1 }
 0x1c3   : > { %2048 = vmatmul.mubr.msk.bf16.vlgmr.msra.gmra.mrb[4].mxu1 %vm615_vm3, %v1329_v24 }
 0x1c4   : > { %2059 = vmatprep.mubr.msk.bf16.mxu1 %vm2206_vm0, %v2205_v0 }
 0x1c6   : > { %v1396_v48 = vpop.trf.xlu0 }
 0x1c7   : > { %2054 = vmatmul.mubr.msk.bf16.vlgmr.msra.gmra.mrb[8].mxu0 %vm615_vm3, %v1396_v48 }
 0x1c8   : > { %2065 = vmatprep.mubr.msk.bf16.mxu0 %vm2206_vm0, %v2205_v0 }
 0x1f6   : > { %v1118_v46 = vpop.xlane.xlu1 %1117 }
 0x1f7   : > { %v1126_v50 = vmax.f32 %v1118_v46, 1e-09 }
 0x1fa   : > { %v1115_v45 = vpop.xlane.xlu0 %1114  ;;  %v1124_v51 = vpop.xlane.xlu1 %1123 }
 0x1fb   : > { %v1125_v47 = vmax.f32 %v1115_v45, 1e-09  ;;  %v1128_v36 = vmax.f32 %v1124_v51, 1e-09 }
 0x1fd   : > { %2133 = vrcp.f32 %v1125_v47 }
 0x1fe   : > { %v1121_v49 = vpop.xlane.xlu0 %1120  ;;  %2135 = vrcp.f32 %v1126_v50 }
 0x1ff   : > { %v1127_v52 = vmax.f32 %v1121_v49, 1e-09 }
 0x201   : > { %2137 = vrcp.f32 %v1127_v52 }
 0x202   : > { %2139 = vrcp.f32 %v1128_v36 }
 0x204   : > { %v1613_v43 = vpop.trf.xlu0 }
 0x207   : > { %v2134_v53 = vpop.eup %2133 }
 0x208   : > { %v2136_v58 = vpop.eup %2135 }
 0x20b   : > { %v2138_v63 = vpop.eup %2137 }
 0x20c   : > { %v2140_v8 = vpop.eup %2139 }
 0x296   : > { %v1381_v54 = vpop.f32.mrb[4].mxu1 }
 0x297   : > { %v2049_v27 = vpop.f32.mrb[5].mxu1 }
 0x298   : > { %v1384_v28 = vpop.f32.mrb[6].mxu1 }
 0x299   : > { %v1471_v31 = vpack.c.bf16 %v1384_v28, %v1381_v54  ;;  %v2050_v10 = vpop.f32.mrb[7].mxu1 }
 0x29a   : > { %v1444_v35 = vpop.f32.mrb[8].mxu0 }
 0x29b   : > { %v1477_v18 = vand.u32 %v1471_v31, %v2531_v21  ;;  %v2055_v37 = vpop.f32.mrb[9].mxu0 }
 0x29c   : > { %v1447_v40 = vpop.f32.mrb[10].mxu0 }
 0x29d   : > { %v1472_v41 = vpack.c.bf16 %v1447_v40, %v1444_v35  ;;  %v2056_v42 = vpop.f32.mrb[11].mxu0  ;;  %2058 = vmatpush3.bf16.msra.mxu1 %v1477_v18 }
 0x29e   : > { %2069 = vmatprep.subr.bf16.mxu1 %v2205_v0 }
 0x29f   : > { %v1524_v44 = vand.u32 %v1472_v41, %v2531_v21 }
 0x2a0   : > { %2060 = vmatmul.mubr.msk.bf16.vlgmr.msra.gmra.mrb[8].mxu1 %vm615_vm3, %v1469_v20 }
 0x2a1   : > { %2064 = vmatpush3.bf16.msra.mxu0 %v1524_v44  ;;  %2071 = vmatprep.mubr.msk.bf16.mxu1 %vm2206_vm0, %v2205_v0 }
 0x2a2   : > { %2075 = vmatprep.subr.bf16.mxu0 %v2205_v0 }
 0x2a4   : > { %2066 = vmatmul.mubr.msk.bf16.vlgmr.msra.gmra.mrb[12].mxu0 %vm615_vm3, %v1470_v26 }
 0x2a5   : > { %2077 = vmatprep.mubr.msk.bf16.mxu0 %vm2206_vm0, %v2205_v0 }
 0x373   : > { %v1513_v56 = vpop.f32.mrb[8].mxu1 }
 0x374   : > { %v1567_v57 = vmul.f32 %v2134_v53, %v1513_v56  ;;  %v2061_v0 = vpop.f32.mrb[9].mxu1 }
 0x375   : > { %v1516_v59 = vpop.f32.mrb[10].mxu1 }
 0x376   : > { %v1577_v60 = vadd.f32 %v1988_v55, %v1567_v57  ;;  %v1568_v61 = vmul.f32 %v2136_v58, %v1516_v59  ;;  %v2062_v62 = vpop.f32.mrb[11].mxu1 }
 0x377   : > { %v1560_v1 = vpop.f32.mrb[12].mxu0 }
 0x378   : > { %vm1581_vm7 = vcmp.gt.f32.partialorder %v1577_v60, 0.0  ;;  %v1585_v2 = vmul.f32 0.2, %v1577_v60  ;;  %v1578_v3 = vadd.f32 %v1988_v55, %v1568_v61  ;;  %v1569_v4 = vmul.f32 %v2138_v63, %v1560_v1  ;;  %v2067_v5 = vpop.f32.mrb[13].mxu0 }
 0x379   : > { %v1563_v16 = vpop.f32.mrb[14].mxu0 }
 0x37a   : > { %v1589_v30 = vsel %vm1581_vm7, %v1577_v60, %v1585_v2  ;;  %vm1582_vm8 = vcmp.gt.f32.partialorder %v1578_v3, 0.0  ;;  %v1586_v9 = vmul.f32 0.2, %v1578_v3  ;;  %v1579_v11 = vadd.f32 %v1988_v55, %v1569_v4  ;;  %v2068_v12 = vpop.f32.mrb[15].mxu0 }
 0x37b   : > { %v1570_v13 = vmul.f32 %v2140_v8, %v1563_v16  ;;  %v1593_v17 = vmul.f32 %v1589_v30, %v2391_v7 }
 0x37c   : > { %v1590_v14 = vsel %vm1582_vm8, %v1578_v3, %v1586_v9  ;;  %vm1583_vm9 = vcmp.gt.f32.partialorder %v1579_v11, 0.0  ;;  %v1587_v15 = vmul.f32 0.2, %v1579_v11 }
 0x37d   : > { %v1594_v19 = vmul.f32 %v1590_v14, %v2400_v32  ;;  %v1580_v6 = vadd.f32 %v1988_v55, %v1570_v13  ;;  %v1676_v32 = vpop.trf.xlu1 }
 0x37e   : > { %v1591_v20 = vsel %vm1583_vm9, %v1579_v11, %v1587_v15 }
 0x37f   : > { %vm1584_vm10 = vcmp.gt.f32.partialorder %v1580_v6, 0.0  ;;  %v1588_v22 = vmul.f32 0.2, %v1580_v6  ;;  %v1603_v33 = vpack.c.bf16 %v1594_v19, %v1593_v17  ;;  %v1595_v26 = vmul.f32 %v1591_v20, %v2404_v34  ;;  %v1991_v34 = vld [vmem:[%s2641_s6] ss:$0 sm:$0xff] }
 0x381   : > { %v1592_v23 = vsel %vm1584_vm10, %v1580_v6, %v1588_v22  ;;  %v1625_v25 = vand.u32 %v1603_v33, %v2531_v21 }
 0x382   : > { %v1596_v39 = vmul.f32 %v1592_v23, %v2418_v38 }
 0x383   : > { %2070 = vmatpush3.bf16.msra.mxu1 %v1625_v25 }
 0x384   : > { %v1604_v29 = vpack.c.bf16 %v1596_v39, %v1595_v26 }
 0x386   : > { %v1688_v7 = vand.u32 %v1604_v29, %v2531_v21  ;;  %2072 = vmatmul.mubr.msk.bf16.vlgmr.msra.gmra.mrb[12].mxu1 %vm615_vm3, %v1613_v43 }
 0x388   : > { %2076 = vmatpush3.bf16.msra.mxu0 %v1688_v7 }
 0x38b   : > { %2078 = vmatmul.mubr.msk.bf16.vlgmr.msra.gmra.mrb[16].mxu0 %vm615_vm3, %v1676_v32 }
 0x459   : > { %v1661_v24 = vpop.f32.mrb[12].mxu1 }
 0x45a   : > { %v1737_v38 = vmul.f32 %v1991_v34, %v1661_v24  ;;  %1754 = vst.msk [vmem:[%s387_s16] sm:$0xff] %vm856_vm2, %v1661_v24  ;;  %v2073_v21 = vpop.f32.mrb[13].mxu1 }
 0x45b   : > { %v1664_v48 = vpop.f32.mrb[14].mxu1 }
 0x45c   : > { %v1738_v54 = vmul.f32 %v1991_v34, %v1664_v48  ;;  %1755 = vst.msk [vmem:[%s387_s16 + $0x8] sm:$0x1f] %vm1744_vm11, %v1664_v48  ;;  %v2074_v27 = vpop.f32.mrb[15].mxu1  ;;  %v1741_v28 = vsel %vm856_vm2, %v1737_v38, 0.0 }
 0x45d   : > { %1742 = vadd.xlane.f32.xlu0 %v1741_v28 }
 0x45e   : > { %v1724_v31 = vpop.f32.mrb[16].mxu0  ;;  %v1745_v10 = vsel %vm1744_vm11, %v1738_v54, 0.0 }
 0x45f   : > { %v1739_v35 = vmul.f32 %v1991_v34, %v1724_v31  ;;  %1756 = vst.msk [vmem:[%s387_s16 + $0x10] sm:$0xff] %vm856_vm2, %v1724_v31  ;;  %v2079_v18 = vpop.f32.mrb[17].mxu0  ;;  %1746 = vadd.xlane.f32.xlu1 %v1745_v10 }
 0x460   : > { %v1727_v37 = vpop.f32.mrb[18].mxu0 }
 0x461   : > { %v1740_v40 = vmul.f32 %v1991_v34, %v1727_v37  ;;  %1757 = vst.msk [vmem:[%s387_s16 + $0x18] sm:$0x1f] %vm1744_vm11, %v1727_v37  ;;  %v2080_v41 = vpop.f32.mrb[19].mxu0  ;;  %v1748_v42 = vsel %vm856_vm2, %v1739_v35, 0.0  ;;  %s2147_s16 = scalar_lea.vmem %s2146_s14, 1024 }
 0x462   : > { %1749 = vadd.xlane.f32.xlu0 %v1748_v42  ;;  %p2149_p1 = scmp.lt.s32.totalorder %s2147_s16, %s2141_s28 }
 0x463   : > { %v1751_v44 = vsel %vm1744_vm11, %v1740_v40, 0.0 }
 0x464   : > { %1752 = vadd.xlane.f32.xlu1 %v1751_v44  ;;  %p2150_p2 = por %p2149_p1, %p2148_p0 }
 0x466   : > { %p2151_p3 = pnand %p2150_p2, %p2144_p13 }
 0x468   : > { %2154 = shalt.err (!%p2151_p3)
}
 0x469   : > { %s2155_s13 = scalar_lea.hbm %s2586_s24, 512  ;;  %s2159_s22 = scalar_lea.hbm %s2643_s8, 1024 }
 0x46a   : > { %p2156_p4 = scmp.ne.s32.totalorder %s2586_s24, %s2155_s13  ;;  %p2160_p9 = scmp.lt.u32.totalorder %s2586_s24, %s2643_s8 }
 0x46b   : > { %p2161_p10 = scmp.lt.u32.totalorder %s2159_s22, %s2155_s13  ;;  %p2163_p12 = scmp.lt.u32.totalorder %s2155_s13, %s2586_s24 }
 0x46c   : > { %p2157_p7 = pnand %p2156_p4, %p2301_p5 }
 0x46d   : > { %p2162_p11 = por %p2161_p10, %p2160_p9 }
 0x46e   : > { %p2158_p8 = pneg %p2157_p7 }
 0x46f   : > { %p2164_p13 = por %p2163_p12, %p2162_p11 }
 0x471   : > { %p2165_p0 = pnand %p2164_p13, %p2158_p8 }
 0x473   : > { %2168 = shalt.err (!%p2165_p0)
}
 0x474   : > { %s2211_s28 = smov 128   ;;  %s2212_s14 = smov 8   ;;  %vm1758_vm12 = vcmask 7168   ;;  %vm1760_vm13 = vcmask 4096  }
 0x475   : > { %2081 = dma.vmem_to_hbm [thread:$0]  (%p2301_p5), %s2580_s17, 512, %s2586_s24, %s2590_s25, %s2211_s28, %s2211_s28, %s2212_s14  }
 0x476   : > { %s435_s21 = scalar_lea.vmem %s2644_s9, %s2327_s26 }
 0x4ea   : > { %v1743_v45 = vpop.xlane.xlu0 %1742 }
 0x4eb   : > { %1759 = vst.msk [vmem:[%s435_s21] sm:$0xff] %vm1758_vm12, %v1743_v45 }
 0x4ec   : > { %v1747_v46 = vpop.xlane.xlu1 %1746 }
 0x4ed   : > { %1761 = vst.msk [vmem:[%s435_s21 + $0x8] sm:$0x1f] %vm1760_vm13, %v1747_v46 }
 0x4ef   : > { %v1750_v47 = vpop.xlane.xlu0 %1749 }
 0x4f0   : > { %1762 = vst.msk [vmem:[%s435_s21 + $0x10] sm:$0xff] %vm1758_vm12, %v1750_v47 }
 0x4f1   : > { %v1753_v49 = vpop.xlane.xlu1 %1752 }
 0x4f2   : > { %1763 = vst.msk [vmem:[%s435_s21 + $0x18] sm:$0x1f] %vm1760_vm13, %v1753_v49 }
 0x4f3 PF: > { %p2087_p1 = scmp.ge.s32.totalorder %s2203_s12, 2  ;;  %s1823_s19 = sand.u32 1, %s2191_s30  }
 0x4f4   : > { %s1824_s17 = scalar_lea.sflag [#allocation3], %s1823_s19 }
 0x4f5   : > { %p2084_p5 = pnand %p2087_p1, %p2305_p6 }
 0x4f7   : > { %2186 = dma.done.wait (!%p2084_p5), %s1824_s17, 512  }
 0x4f8   : > { %2188 = vsyncadd (!%p2084_p5), %s1824_s17, 4294966784  ;;  %p20_p2 = scmp.ge.s32.totalorder %s2288_s15, 4   ;;  %s2647_s30 = smov %s2195_s10 }
 0x4f9   : > { %s2648_s10 = smov %s2199_s11  ;;  %s2649_s11 = smov %s2299_s18 }
 0x4fa   : > { %s2650_s12 = smov %s2288_s15  ;;  %22 = sbr.rel (!%p20_p2) target bundleno = 3 (0x3), region = 116 }
 0x501   :  { %1838 = vsyncpa [#allocation3], 1 }
 0x502   :  { %1840 = vsyncpa [#allocation3 + $0x1], 1 }

// kernel: model_forward.8
= control target key start
LH: loop header
LB: loop body
LE: loop exit
PB: predicated region body
PF: predicated region fallthrough
CT: control target
= control target key end

     0   :  { %s1354_s30 = smov 0   ;;  %s1509_s0 = inlined_call_operand.vmem [shape: f32[2,13,32], index: 0, kind: input, shape index: {}]   ;;  %s1510_s1 = inlined_call_operand.vmem [shape: f32[2,13,1], index: 1, kind: input, shape index: {}]   ;;  %s1511_s2 = inlined_call_operand.vmem [shape: f32[2,13,32], index: 2, kind: input, shape index: {}]   ;;  %s1512_s3 = inlined_call_operand.vmem [shape: f32[2,13,1], index: 3, kind: input, shape index: {}]   ;;  %s1513_s4 = inlined_call_operand.vmem [shape: f32[2,1,13], index: 4, kind: input, shape index: {}]   ;;  %s1514_s5 = inlined_call_operand.vmem [shape: f32[32,32], index: 5, kind: input, shape index: {}]   ;;  %s1515_s6 = inlined_call_operand.vmem [shape: f32[32,32], index: 6, kind: input, shape index: {}]   ;;  %s1516_s7 = inlined_call_operand.vmem [shape: f32[2,13,32], index: 7, kind: output, shape index: {0}]   ;;  %s1517_s8 = inlined_call_operand.vmem [shape: f32[2,13,32], index: 8, kind: output, shape index: {1}]   ;;  %s1518_s9 = inlined_call_operand.vmem [shape: f32[2,1,64], index: 9, kind: output, shape index: {2}]  }
   0x1 LB: > { %s1146_s10 = sadd.s32 4294967295, %s1297_s30   ;;  %p1150_p0 = scmp.ge.s32.totalorder %s1297_s30, 1  ;;  %s1297_s30 = sphi %s1354_s30, %s20_s30  }
   0x2   : > { %p330_p1 = scmp.lt.s32.totalorder %s1297_s30, 3 }
   0x4   : > { %p331_p2 = pnand %p1150_p0, %p330_p1 }
   0x5   : > { %v438_v0 = vld [vmem:[%s1514_s5] sm:$0xff] (!%p331_p2)  ;;  %v439_v1 = vld [vmem:[%s1514_s5 + $0x8] sm:$0xff] (!%p331_p2)  ;;  %v440_v2 = vld [vmem:[%s1514_s5 + $0x10] sm:$0xff] (!%p331_p2)  ;;  %p392_p3 = scmp.lt.s32.totalorder (!%p331_p2), %s1146_s10, 1  ;;  %v1299_v3 = vmov (!%p331_p2), 0.0   ;;  %vm1300_vm0 = vmmov (!%p331_p2), 0   ;;  %v541_v29 = vlaneseq (!%p331_p2) }
   0x6   : > { %334 = sbr.rel (%p331_p2) target bundleno = 1424 (0x590), region = 48  ;;  %1196 = vmatprep.subr.bf16.mxu0 (!%p331_p2), %v1299_v3  ;;  %v443_v4 = vpack.c.bf16 (!%p331_p2), %v439_v1, %v438_v0  ;;  %v441_v5 = vld [vmem:[%s1514_s5 + $0x18] sm:$0xff] (!%p331_p2)  ;;  %1200 = vmatprep.mubr.msk.bf16.mxu0 (!%p331_p2), %vm1300_vm0, %v1299_v3  ;;  %vm576_vm1 = vcmask (!%p331_p2), 1045504   ;;  %vm577_vm2 = vcmask (!%p331_p2), 1046528   ;;  %v1301_v7 = vmov (!%p331_p2), 65535  }
   0x7   : > { %1204 = vmatprep.subr.bf16.mxu1 (!%p331_p2), %v1299_v3  ;;  %1206 = vmatprep.mubr.msk.bf16.mxu1 (!%p331_p2), %vm1300_vm0, %v1299_v3  ;;  %v444_v6 = vpack.c.bf16 (!%p331_p2), %v441_v5, %v440_v2  ;;  %v578_v8 = vsel (!%p331_p2), %vm576_vm1, 4294967295, %v1301_v7  ;;  %vm445_vm3 = vcmask (!%p331_p2), 261120   ;;  %v1302_v19 = vmov (!%p331_p2), 0  }
   0x8   : > { %1197 = vmatpush3.bf16.msra.mxu0 (!%p331_p2), %v443_v4  ;;  %v579_v12 = vsel (!%p331_p2), %vm577_vm2, %v578_v8, 0  ;;  %1251 = vset.pattern.permute.xlu0 (!%p331_p2), %v1302_v19  ;;  %v542_v31 = vshrl.u32 (!%p331_p2), %v541_v29, 7  ;;  %vm548_vm9 = vcmask (!%p331_p2), 105472   ;;  %vm552_vm11 = vcmask (!%p331_p2), 102400  }
   0x9   : > { %1198 = vmatprep.subr.bf16.mxu0 (!%p331_p2), %v1299_v3  ;;  %1252 = vset.pattern.permute.xlu1 (!%p331_p2), %v1302_v19  ;;  %vm762_vm12 = vcmask (!%p331_p2), 7168   ;;  %vm764_vm13 = vcmask (!%p331_p2), 4096   ;;  %vm752_vm14 = vcmask (!%p331_p2), 258048   ;;  %vm872_vm15 = vcmask (!%p331_p2), 253952  }
   0xa   : > { %v1419_v32 = vsub.s32 (!%p331_p2), 0, %v542_v31 }
   0xc   : > { %1199 = vmatpush3.bf16.msra.mxu0 (!%p331_p2), %v444_v6 }
   0xd   : > { %s1520_s10 = smov (!%p392_p3, %s1146_s10), 1  ;;  %1210 = vmatprep.subr.bf16.mxu0 %v1299_v3 }
   0xe   : > { %s1384_s19 = sshll.u32 %s1520_s10, 4  ;;  %s414_s12 = scalar_lea.vmem %s1513_s4, %s1520_s10 }
   0xf   : > { %s396_s22 = scalar_lea.vmem %s1509_s0, %s1384_s19  ;;  %s406_s25 = scalar_lea.vmem %s1511_s2, %s1384_s19  ;;  %v437_v30 = vld [vmem:[%s414_s12] sm:$0x1] }
  0x10   : > { %v429_v9 = vld [vmem:[%s396_s22] sm:$0xff]  ;;  %v430_v10 = vld [vmem:[%s396_s22 + $0x8] sm:$0x1f]  ;;  %s401_s28 = scalar_lea.vmem %s1510_s1, %s1384_s19  ;;  %vm539_vm6 = vcmp.gt.f32.partialorder %v437_v30, 0.0  ;;  %s411_s15 = scalar_lea.vmem %s1512_s3, %s1384_s19 }
  0x11   : > { %v431_v11 = vld [vmem:[%s406_s25] sm:$0xff]  ;;  %v442_v13 = vpack.c.bf16 %v430_v10, %v429_v9  ;;  %v432_v14 = vld [vmem:[%s406_s25 + $0x8] sm:$0x1f]  ;;  %v540_v34 = vsel %vm539_vm6, 1, %v1302_v19  ;;  %s424_s27 = scalar_lea.vmem %s1517_s8, %s1384_s19  ;;  %s419_s11 = scalar_lea.vmem %s1516_s7, %s1384_s19 }
  0x12   : > { %v491_v15 = vpack.c.bf16 %v432_v14, %v431_v11  ;;  %v1405_v20 = vld [vmem:[%s401_s28] sm:$0xff]  ;;  %v1407_v21 = vld [vmem:[%s401_s28 + $0x8] sm:$0x1f]  ;;  %v544_v35 = vrot.slane %v540_v34, %v1419_v32  ;;  %s1303_s19 = smov 32   ;;  %s427_s14 = scalar_lea.vmem %s1518_s9, %s1520_s10 }
  0x13   : > { %v696_v16 = vand.u32 %v579_v12, %v442_v13  ;;  %1201 = vmatmul.mubr.msk.bf16.vlgmr.msra.gmra.mrb[0].mxu0 %vm445_vm3, %v442_v13  ;;  %vm635_vm4 = vcmp.gt.f32.partialorder %v1405_v20, 0.0  ;;  %vm636_vm5 = vcmp.gt.f32.partialorder %v1407_v21, 0.0  ;;  %v763_v29 = vsel %vm762_vm12, %v1405_v20, 0.0 }
  0x14   : > { %v496_v17 = vsel %vm445_vm3, %v491_v15, 0  ;;  %v580_v18 = vand.u32 %v579_v12, %v491_v15  ;;  %1212 = vmatprep.mubr.msk.bf16.mxu0 %vm1300_vm0, %v1299_v3  ;;  %v637_v22 = vsel %vm635_vm4, 1, %v1302_v19  ;;  %v638_v23 = vsel %vm636_vm5, 1, %v1302_v19  ;;  %v436_v19 = vld [vmem:[%s411_s15 + $0x8] sm:$0x1f] }
  0x15   : > { %1205 = vmatpush3.bf16.xpose.msra.mxu1 %v496_v17  ;;  %640 = vperm.xlu0 %1251, %v637_v22   ;;  %vm545_vm8 = vcmp.eq.s32.totalorder %v544_v35, 1  ;;  %v765_v30 = vsel %vm764_vm13, %v1407_v21, 0.0 }
  0x16   : > { %1216 = vmatprep.subr.bf16.mxu1 %v1299_v3  ;;  %1211 = vmatpush3.bf16.msra.mxu0 %v580_v18  ;;  %v435_v18 = vld [vmem:[%s411_s15] sm:$0xff] }
  0x17   : > { %1222 = vmatprep.subr.bf16.mxu0 %v1299_v3  ;;  %v876_v22 = vsel %vm762_vm12, %v435_v18, 0.0 }
  0x19   : > { %643 = vperm.xlu0 %1251, %v638_v23   ;;  %v877_v23 = vsel %vm764_vm13, %v436_v19, 0.0 }
  0x94   : > { %v641_v33 = vpop.permute.xlu0 %640 }
  0x95   : > { %vm645_vm7 = vcmp.eq.s32.totalorder %v641_v33, 1  ;;  %v766_v33 = vadd.f32 %v765_v30, %v763_v29 }
  0x98   : > { %v644_v36 = vpop.permute.xlu0 %643 }
  0x99   : > { %vm646_vm10 = vcmp.eq.s32.totalorder %v644_v36, 1  ;;  %v767_v36 = vrot.slane %v766_v33, 4 }
  0xe6   : > { %v483_v24 = vpop.f32.mrb[0].mxu0 }
  0xe7   : > { %v1202_v25 = vpop.f32.mrb[1].mxu0 }
  0xe8   : > { %v486_v26 = vpop.f32.mrb[2].mxu0 }
  0xe9   : > { %v490_v27 = vpack.c.bf16 %v486_v26, %v483_v24  ;;  %v1203_v28 = vpop.f32.mrb[3].mxu0  ;;  %v878_v24 = vadd.f32 %v877_v23, %v876_v22 }
  0xeb   : > { %1207 = vmatmul.mubr.msk.bf16.vlgmr.msra.gmra.mrb[0].mxu1 %vm445_vm3, %v490_v27  ;;  %v879_v27 = vrot.slane %v878_v24, 4 }
  0xec   : > { %1217 = vmatpush3.bf16.msra.mxu1 %v696_v16  ;;  %1218 = vmatprep.mubr.msk.bf16.mxu1 %vm1300_vm0, %v1299_v3 }
  0xed   : > { %1230 = vmatprep.subr.bf16.mxu1 %v1299_v3  ;;  %v880_v34 = vadd.f32 %v879_v27, %v878_v24 }
 0x1be   : > { %v532_v37 = vpop.f32.mrb[0].mxu1 }
 0x1bf   : > { %v647_v38 = vsel %vm645_vm7, %v532_v37, -1e+09  ;;  %v1208_v39 = vpop.f32.mrb[1].mxu1  ;;  %v546_v40 = vsel %vm545_vm8, %v532_v37, -1e+09  ;;  %v881_v37 = vrot.slane %v880_v34, 2 }
 0x1c0   : > { %v535_v41 = vpop.f32.mrb[2].mxu1  ;;  %v549_v42 = vsel %vm548_vm9, %v546_v40, -inf  ;;  %v649_v46 = vsel %vm548_vm9, %v647_v38, -inf }
 0x1c1   : > { %v648_v43 = vsel %vm646_vm10, %v535_v41, -1e+09  ;;  %550 = vmax.xlane.f32.xlu1 %v549_v42  ;;  %v1209_v44 = vpop.f32.mrb[3].mxu1  ;;  %v547_v45 = vsel %vm545_vm8, %v535_v41, -1e+09  ;;  %v882_v39 = vadd.f32 %v881_v37, %v880_v34 }
 0x1c2   : > { %v650_v47 = vsel %vm552_vm11, %v648_v43, -inf  ;;  %v553_v49 = vsel %vm552_vm11, %v547_v45, -inf }
 0x1c3   : > { %v651_v48 = vmax.f32 %v649_v46, %v650_v47  ;;  %v756_v47 = vld [vmem:[%s1515_s6] sm:$0xff] }
 0x1c5   : > { %v652_v50 = vrot.slane %v651_v48, 4  ;;  %554 = vmax.xlane.f32.xlu1 %v553_v49 }
 0x1c7   : > { %v653_v51 = vmax.f32 %v651_v48, %v652_v50  ;;  %v757_v48 = vld [vmem:[%s1515_s6 + $0x8] sm:$0xff]  ;;  %v758_v50 = vld [vmem:[%s1515_s6 + $0x10] sm:$0xff] }
 0x1c8   : > { %v791_v49 = vpack.c.bf16 %v757_v48, %v756_v47 }
 0x1c9   : > { %v654_v52 = vrot.slane %v653_v51, 2 }
 0x1cb   : > { %v655_v53 = vmax.f32 %v653_v51, %v654_v52 }
 0x1cd   : > { %v656_v54 = vrot.slane %v655_v53, 1 }
 0x1cf   : > { %v657_v55 = vmax.f32 %v655_v53, %v656_v54 }
 0x1d1   : > { %v658_v56 = vsub.f32 %v647_v38, %v657_v55  ;;  %v659_v57 = vsub.f32 %v648_v43, %v657_v55  ;;  %v768_v38 = vadd.f32 %v767_v36, %v766_v33 }
 0x1d3   : > { %v660_v58 = vmul.f32 1.442695, %v658_v56  ;;  %v662_v59 = vmul.f32 1.442695, %v659_v57  ;;  %v769_v41 = vrot.slane %v768_v38, 2 }
 0x1d5   : > { %1253 = vpow2.f32 %v660_v58  ;;  %v770_v42 = vadd.f32 %v769_v41, %v768_v38 }
 0x1d6   : > { %1255 = vpow2.f32 %v662_v59 }
 0x1d7   : > { %v771_v44 = vrot.slane %v770_v42, 1 }
 0x1df   : > { %v1254_v60 = vpop.eup %1253 }
 0x1e0   : > { %v1256_v61 = vpop.eup %1255  ;;  %v664_v62 = vsel %vm548_vm9, %v1254_v60, 0.0 }
 0x1e1   : > { %v665_v63 = vsel %vm552_vm11, %v1256_v61, 0.0 }
 0x1e2   : > { %v666_v0 = vadd.f32 %v665_v63, %v664_v62 }
 0x1e4   : > { %v667_v1 = vrot.slane %v666_v0, 4 }
 0x1e6   : > { %v668_v2 = vadd.f32 %v667_v1, %v666_v0 }
 0x1e8   : > { %v669_v4 = vrot.slane %v668_v2, 2 }
 0x1ea   : > { %v670_v5 = vadd.f32 %v669_v4, %v668_v2 }
 0x1ec   : > { %v671_v6 = vrot.slane %v670_v5, 1 }
 0x1ee   : > { %v672_v7 = vadd.f32 %v671_v6, %v670_v5 }
 0x1f0   : > { %1257 = vrcp.f32 %v672_v7 }
 0x1fa   : > { %v1258_v8 = vpop.eup %1257 }
 0x1fb   : > { %v674_v9 = vmul.f32 %v1258_v8, %v1254_v60  ;;  %v675_v10 = vmul.f32 %v1258_v8, %v1256_v61 }
 0x1fd   : > { %v676_v11 = vpack.c.bf16 %v675_v10, %v674_v9 }
 0x1ff   : > { %677 = vxpose.xlu0.c.b16.start.end [1/1] (short) (narrow) %v676_v11, 16 }
 0x208   : > { %625 = vperm.xlu0 %1251, %v1405_v20  }
 0x24e   : > { %v551_v12 = vpop.xlane.xlu1 %550 }
 0x24f   : > { %v556_v13 = vsub.f32 %v546_v40, %v551_v12  ;;  %v883_v40 = vrot.slane %v882_v39, 1 }
 0x251   : > { %v558_v14 = vmul.f32 1.442695, %v556_v13  ;;  %v884_v20 = vadd.f32 %v883_v40, %v882_v39 }
 0x252   : > { %v555_v15 = vpop.xlane.xlu1 %554 }
 0x253   : > { %1259 = vpow2.f32 %v558_v14  ;;  %v557_v16 = vsub.f32 %v547_v45, %v555_v15  ;;  %v885_v43 = vmax.f32 %v884_v20, 1.0  ;;  %v772_v45 = vadd.f32 %v771_v44, %v770_v42 }
 0x255   : > { %v560_v17 = vmul.f32 1.442695, %v557_v16  ;;  %v773_v46 = vmax.f32 %v772_v45, 1.0 }
 0x257   : > { %1261 = vpow2.f32 %v560_v17 }
 0x25d   : > { %v1260_v25 = vpop.eup %1259 }
 0x25e   : > { %v562_v26 = vsel %vm548_vm9, %v1260_v25, 0.0 }
 0x25f   : > { %563 = vadd.xlane.f32.xlu1 %v562_v26 }
 0x261   : > { %v1262_v28 = vpop.eup %1261 }
 0x262   : > { %v565_v31 = vsel %vm552_vm11, %v1262_v28, 0.0 }
 0x263   : > { %566 = vadd.xlane.f32.xlu1 %v565_v31 }
 0x265   : > { %v685_v35 = vpop.trf.xlu0 }
 0x266   : > { %1219 = vmatmul.mubr.msk.bf16.vlgmr.msra.gmra.mrb[4].mxu1 %vm548_vm9, %v685_v35 }
 0x267   : > { %1234 = vmatprep.mubr.msk.bf16.mxu1 %vm1300_vm0, %v1299_v3  ;;  %1231 = vmatpush3.bf16.msra.mxu1 %v791_v49 }
 0x268   : > { %1232 = vmatprep.subr.bf16.mxu1 %v1299_v3 }
 0x274   : > { %741 = vperm.xlu1 %1252, %v435_v18  }
 0x278   : > { %746 = vperm.xlu1 %1252, %v436_v19  }
 0x27c   : > { %897 = vperm.xlu1 %1252, %v885_v43  }
 0x280   : > { %630 = vperm.xlu1 %1252, %v1407_v21   ;;  %v759_v21 = vld [vmem:[%s1515_s6 + $0x18] sm:$0xff] }
 0x281   : > { %v792_v51 = vpack.c.bf16 %v759_v21, %v758_v50 }
 0x283   : > { %1233 = vmatpush3.bf16.msra.mxu1 %v792_v51 }
 0x284   : > { %785 = vperm.xlu1 %1252, %v773_v46  }
 0x287   : > { %v626_v18 = vpop.permute.xlu0 %625 }
 0x2ec   : > { %v564_v52 = vpop.xlane.xlu1 %563 }
 0x2ed   : > { %1263 = vrcp.f32 %v564_v52 }
 0x2f0   : > { %v567_v53 = vpop.xlane.xlu1 %566 }
 0x2f1   : > { %1265 = vrcp.f32 %v567_v53 }
 0x2f4   : > { %v742_v59 = vpop.permute.xlu1 %741 }
 0x2f7   : > { %v1264_v54 = vpop.eup %1263 }
 0x2f8   : > { %v569_v56 = vmul.f32 %v1264_v54, %v1260_v25  ;;  %v747_v61 = vpop.permute.xlu1 %746 }
 0x2fb   : > { %v1266_v55 = vpop.eup %1265 }
 0x2fc   : > { %v571_v57 = vmul.f32 %v1266_v55, %v1262_v28  ;;  %v898_v6 = vpop.permute.xlu1 %897 }
 0x2fd   : > { %1267 = vrcp.f32 %v898_v6 }
 0x2fe   : > { %v572_v58 = vpack.c.bf16 %v571_v57, %v569_v56 }
 0x300   : > { %1213 = vmatmul.mubr.msk.bf16.vlgmr.msra.gmra.mrb[4].mxu0 %vm548_vm9, %v572_v58  ;;  %v631_v24 = vpop.permute.xlu1 %630 }
 0x301   : > { %1223 = vmatpush3.bf16.msra.mxu0 %v791_v49  ;;  %1226 = vmatprep.mubr.msk.bf16.mxu0 %vm1300_vm0, %v1299_v3  ;;  %vm986_vm0 = vcmask 516352  }
 0x302   : > { %1224 = vmatprep.subr.bf16.mxu0 %v1299_v3 }
 0x304   : > { %v786_v33 = vpop.permute.xlu1 %785 }
 0x305   : > { %1225 = vmatpush3.bf16.msra.mxu0 %v792_v51  ;;  %1269 = vrcp.f32 %v786_v33 }
 0x307   : > { %v1268_v14 = vpop.eup %1267 }
 0x30f   : > { %v1270_v41 = vpop.eup %1269 }
 0x339   : > { %v732_v60 = vpop.f32.mrb[4].mxu1 }
 0x33a   : > { %v749_v62 = vmul.f32 %v742_v59, %v732_v60  ;;  %v1220_v63 = vpop.f32.mrb[5].mxu1 }
 0x33b   : > { %v735_v0 = vpop.f32.mrb[6].mxu1 }
 0x33c   : > { %754 = vst.msk [vmem:[%s424_s27] sm:$0xff] %vm445_vm3, %v749_v62  ;;  %v1463_v1 = vmul.f32 %v749_v62, %v742_v59  ;;  %v750_v2 = vmul.f32 %v747_v61, %v735_v0  ;;  %v1221_v4 = vpop.f32.mrb[7].mxu1 }
 0x33e   : > { %v886_v3 = vsel %vm445_vm3, %v1463_v1, 0.0  ;;  %755 = vst.msk [vmem:[%s424_s27 + $0x8] sm:$0x1f] %vm752_vm14, %v750_v2  ;;  %v1468_v5 = vmul.f32 %v750_v2, %v747_v61 }
 0x340   : > { %v887_v7 = vsel %vm752_vm14, %v1468_v5, 0.0 }
 0x341   : > { %v888_v8 = vadd.f32 %v887_v7, %v886_v3 }
 0x343   : > { %v889_v9 = vrot.slane %v888_v8, 4 }
 0x345   : > { %v890_v10 = vadd.f32 %v889_v9, %v888_v8 }
 0x347   : > { %v891_v11 = vrot.slane %v890_v10, 2 }
 0x349   : > { %v892_v12 = vadd.f32 %v891_v11, %v890_v10 }
 0x34b   : > { %v893_v13 = vrot.slane %v892_v12, 1 }
 0x34d   : > { %v894_v15 = vadd.f32 %v893_v13, %v892_v12 }
 0x34f   : > { %v901_v16 = vmul.f32 %v1268_v14, %v894_v15 }
 0x351   : > { %v902_v17 = vpack.c.bf16 %v901_v16, %v901_v16 }
 0x353   : > { %1235 = vmatmul.mubr.msk.bf16.vlgmr.msra.gmra.mrb[8].mxu1 %vm445_vm3, %v902_v17 }
 0x3d3   : > { %v616_v19 = vpop.f32.mrb[4].mxu0 }
 0x3d4   : > { %v633_v22 = vmul.f32 %v626_v18, %v616_v19  ;;  %v1214_v23 = vpop.f32.mrb[5].mxu0 }
 0x3d5   : > { %v619_v25 = vpop.f32.mrb[6].mxu0 }
 0x3d6   : > { %751 = vst.msk [vmem:[%s419_s11] sm:$0xff] %vm445_vm3, %v633_v22  ;;  %v1478_v26 = vmul.f32 %v633_v22, %v626_v18  ;;  %v634_v27 = vmul.f32 %v631_v24, %v619_v25  ;;  %v1215_v28 = vpop.f32.mrb[7].mxu0 }
 0x3d8   : > { %753 = vst.msk [vmem:[%s419_s11 + $0x8] sm:$0x1f] %vm752_vm14, %v634_v27  ;;  %v1481_v29 = vmul.f32 %v634_v27, %v631_v24  ;;  %v774_v30 = vsel %vm445_vm3, %v1478_v26, 0.0 }
 0x3da   : > { %v775_v31 = vsel %vm752_vm14, %v1481_v29, 0.0 }
 0x3db   : > { %v776_v34 = vadd.f32 %v775_v31, %v774_v30 }
 0x3dd   : > { %v777_v35 = vrot.slane %v776_v34, 4 }
 0x3df   : > { %v778_v36 = vadd.f32 %v777_v35, %v776_v34 }
 0x3e1   : > { %v779_v37 = vrot.slane %v778_v36, 2 }
 0x3e3   : > { %v780_v38 = vadd.f32 %v779_v37, %v778_v36 }
 0x3e5   : > { %v781_v39 = vrot.slane %v780_v38, 1 }
 0x3e7   : > { %v782_v40 = vadd.f32 %v781_v39, %v780_v38 }
 0x3e9   : > { %v789_v20 = vmul.f32 %v1270_v41, %v782_v40 }
 0x3eb   : > { %v790_v42 = vpack.c.bf16 %v789_v20, %v789_v20 }
 0x3ed   : > { %1227 = vmatmul.mubr.msk.bf16.vlgmr.msra.gmra.mrb[8].mxu0 %vm445_vm3, %v790_v42 }
 0x426   : > { %v940_v43 = vpop.f32.mrb[8].mxu1 }
 0x427   : > { %1271 = vtanh.f32 %v940_v43  ;;  %v1236_v44 = vpop.f32.mrb[9].mxu1 }
 0x428   : > { %v943_v45 = vpop.f32.mrb[10].mxu1 }
 0x429   : > { %v1237_v46 = vpop.f32.mrb[11].mxu1 }
 0x431   : > { %v1272_v47 = vpop.eup %1271 }
 0x432   : > { %v950_v48 = vrot.slane %v1272_v47, %v1419_v32 }
 0x434   : > { %v952_v49 = vmul.f32 %v950_v48, %v750_v2  ;;  %v951_v50 = vmul.f32 %v950_v48, %v749_v62 }
 0x436   : > { %v956_v21 = vsel %vm752_vm14, %v952_v49, 0.0  ;;  %v953_v51 = vsel %vm445_vm3, %v951_v50, 0.0 }
 0x437   : > { %957 = vadd.xlane.f32.xlu1 %v956_v21  ;;  %954 = vadd.xlane.f32.xlu0 %v953_v51 }
 0x4c0   : > { %v830_v52 = vpop.f32.mrb[8].mxu0 }
 0x4c1   : > { %1273 = vtanh.f32 %v830_v52  ;;  %v1228_v53 = vpop.f32.mrb[9].mxu0 }
 0x4c2   : > { %v833_v54 = vpop.f32.mrb[10].mxu0 }
 0x4c3   : > { %v1229_v55 = vpop.f32.mrb[11].mxu0 }
 0x4c4   : > { %v958_v56 = vpop.xlane.xlu1 %957  ;;  %v955_v57 = vpop.xlane.xlu0 %954 }
 0x4c5   : > { %v1172_v58 = vmul.f32 -1.442695, %v958_v56  ;;  %v1171_v59 = vmul.f32 -1.442695, %v955_v57 }
 0x4c7   : > { %1275 = vpow2.f32 %v1172_v58 }
 0x4c8   : > { %1277 = vpow2.f32 %v1171_v59 }
 0x4cb   : > { %v1274_v60 = vpop.eup %1273 }
 0x4cc   : > { %v840_v61 = vrot.slane %v1274_v60, %v1419_v32 }
 0x4ce   : > { %v841_v62 = vmul.f32 %v840_v61, %v633_v22  ;;  %v842_v0 = vmul.f32 %v840_v61, %v634_v27 }
 0x4d0   : > { %v843_v63 = vsel %vm445_vm3, %v841_v62, 0.0  ;;  %v846_v7 = vsel %vm752_vm14, %v842_v0, 0.0 }
 0x4d1   : > { %v1276_v2 = vpop.eup %1275  ;;  %844 = vadd.xlane.f32.xlu0 %v843_v63 }
 0x4d2   : > { %v1278_v4 = vpop.eup %1277  ;;  %v966_v3 = vadd.f32 1.0, %v1276_v2 }
 0x4d3   : > { %v965_v6 = vadd.f32 1.0, %v1278_v4 }
 0x4d4   : > { %1279 = vrcp.f32 %v966_v3 }
 0x4d5   : > { %1281 = vrcp.f32 %v965_v6  ;;  %847 = vadd.xlane.f32.xlu0 %v846_v7 }
 0x4de   : > { %v1280_v8 = vpop.eup %1279 }
 0x4df   : > { %v1282_v9 = vpop.eup %1281  ;;  %v972_v10 = vmul.f32 %v1280_v8, %v1468_v5 }
 0x4e0   : > { %v971_v32 = vmul.f32 %v1282_v9, %v1463_v1 }
 0x4e1   : > { %v974_v11 = vsel %vm752_vm14, %v972_v10, 0.0 }
 0x4e2   : > { %v973_v12 = vsel %vm445_vm3, %v971_v32, 0.0 }
 0x4e3   : > { %v975_v13 = vadd.f32 %v974_v11, %v973_v12 }
 0x4e5   : > { %v976_v14 = vrot.slane %v975_v13, 4 }
 0x4e7   : > { %v977_v15 = vadd.f32 %v976_v14, %v975_v13 }
 0x4e9   : > { %v978_v16 = vrot.slane %v977_v15, 2 }
 0x4eb   : > { %v979_v17 = vadd.f32 %v978_v16, %v977_v15 }
 0x4ed   : > { %v980_v18 = vrot.slane %v979_v17, 1 }
 0x4ef   : > { %v981_v19 = vadd.f32 %v980_v18, %v979_v17 }
 0x4f1   : > { %983 = vrot.lane.b32.xlu1 %v981_v19, %s1303_s19 }
 0x55e   : > { %v845_v22 = vpop.xlane.xlu0 %844 }
 0x55f   : > { %v1168_v23 = vmul.f32 -1.442695, %v845_v22 }
 0x561   : > { %1283 = vpow2.f32 %v1168_v23 }
 0x562   : > { %v848_v24 = vpop.xlane.xlu0 %847 }
 0x563   : > { %v1169_v5 = vmul.f32 -1.442695, %v848_v24  ;;  %v984_v42 = vpop.permute.xlu1 %983 }
 0x565   : > { %1285 = vpow2.f32 %v1169_v5 }
 0x56b   : > { %v1284_v1 = vpop.eup %1283 }
 0x56c   : > { %v855_v25 = vadd.f32 1.0, %v1284_v1 }
 0x56e   : > { %1287 = vrcp.f32 %v855_v25 }
 0x56f   : > { %v1286_v27 = vpop.eup %1285 }
 0x570   : > { %v856_v28 = vadd.f32 1.0, %v1286_v27 }
 0x572   : > { %1289 = vrcp.f32 %v856_v28 }
 0x578   : > { %v1288_v30 = vpop.eup %1287 }
 0x579   : > { %v861_v31 = vmul.f32 %v1288_v30, %v1478_v26 }
 0x57b   : > { %v863_v35 = vsel %vm445_vm3, %v861_v31, 0.0 }
 0x57c   : > { %v1290_v33 = vpop.eup %1289 }
 0x57d   : > { %v862_v34 = vmul.f32 %v1290_v33, %v1481_v29 }
 0x57f   : > { %v864_v36 = vsel %vm752_vm14, %v862_v34, 0.0 }
 0x580   : > { %v865_v37 = vadd.f32 %v864_v36, %v863_v35 }
 0x582   : > { %v866_v38 = vrot.slane %v865_v37, 4 }
 0x584   : > { %v867_v39 = vadd.f32 %v866_v38, %v865_v37 }
 0x586   : > { %v868_v40 = vrot.slane %v867_v39, 2 }
 0x588   : > { %v869_v41 = vadd.f32 %v868_v40, %v867_v39 }
 0x58a   : > { %v870_v20 = vrot.slane %v869_v41, 1 }
 0x58c   : > { %v871_v26 = vadd.f32 %v870_v20, %v869_v41 }
 0x58e   : > { %873 = vst.msk [vmem:[%s427_s14] sm:$0x1] %vm872_vm15, %v871_v26 }
 0x58f   : > { %987 = vst.msk [vmem:[%s427_s14] sm:$0x1] %vm986_vm0, %v984_v42 }
 0x590 PF: > { %s20_s30 = sadd.s32 1, %s1297_s30  }
 0x591   : > { %p17_p4 = scmp.ge.s32.totalorder %s20_s30, 4  }
 0x593   :  { %19 = sbr.rel (!%p17_p4) target bundleno = 1 (0x1), region = 114 }

// kernel: model_forward.10
= control target key start
LH: loop header
LB: loop body
LE: loop exit
PB: predicated region body
PF: predicated region fallthrough
CT: control target
= control target key end

     0   :  { %s1354_s30 = smov 0   ;;  %s1509_s0 = inlined_call_operand.vmem [shape: f32[2,11,32], index: 0, kind: input, shape index: {}]   ;;  %s1510_s1 = inlined_call_operand.vmem [shape: f32[2,11,1], index: 1, kind: input, shape index: {}]   ;;  %s1511_s2 = inlined_call_operand.vmem [shape: f32[2,11,32], index: 2, kind: input, shape index: {}]   ;;  %s1512_s3 = inlined_call_operand.vmem [shape: f32[2,11,1], index: 3, kind: input, shape index: {}]   ;;  %s1513_s4 = inlined_call_operand.vmem [shape: f32[2,1,11], index: 4, kind: input, shape index: {}]   ;;  %s1514_s5 = inlined_call_operand.vmem [shape: f32[32,32], index: 5, kind: input, shape index: {}]   ;;  %s1515_s6 = inlined_call_operand.vmem [shape: f32[32,32], index: 6, kind: input, shape index: {}]   ;;  %s1516_s7 = inlined_call_operand.vmem [shape: f32[2,11,32], index: 7, kind: output, shape index: {0}]   ;;  %s1517_s8 = inlined_call_operand.vmem [shape: f32[2,11,32], index: 8, kind: output, shape index: {1}]   ;;  %s1518_s9 = inlined_call_operand.vmem [shape: f32[2,1,64], index: 9, kind: output, shape index: {2}]  }
   0x1 LB: > { %s1146_s10 = sadd.s32 4294967295, %s1297_s30   ;;  %p1150_p0 = scmp.ge.s32.totalorder %s1297_s30, 1  ;;  %s1297_s30 = sphi %s1354_s30, %s20_s30  }
   0x2   : > { %p330_p1 = scmp.lt.s32.totalorder %s1297_s30, 3 }
   0x4   : > { %p331_p2 = pnand %p1150_p0, %p330_p1 }
   0x5   : > { %v438_v0 = vld [vmem:[%s1514_s5] sm:$0xff] (!%p331_p2)  ;;  %v439_v1 = vld [vmem:[%s1514_s5 + $0x8] sm:$0xff] (!%p331_p2)  ;;  %v440_v2 = vld [vmem:[%s1514_s5 + $0x10] sm:$0xff] (!%p331_p2)  ;;  %p392_p3 = scmp.lt.s32.totalorder (!%p331_p2), %s1146_s10, 1  ;;  %v1299_v3 = vmov (!%p331_p2), 0.0   ;;  %vm1300_vm0 = vmmov (!%p331_p2), 0   ;;  %v541_v29 = vlaneseq (!%p331_p2) }
   0x6   : > { %334 = sbr.rel (%p331_p2) target bundleno = 1424 (0x590), region = 48  ;;  %1196 = vmatprep.subr.bf16.mxu0 (!%p331_p2), %v1299_v3  ;;  %v443_v4 = vpack.c.bf16 (!%p331_p2), %v439_v1, %v438_v0  ;;  %v441_v5 = vld [vmem:[%s1514_s5 + $0x18] sm:$0xff] (!%p331_p2)  ;;  %1200 = vmatprep.mubr.msk.bf16.mxu0 (!%p331_p2), %vm1300_vm0, %v1299_v3  ;;  %vm576_vm1 = vcmask (!%p331_p2), 1044480   ;;  %vm577_vm2 = vcmask (!%p331_p2), 1045504   ;;  %v1301_v7 = vmov (!%p331_p2), 65535  }
   0x7   : > { %1204 = vmatprep.subr.bf16.mxu1 (!%p331_p2), %v1299_v3  ;;  %1206 = vmatprep.mubr.msk.bf16.mxu1 (!%p331_p2), %vm1300_vm0, %v1299_v3  ;;  %v444_v6 = vpack.c.bf16 (!%p331_p2), %v441_v5, %v440_v2  ;;  %v578_v8 = vsel (!%p331_p2), %vm576_vm1, 4294967295, %v1301_v7  ;;  %vm445_vm3 = vcmask (!%p331_p2), 261120   ;;  %v1302_v19 = vmov (!%p331_p2), 0  }
   0x8   : > { %1197 = vmatpush3.bf16.msra.mxu0 (!%p331_p2), %v443_v4  ;;  %v579_v12 = vsel (!%p331_p2), %vm577_vm2, %v578_v8, 0  ;;  %1251 = vset.pattern.permute.xlu0 (!%p331_p2), %v1302_v19  ;;  %v542_v31 = vshrl.u32 (!%p331_p2), %v541_v29, 7  ;;  %vm548_vm9 = vcmask (!%p331_p2), 89088   ;;  %vm552_vm11 = vcmask (!%p331_p2), 83968  }
   0x9   : > { %1198 = vmatprep.subr.bf16.mxu0 (!%p331_p2), %v1299_v3  ;;  %1252 = vset.pattern.permute.xlu1 (!%p331_p2), %v1302_v19  ;;  %vm762_vm12 = vcmask (!%p331_p2), 7168   ;;  %vm764_vm13 = vcmask (!%p331_p2), 2048   ;;  %vm752_vm14 = vcmask (!%p331_p2), 256000   ;;  %vm872_vm15 = vcmask (!%p331_p2), 253952  }
   0xa   : > { %v1419_v32 = vsub.s32 (!%p331_p2), 0, %v542_v31 }
   0xc   : > { %1199 = vmatpush3.bf16.msra.mxu0 (!%p331_p2), %v444_v6 }
   0xd   : > { %s1520_s10 = smov (!%p392_p3, %s1146_s10), 1  ;;  %1210 = vmatprep.subr.bf16.mxu0 %v1299_v3 }
   0xe   : > { %s1384_s19 = sshll.u32 %s1520_s10, 4  ;;  %s414_s12 = scalar_lea.vmem %s1513_s4, %s1520_s10 }
   0xf   : > { %s396_s22 = scalar_lea.vmem %s1509_s0, %s1384_s19  ;;  %s406_s25 = scalar_lea.vmem %s1511_s2, %s1384_s19  ;;  %v437_v30 = vld [vmem:[%s414_s12] sm:$0x1] }
  0x10   : > { %v429_v9 = vld [vmem:[%s396_s22] sm:$0xff]  ;;  %v430_v10 = vld [vmem:[%s396_s22 + $0x8] sm:$0x7]  ;;  %s401_s28 = scalar_lea.vmem %s1510_s1, %s1384_s19  ;;  %vm539_vm6 = vcmp.gt.f32.partialorder %v437_v30, 0.0  ;;  %s411_s15 = scalar_lea.vmem %s1512_s3, %s1384_s19 }
  0x11   : > { %v431_v11 = vld [vmem:[%s406_s25] sm:$0xff]  ;;  %v442_v13 = vpack.c.bf16 %v430_v10, %v429_v9  ;;  %v432_v14 = vld [vmem:[%s406_s25 + $0x8] sm:$0x7]  ;;  %v540_v34 = vsel %vm539_vm6, 1, %v1302_v19  ;;  %s424_s27 = scalar_lea.vmem %s1517_s8, %s1384_s19  ;;  %s419_s11 = scalar_lea.vmem %s1516_s7, %s1384_s19 }
  0x12   : > { %v491_v15 = vpack.c.bf16 %v432_v14, %v431_v11  ;;  %v1405_v20 = vld [vmem:[%s401_s28] sm:$0xff]  ;;  %v1407_v21 = vld [vmem:[%s401_s28 + $0x8] sm:$0x7]  ;;  %v544_v35 = vrot.slane %v540_v34, %v1419_v32  ;;  %s1303_s19 = smov 32   ;;  %s427_s14 = scalar_lea.vmem %s1518_s9, %s1520_s10 }
  0x13   : > { %v696_v16 = vand.u32 %v579_v12, %v442_v13  ;;  %1201 = vmatmul.mubr.msk.bf16.vlgmr.msra.gmra.mrb[0].mxu0 %vm445_vm3, %v442_v13  ;;  %vm635_vm4 = vcmp.gt.f32.partialorder %v1405_v20, 0.0  ;;  %vm636_vm5 = vcmp.gt.f32.partialorder %v1407_v21, 0.0  ;;  %v763_v29 = vsel %vm762_vm12, %v1405_v20, 0.0 }
  0x14   : > { %v496_v17 = vsel %vm445_vm3, %v491_v15, 0  ;;  %v580_v18 = vand.u32 %v579_v12, %v491_v15  ;;  %1212 = vmatprep.mubr.msk.bf16.mxu0 %vm1300_vm0, %v1299_v3  ;;  %v637_v22 = vsel %vm635_vm4, 1, %v1302_v19  ;;  %v638_v23 = vsel %vm636_vm5, 1, %v1302_v19  ;;  %v436_v19 = vld [vmem:[%s411_s15 + $0x8] sm:$0x7] }
  0x15   : > { %1205 = vmatpush3.bf16.xpose.msra.mxu1 %v496_v17  ;;  %640 = vperm.xlu0 %1251, %v637_v22   ;;  %vm545_vm8 = vcmp.eq.s32.totalorder %v544_v35, 1  ;;  %v765_v30 = vsel %vm764_vm13, %v1407_v21, 0.0 }
  0x16   : > { %1216 = vmatprep.subr.bf16.mxu1 %v1299_v3  ;;  %1211 = vmatpush3.bf16.msra.mxu0 %v580_v18  ;;  %v435_v18 = vld [vmem:[%s411_s15] sm:$0xff] }
  0x17   : > { %1222 = vmatprep.subr.bf16.mxu0 %v1299_v3  ;;  %v876_v22 = vsel %vm762_vm12, %v435_v18, 0.0 }
  0x19   : > { %643 = vperm.xlu0 %1251, %v638_v23   ;;  %v877_v23 = vsel %vm764_vm13, %v436_v19, 0.0 }
  0x94   : > { %v641_v33 = vpop.permute.xlu0 %640 }
  0x95   : > { %vm645_vm7 = vcmp.eq.s32.totalorder %v641_v33, 1  ;;  %v766_v33 = vadd.f32 %v765_v30, %v763_v29 }
  0x98   : > { %v644_v36 = vpop.permute.xlu0 %643 }
  0x99   : > { %vm646_vm10 = vcmp.eq.s32.totalorder %v644_v36, 1  ;;  %v767_v36 = vrot.slane %v766_v33, 4 }
  0xe6   : > { %v483_v24 = vpop.f32.mrb[0].mxu0 }
  0xe7   : > { %v1202_v25 = vpop.f32.mrb[1].mxu0 }
  0xe8   : > { %v486_v26 = vpop.f32.mrb[2].mxu0 }
  0xe9   : > { %v490_v27 = vpack.c.bf16 %v486_v26, %v483_v24  ;;  %v1203_v28 = vpop.f32.mrb[3].mxu0  ;;  %v878_v24 = vadd.f32 %v877_v23, %v876_v22 }
  0xeb   : > { %1207 = vmatmul.mubr.msk.bf16.vlgmr.msra.gmra.mrb[0].mxu1 %vm445_vm3, %v490_v27  ;;  %v879_v27 = vrot.slane %v878_v24, 4 }
  0xec   : > { %1217 = vmatpush3.bf16.msra.mxu1 %v696_v16  ;;  %1218 = vmatprep.mubr.msk.bf16.mxu1 %vm1300_vm0, %v1299_v3 }
  0xed   : > { %1230 = vmatprep.subr.bf16.mxu1 %v1299_v3  ;;  %v880_v34 = vadd.f32 %v879_v27, %v878_v24 }
 0x1be   : > { %v532_v37 = vpop.f32.mrb[0].mxu1 }
 0x1bf   : > { %v647_v38 = vsel %vm645_vm7, %v532_v37, -1e+09  ;;  %v1208_v39 = vpop.f32.mrb[1].mxu1  ;;  %v546_v40 = vsel %vm545_vm8, %v532_v37, -1e+09  ;;  %v881_v37 = vrot.slane %v880_v34, 2 }
 0x1c0   : > { %v535_v41 = vpop.f32.mrb[2].mxu1  ;;  %v549_v42 = vsel %vm548_vm9, %v546_v40, -inf  ;;  %v649_v46 = vsel %vm548_vm9, %v647_v38, -inf }
 0x1c1   : > { %v648_v43 = vsel %vm646_vm10, %v535_v41, -1e+09  ;;  %550 = vmax.xlane.f32.xlu1 %v549_v42  ;;  %v1209_v44 = vpop.f32.mrb[3].mxu1  ;;  %v547_v45 = vsel %vm545_vm8, %v535_v41, -1e+09  ;;  %v882_v39 = vadd.f32 %v881_v37, %v880_v34 }
 0x1c2   : > { %v650_v47 = vsel %vm552_vm11, %v648_v43, -inf  ;;  %v553_v49 = vsel %vm552_vm11, %v547_v45, -inf }
 0x1c3   : > { %v651_v48 = vmax.f32 %v649_v46, %v650_v47  ;;  %v756_v47 = vld [vmem:[%s1515_s6] sm:$0xff] }
 0x1c5   : > { %v652_v50 = vrot.slane %v651_v48, 4  ;;  %554 = vmax.xlane.f32.xlu1 %v553_v49 }
 0x1c7   : > { %v653_v51 = vmax.f32 %v651_v48, %v652_v50  ;;  %v757_v48 = vld [vmem:[%s1515_s6 + $0x8] sm:$0xff]  ;;  %v758_v50 = vld [vmem:[%s1515_s6 + $0x10] sm:$0xff] }
 0x1c8   : > { %v791_v49 = vpack.c.bf16 %v757_v48, %v756_v47 }
 0x1c9   : > { %v654_v52 = vrot.slane %v653_v51, 2 }
 0x1cb   : > { %v655_v53 = vmax.f32 %v653_v51, %v654_v52 }
 0x1cd   : > { %v656_v54 = vrot.slane %v655_v53, 1 }
 0x1cf   : > { %v657_v55 = vmax.f32 %v655_v53, %v656_v54 }
 0x1d1   : > { %v658_v56 = vsub.f32 %v647_v38, %v657_v55  ;;  %v659_v57 = vsub.f32 %v648_v43, %v657_v55  ;;  %v768_v38 = vadd.f32 %v767_v36, %v766_v33 }
 0x1d3   : > { %v660_v58 = vmul.f32 1.442695, %v658_v56  ;;  %v662_v59 = vmul.f32 1.442695, %v659_v57  ;;  %v769_v41 = vrot.slane %v768_v38, 2 }
 0x1d5   : > { %1253 = vpow2.f32 %v660_v58  ;;  %v770_v42 = vadd.f32 %v769_v41, %v768_v38 }
 0x1d6   : > { %1255 = vpow2.f32 %v662_v59 }
 0x1d7   : > { %v771_v44 = vrot.slane %v770_v42, 1 }
 0x1df   : > { %v1254_v60 = vpop.eup %1253 }
 0x1e0   : > { %v1256_v61 = vpop.eup %1255  ;;  %v664_v62 = vsel %vm548_vm9, %v1254_v60, 0.0 }
 0x1e1   : > { %v665_v63 = vsel %vm552_vm11, %v1256_v61, 0.0 }
 0x1e2   : > { %v666_v0 = vadd.f32 %v665_v63, %v664_v62 }
 0x1e4   : > { %v667_v1 = vrot.slane %v666_v0, 4 }
 0x1e6   : > { %v668_v2 = vadd.f32 %v667_v1, %v666_v0 }
 0x1e8   : > { %v669_v4 = vrot.slane %v668_v2, 2 }
 0x1ea   : > { %v670_v5 = vadd.f32 %v669_v4, %v668_v2 }
 0x1ec   : > { %v671_v6 = vrot.slane %v670_v5, 1 }
 0x1ee   : > { %v672_v7 = vadd.f32 %v671_v6, %v670_v5 }
 0x1f0   : > { %1257 = vrcp.f32 %v672_v7 }
 0x1fa   : > { %v1258_v8 = vpop.eup %1257 }
 0x1fb   : > { %v674_v9 = vmul.f32 %v1258_v8, %v1254_v60  ;;  %v675_v10 = vmul.f32 %v1258_v8, %v1256_v61 }
 0x1fd   : > { %v676_v11 = vpack.c.bf16 %v675_v10, %v674_v9 }
 0x1ff   : > { %677 = vxpose.xlu0.c.b16.start.end [1/1] (short) (narrow) %v676_v11, 16 }
 0x208   : > { %625 = vperm.xlu0 %1251, %v1405_v20  }
 0x24e   : > { %v551_v12 = vpop.xlane.xlu1 %550 }
 0x24f   : > { %v556_v13 = vsub.f32 %v546_v40, %v551_v12  ;;  %v883_v40 = vrot.slane %v882_v39, 1 }
 0x251   : > { %v558_v14 = vmul.f32 1.442695, %v556_v13  ;;  %v884_v20 = vadd.f32 %v883_v40, %v882_v39 }
 0x252   : > { %v555_v15 = vpop.xlane.xlu1 %554 }
 0x253   : > { %1259 = vpow2.f32 %v558_v14  ;;  %v557_v16 = vsub.f32 %v547_v45, %v555_v15  ;;  %v885_v43 = vmax.f32 %v884_v20, 1.0  ;;  %v772_v45 = vadd.f32 %v771_v44, %v770_v42 }
 0x255   : > { %v560_v17 = vmul.f32 1.442695, %v557_v16  ;;  %v773_v46 = vmax.f32 %v772_v45, 1.0 }
 0x257   : > { %1261 = vpow2.f32 %v560_v17 }
 0x25d   : > { %v1260_v25 = vpop.eup %1259 }
 0x25e   : > { %v562_v26 = vsel %vm548_vm9, %v1260_v25, 0.0 }
 0x25f   : > { %563 = vadd.xlane.f32.xlu1 %v562_v26 }
 0x261   : > { %v1262_v28 = vpop.eup %1261 }
 0x262   : > { %v565_v31 = vsel %vm552_vm11, %v1262_v28, 0.0 }
 0x263   : > { %566 = vadd.xlane.f32.xlu1 %v565_v31 }
 0x265   : > { %v685_v35 = vpop.trf.xlu0 }
 0x266   : > { %1219 = vmatmul.mubr.msk.bf16.vlgmr.msra.gmra.mrb[4].mxu1 %vm548_vm9, %v685_v35 }
 0x267   : > { %1234 = vmatprep.mubr.msk.bf16.mxu1 %vm1300_vm0, %v1299_v3  ;;  %1231 = vmatpush3.bf16.msra.mxu1 %v791_v49 }
 0x268   : > { %1232 = vmatprep.subr.bf16.mxu1 %v1299_v3 }
 0x274   : > { %741 = vperm.xlu1 %1252, %v435_v18  }
 0x278   : > { %746 = vperm.xlu1 %1252, %v436_v19  }
 0x27c   : > { %897 = vperm.xlu1 %1252, %v885_v43  }
 0x280   : > { %630 = vperm.xlu1 %1252, %v1407_v21   ;;  %v759_v21 = vld [vmem:[%s1515_s6 + $0x18] sm:$0xff] }
 0x281   : > { %v792_v51 = vpack.c.bf16 %v759_v21, %v758_v50 }
 0x283   : > { %1233 = vmatpush3.bf16.msra.mxu1 %v792_v51 }
 0x284   : > { %785 = vperm.xlu1 %1252, %v773_v46  }
 0x287   : > { %v626_v18 = vpop.permute.xlu0 %625 }
 0x2ec   : > { %v564_v52 = vpop.xlane.xlu1 %563 }
 0x2ed   : > { %1263 = vrcp.f32 %v564_v52 }
 0x2f0   : > { %v567_v53 = vpop.xlane.xlu1 %566 }
 0x2f1   : > { %1265 = vrcp.f32 %v567_v53 }
 0x2f4   : > { %v742_v59 = vpop.permute.xlu1 %741 }
 0x2f7   : > { %v1264_v54 = vpop.eup %1263 }
 0x2f8   : > { %v569_v56 = vmul.f32 %v1264_v54, %v1260_v25  ;;  %v747_v61 = vpop.permute.xlu1 %746 }
 0x2fb   : > { %v1266_v55 = vpop.eup %1265 }
 0x2fc   : > { %v571_v57 = vmul.f32 %v1266_v55, %v1262_v28  ;;  %v898_v6 = vpop.permute.xlu1 %897 }
 0x2fd   : > { %1267 = vrcp.f32 %v898_v6 }
 0x2fe   : > { %v572_v58 = vpack.c.bf16 %v571_v57, %v569_v56 }
 0x300   : > { %1213 = vmatmul.mubr.msk.bf16.vlgmr.msra.gmra.mrb[4].mxu0 %vm548_vm9, %v572_v58  ;;  %v631_v24 = vpop.permute.xlu1 %630 }
 0x301   : > { %1223 = vmatpush3.bf16.msra.mxu0 %v791_v49  ;;  %1226 = vmatprep.mubr.msk.bf16.mxu0 %vm1300_vm0, %v1299_v3  ;;  %vm986_vm0 = vcmask 516352  }
 0x302   : > { %1224 = vmatprep.subr.bf16.mxu0 %v1299_v3 }
 0x304   : > { %v786_v33 = vpop.permute.xlu1 %785 }
 0x305   : > { %1225 = vmatpush3.bf16.msra.mxu0 %v792_v51  ;;  %1269 = vrcp.f32 %v786_v33 }
 0x307   : > { %v1268_v14 = vpop.eup %1267 }
 0x30f   : > { %v1270_v41 = vpop.eup %1269 }
 0x339   : > { %v732_v60 = vpop.f32.mrb[4].mxu1 }
 0x33a   : > { %v749_v62 = vmul.f32 %v742_v59, %v732_v60  ;;  %v1220_v63 = vpop.f32.mrb[5].mxu1 }
 0x33b   : > { %v735_v0 = vpop.f32.mrb[6].mxu1 }
 0x33c   : > { %754 = vst.msk [vmem:[%s424_s27] sm:$0xff] %vm445_vm3, %v749_v62  ;;  %v1463_v1 = vmul.f32 %v749_v62, %v742_v59  ;;  %v750_v2 = vmul.f32 %v747_v61, %v735_v0  ;;  %v1221_v4 = vpop.f32.mrb[7].mxu1 }
 0x33e   : > { %v886_v3 = vsel %vm445_vm3, %v1463_v1, 0.0  ;;  %755 = vst.msk [vmem:[%s424_s27 + $0x8] sm:$0x7] %vm752_vm14, %v750_v2  ;;  %v1468_v5 = vmul.f32 %v750_v2, %v747_v61 }
 0x340   : > { %v887_v7 = vsel %vm752_vm14, %v1468_v5, 0.0 }
 0x341   : > { %v888_v8 = vadd.f32 %v887_v7, %v886_v3 }
 0x343   : > { %v889_v9 = vrot.slane %v888_v8, 4 }
 0x345   : > { %v890_v10 = vadd.f32 %v889_v9, %v888_v8 }
 0x347   : > { %v891_v11 = vrot.slane %v890_v10, 2 }
 0x349   : > { %v892_v12 = vadd.f32 %v891_v11, %v890_v10 }
 0x34b   : > { %v893_v13 = vrot.slane %v892_v12, 1 }
 0x34d   : > { %v894_v15 = vadd.f32 %v893_v13, %v892_v12 }
 0x34f   : > { %v901_v16 = vmul.f32 %v1268_v14, %v894_v15 }
 0x351   : > { %v902_v17 = vpack.c.bf16 %v901_v16, %v901_v16 }
 0x353   : > { %1235 = vmatmul.mubr.msk.bf16.vlgmr.msra.gmra.mrb[8].mxu1 %vm445_vm3, %v902_v17 }
 0x3d3   : > { %v616_v19 = vpop.f32.mrb[4].mxu0 }
 0x3d4   : > { %v633_v22 = vmul.f32 %v626_v18, %v616_v19  ;;  %v1214_v23 = vpop.f32.mrb[5].mxu0 }
 0x3d5   : > { %v619_v25 = vpop.f32.mrb[6].mxu0 }
 0x3d6   : > { %751 = vst.msk [vmem:[%s419_s11] sm:$0xff] %vm445_vm3, %v633_v22  ;;  %v1478_v26 = vmul.f32 %v633_v22, %v626_v18  ;;  %v634_v27 = vmul.f32 %v631_v24, %v619_v25  ;;  %v1215_v28 = vpop.f32.mrb[7].mxu0 }
 0x3d8   : > { %753 = vst.msk [vmem:[%s419_s11 + $0x8] sm:$0x7] %vm752_vm14, %v634_v27  ;;  %v1481_v29 = vmul.f32 %v634_v27, %v631_v24  ;;  %v774_v30 = vsel %vm445_vm3, %v1478_v26, 0.0 }
 0x3da   : > { %v775_v31 = vsel %vm752_vm14, %v1481_v29, 0.0 }
 0x3db   : > { %v776_v34 = vadd.f32 %v775_v31, %v774_v30 }
 0x3dd   : > { %v777_v35 = vrot.slane %v776_v34, 4 }
 0x3df   : > { %v778_v36 = vadd.f32 %v777_v35, %v776_v34 }
 0x3e1   : > { %v779_v37 = vrot.slane %v778_v36, 2 }
 0x3e3   : > { %v780_v38 = vadd.f32 %v779_v37, %v778_v36 }
 0x3e5   : > { %v781_v39 = vrot.slane %v780_v38, 1 }
 0x3e7   : > { %v782_v40 = vadd.f32 %v781_v39, %v780_v38 }
 0x3e9   : > { %v789_v20 = vmul.f32 %v1270_v41, %v782_v40 }
 0x3eb   : > { %v790_v42 = vpack.c.bf16 %v789_v20, %v789_v20 }
 0x3ed   : > { %1227 = vmatmul.mubr.msk.bf16.vlgmr.msra.gmra.mrb[8].mxu0 %vm445_vm3, %v790_v42 }
 0x426   : > { %v940_v43 = vpop.f32.mrb[8].mxu1 }
 0x427   : > { %1271 = vtanh.f32 %v940_v43  ;;  %v1236_v44 = vpop.f32.mrb[9].mxu1 }
 0x428   : > { %v943_v45 = vpop.f32.mrb[10].mxu1 }
 0x429   : > { %v1237_v46 = vpop.f32.mrb[11].mxu1 }
 0x431   : > { %v1272_v47 = vpop.eup %1271 }
 0x432   : > { %v950_v48 = vrot.slane %v1272_v47, %v1419_v32 }
 0x434   : > { %v952_v49 = vmul.f32 %v950_v48, %v750_v2  ;;  %v951_v50 = vmul.f32 %v950_v48, %v749_v62 }
 0x436   : > { %v956_v21 = vsel %vm752_vm14, %v952_v49, 0.0  ;;  %v953_v51 = vsel %vm445_vm3, %v951_v50, 0.0 }
 0x437   : > { %957 = vadd.xlane.f32.xlu1 %v956_v21  ;;  %954 = vadd.xlane.f32.xlu0 %v953_v51 }
 0x4c0   : > { %v830_v52 = vpop.f32.mrb[8].mxu0 }
 0x4c1   : > { %1273 = vtanh.f32 %v830_v52  ;;  %v1228_v53 = vpop.f32.mrb[9].mxu0 }
 0x4c2   : > { %v833_v54 = vpop.f32.mrb[10].mxu0 }
 0x4c3   : > { %v1229_v55 = vpop.f32.mrb[11].mxu0 }
 0x4c4   : > { %v958_v56 = vpop.xlane.xlu1 %957  ;;  %v955_v57 = vpop.xlane.xlu0 %954 }
 0x4c5   : > { %v1172_v58 = vmul.f32 -1.442695, %v958_v56  ;;  %v1171_v59 = vmul.f32 -1.442695, %v955_v57 }
 0x4c7   : > { %1275 = vpow2.f32 %v1172_v58 }
 0x4c8   : > { %1277 = vpow2.f32 %v1171_v59 }
 0x4cb   : > { %v1274_v60 = vpop.eup %1273 }
 0x4cc   : > { %v840_v61 = vrot.slane %v1274_v60, %v1419_v32 }
 0x4ce   : > { %v841_v62 = vmul.f32 %v840_v61, %v633_v22  ;;  %v842_v0 = vmul.f32 %v840_v61, %v634_v27 }
 0x4d0   : > { %v843_v63 = vsel %vm445_vm3, %v841_v62, 0.0  ;;  %v846_v7 = vsel %vm752_vm14, %v842_v0, 0.0 }
 0x4d1   : > { %v1276_v2 = vpop.eup %1275  ;;  %844 = vadd.xlane.f32.xlu0 %v843_v63 }
 0x4d2   : > { %v1278_v4 = vpop.eup %1277  ;;  %v966_v3 = vadd.f32 1.0, %v1276_v2 }
 0x4d3   : > { %v965_v6 = vadd.f32 1.0, %v1278_v4 }
 0x4d4   : > { %1279 = vrcp.f32 %v966_v3 }
 0x4d5   : > { %1281 = vrcp.f32 %v965_v6  ;;  %847 = vadd.xlane.f32.xlu0 %v846_v7 }
 0x4de   : > { %v1280_v8 = vpop.eup %1279 }
 0x4df   : > { %v1282_v9 = vpop.eup %1281  ;;  %v972_v10 = vmul.f32 %v1280_v8, %v1468_v5 }
 0x4e0   : > { %v971_v32 = vmul.f32 %v1282_v9, %v1463_v1 }
 0x4e1   : > { %v974_v11 = vsel %vm752_vm14, %v972_v10, 0.0 }
 0x4e2   : > { %v973_v12 = vsel %vm445_vm3, %v971_v32, 0.0 }
 0x4e3   : > { %v975_v13 = vadd.f32 %v974_v11, %v973_v12 }
 0x4e5   : > { %v976_v14 = vrot.slane %v975_v13, 4 }
 0x4e7   : > { %v977_v15 = vadd.f32 %v976_v14, %v975_v13 }
 0x4e9   : > { %v978_v16 = vrot.slane %v977_v15, 2 }
 0x4eb   : > { %v979_v17 = vadd.f32 %v978_v16, %v977_v15 }
 0x4ed   : > { %v980_v18 = vrot.slane %v979_v17, 1 }
 0x4ef   : > { %v981_v19 = vadd.f32 %v980_v18, %v979_v17 }
 0x4f1   : > { %983 = vrot.lane.b32.xlu1 %v981_v19, %s1303_s19 }
 0x55e   : > { %v845_v22 = vpop.xlane.xlu0 %844 }
 0x55f   : > { %v1168_v23 = vmul.f32 -1.442695, %v845_v22 }
 0x561   : > { %1283 = vpow2.f32 %v1168_v23 }
 0x562   : > { %v848_v24 = vpop.xlane.xlu0 %847 }
 0x563   : > { %v1169_v5 = vmul.f32 -1.442695, %v848_v24  ;;  %v984_v42 = vpop.permute.xlu1 %983 }
 0x565   : > { %1285 = vpow2.f32 %v1169_v5 }
 0x56b   : > { %v1284_v1 = vpop.eup %1283 }
 0x56c   : > { %v855_v25 = vadd.f32 1.0, %v1284_v1 }
 0x56e   : > { %1287 = vrcp.f32 %v855_v25 }
 0x56f   : > { %v1286_v27 = vpop.eup %1285 }
 0x570   : > { %v856_v28 = vadd.f32 1.0, %v1286_v27 }
 0x572   : > { %1289 = vrcp.f32 %v856_v28 }
 0x578   : > { %v1288_v30 = vpop.eup %1287 }
 0x579   : > { %v861_v31 = vmul.f32 %v1288_v30, %v1478_v26 }
 0x57b   : > { %v863_v35 = vsel %vm445_vm3, %v861_v31, 0.0 }
 0x57c   : > { %v1290_v33 = vpop.eup %1289 }
 0x57d   : > { %v862_v34 = vmul.f32 %v1290_v33, %v1481_v29 }
 0x57f   : > { %v864_v36 = vsel %vm752_vm14, %v862_v34, 0.0 }
 0x580   : > { %v865_v37 = vadd.f32 %v864_v36, %v863_v35 }
 0x582   : > { %v866_v38 = vrot.slane %v865_v37, 4 }
 0x584   : > { %v867_v39 = vadd.f32 %v866_v38, %v865_v37 }
 0x586   : > { %v868_v40 = vrot.slane %v867_v39, 2 }
 0x588   : > { %v869_v41 = vadd.f32 %v868_v40, %v867_v39 }
 0x58a   : > { %v870_v20 = vrot.slane %v869_v41, 1 }
 0x58c   : > { %v871_v26 = vadd.f32 %v870_v20, %v869_v41 }
 0x58e   : > { %873 = vst.msk [vmem:[%s427_s14] sm:$0x1] %vm872_vm15, %v871_v26 }
 0x58f   : > { %987 = vst.msk [vmem:[%s427_s14] sm:$0x1] %vm986_vm0, %v984_v42 }
 0x590 PF: > { %s20_s30 = sadd.s32 1, %s1297_s30  }
 0x591   : > { %p17_p4 = scmp.ge.s32.totalorder %s20_s30, 4  }
 0x593   :  { %19 = sbr.rel (!%p17_p4) target bundleno = 1 (0x1), region = 114 }

// kernel: model_forward.11
= control target key start
LH: loop header
LB: loop body
LE: loop exit
PB: predicated region body
PF: predicated region fallthrough
CT: control target
= control target key end

     0   :  { %s2636_s0 = inlined_call_operand.vmem [shape: f32[4,11,32], index: 0, kind: input, shape index: {}]   ;;  %s2637_s1 = inlined_call_operand.vmem [shape: f32[4,13,11], index: 1, kind: input, shape index: {}]   ;;  %s2638_s2 = inlined_call_operand.vmem [shape: f32[4,11,1], index: 2, kind: input, shape index: {}]   ;;  %s2639_s3 = inlined_call_operand.vmem [shape: f32[4,1,11], index: 3, kind: input, shape index: {}]   ;;  %s2640_s4 = inlined_call_operand.vmem [shape: f32[32,32], index: 4, kind: input, shape index: {}]   ;;  %s2641_s5 = inlined_call_operand.vmem [shape: f32[1,32], index: 5, kind: input, shape index: {}]   ;;  %s2642_s6 = inlined_call_operand.vmem [shape: f32[1,32], index: 6, kind: input, shape index: {}]   ;;  %s2643_s7 = inlined_call_operand.hbm [shape: f32[4,11,11], index: 7, kind: output, shape index: {0}]   ;;  %s2644_s8 = inlined_call_operand.hbm [shape: f32[4,11,32], index: 8, kind: output, shape index: {1}]   ;;  %s2645_s9 = inlined_call_operand.vmem [shape: f32[4,11,1], index: 9, kind: output, shape index: {2}]  }
   0x1   :  { %2646 = sst [smem:[#allocation8_spill]] %s2636_s0 }
   0x2   :  { %2647 = sst [smem:[#allocation9_spill]] %s2637_s1 }
   0x3   :  { %2648 = sst [smem:[#allocation10_spill]] %s2638_s2 }
   0x4   :  { %15 = vsyncpa [#allocation3], 0 }
   0x5   :  { %17 = vsyncpa [#allocation3 + $0x1], 0 }
   0x6   :  { %18 = vsyncpa [#allocation5], 0 }
   0x7   :  { %20 = vsyncpa [#allocation5 + $0x1], 0  ;;  %s2243_s30 = smov 0   ;;  %s2245_s10 = smov 0  }
   0x8   :  { %s2247_s11 = smov 0   ;;  %s2249_s12 = smov 0  }
   0x9 LB: > { %s2264_s13 = sadd.s32 4294967295, %s2182_s12   ;;  %s1887_s14 = sadd.s32 4294967294, %s2182_s12   ;;  %s2182_s12 = sphi %s2249_s12, %s2657_s12   ;;  %s2178_s11 = sphi %s2247_s11, %s2656_s11   ;;  %s2174_s10 = sphi %s2245_s10, %s2655_s10   ;;  %s2170_s30 = sphi %s2243_s30, %s2654_s30  }
   0xa   : > { %s2268_s15 = sadd.s32 1, %s2182_s12   ;;  %s200_s16 = sadd.s32 1, %s2178_s11 }
   0xb   : > { %s197_s17 = ssub.s32 %s2182_s12, %s2268_s15  ;;  %p210_p0 = scmp.ne.s32.totalorder %s2178_s11, %s2174_s10 }
   0xc   : > { %p198_p1 = scmp.eq.s32.totalorder %s197_s17, 0  ;;  %p211_p2 = scmp.eq.s32.totalorder %s2264_s13, 1 }
   0xd   : > { %p216_p3 = scmp.ne.s32.totalorder %s2174_s10, %s2170_s30  ;;  %p217_p4 = scmp.eq.s32.totalorder %s1887_s14, 1 }
   0xe   : > { %s2279_s18 = scalar_select %p198_p1, %s2178_s11, %s200_s16  }
   0xf   : > { %p2281_p5 = por %p211_p2, %p210_p0  ;;  %p2285_p6 = por %p217_p4, %p216_p3 }
  0x10   : > { %p1890_p7 = scmp.ge.s32.totalorder %s2182_s12, 1  ;;  %p334_p8 = scmp.lt.s32.totalorder %s2182_s12, 3 }
  0x12   : > { %p335_p9 = pnand %p1890_p7, %p334_p8 }
  0x13   : > { %s1893_s21 = sshll.u32 (!%p335_p9), %s2264_s13, 1  ;;  %v2184_v0 = vmov (!%p335_p9), 0.0   ;;  %vm470_vm0 = vcmask (!%p335_p9), 1045504   ;;  %vm1264_vm1 = vcmask (!%p335_p9), 1044480   ;;  %v2185_v1 = vmov (!%p335_p9), 65535   ;;  %s2651_s1 = sld [smem:[#allocation9_spill]] (!%p335_p9) }
  0x14   : > { %338 = sbr.rel (%p335_p9) target bundleno = 1273 (0x4f9), region = 48  ;;  %p399_p10 = scmp.lt.s32.totalorder (!%p335_p9), %s1893_s21, 3  ;;  %1967 = vmatprep.subr.bf16.mxu0 (!%p335_p9), %v2184_v0  ;;  %1973 = vmatprep.subr.bf16.mxu1 (!%p335_p9), %v2184_v0  ;;  %v1265_v2 = vsel (!%p335_p9), %vm1264_vm1, 4294967295, %v2185_v1  ;;  %vm2186_vm2 = vmmov (!%p335_p9), 0   ;;  %vm471_vm3 = vcmask (!%p335_p9), 1046528   ;;  %v472_v4 = vsel (!%p335_p9), %vm470_vm0, 4294967295, %v2185_v1 }
  0x15   : > { %v2296_v3 = vsel (!%p335_p9), %vm470_vm0, %v1265_v2, 0  ;;  %1969 = vmatprep.mubr.msk.bf16.mxu0 (!%p335_p9), %vm2186_vm2, %v2184_v0  ;;  %1975 = vmatprep.mubr.msk.bf16.mxu1 (!%p335_p9), %vm2186_vm2, %v2184_v0  ;;  %v2187_v5 = vmov (!%p335_p9), 0   ;;  %v627_v6 = vld [vmem:[%s2640_s4] sm:$0xff] (!%p335_p9)  ;;  %v628_v7 = vld [vmem:[%s2640_s4 + $0x8] sm:$0xff] (!%p335_p9)  ;;  %v473_v10 = vsel (!%p335_p9), %vm471_vm3, %v472_v4, 0  ;;  %s2652_s2 = sld [smem:[#allocation10_spill]] (!%p335_p9)  ;;  %v603_v22 = vlaneseq (!%p335_p9) }
  0x16   : > { %2074 = vset.pattern.permute.xlu1 (!%p335_p9), %v2187_v5  ;;  %v2319_v14 = vpack.c.bf16 (!%p335_p9), %v628_v7, %v627_v6  ;;  %v2188_v23 = vmov (!%p335_p9), 1966171168   ;;  %s2653_s0 = sld [smem:[#allocation8_spill]] (!%p335_p9)  ;;  %vm466_vm4 = vcmask (!%p335_p9), 105472   ;;  %vm838_vm5 = vcmask (!%p335_p9), 261120   ;;  %s2379_s23 = sand.u32 (!%p335_p9), 1, %s2174_s10  }
  0x17   : > { %v641_v24 = vunpack.c.l.s4 (!%p335_p9), %v2188_v23  ;;  %v2327_v25 = vshrl.u32 (!%p335_p9), %v603_v22, 7  ;;  %s1891_s24 = sshll.u32 (!%p335_p9), %s2379_s23, 5  ;;  %vm621_vm6 = vcmask (!%p335_p9), 89088   ;;  %vm623_vm7 = vcmask (!%p335_p9), 83968  }
  0x18   : > { %vm1667_vm12 = vcmask (!%p335_p9), 256000   ;;  %s389_s29 = scalar_lea.vmem (!%p335_p9), [#allocation4], %s1891_s24 }
  0x19   : > { %v642_v26 = vunpack.c.0.s8 (!%p335_p9), %v641_v24  ;;  %s1730_s16 = sshll.u32 (!%p335_p9), %s389_s29, 4  ;;  %s2548_s16 = int_to_ptr.vmem [resolvable:$true] %s1730_s16 }
  0x1b   : > { %s2659_s21 = smov (!%p399_p10, %s1893_s21), 3  ;;  %v2330_v29 = vsub.s32 %v642_v26, %v2327_v25 }
  0x1c   : > { %s2303_s22 = sshll.u32 %s2659_s21, 4 }
  0x1d   : > { %s410_s25 = scalar_lea.vmem %s2651_s1, %s2303_s22  ;;  %s417_s17 = scalar_lea.vmem %s2652_s2, %s2303_s22 }
  0x1e   : > { %v438_v8 = vld [vmem:[%s410_s25] sm:$0xff]  ;;  %v439_v9 = vld [vmem:[%s410_s25 + $0x8] sm:$0x1f]  ;;  %v440_v12 = vld [vmem:[%s410_s25 + $0x10] sm:$0xff]  ;;  %s2189_s1 = smov [#allocation2]  }
  0x1f   : > { %v448_v11 = vpack.c.bf16 %v439_v9, %v438_v8  ;;  %v441_v13 = vld [vmem:[%s410_s25 + $0x18] sm:$0x1f]  ;;  %v442_v15 = vld [vmem:[%s417_s17] sm:$0xff]  ;;  %v443_v19 = vld [vmem:[%s417_s17 + $0x8] sm:$0x7]  ;;  %s403_s25 = scalar_lea.vmem %s2653_s0, %s2303_s22  ;;  %s2092_s2 = sshll.u32 %s2189_s1, 4  ;;  %s2093_s2 = int_to_ptr.vmem [resolvable:$false] %s2092_s2 }
  0x20   : > { %v449_v16 = vpack.c.bf16 %v441_v13, %v440_v12  ;;  %583 = vperm.xlu1 %2074, %v442_v15   ;;  %v445_v20 = vld [vmem:[%s417_s17 + $0x18] sm:$0x7]  ;;  %v444_v21 = vld [vmem:[%s417_s17 + $0x10] sm:$0xff]  ;;  %v435_v31 = vld [vmem:[%s403_s25 + $0x8] sm:$0x7]  ;;  %s422_s17 = scalar_lea.vmem %s2639_s3, %s2659_s21  ;;  %s2406_s21 = scalar_lea.vmem [#allocation2], %s1891_s24 }
  0x21   : > { %450 = vxpose.xlu0.c.b16.start.end [1/1] (short) (narrow) %v448_v11, 16  ;;  %v475_v17 = vand.u32 %v473_v10, %v448_v11  ;;  %v436_v27 = vld [vmem:[%s403_s25 + $0x10] sm:$0xff]  ;;  %v437_v28 = vld [vmem:[%s403_s25 + $0x18] sm:$0x7]  ;;  %v434_v32 = vld [vmem:[%s403_s25] sm:$0xff]  ;;  %v1908_v33 = vpack.c.bf16 %v435_v31, %v435_v31  ;;  %s1713_s14 = sshll.u32 %s2406_s21, 4  ;;  %s2546_s14 = int_to_ptr.vmem [resolvable:$true] %s1713_s14 }
  0x22   : > { %v538_v18 = vand.u32 %v473_v10, %v449_v16  ;;  %v634_v30 = vpack.c.bf16 %v437_v28, %v436_v27  ;;  %v633_v35 = vpack.c.bf16 %v435_v31, %v434_v32  ;;  %v1909_v47 = vpack.c.bf16 %v437_v28, %v437_v28  ;;  %p2095_p0 = scmp.lt.s32.totalorder %s2546_s14, %s2093_s2 }
  0x23   : > { %1968 = vmatpush3.bf16.msra.mxu0 %v475_v17  ;;  %v653_v37 = vrot.slane %v1908_v33, %v2330_v29  ;;  %v629_v17 = vld [vmem:[%s2640_s4 + $0x10] sm:$0xff]  ;;  %v2374_v28 = vsub.s32 0, %v2327_v25  ;;  %v2385_v33 = vld [vmem:[%s422_s17 + $0x1] sm:$0x1] }
  0x24   : > { %1979 = vmatprep.subr.bf16.mxu0 %v2319_v14  ;;  %1974 = vmatpush3.bf16.msra.mxu1 %v538_v18  ;;  %v693_v34 = vrot.slane %v634_v30, %v2330_v29  ;;  %v646_v38 = vrot.slane %v633_v35, %v2330_v29  ;;  %v700_v54 = vrot.slane %v1909_v47, %v2330_v29  ;;  %v630_v18 = vld [vmem:[%s2640_s4 + $0x18] sm:$0xff]  ;;  %v2376_v30 = vld [vmem:[%s422_s17] sm:$0x1]  ;;  %s1944_s17 = sshll.u32 %s2264_s13, 9  ;;  %s2094_s13 = scalar_lea.vmem %s2093_s2, 1024 }
  0x25   : > { %518 = vxpose.xlu0.c.b16.start.end [1/1] (short) (narrow) %v449_v16, 16  ;;  %588 = vperm.xlu1 %2074, %v443_v19   ;;  %v655_v39 = vcombine.high %v653_v37, %v653_v37  ;;  %v669_v49 = vrot.slane %v653_v37, %v2330_v29  ;;  %v636_v22 = vpack.c.bf16 %v630_v18, %v629_v17  ;;  %s2554_s26 = scalar_lea.hbm %s2643_s7, %s1944_s17  ;;  %s2559_s0 = scalar_lea.hbm %s2644_s8, %s1944_s17 }
  0x26   : > { %1987 = vmatprep.subr.bf16.mxu1 %v2184_v0  ;;  %v701_v36 = vcombine.high %v693_v34, %v693_v34  ;;  %v709_v40 = vrot.slane %v693_v34, %v2330_v29  ;;  %v654_v42 = vcombine.high %v646_v38, %v646_v38  ;;  %v662_v48 = vrot.slane %v646_v38, %v2330_v29 }
  0x27   : > { %v683_v43 = vrot.slane %v655_v39, %v2330_v29  ;;  %v702_v61 = vcombine.high %v700_v54, %v700_v54  ;;  %v716_v62 = vrot.slane %v700_v54, %v2330_v29  ;;  %v606_v31 = vrot.slane %v2376_v30, %v2374_v28 }
  0x28   : > { %v723_v41 = vrot.slane %v701_v36, %v2330_v29  ;;  %v731_v44 = vcombine.high %v709_v40, %v709_v40  ;;  %v745_v45 = vunpack.i.h.s16 %v709_v40  ;;  %v676_v50 = vrot.slane %v654_v42, %v2330_v29 }
  0x29   : > { %598 = vperm.xlu1 %2074, %v445_v20   ;;  %v1910_v51 = vpack.i.b16 %v709_v40, %v683_v43  ;;  %v730_v6 = vrot.slane %v702_v61, %v2330_v29  ;;  %v753_v7 = vunpack.i.h.s16 %v716_v62  ;;  %v2393_v25 = vrot.slane %v2385_v33, %v2374_v28 }
  0x2a   : > { %v747_v46 = vunpack.i.h.s16 %v723_v41  ;;  %v1911_v52 = vpack.i.b16 %v723_v41, %v745_v45  ;;  %v732_v55 = vcombine.high %v723_v41, %v723_v41  ;;  %v766_v56 = vcombine.low %v662_v48, %v676_v50 }
  0x2b   : > { %v1916_v57 = vcombine.high %v662_v48, %v676_v50  ;;  %v768_v58 = vcombine.low %v669_v49, %v1910_v51  ;;  %v749_v60 = vunpack.i.h.s16 %v731_v44  ;;  %v1915_v12 = vpack.i.b16 %v730_v6, %v753_v7 }
  0x2c   : > { %v1912_v53 = vpack.i.b16 %v731_v44, %v747_v46  ;;  %v751_v63 = vunpack.i.h.s16 %v732_v55  ;;  %v776_v1 = vrot.slane %v766_v56, %v2330_v29 }
  0x2d   : > { %v783_v2 = vrot.slane %v1916_v57, %v2330_v29  ;;  %v790_v4 = vrot.slane %v768_v58, %v2330_v29  ;;  %v1913_v8 = vpack.i.b16 %v732_v55, %v749_v60  ;;  %v829_v20 = vrot.slane %v1915_v12, %v2330_v29 }
  0x2e   : > { %2075 = vset.pattern.permute.xlu0 %v2187_v5  ;;  %v769_v59 = vcombine.low %v1911_v52, %v1912_v53  ;;  %v1914_v9 = vpack.i.b16 %v716_v62, %v751_v63 }
  0x2f   : > { %593 = vperm.xlu0 %2075, %v444_v21   ;;  %v798_v10 = vcombine.low %v776_v1, %v783_v2 }
  0x30   : > { %v797_v5 = vrot.slane %v769_v59, %v2330_v29  ;;  %v815_v13 = vcombine.low %v1913_v8, %v1914_v9 }
  0x31   : > { %v806_v15 = vrot.slane %v798_v10, %v2330_v29 }
  0x32   : > { %v799_v11 = vcombine.low %v790_v4, %v797_v5  ;;  %v822_v19 = vrot.slane %v815_v13, %v2330_v29 }
  0x34   : > { %v813_v16 = vrot.slane %v799_v11, %v2330_v29  ;;  %v830_v24 = vcombine.low %v822_v19, %v829_v20 }
  0x36   : > { %v814_v21 = vcombine.low %v806_v15, %v813_v16  ;;  %v837_v27 = vrot.slane %v830_v24, %v2330_v29 }
  0x87   : > { %v458_v23 = vpop.trf.xlu0 }
  0x88   : > { %1970 = vmatmul.mubr.msk.bf16.vlgmr.msra.gmra.mrb[0].mxu0 %vm466_vm4, %v458_v23 }
  0x89   : > { %1980 = vmatpush3.bf16.msra.mxu0 %v2319_v14  ;;  %1983 = vmatprep.mubr.msk.bf16.mxu0 %vm838_vm5, %v814_v21 }
  0x8a   : > { %1981 = vmatprep.subr.bf16.mxu0 %v636_v22 }
  0x8b   : > { %v526_v26 = vpop.trf.xlu0 }
  0x8c   : > { %1976 = vmatmul.mubr.msk.bf16.vlgmr.msra.gmra.mrb[0].mxu1 %vm466_vm4, %v526_v26 }
  0x8d   : > { %1982 = vmatpush3.bf16.msra.mxu0 %v636_v22  ;;  %1989 = vmatprep.mubr.msk.bf16.mxu1 %vm2186_vm2, %v2184_v0 }
  0x8e   : > { %1993 = vmatprep.subr.bf16.mxu0 %v2184_v0 }
  0x90   : > { %1984 = vmatmul.mubr.msk.bf16.vlgmr.msra.gmra.mrb[4].mxu0 %vm838_vm5, %v837_v27 }
  0x91   : > { %1995 = vmatprep.mubr.msk.bf16.mxu0 %vm2186_vm2, %v2184_v0 }
  0x9f   : > { %v2371_v14 = vpop.permute.xlu1 %583 }
  0xa0   : > { %v613_v35 = vmul.f32 %v606_v31, %v2371_v14 }
  0xa4   : > { %v2383_v32 = vpop.permute.xlu1 %588 }
  0xa5   : > { %v614_v37 = vmul.f32 %v606_v31, %v2383_v32 }
  0xa8   : > { %v2396_v38 = vpop.permute.xlu1 %598 }
  0xa9   : > { %v616_v45 = vmul.f32 %v2393_v25, %v2396_v38 }
  0xae   : > { %v2388_v34 = vpop.permute.xlu0 %593 }
  0xaf   : > { %v615_v41 = vmul.f32 %v2393_v25, %v2388_v34 }
 0x15b   : > { %v511_v36 = vpop.f32.mrb[0].mxu0 }
 0x15c   : > { %v2398_v39 = vmul.f32 %v613_v35, %v511_v36  ;;  %v1971_v40 = vpop.f32.mrb[1].mxu0 }
 0x15d   : > { %v514_v42 = vpop.f32.mrb[2].mxu0 }
 0x15e   : > { %v2402_v43 = vmul.f32 %v614_v37, %v514_v42  ;;  %v1972_v44 = vpop.f32.mrb[3].mxu0  ;;  %622 = vst.msk [vmem:[%s2406_s21] sm:$0xff] %vm621_vm6, %v2398_v39  ;;  %v1041_v47 = vsel %vm621_vm6, %v2398_v39, 0.0  ;;  %v1065_v57 = vmul.f32 %v2398_v39, %v606_v31 }
 0x15f   : > { %v574_v46 = vpop.f32.mrb[0].mxu1 }
 0x160   : > { %v2415_v48 = vmul.f32 %v615_v41, %v574_v46  ;;  %v1977_v49 = vpop.f32.mrb[1].mxu1  ;;  %v1093_v50 = vpack.c.bf16 %v2402_v43, %v2398_v39  ;;  %v1042_v51 = vsel %vm623_vm7, %v2402_v43, 0.0  ;;  %624 = vst.msk [vmem:[%s2406_s21 + $0x8] sm:$0x7] %vm623_vm7, %v2402_v43  ;;  %v1066_v62 = vmul.f32 %v2402_v43, %v606_v31 }
 0x161   : > { %v577_v52 = vpop.f32.mrb[2].mxu1  ;;  %v1043_v53 = vadd.f32 %v1042_v51, %v1041_v47  ;;  %v1069_v12 = vsel %vm621_vm6, %v1065_v57, 0.0 }
 0x162   : > { %v2424_v54 = vmul.f32 %v616_v45, %v577_v52  ;;  %v1978_v55 = vpop.f32.mrb[3].mxu1  ;;  %1245 = vxpose.xlu1.c.b16.start.end [1/1] (short) (narrow) %v1093_v50, 16  ;;  %625 = vst.msk [vmem:[%s2406_s21 + $0x10] sm:$0xff] %vm621_vm6, %v2415_v48  ;;  %v1050_v59 = vsel %vm621_vm6, %v2415_v48, 0.0  ;;  %v1072_v20 = vsel %vm623_vm7, %v1066_v62, 0.0  ;;  %v1067_v36 = vmul.f32 %v2415_v48, %v2393_v25 }
 0x163   : > { %v1044_v56 = vrot.slane %v1043_v53, 4  ;;  %v1985_v58 = vpop.f32.mrb[4].mxu0 }
 0x164   : > { %v1094_v60 = vpack.c.bf16 %v2424_v54, %v2415_v48  ;;  %v1051_v61 = vsel %vm623_vm7, %v2424_v54, 0.0  ;;  %v879_v63 = vpop.f32.mrb[5].mxu0  ;;  %626 = vst.msk [vmem:[%s2406_s21 + $0x18] sm:$0x7] %vm623_vm7, %v2424_v54  ;;  %v994_v4 = vcombine.high %v1985_v58, %v1985_v58  ;;  %v1001_v5 = vrot.slane %v1985_v58, %v2330_v29  ;;  %s1688_s21 = scalar_lea.sflag [#allocation3], %s2379_s23 }
 0x165   : > { %v1052_v1 = vadd.f32 %v1051_v61, %v1050_v59  ;;  %v1045_v2 = vadd.f32 %v1044_v56, %v1043_v53  ;;  %v1986_v6 = vpop.f32.mrb[6].mxu0  ;;  %v896_v7 = vcombine.high %v879_v63, %v879_v63  ;;  %v903_v8 = vrot.slane %v879_v63, %v2330_v29 }
 0x166   : > { %1311 = vxpose.xlu0.c.b16.start.end [1/1] (short) (narrow) %v1094_v60, 16  ;;  %v882_v9 = vpop.f32.mrb[7].mxu0  ;;  %v1009_v13 = vcombine.high %v1001_v5, %v1001_v5  ;;  %v1068_v15 = vmul.f32 %v2424_v54, %v2393_v25  ;;  %v1008_v16 = vrot.slane %v994_v4, %v2330_v29  ;;  %v2450_v23 = vrot.slane %v1001_v5, %v2330_v29 }
 0x167   : > { %v1053_v10 = vrot.slane %v1052_v1, 4  ;;  %v1046_v11 = vrot.slane %v1045_v2, 2  ;;  %v910_v17 = vrot.slane %v896_v7, %v2330_v29  ;;  %v911_v18 = vcombine.high %v903_v8, %v903_v8 }
 0x168   : > { %v919_v22 = vrot.slane %v903_v8, %v2330_v29  ;;  %v1031_v24 = vrot.slane %v1009_v13, %v2330_v29  ;;  %v1078_v40 = vsel %vm623_vm7, %v1068_v15, 0.0  ;;  %v1010_v41 = vcombine.high %v1008_v16, %v1008_v16 }
 0x169   : > { %v1054_v19 = vadd.f32 %v1053_v10, %v1052_v1  ;;  %v1047_v21 = vadd.f32 %v1046_v11, %v1045_v2  ;;  %v912_v26 = vcombine.high %v910_v17, %v910_v17  ;;  %v926_v27 = vrot.slane %v910_v17, %v2330_v29 }
 0x16a   : > { %v933_v37 = vrot.slane %v911_v18, %v2330_v29  ;;  %v1024_v42 = vrot.slane %v1008_v16, %v2330_v29  ;;  %v945_v49 = vcombine.high %v882_v9, %v882_v9  ;;  %v1039_v50 = vcombine.high %v2450_v23, %v2450_v23 }
 0x16b   : > { %v1055_v31 = vrot.slane %v1054_v19, 2  ;;  %v1048_v35 = vrot.slane %v1047_v21, 1  ;;  %v940_v44 = vrot.slane %v912_v26, %v2330_v29  ;;  %v1040_v51 = vcombine.high %v1031_v24, %v1031_v24 }
 0x16c   : > { %v1095_v47 = vcombine.low %v919_v22, %v933_v37  ;;  %v1919_v52 = vcombine.high %v919_v22, %v933_v37  ;;  %v1038_v58 = vrot.slane %v1010_v41, %v2330_v29  ;;  %v952_v61 = vrot.slane %v882_v9, %v2330_v29 }
 0x16d   : > { %v1056_v45 = vadd.f32 %v1055_v31, %v1054_v19  ;;  %v1049_v46 = vadd.f32 %v1048_v35, %v1047_v21  ;;  %v1097_v53 = vcombine.low %v926_v27, %v940_v44  ;;  %v1920_v56 = vcombine.high %v926_v27, %v940_v44 }
 0x16e   : > { %v1105_v57 = vrot.slane %v1095_v47, %v2330_v29  ;;  %v1112_v59 = vrot.slane %v1919_v52, %v2330_v29  ;;  %v959_v1 = vrot.slane %v945_v49, %v2330_v29  ;;  %v1216_v2 = vcombine.low %v1040_v51, %v1024_v42 }
 0x16f   : > { %v1057_v25 = vrot.slane %v1056_v45, 1  ;;  %1073 = vadd.xlane.f32.xlu1 %v1072_v20  ;;  %v1059_v55 = vmax.f32 %v1049_v46, 1e-09  ;;  %v1119_v60 = vrot.slane %v1097_v53, %v2330_v29  ;;  %v1126_v63 = vrot.slane %v1920_v56, %v2330_v29 }
 0x170   : > { %v1127_v4 = vcombine.low %v1105_v57, %v1112_v59  ;;  %v960_v5 = vcombine.high %v952_v61, %v952_v61  ;;  %v968_v6 = vrot.slane %v952_v61, %v2330_v29  ;;  %v961_v10 = vcombine.high %v959_v1, %v959_v1 }
 0x171   : > { %v1058_v62 = vadd.f32 %v1057_v25, %v1056_v45  ;;  %2076 = vrcp.f32 %v1059_v55  ;;  %v1128_v8 = vcombine.low %v1119_v60, %v1126_v63  ;;  %v975_v11 = vrot.slane %v959_v1, %v2330_v29 }
 0x172   : > { %v1075_v9 = vsel %vm621_vm6, %v1067_v36, 0.0  ;;  %v1170_v13 = vcombine.low %v1031_v24, %v1039_v50  ;;  %v982_v15 = vrot.slane %v960_v5, %v2330_v29  ;;  %v990_v16 = vcombine.high %v968_v6, %v968_v6 }
 0x173   : > { %v1060_v7 = vmax.f32 %v1058_v62, 1e-09  ;;  %1070 = vadd.xlane.f32.xlu0 %v1069_v12  ;;  %1079 = vadd.xlane.f32.xlu1 %v1078_v40  ;;  %v1135_v17 = vrot.slane %v1127_v4, %v2330_v29  ;;  %v989_v18 = vrot.slane %v961_v10, %v2330_v29  ;;  %v991_v19 = vcombine.high %v975_v11, %v975_v11 }
 0x174   : > { %v992_v20 = vcombine.high %v982_v15, %v982_v15  ;;  %v1144_v21 = vcombine.low %v968_v6, %v982_v15  ;;  %v1158_v12 = vrot.slane %v990_v16, %v2330_v29  ;;  %v1142_v22 = vrot.slane %v1128_v8, %v2330_v29 }
 0x175   : > { %2078 = vrcp.f32 %v1060_v7  ;;  %v1223_v26 = vrot.slane %v1216_v2, %v2330_v29  ;;  %v1230_v24 = vrot.slane %v1038_v58, %v2330_v29  ;;  %v993_v27 = vcombine.high %v989_v18, %v989_v18 }
 0x176   : > { %v1168_v31 = vcombine.low %v989_v18, %v991_v19  ;;  %v1151_v35 = vrot.slane %v1144_v21, %v2330_v29  ;;  %v1167_v36 = vcombine.low %v992_v20, %v975_v11  ;;  %v1198_v37 = vrot.slane %v1170_v13, %v2330_v29 }
 0x177   : > { %1076 = vadd.xlane.f32.xlu0 %v1075_v9  ;;  %v1169_v40 = vcombine.low %v993_v27, %v2450_v23  ;;  %v1143_v45 = vcombine.low %v1135_v17, %v1142_v22  ;;  %v1231_v47 = vcombine.low %v1223_v26, %v1230_v24 }
 0x178   : > { %v1184_v41 = vrot.slane %v1168_v31, %v2330_v29  ;;  %v1159_v42 = vcombine.low %v1151_v35, %v1158_v12  ;;  %v1177_v44 = vrot.slane %v1167_v36, %v2330_v29 }
 0x179   : > { %v1191_v49 = vrot.slane %v1169_v40, %v2330_v29  ;;  %v1238_v60 = vrot.slane %v1231_v47, %v2330_v29 }
 0x17a   : > { %v1199_v52 = vcombine.low %v1177_v44, %v1184_v41  ;;  %v1166_v53 = vrot.slane %v1159_v42, %v2330_v29  ;;  %v1925_v41 = vld [vmem:[%s2641_s5] ss:$0 sm:$0xff] }
 0x17b   : > { %v2077_v46 = vpop.eup %2076  ;;  %v1200_v25 = vcombine.low %v1191_v49, %v1198_v37 }
 0x17c   : > { %v1520_v50 = vmul.f32 %v2077_v46, %v2398_v39  ;;  %v1521_v51 = vmul.f32 %v2077_v46, %v2402_v43  ;;  %v1374_v23 = vmul.f32 %v2077_v46, %v2376_v30  ;;  %v1243_v56 = vpack.c.bf16 %v1166_v53, %v1143_v45 }
 0x17d   : > { %v1207_v57 = vrot.slane %v1199_v52, %v2330_v29  ;;  %v1214_v59 = vrot.slane %v1200_v25, %v2330_v29 }
 0x17e   : > { %v1524_v55 = vpack.c.bf16 %v1521_v51, %v1520_v50  ;;  %v1381_v61 = vrot.slane %v1374_v23, %v2374_v28  ;;  %v1268_v1 = vand.u32 %v2296_v3, %v1243_v56 }
 0x17f   : > { %v2079_v58 = vpop.eup %2078  ;;  %v1215_v30 = vcombine.low %v1207_v57, %v1214_v59 }
 0x180   : > { %v1522_v62 = vmul.f32 %v2079_v58, %v2415_v48  ;;  %v1523_v63 = vmul.f32 %v2079_v58, %v2424_v54  ;;  %v1375_v2 = vmul.f32 %v2079_v58, %v2385_v33  ;;  %v1388_v4 = vmul.f32 %v1381_v61, %v2398_v39  ;;  %1988 = vmatpush3.bf16.msra.mxu1 %v1268_v1 }
 0x181   : > { %v1389_v5 = vmul.f32 %v1381_v61, %v2402_v43  ;;  %v1244_v29 = vpack.c.bf16 %v1238_v60, %v1215_v30  ;;  %1999 = vmatprep.subr.bf16.mxu1 %v2184_v0 }
 0x182   : > { %v1525_v6 = vpack.c.bf16 %v1523_v63, %v1522_v62  ;;  %v1385_v7 = vrot.slane %v1375_v2, %v2374_v28 }
 0x183   : > { %v1392_v8 = vpack.c.bf16 %v1389_v5, %v1388_v4  ;;  %v1331_v9 = vand.u32 %v2296_v3, %v1244_v29 }
 0x184   : > { %v1390_v10 = vmul.f32 %v1385_v7, %v2415_v48  ;;  %v1391_v11 = vmul.f32 %v1385_v7, %v2424_v54 }
 0x185   : > { %1994 = vmatpush3.bf16.msra.mxu0 %v1331_v9 }
 0x186   : > { %v1393_v33 = vpack.c.bf16 %v1391_v11, %v1390_v10  ;;  %2005 = vmatprep.subr.bf16.mxu0 %v2184_v0 }
 0x1a0   : > { %1591 = vxpose.xlu1.c.b16.start.end [1/1] (short) (narrow) %v1525_v6, 16 }
 0x1a4   : > { %1528 = vxpose.xlu0.c.b16.start.end [1/1] (short) (narrow) %v1524_v55, 16 }
 0x1c8   : > { %v1253_v39 = vpop.trf.xlu1 }
 0x1c9   : > { %1990 = vmatmul.mubr.msk.bf16.vlgmr.msra.gmra.mrb[4].mxu1 %vm621_vm6, %v1253_v39  ;;  %v1928_v39 = vld [vmem:[%s2642_s6] ss:$0 sm:$0xff] }
 0x1ca   : > { %2001 = vmatprep.mubr.msk.bf16.mxu1 %vm2186_vm2, %v2184_v0 }
 0x1cc   : > { %v1319_v28 = vpop.trf.xlu0 }
 0x1cd   : > { %1996 = vmatmul.mubr.msk.bf16.vlgmr.msra.gmra.mrb[8].mxu0 %vm621_vm6, %v1319_v28 }
 0x1ce   : > { %2007 = vmatprep.mubr.msk.bf16.mxu0 %vm2186_vm2, %v2184_v0 }
 0x1fc   : > { %v1074_v26 = vpop.xlane.xlu1 %1073 }
 0x1fd   : > { %v1082_v31 = vmax.f32 %v1074_v26, 1e-09 }
 0x200   : > { %v1071_v22 = vpop.xlane.xlu0 %1070  ;;  %v1080_v35 = vpop.xlane.xlu1 %1079 }
 0x201   : > { %v1081_v24 = vmax.f32 %v1071_v22, 1e-09  ;;  %v1084_v37 = vmax.f32 %v1080_v35, 1e-09 }
 0x203   : > { %2080 = vrcp.f32 %v1081_v24 }
 0x204   : > { %v1077_v27 = vpop.xlane.xlu0 %1076  ;;  %2082 = vrcp.f32 %v1082_v31 }
 0x205   : > { %v1083_v36 = vmax.f32 %v1077_v27, 1e-09 }
 0x207   : > { %2084 = vrcp.f32 %v1083_v36 }
 0x208   : > { %2086 = vrcp.f32 %v1084_v37 }
 0x20a   : > { %v1536_v9 = vpop.trf.xlu0 }
 0x20d   : > { %v2081_v40 = vpop.eup %2080 }
 0x20e   : > { %v2083_v45 = vpop.eup %2082 }
 0x211   : > { %v2085_v51 = vpop.eup %2084 }
 0x212   : > { %v2087_v57 = vpop.eup %2086 }
 0x29c   : > { %v1304_v43 = vpop.f32.mrb[4].mxu1 }
 0x29d   : > { %v1991_v48 = vpop.f32.mrb[5].mxu1 }
 0x29e   : > { %v1307_v54 = vpop.f32.mrb[6].mxu1 }
 0x29f   : > { %v1394_v13 = vpack.c.bf16 %v1307_v54, %v1304_v43  ;;  %v1992_v15 = vpop.f32.mrb[7].mxu1 }
 0x2a0   : > { %v1367_v16 = vpop.f32.mrb[8].mxu0 }
 0x2a1   : > { %v1400_v17 = vand.u32 %v1394_v13, %v2296_v3  ;;  %v1997_v18 = vpop.f32.mrb[9].mxu0 }
 0x2a2   : > { %v1370_v19 = vpop.f32.mrb[10].mxu0 }
 0x2a3   : > { %v1395_v20 = vpack.c.bf16 %v1370_v19, %v1367_v16  ;;  %v1998_v21 = vpop.f32.mrb[11].mxu0  ;;  %2000 = vmatpush3.bf16.msra.mxu1 %v1400_v17 }
 0x2a4   : > { %2011 = vmatprep.subr.bf16.mxu1 %v2184_v0 }
 0x2a5   : > { %v1447_v12 = vand.u32 %v1395_v20, %v2296_v3 }
 0x2a6   : > { %2002 = vmatmul.mubr.msk.bf16.vlgmr.msra.gmra.mrb[8].mxu1 %vm621_vm6, %v1392_v8 }
 0x2a7   : > { %2006 = vmatpush3.bf16.msra.mxu0 %v1447_v12  ;;  %2013 = vmatprep.mubr.msk.bf16.mxu1 %vm2186_vm2, %v2184_v0 }
 0x2a8   : > { %2017 = vmatprep.subr.bf16.mxu0 %v2184_v0 }
 0x2aa   : > { %2008 = vmatmul.mubr.msk.bf16.vlgmr.msra.gmra.mrb[12].mxu0 %vm621_vm6, %v1393_v33 }
 0x2ab   : > { %2019 = vmatprep.mubr.msk.bf16.mxu0 %vm2186_vm2, %v2184_v0 }
 0x379   : > { %v1436_v42 = vpop.f32.mrb[8].mxu1 }
 0x37a   : > { %v1490_v44 = vmul.f32 %v2081_v40, %v1436_v42  ;;  %v2003_v0 = vpop.f32.mrb[9].mxu1 }
 0x37b   : > { %v1439_v46 = vpop.f32.mrb[10].mxu1 }
 0x37c   : > { %v1500_v47 = vadd.f32 %v1925_v41, %v1490_v44  ;;  %v1491_v49 = vmul.f32 %v2083_v45, %v1439_v46  ;;  %v2004_v50 = vpop.f32.mrb[11].mxu1 }
 0x37d   : > { %v1483_v52 = vpop.f32.mrb[12].mxu0 }
 0x37e   : > { %vm1504_vm8 = vcmp.gt.f32.partialorder %v1500_v47, 0.0  ;;  %v1508_v53 = vmul.f32 0.2, %v1500_v47  ;;  %v1501_v25 = vadd.f32 %v1925_v41, %v1491_v49  ;;  %v1492_v23 = vmul.f32 %v2085_v51, %v1483_v52  ;;  %v2009_v55 = vpop.f32.mrb[13].mxu0 }
 0x37f   : > { %v1486_v56 = vpop.f32.mrb[14].mxu0 }
 0x380   : > { %v1512_v58 = vsel %vm1504_vm8, %v1500_v47, %v1508_v53  ;;  %vm1505_vm9 = vcmp.gt.f32.partialorder %v1501_v25, 0.0  ;;  %v1509_v59 = vmul.f32 0.2, %v1501_v25  ;;  %v1502_v60 = vadd.f32 %v1925_v41, %v1492_v23  ;;  %v2010_v61 = vpop.f32.mrb[15].mxu0 }
 0x381   : > { %v1493_v62 = vmul.f32 %v2087_v57, %v1486_v56  ;;  %v1516_v2 = vmul.f32 %v1512_v58, %v2371_v14 }
 0x382   : > { %v1513_v63 = vsel %vm1505_vm9, %v1501_v25, %v1509_v59  ;;  %vm1506_vm10 = vcmp.gt.f32.partialorder %v1502_v60, 0.0  ;;  %v1510_v1 = vmul.f32 0.2, %v1502_v60 }
 0x383   : > { %v1517_v30 = vmul.f32 %v1513_v63, %v2383_v32  ;;  %v1503_v4 = vadd.f32 %v1925_v41, %v1493_v62  ;;  %v1599_v32 = vpop.trf.xlu1 }
 0x384   : > { %v1514_v5 = vsel %vm1506_vm10, %v1502_v60, %v1510_v1 }
 0x385   : > { %vm1507_vm11 = vcmp.gt.f32.partialorder %v1503_v4, 0.0  ;;  %v1511_v6 = vmul.f32 0.2, %v1503_v4  ;;  %v1526_v7 = vpack.c.bf16 %v1517_v30, %v1516_v2  ;;  %v1518_v10 = vmul.f32 %v1514_v5, %v2388_v34 }
 0x387   : > { %v1515_v29 = vsel %vm1507_vm11, %v1503_v4, %v1511_v6  ;;  %v1548_v8 = vand.u32 %v1526_v7, %v2296_v3 }
 0x388   : > { %v1519_v11 = vmul.f32 %v1515_v29, %v2396_v38 }
 0x389   : > { %2012 = vmatpush3.bf16.msra.mxu1 %v1548_v8 }
 0x38a   : > { %v1527_v33 = vpack.c.bf16 %v1519_v11, %v1518_v10 }
 0x38c   : > { %v1611_v14 = vand.u32 %v1527_v33, %v2296_v3  ;;  %2014 = vmatmul.mubr.msk.bf16.vlgmr.msra.gmra.mrb[12].mxu1 %vm621_vm6, %v1536_v9 }
 0x38e   : > { %2018 = vmatpush3.bf16.msra.mxu0 %v1611_v14 }
 0x391   : > { %2020 = vmatmul.mubr.msk.bf16.vlgmr.msra.gmra.mrb[16].mxu0 %vm621_vm6, %v1599_v32 }
 0x45f   : > { %v1584_v28 = vpop.f32.mrb[12].mxu1 }
 0x460   : > { %v1660_v34 = vmul.f32 %v1928_v39, %v1584_v28  ;;  %1677 = vst.msk [vmem:[%s389_s29] sm:$0xff] %vm838_vm5, %v1584_v28  ;;  %v2015_v38 = vpop.f32.mrb[13].mxu1 }
 0x461   : > { %v1587_v43 = vpop.f32.mrb[14].mxu1 }
 0x462   : > { %v1661_v3 = vmul.f32 %v1928_v39, %v1587_v43  ;;  %1678 = vst.msk [vmem:[%s389_s29 + $0x8] sm:$0x7] %vm1667_vm12, %v1587_v43  ;;  %v2016_v48 = vpop.f32.mrb[15].mxu1  ;;  %v1664_v54 = vsel %vm838_vm5, %v1660_v34, 0.0 }
 0x463   : > { %1665 = vadd.xlane.f32.xlu0 %v1664_v54 }
 0x464   : > { %v1647_v13 = vpop.f32.mrb[16].mxu0  ;;  %v1668_v15 = vsel %vm1667_vm12, %v1661_v3, 0.0 }
 0x465   : > { %v1662_v16 = vmul.f32 %v1928_v39, %v1647_v13  ;;  %1679 = vst.msk [vmem:[%s389_s29 + $0x10] sm:$0xff] %vm838_vm5, %v1647_v13  ;;  %v2021_v17 = vpop.f32.mrb[17].mxu0  ;;  %1669 = vadd.xlane.f32.xlu1 %v1668_v15 }
 0x466   : > { %v1650_v18 = vpop.f32.mrb[18].mxu0 }
 0x467   : > { %v1663_v19 = vmul.f32 %v1928_v39, %v1650_v18  ;;  %1680 = vst.msk [vmem:[%s389_s29 + $0x18] sm:$0x7] %vm1667_vm12, %v1650_v18  ;;  %v2022_v20 = vpop.f32.mrb[19].mxu0  ;;  %v1671_v21 = vsel %vm838_vm5, %v1662_v16, 0.0  ;;  %s2088_s29 = scalar_lea.vmem %s2546_s14, 512 }
 0x468   : > { %1672 = vadd.xlane.f32.xlu0 %v1671_v21  ;;  %p2089_p11 = scmp.ne.s32.totalorder %s2546_s14, %s2088_s29  ;;  %p2096_p1 = scmp.lt.s32.totalorder %s2094_s13, %s2088_s29 }
 0x469   : > { %v1674_v12 = vsel %vm1667_vm12, %v1663_v19, 0.0 }
 0x46a   : > { %1675 = vadd.xlane.f32.xlu1 %v1674_v12  ;;  %p2090_p12 = pnand %p2089_p11, %p2281_p5  ;;  %p2097_p2 = por %p2096_p1, %p2095_p0 }
 0x46c   : > { %p2091_p13 = pneg %p2090_p12 }
 0x46e   : > { %p2098_p3 = pnand %p2097_p2, %p2091_p13 }
 0x470   : > { %2101 = shalt.err (!%p2098_p3)
}
 0x471   : > { %s2102_s17 = scalar_lea.hbm %s2554_s26, 512  ;;  %s2106_s1 = scalar_lea.hbm %s2643_s7, 1024 }
 0x472   : > { %p2103_p4 = scmp.ne.s32.totalorder %s2554_s26, %s2102_s17  ;;  %p2107_p9 = scmp.lt.u32.totalorder %s2554_s26, %s2643_s7 }
 0x473   : > { %p2108_p10 = scmp.lt.u32.totalorder %s2106_s1, %s2102_s17  ;;  %p2110_p12 = scmp.lt.u32.totalorder %s2102_s17, %s2554_s26 }
 0x474   : > { %p2104_p7 = pnand %p2103_p4, %p2281_p5 }
 0x475   : > { %p2109_p11 = por %p2108_p10, %p2107_p9 }
 0x476   : > { %p2105_p8 = pneg %p2104_p7 }
 0x477   : > { %p2111_p13 = por %p2110_p12, %p2109_p11 }
 0x479   : > { %p2112_p0 = pnand %p2111_p13, %p2105_p8 }
 0x47b   : > { %2115 = shalt.err (!%p2112_p0)
}
 0x47c   : > { %s2190_s28 = smov 128   ;;  %s2191_s29 = smov 8  }
 0x47d   : > { %2023 = dma.vmem_to_hbm [thread:$0]  (%p2281_p5), %s2546_s14, 512, %s2554_s26, %s1688_s21, %s2190_s28, %s2190_s28, %s2191_s29  }
 0x47e   : > { %s1693_s13 = scalar_lea.sflag [#allocation5], %s2379_s23  ;;  %s2116_s17 = scalar_lea.vmem %s2548_s16, 512 }
 0x47f   : > { %p2117_p1 = scmp.ne.s32.totalorder %s2548_s16, %s2116_s17  ;;  %s2192_s24 = smov [#allocation4]  }
 0x480   : > { %s2120_s25 = sshll.u32 %s2192_s24, 4  ;;  %s2121_s25 = int_to_ptr.vmem [resolvable:$false] %s2120_s25 }
 0x481   : > { %p2118_p2 = pnand %p2117_p1, %p2281_p5  ;;  %s2122_s1 = scalar_lea.vmem %s2121_s25, 1024 }
 0x482   : > { %p2123_p4 = scmp.lt.s32.totalorder %s2548_s16, %s2121_s25  ;;  %p2124_p7 = scmp.lt.s32.totalorder %s2122_s1, %s2116_s17 }
 0x483   : > { %p2119_p3 = pneg %p2118_p2 }
 0x484   : > { %p2125_p8 = por %p2124_p7, %p2123_p4 }
 0x486   : > { %p2126_p9 = pnand %p2125_p8, %p2119_p3 }
 0x488   : > { %2129 = shalt.err (!%p2126_p9)
}
 0x489   : > { %s2130_s14 = scalar_lea.hbm %s2559_s0, 512  ;;  %s2134_s27 = scalar_lea.hbm %s2644_s8, 1024 }
 0x48a   : > { %p2131_p10 = scmp.ne.s32.totalorder %s2559_s0, %s2130_s14  ;;  %p2135_p13 = scmp.lt.u32.totalorder %s2559_s0, %s2644_s8 }
 0x48b   : > { %p2136_p0 = scmp.lt.u32.totalorder %s2134_s27, %s2130_s14  ;;  %p2138_p2 = scmp.lt.u32.totalorder %s2130_s14, %s2559_s0 }
 0x48c   : > { %p2132_p11 = pnand %p2131_p10, %p2281_p5 }
 0x48d   : > { %p2137_p1 = por %p2136_p0, %p2135_p13 }
 0x48e   : > { %p2133_p12 = pneg %p2132_p11 }
 0x48f   : > { %p2139_p3 = por %p2138_p2, %p2137_p1 }
 0x491   : > { %p2140_p4 = pnand %p2139_p3, %p2133_p12 }
 0x493   : > { %2143 = shalt.err (!%p2140_p4)
}
 0x494   : > { %2024 = dma.vmem_to_hbm [thread:$0]  (%p2281_p5), %s2548_s16, 512, %s2559_s0, %s1693_s13, %s2190_s28, %s2190_s28, %s2191_s29   ;;  %vm1681_vm13 = vcmask 7168   ;;  %vm1683_vm14 = vcmask 2048  }
 0x495   : > { %s431_s1 = scalar_lea.vmem %s2645_s9, %s2303_s22 }
 0x4f0   : > { %v1666_v22 = vpop.xlane.xlu0 %1665 }
 0x4f1   : > { %1682 = vst.msk [vmem:[%s431_s1] sm:$0xff] %vm1681_vm13, %v1666_v22 }
 0x4f2   : > { %v1670_v26 = vpop.xlane.xlu1 %1669 }
 0x4f3   : > { %1684 = vst.msk [vmem:[%s431_s1 + $0x8] sm:$0x7] %vm1683_vm14, %v1670_v26 }
 0x4f5   : > { %v1673_v24 = vpop.xlane.xlu0 %1672 }
 0x4f6   : > { %1685 = vst.msk [vmem:[%s431_s1 + $0x10] sm:$0xff] %vm1681_vm13, %v1673_v24 }
 0x4f7   : > { %v1676_v27 = vpop.xlane.xlu1 %1675 }
 0x4f8   : > { %1686 = vst.msk [vmem:[%s431_s1 + $0x18] sm:$0x7] %vm1683_vm14, %v1676_v27 }
 0x4f9 PF: > { %p2034_p7 = scmp.ge.s32.totalorder %s2182_s12, 2  ;;  %s1749_s0 = sand.u32 1, %s2170_s30  }
 0x4fa   : > { %s1750_s19 = scalar_lea.sflag [#allocation3], %s1749_s0 }
 0x4fb   : > { %p2028_p5 = pnand %p2034_p7, %p2285_p6 }
 0x4fd   : > { %2161 = dma.done.wait (!%p2028_p5), %s1750_s19, 512  }
 0x4fe   : > { %2163 = vsyncadd (!%p2028_p5), %s1750_s19, 4294966784  ;;  %s1759_s22 = scalar_lea.sflag [#allocation5], %s1749_s0 }
 0x4ff   : > { %2165 = dma.done.wait (!%p2028_p5), %s1759_s22, 512  }
 0x500   : > { %2167 = vsyncadd (!%p2028_p5), %s1759_s22, 4294966784  ;;  %p23_p8 = scmp.ge.s32.totalorder %s2268_s15, 4   ;;  %s2654_s30 = smov %s2174_s10 }
 0x501   : > { %s2655_s10 = smov %s2178_s11  ;;  %s2656_s11 = smov %s2279_s18 }
 0x502   : > { %s2657_s12 = smov %s2268_s15  ;;  %25 = sbr.rel (!%p23_p8) target bundleno = 9 (0x9), region = 121 }
 0x509   :  { %1773 = vsyncpa [#allocation3], 1 }
 0x50a   :  { %1775 = vsyncpa [#allocation3 + $0x1], 1 }
 0x50b   :  { %1776 = vsyncpa [#allocation5], 1 }
 0x50c   :  { %1778 = vsyncpa [#allocation5 + $0x1], 1 }

// kernel: model_forward.13
= control target key start
LH: loop header
LB: loop body
LE: loop exit
PB: predicated region body
PF: predicated region fallthrough
CT: control target
= control target key end

     0   :  { %v446_v3 = vmov 0.0   ;;  %vm447_vm0 = vmmov 0   ;;  %vm238_vm1 = vcmask 523264   ;;  %vm297_vm2 = vcmask 261120   ;;  %s722_s1 = inlined_call_operand.vmem [shape: f32[256,128], index: 1, kind: input, shape index: {}]   ;;  %s723_s0 = inlined_call_operand.vmem [shape: f32[2,256], index: 0, kind: input, shape index: {}]   ;;  %s724_s3 = inlined_call_operand.vmem [shape: f32[128,64], index: 3, kind: input, shape index: {}]   ;;  %s725_s5 = inlined_call_operand.vmem [shape: f32[64,32], index: 5, kind: input, shape index: {}]   ;;  %s726_s2 = inlined_call_operand.vmem [shape: f32[1,128], index: 2, kind: input, shape index: {}]   ;;  %s727_s7 = inlined_call_operand.vmem [shape: f32[32,1], index: 7, kind: input, shape index: {}]   ;;  %s728_s4 = inlined_call_operand.vmem [shape: f32[1,64], index: 4, kind: input, shape index: {}]   ;;  %s729_s8 = inlined_call_operand.<no memory space> [shape: f32[1,1], index: 8, kind: input, shape index: {}]   ;;  %s730_s6 = inlined_call_operand.vmem [shape: f32[1,32], index: 6, kind: input, shape index: {}]   ;;  %s731_s9 = inlined_call_operand.vmem [shape: f32[2,1], index: 9, kind: output, shape index: {}]  }
   0x1   :  { %v52_v0 = vld [vmem:[%s722_s1 + $0x80] sm:$0xff]  ;;  %v53_v1 = vld [vmem:[%s722_s1 + $0x88] sm:$0xff]  ;;  %400 = vmatprep.subr.bf16.mxu1 %v446_v3  ;;  %v54_v6 = vld [vmem:[%s722_s1 + $0x90] sm:$0xff]  ;;  %416 = vmatprep.mubr.msk.bf16.mxu1 %vm447_vm0, %v446_v3  ;;  %vm347_vm3 = vcmask 1024  }
   0x2   :  { %v36_v2 = vld [vmem:[%s722_s1] sm:$0xff]  ;;  %v89_v4 = vpack.c.bf16 %v53_v1, %v52_v0  ;;  %v37_v5 = vld [vmem:[%s722_s1 + $0x8] sm:$0xff]  ;;  %v55_v7 = vld [vmem:[%s722_s1 + $0x98] sm:$0xff] }
   0x3   :  { %v81_v8 = vpack.c.bf16 %v37_v5, %v36_v2  ;;  %v90_v9 = vpack.c.bf16 %v55_v7, %v54_v6  ;;  %v38_v10 = vld [vmem:[%s722_s1 + $0x10] sm:$0xff]  ;;  %v39_v11 = vld [vmem:[%s722_s1 + $0x18] sm:$0xff]  ;;  %v56_v12 = vld [vmem:[%s722_s1 + $0xa0] sm:$0xff] }
   0x4   :  { %361 = vmatprep.subr.bf16.mxu0 %v89_v4  ;;  %v57_v13 = vld [vmem:[%s722_s1 + $0xa8] sm:$0xff]  ;;  %v82_v14 = vpack.c.bf16 %v39_v11, %v38_v10  ;;  %v40_v16 = vld [vmem:[%s722_s1 + $0x20] sm:$0xff]  ;;  %v58_v18 = vld [vmem:[%s722_s1 + $0xb0] sm:$0xff] }
   0x5   :  { %362 = vmatpush3.bf16.msra.mxu0 %v81_v8  ;;  %v91_v15 = vpack.c.bf16 %v57_v13, %v56_v12  ;;  %v41_v17 = vld [vmem:[%s722_s1 + $0x28] sm:$0xff]  ;;  %v59_v19 = vld [vmem:[%s722_s1 + $0xb8] sm:$0xff]  ;;  %v42_v22 = vld [vmem:[%s722_s1 + $0x30] sm:$0xff] }
   0x6   :  { %363 = vmatprep.subr.bf16.mxu0 %v90_v9  ;;  %v83_v20 = vpack.c.bf16 %v41_v17, %v40_v16  ;;  %v92_v21 = vpack.c.bf16 %v59_v19, %v58_v18  ;;  %v43_v23 = vld [vmem:[%s722_s1 + $0x38] sm:$0xff]  ;;  %v60_v24 = vld [vmem:[%s722_s1 + $0xc0] sm:$0xff]  ;;  %v61_v25 = vld [vmem:[%s722_s1 + $0xc8] sm:$0xff] }
   0x7   :  { %v556_v26 = vld.sshfl [vmem:[%s723_s0] sm:$0x33 pattern:$0x76325410]  ;;  %v146_v29 = vld [vmem:[%s724_s3 + $0x8] sm:$0xff]  ;;  %v147_v30 = vld [vmem:[%s724_s3 + $0x10] sm:$0xff]  ;;  %v84_v31 = vpack.c.bf16 %v43_v23, %v42_v22  ;;  %v93_v34 = vpack.c.bf16 %v61_v25, %v60_v24 }
   0x8   :  { %v76_v27 = vcombine.high %v556_v26, %v556_v26  ;;  %v145_v28 = vld [vmem:[%s724_s3] sm:$0xff]  ;;  %v148_v33 = vld [vmem:[%s724_s3 + $0x18] sm:$0xff]  ;;  %v45_v36 = vld [vmem:[%s722_s1 + $0x48] sm:$0xff]  ;;  %v79_v7 = vpack.c.bf16 %v556_v26, %v556_v26 }
   0x9   :  { %364 = vmatpush3.bf16.msra.mxu0 %v82_v14  ;;  %v162_v32 = vpack.c.bf16 %v146_v29, %v145_v28  ;;  %v44_v35 = vld [vmem:[%s722_s1 + $0x40] sm:$0xff]  ;;  %v62_v38 = vld [vmem:[%s722_s1 + $0xd0] sm:$0xff]  ;;  %v63_v39 = vld [vmem:[%s722_s1 + $0xd8] sm:$0xff]  ;;  %v163_v40 = vpack.c.bf16 %v148_v33, %v147_v30 }
   0xa   :  { %365 = vmatprep.subr.bf16.mxu0 %v91_v15  ;;  %v80_v37 = vpack.c.bf16 %v76_v27, %v76_v27  ;;  %v149_v41 = vld [vmem:[%s724_s3 + $0x20] sm:$0xff]  ;;  %v150_v42 = vld [vmem:[%s724_s3 + $0x28] sm:$0xff]  ;;  %v85_v43 = vpack.c.bf16 %v45_v36, %v44_v35  ;;  %v94_v44 = vpack.c.bf16 %v63_v39, %v62_v38  ;;  %v46_v45 = vld [vmem:[%s722_s1 + $0x50] sm:$0xff] }
   0xb   :  { %401 = vmatpush3.bf16.msra.mxu1 %v162_v32  ;;  %v47_v46 = vld [vmem:[%s722_s1 + $0x58] sm:$0xff]  ;;  %v64_v47 = vld [vmem:[%s722_s1 + $0xe0] sm:$0xff]  ;;  %v65_v48 = vld [vmem:[%s722_s1 + $0xe8] sm:$0xff]  ;;  %v164_v49 = vpack.c.bf16 %v150_v42, %v149_v41 }
   0xc   :  { %136 = vmatprep.mubr.bf16.mxu0 %v80_v37  ;;  %402 = vmatprep.subr.bf16.mxu1 %v446_v3  ;;  %v151_v50 = vld [vmem:[%s724_s3 + $0x30] sm:$0xff]  ;;  %v152_v51 = vld [vmem:[%s724_s3 + $0x38] sm:$0xff]  ;;  %v86_v52 = vpack.c.bf16 %v47_v46, %v46_v45  ;;  %v95_v53 = vpack.c.bf16 %v65_v48, %v64_v47  ;;  %v48_v54 = vld [vmem:[%s722_s1 + $0x60] sm:$0xff]  ;;  %v14_v48 = vstv %s729_s8 }
   0xd   :  { %366 = vmatpush3.bf16.msra.mxu0 %v83_v20  ;;  %v49_v55 = vld [vmem:[%s722_s1 + $0x68] sm:$0xff]  ;;  %v66_v56 = vld [vmem:[%s722_s1 + $0xf0] sm:$0xff]  ;;  %v67_v57 = vld [vmem:[%s722_s1 + $0xf8] sm:$0xff]  ;;  %v165_v58 = vpack.c.bf16 %v152_v51, %v151_v50  ;;  %15 = vst [vmem:[#allocation2] sm:$0x1] %v14_v48 }
   0xe   :  { %367 = vmatprep.subr.bf16.mxu0 %v92_v21  ;;  %v153_v59 = vld [vmem:[%s724_s3 + $0x40] sm:$0xff]  ;;  %v154_v60 = vld [vmem:[%s724_s3 + $0x48] sm:$0xff]  ;;  %v87_v61 = vpack.c.bf16 %v49_v55, %v48_v54  ;;  %v96_v62 = vpack.c.bf16 %v67_v57, %v66_v56  ;;  %v50_v63 = vld [vmem:[%s722_s1 + $0x70] sm:$0xff] }
   0xf   :  { %403 = vmatpush3.bf16.msra.mxu1 %v163_v40  ;;  %v51_v0 = vld [vmem:[%s722_s1 + $0x78] sm:$0xff]  ;;  %v166_v1 = vpack.c.bf16 %v154_v60, %v153_v59  ;;  %v155_v2 = vld [vmem:[%s724_s3 + $0x50] sm:$0xff]  ;;  %v157_v8 = vld [vmem:[%s724_s3 + $0x60] sm:$0xff] }
  0x10   :  { %404 = vmatprep.subr.bf16.mxu1 %v446_v3  ;;  %v156_v4 = vld [vmem:[%s724_s3 + $0x58] sm:$0xff]  ;;  %v88_v5 = vpack.c.bf16 %v51_v0, %v50_v63  ;;  %v158_v9 = vld [vmem:[%s724_s3 + $0x68] sm:$0xff]  ;;  %v159_v11 = vld [vmem:[%s724_s3 + $0x70] sm:$0xff] }
  0x11   :  { %368 = vmatpush3.bf16.msra.mxu0 %v84_v31  ;;  %v167_v6 = vpack.c.bf16 %v156_v4, %v155_v2  ;;  %v168_v10 = vpack.c.bf16 %v158_v9, %v157_v8  ;;  %v160_v12 = vld [vmem:[%s724_s3 + $0x78] sm:$0xff]  ;;  %v218_v14 = vld [vmem:[%s725_s5] sm:$0xff]  ;;  %v219_v15 = vld [vmem:[%s725_s5 + $0x8] sm:$0xff] }
  0x12   :  { %369 = vmatprep.subr.bf16.mxu0 %v93_v34  ;;  %v169_v13 = vpack.c.bf16 %v160_v12, %v159_v11  ;;  %v220_v16 = vld [vmem:[%s725_s5 + $0x10] sm:$0xff]  ;;  %v227_v17 = vpack.c.bf16 %v219_v15, %v218_v14  ;;  %v221_v18 = vld [vmem:[%s725_s5 + $0x18] sm:$0xff]  ;;  %v354_v21 = vld [vmem:[%s726_s2] ss:$0 sm:$0xff] }
  0x13   :  { %405 = vmatpush3.bf16.msra.mxu1 %v164_v49  ;;  %v228_v19 = vpack.c.bf16 %v221_v18, %v220_v16  ;;  %v222_v29 = vld [vmem:[%s725_s5 + $0x20] sm:$0xff]  ;;  %v223_v30 = vld [vmem:[%s725_s5 + $0x28] sm:$0xff]  ;;  %v224_v32 = vld [vmem:[%s725_s5 + $0x30] sm:$0xff] }
  0x14   :  { %406 = vmatprep.subr.bf16.mxu1 %v446_v3  ;;  %v229_v31 = vpack.c.bf16 %v223_v30, %v222_v29  ;;  %v225_v33 = vld [vmem:[%s725_s5 + $0x38] sm:$0xff]  ;;  %v283_v35 = vld [vmem:[%s727_s7] sm:$0xff]  ;;  %v284_v36 = vld [vmem:[%s727_s7 + $0x8] sm:$0xff] }
  0x15   :  { %370 = vmatpush3.bf16.msra.mxu0 %v85_v43  ;;  %v230_v34 = vpack.c.bf16 %v225_v33, %v224_v32  ;;  %v288_v37 = vpack.c.bf16 %v284_v36, %v283_v35  ;;  %v355_v38 = vld [vmem:[%s728_s4] ss:$0 sm:$0xff]  ;;  %v285_v46 = vld [vmem:[%s727_s7 + $0x10] sm:$0xff] }
  0x16   :  { %371 = vmatprep.subr.bf16.mxu0 %v94_v44  ;;  %v356_v49 = vld [vmem:[%s730_s6] ss:$0 sm:$0xff] }
  0x17   :  { %407 = vmatpush3.bf16.msra.mxu1 %v165_v58  ;;  %v358_v57 = vld [vmem:[#allocation2] ss:$0 sm:$0xff] }
  0x18   :  { %408 = vmatprep.subr.bf16.mxu1 %v446_v3 }
  0x19   :  { %372 = vmatpush3.bf16.msra.mxu0 %v86_v52 }
  0x1a   :  { %373 = vmatprep.subr.bf16.mxu0 %v95_v53 }
  0x1b   :  { %409 = vmatpush3.bf16.msra.mxu1 %v166_v1 }
  0x1c   :  { %410 = vmatprep.subr.bf16.mxu1 %v446_v3 }
  0x1d   :  { %374 = vmatpush3.bf16.msra.mxu0 %v87_v61 }
  0x1e   :  { %375 = vmatprep.subr.bf16.mxu0 %v96_v62 }
  0x1f   :  { %411 = vmatpush3.bf16.msra.mxu1 %v167_v6 }
  0x20   :  { %412 = vmatprep.subr.bf16.mxu1 %v446_v3 }
  0x21   :  { %376 = vmatpush3.bf16.msra.mxu0 %v88_v5 }
  0x22   :  { %420 = vmatprep.subr.bf16.mxu0 %v446_v3 }
  0x23   :  { %413 = vmatpush3.bf16.msra.mxu1 %v168_v10 }
  0x24   :  { %137 = vmatmul.mubr.bf16.vlgmr.msra.gmra.mrb[0].mxu0 %v79_v7  ;;  %414 = vmatprep.subr.bf16.mxu1 %v446_v3 }
  0x25   :  { %428 = vmatprep.mubr.msk.bf16.mxu0 %vm447_vm0, %v446_v3  ;;  %421 = vmatpush3.bf16.msra.mxu0 %v227_v17 }
  0x26   :  { %422 = vmatprep.subr.bf16.mxu0 %v446_v3 }
  0x27   :  { %415 = vmatpush3.bf16.msra.mxu1 %v169_v13 }
  0x28   :  { %432 = vmatprep.subr.bf16.mxu1 %v446_v3 }
  0x29   :  { %423 = vmatpush3.bf16.msra.mxu0 %v228_v19 }
  0x2a   :  { %424 = vmatprep.subr.bf16.mxu0 %v446_v3 }
  0x2d   :  { %425 = vmatpush3.bf16.msra.mxu0 %v229_v31 }
  0x2e   :  { %426 = vmatprep.subr.bf16.mxu0 %v446_v3 }
  0x31   :  { %427 = vmatpush3.bf16.msra.mxu0 %v230_v34 }
  0xf7   :  { %v377_v20 = vpop.f32.mrb[0].mxu0 }
  0xf8   :  { %v378_v22 = vpop.f32.mrb[1].mxu0 }
  0xf9   :  { %v379_v23 = vadd.f32 %v378_v22, %v377_v20  ;;  %v380_v24 = vpop.f32.mrb[2].mxu0 }
  0xfa   :  { %v381_v25 = vpop.f32.mrb[3].mxu0 }
  0xfb   :  { %v139_v26 = vadd.f32 %v379_v23, %v354_v21 }
  0xfd   :  { %v144_v27 = vmax.f32 %v139_v26, 0.0 }
  0xff   :  { %v161_v28 = vpack.c.bf16 %v144_v27, %v144_v27 }
 0x101   :  { %417 = vmatmul.mubr.bf16.vlgmr.msra.gmra.mrb[0].mxu1 %v161_v28 }
 0x102   :  { %436 = vmatprep.mubr.msk.bf16.mxu1 %vm447_vm0, %v446_v3  ;;  %433 = vmatpush3.bf16.msra.mxu1 %v288_v37 }
 0x103   :  { %434 = vmatprep.subr.bf16.mxu1 %v446_v3  ;;  %v286_v3 = vld [vmem:[%s727_s7 + $0x18] sm:$0xff] }
 0x104   :  { %v289_v47 = vpack.c.bf16 %v286_v3, %v285_v46 }
 0x106   :  { %435 = vmatpush3.bf16.msra.mxu1 %v289_v47 }
 0x1d4   :  { %v211_v39 = vpop.f32.mrb[0].mxu1 }
 0x1d5   :  { %v212_v40 = vadd.f32 %v355_v38, %v211_v39  ;;  %v418_v41 = vpop.f32.mrb[1].mxu1 }
 0x1d6   :  { %v214_v42 = vpop.f32.mrb[2].mxu1 }
 0x1d7   :  { %v217_v43 = vmax.f32 %v212_v40, 0.0  ;;  %v419_v44 = vpop.f32.mrb[3].mxu1 }
 0x1d9   :  { %v226_v45 = vpack.c.bf16 %v217_v43, %v217_v43 }
 0x1db   :  { %429 = vmatmul.mubr.msk.bf16.vlgmr.msra.gmra.mrb[4].mxu0 %vm238_vm1, %v226_v45 }
 0x2ae   :  { %v276_v50 = vpop.f32.mrb[4].mxu0 }
 0x2af   :  { %v277_v51 = vadd.f32 %v356_v49, %v276_v50  ;;  %v430_v52 = vpop.f32.mrb[5].mxu0 }
 0x2b0   :  { %v279_v53 = vpop.f32.mrb[6].mxu0 }
 0x2b1   :  { %v282_v54 = vmax.f32 %v277_v51, 0.0  ;;  %v431_v55 = vpop.f32.mrb[7].mxu0 }
 0x2b3   :  { %v287_v56 = vpack.c.bf16 %v282_v54, %v282_v54 }
 0x2b5   :  { %437 = vmatmul.mubr.msk.bf16.vlgmr.msra.gmra.mrb[4].mxu1 %vm297_vm2, %v287_v56 }
 0x388   :  { %v335_v58 = vpop.f32.mrb[4].mxu1 }
 0x389   :  { %v336_v59 = vadd.f32 %v358_v57, %v335_v58  ;;  %v438_v60 = vpop.f32.mrb[5].mxu1 }
 0x38a   :  { %v338_v61 = vpop.f32.mrb[6].mxu1 }
 0x38b   :  { %v360_v62 = vmul.f32 -1.442695, %v336_v59  ;;  %v439_v63 = vpop.f32.mrb[7].mxu1 }
 0x38d   :  { %442 = vpow2.f32 %v360_v62 }
 0x397   :  { %v443_v0 = vpop.eup %442 }
 0x398   :  { %v344_v1 = vadd.f32 1.0, %v443_v0 }
 0x39a   :  { %444 = vrcp.f32 %v344_v1 }
 0x3a4   :  { %v445_v2 = vpop.eup %444 }
 0x3a5   :  { %348 = vst.msk [vmem:[%s731_s9] sm:$0x3] %vm347_vm3, %v445_v2 }

// kernel: model_forward.12
= control target key start
LH: loop header
LB: loop body
LE: loop exit
PB: predicated region body
PF: predicated region fallthrough
CT: control target
= control target key end

     0   :  { %s1818_s0 = inlined_call_operand.vmem [shape: f32[2,9,32], index: 0, kind: input, shape index: {}]   ;;  %s1819_s1 = inlined_call_operand.vmem [shape: f32[2,9,1], index: 1, kind: input, shape index: {}]   ;;  %s1820_s2 = inlined_call_operand.vmem [shape: f32[2,9,32], index: 2, kind: input, shape index: {}]   ;;  %s1821_s3 = inlined_call_operand.vmem [shape: f32[2,9,1], index: 3, kind: input, shape index: {}]   ;;  %s1822_s4 = inlined_call_operand.vmem [shape: f32[2,1,9], index: 4, kind: input, shape index: {}]   ;;  %s1823_s5 = inlined_call_operand.vmem [shape: f32[32,32], index: 5, kind: input, shape index: {}]   ;;  %s1824_s6 = inlined_call_operand.vmem [shape: f32[32,32], index: 6, kind: input, shape index: {}]   ;;  %s1825_s7 = inlined_call_operand.hbm [shape: f32[2,9,32], index: 7, kind: output, shape index: {0}]   ;;  %s1826_s8 = inlined_call_operand.hbm [shape: f32[2,9,32], index: 8, kind: output, shape index: {1}]   ;;  %s1827_s9 = inlined_call_operand.vmem [shape: f32[2,1,64], index: 9, kind: output, shape index: {2}]  }
   0x1   :  { %1829 = sst [smem:[#allocation8_spill]] %s1818_s0 }
   0x2   :  { %1830 = sst [smem:[#allocation9_spill]] %s1819_s1 }
   0x3   :  { %1831 = sst [smem:[#allocation10_spill]] %s1820_s2 }
   0x4   :  { %1832 = sst [smem:[#allocation11_spill]] %s1821_s3 }
   0x5   :  { %1833 = sst [smem:[#allocation12_spill]] %s1822_s4 }
   0x6   :  { %15 = vsyncpa [#allocation3], 0 }
   0x7   :  { %17 = vsyncpa [#allocation3 + $0x1], 0 }
   0x8   :  { %18 = vsyncpa [#allocation5], 0 }
   0x9   :  { %20 = vsyncpa [#allocation5 + $0x1], 0  ;;  %s1523_s30 = smov 0   ;;  %s1525_s10 = smov 0  }
   0xa   :  { %s1527_s11 = smov 0   ;;  %s1529_s12 = smov 0  }
   0xb LB: > { %s1544_s13 = sadd.s32 4294967295, %s1462_s12   ;;  %s1182_s14 = sadd.s32 4294967294, %s1462_s12   ;;  %s1462_s12 = sphi %s1529_s12, %s1846_s12   ;;  %s1458_s11 = sphi %s1527_s11, %s1845_s11   ;;  %s1454_s10 = sphi %s1525_s10, %s1844_s10   ;;  %s1450_s30 = sphi %s1523_s30, %s1843_s30  }
   0xc   : > { %s1548_s15 = sadd.s32 1, %s1462_s12   ;;  %s205_s16 = sadd.s32 1, %s1458_s11 }
   0xd   : > { %s202_s17 = ssub.s32 %s1462_s12, %s1548_s15  ;;  %p215_p0 = scmp.ne.s32.totalorder %s1458_s11, %s1454_s10 }
   0xe   : > { %p203_p1 = scmp.eq.s32.totalorder %s202_s17, 0  ;;  %p216_p2 = scmp.eq.s32.totalorder %s1544_s13, 1 }
   0xf   : > { %p221_p3 = scmp.ne.s32.totalorder %s1454_s10, %s1450_s30  ;;  %p222_p4 = scmp.eq.s32.totalorder %s1182_s14, 1 }
  0x10   : > { %s1559_s18 = scalar_select %p203_p1, %s1458_s11, %s205_s16  }
  0x11   : > { %p1561_p5 = por %p216_p2, %p215_p0  ;;  %p1565_p6 = por %p222_p4, %p221_p3 }
  0x12   : > { %p1185_p7 = scmp.ge.s32.totalorder %s1462_s12, 1  ;;  %p336_p8 = scmp.lt.s32.totalorder %s1462_s12, 3 }
  0x14   : > { %p337_p9 = pnand %p1185_p7, %p336_p8 }
  0x15   : > { %v434_v0 = vld [vmem:[%s1823_s5] sm:$0xff] (!%p337_p9)  ;;  %v435_v1 = vld [vmem:[%s1823_s5 + $0x8] sm:$0xff] (!%p337_p9)  ;;  %v436_v2 = vld [vmem:[%s1823_s5 + $0x10] sm:$0xff] (!%p337_p9)  ;;  %p398_p10 = scmp.lt.s32.totalorder (!%p337_p9), %s1544_s13, 1  ;;  %v1464_v3 = vmov (!%p337_p9), 0.0   ;;  %vm1465_vm0 = vmmov (!%p337_p9), 0   ;;  %v537_v29 = vlaneseq (!%p337_p9) }
  0x16   : > { %340 = sbr.rel (%p337_p9) target bundleno = 1441 (0x5a1), region = 48  ;;  %1235 = vmatprep.subr.bf16.mxu0 (!%p337_p9), %v1464_v3  ;;  %v439_v4 = vpack.c.bf16 (!%p337_p9), %v435_v1, %v434_v0  ;;  %v437_v5 = vld [vmem:[%s1823_s5 + $0x18] sm:$0xff] (!%p337_p9)  ;;  %1239 = vmatprep.mubr.msk.bf16.mxu0 (!%p337_p9), %vm1465_vm0, %v1464_v3  ;;  %vm572_vm1 = vcmask (!%p337_p9), 1043456   ;;  %vm573_vm2 = vcmask (!%p337_p9), 1044480   ;;  %v1466_v7 = vmov (!%p337_p9), 65535   ;;  %s1836_s0 = sld [smem:[#allocation8_spill]] (!%p337_p9) }
  0x17   : > { %1243 = vmatprep.subr.bf16.mxu1 (!%p337_p9), %v1464_v3  ;;  %1245 = vmatprep.mubr.msk.bf16.mxu1 (!%p337_p9), %vm1465_vm0, %v1464_v3  ;;  %v440_v6 = vpack.c.bf16 (!%p337_p9), %v437_v5, %v436_v2  ;;  %v574_v8 = vsel (!%p337_p9), %vm572_vm1, 4294967295, %v1466_v7  ;;  %s1837_s2 = sld [smem:[#allocation10_spill]] (!%p337_p9)  ;;  %vm441_vm3 = vcmask (!%p337_p9), 261120   ;;  %s1838_s1 = sld [smem:[#allocation9_spill]] (!%p337_p9)  ;;  %v1467_v19 = vmov (!%p337_p9), 0  }
  0x18   : > { %1236 = vmatpush3.bf16.msra.mxu0 (!%p337_p9), %v439_v4  ;;  %v575_v12 = vsel (!%p337_p9), %vm573_vm2, %v574_v8, 0  ;;  %1328 = vset.pattern.permute.xlu0 (!%p337_p9), %v1467_v19  ;;  %s1839_s4 = sld [smem:[#allocation12_spill]] (!%p337_p9)  ;;  %v538_v31 = vshrl.u32 (!%p337_p9), %v537_v29, 7  ;;  %vm544_vm9 = vcmask (!%p337_p9), 72704   ;;  %vm548_vm11 = vcmask (!%p337_p9), 65536   ;;  %s1840_s3 = sld [smem:[#allocation11_spill]] (!%p337_p9) }
  0x19   : > { %1237 = vmatprep.subr.bf16.mxu0 (!%p337_p9), %v1464_v3  ;;  %1329 = vset.pattern.permute.xlu1 (!%p337_p9), %v1467_v19  ;;  %vm758_vm12 = vcmask (!%p337_p9), 7168   ;;  %vm760_vm13 = vcmask (!%p337_p9), 0   ;;  %vm748_vm14 = vcmask (!%p337_p9), 253952  }
  0x1a   : > { %v1630_v32 = vsub.s32 (!%p337_p9), 0, %v538_v31 }
  0x1c   : > { %1238 = vmatpush3.bf16.msra.mxu0 (!%p337_p9), %v440_v6 }
  0x1d   : > { %s1588_s29 = scalar_select %p398_p10, %s1544_s13, 1  ;;  %1249 = vmatprep.subr.bf16.mxu0 %v1464_v3 }
  0x1f   : > { %s1595_s14 = sshll.u32 %s1588_s29, 4  ;;  %s420_s17 = scalar_lea.vmem %s1839_s4, %s1588_s29 }
  0x20   : > { %s402_s21 = scalar_lea.vmem %s1836_s0, %s1595_s14  ;;  %s412_s24 = scalar_lea.vmem %s1837_s2, %s1595_s14  ;;  %v433_v30 = vld [vmem:[%s420_s17] sm:$0x1] }
  0x21   : > { %v425_v9 = vld [vmem:[%s402_s21] sm:$0xff]  ;;  %v426_v10 = vld [vmem:[%s402_s21 + $0x8] sm:$0x1]  ;;  %s407_s27 = scalar_lea.vmem %s1838_s1, %s1595_s14  ;;  %vm535_vm6 = vcmp.gt.f32.partialorder %v433_v30, 0.0  ;;  %s417_s23 = scalar_lea.vmem %s1840_s3, %s1595_s14 }
  0x22   : > { %v427_v11 = vld [vmem:[%s412_s24] sm:$0xff]  ;;  %v438_v13 = vpack.c.bf16 %v426_v10, %v425_v9  ;;  %v428_v14 = vld [vmem:[%s412_s24 + $0x8] sm:$0x1]  ;;  %v536_v34 = vsel %vm535_vm6, 1, %v1467_v19  ;;  %s1670_s21 = sand.u32 1, %s1454_s10   ;;  %s1468_s24 = smov 32  }
  0x23   : > { %v487_v15 = vpack.c.bf16 %v428_v14, %v427_v11  ;;  %v1616_v20 = vld [vmem:[%s407_s27] sm:$0xff]  ;;  %v1618_v21 = vld [vmem:[%s407_s27 + $0x8] sm:$0x1]  ;;  %v540_v35 = vrot.slane %v536_v34, %v1630_v32  ;;  %s1186_s22 = sshll.u32 %s1670_s21, 4  ;;  %s1828_s27 = sshll.u32 %s1544_s13, 8 }
  0x24   : > { %v692_v16 = vand.u32 %v575_v12, %v438_v13  ;;  %1240 = vmatmul.mubr.msk.bf16.vlgmr.msra.gmra.mrb[0].mxu0 %vm441_vm3, %v438_v13  ;;  %vm631_vm4 = vcmp.gt.f32.partialorder %v1616_v20, 0.0  ;;  %vm632_vm5 = vcmp.gt.f32.partialorder %v1618_v21, 0.0  ;;  %v759_v29 = vsel %vm758_vm12, %v1616_v20, 0.0  ;;  %s1692_s14 = scalar_lea.vmem [#allocation2], %s1186_s22  ;;  %s1729_s17 = scalar_lea.hbm %s1825_s7, %s1828_s27 }
  0x25   : > { %v492_v17 = vsel %vm441_vm3, %v487_v15, 0  ;;  %v576_v18 = vand.u32 %v575_v12, %v487_v15  ;;  %1251 = vmatprep.mubr.msk.bf16.mxu0 %vm1465_vm0, %v1464_v3  ;;  %v633_v22 = vsel %vm631_vm4, 1, %v1467_v19  ;;  %v634_v23 = vsel %vm632_vm5, 1, %v1467_v19  ;;  %v432_v19 = vld [vmem:[%s417_s23 + $0x8] sm:$0x1]  ;;  %s1005_s26 = sshll.u32 %s1692_s14, 4  ;;  %s1721_s26 = int_to_ptr.vmem [resolvable:$true] %s1005_s26 }
  0x26   : > { %1244 = vmatpush3.bf16.xpose.msra.mxu1 %v492_v17  ;;  %636 = vperm.xlu0 %1328, %v633_v22   ;;  %vm541_vm8 = vcmp.eq.s32.totalorder %v540_v35, 1  ;;  %v761_v30 = vsel %vm760_vm13, %v1618_v21, 0.0  ;;  %s1368_s0 = scalar_lea.vmem %s1721_s26, 256 }
  0x27   : > { %1255 = vmatprep.subr.bf16.mxu1 %v1464_v3  ;;  %1250 = vmatpush3.bf16.msra.mxu0 %v576_v18  ;;  %v431_v18 = vld [vmem:[%s417_s23] sm:$0xff]  ;;  %s1675_s23 = scalar_lea.vmem [#allocation4], %s1186_s22  ;;  %p1369_p11 = scmp.ne.s32.totalorder %s1721_s26, %s1368_s0 }
  0x28   : > { %1261 = vmatprep.subr.bf16.mxu0 %v1464_v3  ;;  %v871_v22 = vsel %vm758_vm12, %v431_v18, 0.0  ;;  %s1021_s25 = sshll.u32 %s1675_s23, 4  ;;  %s1719_s25 = int_to_ptr.vmem [resolvable:$true] %s1021_s25 }
  0x29   : > { %p1370_p12 = pnand %p1369_p11, %p1561_p5 }
  0x2a   : > { %639 = vperm.xlu0 %1328, %v634_v23   ;;  %v872_v23 = vsel %vm760_vm13, %v432_v19, 0.0 }
  0x2b   : > { %p1371_p13 = pneg %p1370_p12 }
  0xa5   : > { %v637_v33 = vpop.permute.xlu0 %636 }
  0xa6   : > { %vm641_vm7 = vcmp.eq.s32.totalorder %v637_v33, 1  ;;  %v762_v33 = vadd.f32 %v761_v30, %v759_v29 }
  0xa9   : > { %v640_v36 = vpop.permute.xlu0 %639 }
  0xaa   : > { %vm642_vm10 = vcmp.eq.s32.totalorder %v640_v36, 1  ;;  %v763_v36 = vrot.slane %v762_v33, 4 }
  0xf7   : > { %v479_v24 = vpop.f32.mrb[0].mxu0 }
  0xf8   : > { %v1241_v25 = vpop.f32.mrb[1].mxu0 }
  0xf9   : > { %v482_v26 = vpop.f32.mrb[2].mxu0 }
  0xfa   : > { %v486_v27 = vpack.c.bf16 %v482_v26, %v479_v24  ;;  %v1242_v28 = vpop.f32.mrb[3].mxu0  ;;  %v873_v24 = vadd.f32 %v872_v23, %v871_v22 }
  0xfc   : > { %1246 = vmatmul.mubr.msk.bf16.vlgmr.msra.gmra.mrb[0].mxu1 %vm441_vm3, %v486_v27  ;;  %v874_v27 = vrot.slane %v873_v24, 4 }
  0xfd   : > { %1256 = vmatpush3.bf16.msra.mxu1 %v692_v16  ;;  %1257 = vmatprep.mubr.msk.bf16.mxu1 %vm1465_vm0, %v1464_v3 }
  0xfe   : > { %1269 = vmatprep.subr.bf16.mxu1 %v1464_v3  ;;  %v875_v34 = vadd.f32 %v874_v27, %v873_v24 }
 0x1cf   : > { %v528_v37 = vpop.f32.mrb[0].mxu1 }
 0x1d0   : > { %v643_v38 = vsel %vm641_vm7, %v528_v37, -1e+09  ;;  %v1247_v39 = vpop.f32.mrb[1].mxu1  ;;  %v542_v40 = vsel %vm541_vm8, %v528_v37, -1e+09  ;;  %v876_v37 = vrot.slane %v875_v34, 2 }
 0x1d1   : > { %v531_v41 = vpop.f32.mrb[2].mxu1  ;;  %v545_v42 = vsel %vm544_vm9, %v542_v40, -inf  ;;  %v645_v46 = vsel %vm544_vm9, %v643_v38, -inf }
 0x1d2   : > { %v644_v43 = vsel %vm642_vm10, %v531_v41, -1e+09  ;;  %546 = vmax.xlane.f32.xlu1 %v545_v42  ;;  %v1248_v44 = vpop.f32.mrb[3].mxu1  ;;  %v543_v45 = vsel %vm541_vm8, %v531_v41, -1e+09  ;;  %v877_v39 = vadd.f32 %v876_v37, %v875_v34 }
 0x1d3   : > { %v646_v47 = vsel %vm548_vm11, %v644_v43, -inf  ;;  %v549_v49 = vsel %vm548_vm11, %v543_v45, -inf }
 0x1d4   : > { %v647_v48 = vmax.f32 %v645_v46, %v646_v47  ;;  %v752_v47 = vld [vmem:[%s1824_s6] sm:$0xff] }
 0x1d6   : > { %v648_v50 = vrot.slane %v647_v48, 4  ;;  %550 = vmax.xlane.f32.xlu1 %v549_v49 }
 0x1d8   : > { %v649_v51 = vmax.f32 %v647_v48, %v648_v50  ;;  %v753_v48 = vld [vmem:[%s1824_s6 + $0x8] sm:$0xff]  ;;  %v754_v50 = vld [vmem:[%s1824_s6 + $0x10] sm:$0xff] }
 0x1d9   : > { %v787_v49 = vpack.c.bf16 %v753_v48, %v752_v47 }
 0x1da   : > { %v650_v52 = vrot.slane %v649_v51, 2 }
 0x1dc   : > { %v651_v53 = vmax.f32 %v649_v51, %v650_v52 }
 0x1de   : > { %v652_v54 = vrot.slane %v651_v53, 1 }
 0x1e0   : > { %v653_v55 = vmax.f32 %v651_v53, %v652_v54 }
 0x1e2   : > { %v654_v56 = vsub.f32 %v643_v38, %v653_v55  ;;  %v655_v57 = vsub.f32 %v644_v43, %v653_v55  ;;  %v764_v38 = vadd.f32 %v763_v36, %v762_v33 }
 0x1e4   : > { %v656_v58 = vmul.f32 1.442695, %v654_v56  ;;  %v658_v59 = vmul.f32 1.442695, %v655_v57  ;;  %v765_v41 = vrot.slane %v764_v38, 2 }
 0x1e6   : > { %1330 = vpow2.f32 %v656_v58  ;;  %v766_v42 = vadd.f32 %v765_v41, %v764_v38 }
 0x1e7   : > { %1332 = vpow2.f32 %v658_v59 }
 0x1e8   : > { %v767_v44 = vrot.slane %v766_v42, 1 }
 0x1f0   : > { %v1331_v60 = vpop.eup %1330 }
 0x1f1   : > { %v1333_v61 = vpop.eup %1332  ;;  %v660_v62 = vsel %vm544_vm9, %v1331_v60, 0.0 }
 0x1f2   : > { %v661_v63 = vsel %vm548_vm11, %v1333_v61, 0.0 }
 0x1f3   : > { %v662_v0 = vadd.f32 %v661_v63, %v660_v62 }
 0x1f5   : > { %v663_v1 = vrot.slane %v662_v0, 4 }
 0x1f7   : > { %v664_v2 = vadd.f32 %v663_v1, %v662_v0 }
 0x1f9   : > { %v665_v4 = vrot.slane %v664_v2, 2 }
 0x1fb   : > { %v666_v5 = vadd.f32 %v665_v4, %v664_v2 }
 0x1fd   : > { %v667_v6 = vrot.slane %v666_v5, 1 }
 0x1ff   : > { %v668_v7 = vadd.f32 %v667_v6, %v666_v5 }
 0x201   : > { %1334 = vrcp.f32 %v668_v7 }
 0x20b   : > { %v1335_v8 = vpop.eup %1334 }
 0x20c   : > { %v670_v9 = vmul.f32 %v1335_v8, %v1331_v60  ;;  %v671_v10 = vmul.f32 %v1335_v8, %v1333_v61 }
 0x20e   : > { %v672_v11 = vpack.c.bf16 %v671_v10, %v670_v9 }
 0x210   : > { %673 = vxpose.xlu0.c.b16.start.end [1/1] (short) (narrow) %v672_v11, 16 }
 0x219   : > { %621 = vperm.xlu0 %1328, %v1616_v20  }
 0x25f   : > { %v547_v12 = vpop.xlane.xlu1 %546 }
 0x260   : > { %v552_v13 = vsub.f32 %v542_v40, %v547_v12  ;;  %v878_v40 = vrot.slane %v877_v39, 1 }
 0x262   : > { %v554_v14 = vmul.f32 1.442695, %v552_v13  ;;  %v879_v20 = vadd.f32 %v878_v40, %v877_v39 }
 0x263   : > { %v551_v15 = vpop.xlane.xlu1 %550 }
 0x264   : > { %1336 = vpow2.f32 %v554_v14  ;;  %v553_v16 = vsub.f32 %v543_v45, %v551_v15  ;;  %v880_v43 = vmax.f32 %v879_v20, 1.0  ;;  %v768_v45 = vadd.f32 %v767_v44, %v766_v42 }
 0x266   : > { %v556_v17 = vmul.f32 1.442695, %v553_v16  ;;  %v769_v46 = vmax.f32 %v768_v45, 1.0 }
 0x268   : > { %1338 = vpow2.f32 %v556_v17 }
 0x26e   : > { %v1337_v25 = vpop.eup %1336 }
 0x26f   : > { %v558_v26 = vsel %vm544_vm9, %v1337_v25, 0.0 }
 0x270   : > { %559 = vadd.xlane.f32.xlu1 %v558_v26 }
 0x272   : > { %v1339_v28 = vpop.eup %1338 }
 0x273   : > { %v561_v31 = vsel %vm548_vm11, %v1339_v28, 0.0 }
 0x274   : > { %562 = vadd.xlane.f32.xlu1 %v561_v31 }
 0x276   : > { %v681_v35 = vpop.trf.xlu0 }
 0x277   : > { %1258 = vmatmul.mubr.msk.bf16.vlgmr.msra.gmra.mrb[4].mxu1 %vm544_vm9, %v681_v35 }
 0x278   : > { %1273 = vmatprep.mubr.msk.bf16.mxu1 %vm1465_vm0, %v1464_v3  ;;  %1270 = vmatpush3.bf16.msra.mxu1 %v787_v49 }
 0x279   : > { %1271 = vmatprep.subr.bf16.mxu1 %v1464_v3 }
 0x285   : > { %737 = vperm.xlu1 %1329, %v431_v18  }
 0x289   : > { %742 = vperm.xlu1 %1329, %v432_v19  }
 0x28d   : > { %892 = vperm.xlu1 %1329, %v880_v43  }
 0x291   : > { %626 = vperm.xlu1 %1329, %v1618_v21   ;;  %v755_v21 = vld [vmem:[%s1824_s6 + $0x18] sm:$0xff] }
 0x292   : > { %v788_v51 = vpack.c.bf16 %v755_v21, %v754_v50 }
 0x294   : > { %1272 = vmatpush3.bf16.msra.mxu1 %v788_v51 }
 0x295   : > { %781 = vperm.xlu1 %1329, %v769_v46  }
 0x298   : > { %v622_v18 = vpop.permute.xlu0 %621 }
 0x2fd   : > { %v560_v52 = vpop.xlane.xlu1 %559 }
 0x2fe   : > { %1340 = vrcp.f32 %v560_v52 }
 0x301   : > { %v563_v53 = vpop.xlane.xlu1 %562 }
 0x302   : > { %1342 = vrcp.f32 %v563_v53 }
 0x305   : > { %v738_v59 = vpop.permute.xlu1 %737 }
 0x308   : > { %v1341_v54 = vpop.eup %1340 }
 0x309   : > { %v565_v56 = vmul.f32 %v1341_v54, %v1337_v25  ;;  %v743_v61 = vpop.permute.xlu1 %742 }
 0x30c   : > { %v1343_v55 = vpop.eup %1342 }
 0x30d   : > { %v567_v57 = vmul.f32 %v1343_v55, %v1339_v28  ;;  %v893_v6 = vpop.permute.xlu1 %892 }
 0x30e   : > { %1344 = vrcp.f32 %v893_v6 }
 0x30f   : > { %v568_v58 = vpack.c.bf16 %v567_v57, %v565_v56 }
 0x311   : > { %1252 = vmatmul.mubr.msk.bf16.vlgmr.msra.gmra.mrb[4].mxu0 %vm544_vm9, %v568_v58  ;;  %v627_v24 = vpop.permute.xlu1 %626 }
 0x312   : > { %1262 = vmatpush3.bf16.msra.mxu0 %v787_v49  ;;  %1265 = vmatprep.mubr.msk.bf16.mxu0 %vm1465_vm0, %v1464_v3 }
 0x313   : > { %1263 = vmatprep.subr.bf16.mxu0 %v1464_v3 }
 0x315   : > { %v782_v33 = vpop.permute.xlu1 %781 }
 0x316   : > { %1264 = vmatpush3.bf16.msra.mxu0 %v788_v51  ;;  %1346 = vrcp.f32 %v782_v33 }
 0x318   : > { %v1345_v14 = vpop.eup %1344 }
 0x320   : > { %v1347_v41 = vpop.eup %1346 }
 0x34a   : > { %v728_v60 = vpop.f32.mrb[4].mxu1 }
 0x34b   : > { %v745_v62 = vmul.f32 %v738_v59, %v728_v60  ;;  %v1259_v63 = vpop.f32.mrb[5].mxu1 }
 0x34c   : > { %v731_v0 = vpop.f32.mrb[6].mxu1 }
 0x34d   : > { %750 = vst.msk [vmem:[%s1675_s23] sm:$0xff] %vm441_vm3, %v745_v62  ;;  %v1679_v3 = vmul.f32 %v745_v62, %v738_v59  ;;  %v746_v1 = vmul.f32 %v743_v61, %v731_v0  ;;  %v1260_v2 = vpop.f32.mrb[7].mxu1 }
 0x34f   : > { %v881_v4 = vsel %vm441_vm3, %v1679_v3, 0.0  ;;  %751 = vst.msk [vmem:[%s1675_s23 + $0x8] sm:$0x1] %vm748_vm14, %v746_v1  ;;  %v1685_v5 = vmul.f32 %v746_v1, %v743_v61  ;;  %s1469_s23 = smov [#allocation2]  }
 0x351   : > { %v882_v7 = vsel %vm748_vm14, %v1685_v5, 0.0 }
 0x352   : > { %v883_v8 = vadd.f32 %v882_v7, %v881_v4 }
 0x354   : > { %v884_v9 = vrot.slane %v883_v8, 4 }
 0x356   : > { %v885_v10 = vadd.f32 %v884_v9, %v883_v8 }
 0x358   : > { %v886_v11 = vrot.slane %v885_v10, 2 }
 0x35a   : > { %v887_v12 = vadd.f32 %v886_v11, %v885_v10 }
 0x35c   : > { %v888_v13 = vrot.slane %v887_v12, 1 }
 0x35e   : > { %v889_v15 = vadd.f32 %v888_v13, %v887_v12 }
 0x360   : > { %v896_v16 = vmul.f32 %v1345_v14, %v889_v15 }
 0x362   : > { %v897_v17 = vpack.c.bf16 %v896_v16, %v896_v16 }
 0x364   : > { %1274 = vmatmul.mubr.msk.bf16.vlgmr.msra.gmra.mrb[8].mxu1 %vm441_vm3, %v897_v17 }
 0x3e4   : > { %v612_v19 = vpop.f32.mrb[4].mxu0 }
 0x3e5   : > { %v629_v22 = vmul.f32 %v622_v18, %v612_v19  ;;  %v1253_v23 = vpop.f32.mrb[5].mxu0 }
 0x3e6   : > { %v615_v25 = vpop.f32.mrb[6].mxu0 }
 0x3e7   : > { %747 = vst.msk [vmem:[%s1692_s14] sm:$0xff] %vm441_vm3, %v629_v22  ;;  %v1696_v26 = vmul.f32 %v629_v22, %v622_v18  ;;  %v630_v27 = vmul.f32 %v627_v24, %v615_v25  ;;  %v1254_v28 = vpop.f32.mrb[7].mxu0 }
 0x3e9   : > { %749 = vst.msk [vmem:[%s1692_s14 + $0x8] sm:$0x1] %vm748_vm14, %v630_v27  ;;  %v1700_v29 = vmul.f32 %v630_v27, %v627_v24  ;;  %v770_v30 = vsel %vm441_vm3, %v1696_v26, 0.0  ;;  %s1372_s14 = sshll.u32 %s1469_s23, 4  ;;  %s1373_s14 = int_to_ptr.vmem [resolvable:$false] %s1372_s14 }
 0x3ea   : > { %p1375_p0 = scmp.lt.s32.totalorder %s1721_s26, %s1373_s14 }
 0x3eb   : > { %v771_v31 = vsel %vm748_vm14, %v1700_v29, 0.0 }
 0x3ec   : > { %v772_v34 = vadd.f32 %v771_v31, %v770_v30 }
 0x3ee   : > { %v773_v35 = vrot.slane %v772_v34, 4 }
 0x3f0   : > { %v774_v36 = vadd.f32 %v773_v35, %v772_v34 }
 0x3f2   : > { %v775_v37 = vrot.slane %v774_v36, 2 }
 0x3f4   : > { %v776_v38 = vadd.f32 %v775_v37, %v774_v36 }
 0x3f6   : > { %v777_v39 = vrot.slane %v776_v38, 1 }
 0x3f8   : > { %v778_v40 = vadd.f32 %v777_v39, %v776_v38 }
 0x3fa   : > { %v785_v20 = vmul.f32 %v1347_v41, %v778_v40 }
 0x3fc   : > { %v786_v42 = vpack.c.bf16 %v785_v20, %v785_v20 }
 0x3fe   : > { %1266 = vmatmul.mubr.msk.bf16.vlgmr.msra.gmra.mrb[8].mxu0 %vm441_vm3, %v786_v42 }
 0x437   : > { %v935_v43 = vpop.f32.mrb[8].mxu1 }
 0x438   : > { %1348 = vtanh.f32 %v935_v43  ;;  %v1275_v44 = vpop.f32.mrb[9].mxu1 }
 0x439   : > { %v938_v45 = vpop.f32.mrb[10].mxu1 }
 0x43a   : > { %v1276_v46 = vpop.f32.mrb[11].mxu1 }
 0x442   : > { %v1349_v47 = vpop.eup %1348 }
 0x443   : > { %v945_v48 = vrot.slane %v1349_v47, %v1630_v32 }
 0x445   : > { %v947_v49 = vmul.f32 %v945_v48, %v746_v1  ;;  %v946_v50 = vmul.f32 %v945_v48, %v745_v62 }
 0x447   : > { %v951_v21 = vsel %vm748_vm14, %v947_v49, 0.0  ;;  %v948_v51 = vsel %vm441_vm3, %v946_v50, 0.0 }
 0x448   : > { %952 = vadd.xlane.f32.xlu1 %v951_v21  ;;  %949 = vadd.xlane.f32.xlu0 %v948_v51 }
 0x4d1   : > { %v826_v52 = vpop.f32.mrb[8].mxu0 }
 0x4d2   : > { %1350 = vtanh.f32 %v826_v52  ;;  %v1267_v53 = vpop.f32.mrb[9].mxu0 }
 0x4d3   : > { %v829_v54 = vpop.f32.mrb[10].mxu0 }
 0x4d4   : > { %v1268_v55 = vpop.f32.mrb[11].mxu0 }
 0x4d5   : > { %v953_v56 = vpop.xlane.xlu1 %952  ;;  %v950_v57 = vpop.xlane.xlu0 %949 }
 0x4d6   : > { %v1205_v58 = vmul.f32 -1.442695, %v953_v56  ;;  %v1204_v59 = vmul.f32 -1.442695, %v950_v57 }
 0x4d8   : > { %1352 = vpow2.f32 %v1205_v58 }
 0x4d9   : > { %1354 = vpow2.f32 %v1204_v59 }
 0x4dc   : > { %v1351_v60 = vpop.eup %1350 }
 0x4dd   : > { %v836_v61 = vrot.slane %v1351_v60, %v1630_v32 }
 0x4df   : > { %v837_v62 = vmul.f32 %v836_v61, %v629_v22  ;;  %v838_v0 = vmul.f32 %v836_v61, %v630_v27 }
 0x4e1   : > { %v839_v63 = vsel %vm441_vm3, %v837_v62, 0.0  ;;  %v842_v7 = vsel %vm748_vm14, %v838_v0, 0.0 }
 0x4e2   : > { %v1353_v1 = vpop.eup %1352  ;;  %840 = vadd.xlane.f32.xlu0 %v839_v63 }
 0x4e3   : > { %v1355_v2 = vpop.eup %1354  ;;  %v961_v4 = vadd.f32 1.0, %v1353_v1 }
 0x4e4   : > { %v960_v6 = vadd.f32 1.0, %v1355_v2 }
 0x4e5   : > { %1356 = vrcp.f32 %v961_v4 }
 0x4e6   : > { %1358 = vrcp.f32 %v960_v6  ;;  %843 = vadd.xlane.f32.xlu0 %v842_v7 }
 0x4ef   : > { %v1357_v8 = vpop.eup %1356 }
 0x4f0   : > { %v1359_v9 = vpop.eup %1358  ;;  %v967_v32 = vmul.f32 %v1357_v8, %v1685_v5 }
 0x4f1   : > { %v966_v10 = vmul.f32 %v1359_v9, %v1679_v3 }
 0x4f2   : > { %v969_v11 = vsel %vm748_vm14, %v967_v32, 0.0 }
 0x4f3   : > { %v968_v12 = vsel %vm441_vm3, %v966_v10, 0.0 }
 0x4f4   : > { %v970_v13 = vadd.f32 %v969_v11, %v968_v12 }
 0x4f6   : > { %v971_v14 = vrot.slane %v970_v13, 4 }
 0x4f8   : > { %v972_v15 = vadd.f32 %v971_v14, %v970_v13 }
 0x4fa   : > { %v973_v16 = vrot.slane %v972_v15, 2 }
 0x4fc   : > { %v974_v17 = vadd.f32 %v973_v16, %v972_v15 }
 0x4fe   : > { %v975_v18 = vrot.slane %v974_v17, 1 }
 0x500   : > { %v976_v19 = vadd.f32 %v975_v18, %v974_v17 }
 0x502   : > { %978 = vrot.lane.b32.xlu1 %v976_v19, %s1468_s24  ;;  %s1374_s24 = scalar_lea.vmem %s1373_s14, 512 }
 0x503   : > { %p1376_p1 = scmp.lt.s32.totalorder %s1374_s24, %s1368_s0 }
 0x505   : > { %p1377_p2 = por %p1376_p1, %p1375_p0 }
 0x507   : > { %p1378_p3 = pnand %p1377_p2, %p1371_p13 }
 0x509   : > { %1381 = shalt.err (!%p1378_p3)
}
 0x50a   : > { %s1382_s28 = scalar_lea.hbm %s1729_s17, 256  ;;  %s1386_s23 = scalar_lea.hbm %s1825_s7, 512 }
 0x50b   : > { %p1383_p4 = scmp.ne.s32.totalorder %s1729_s17, %s1382_s28  ;;  %p1387_p9 = scmp.lt.u32.totalorder %s1729_s17, %s1825_s7 }
 0x50c   : > { %p1388_p10 = scmp.lt.u32.totalorder %s1386_s23, %s1382_s28  ;;  %p1390_p12 = scmp.lt.u32.totalorder %s1382_s28, %s1729_s17 }
 0x50d   : > { %p1384_p7 = pnand %p1383_p4, %p1561_p5 }
 0x50e   : > { %p1389_p11 = por %p1388_p10, %p1387_p9 }
 0x50f   : > { %p1385_p8 = pneg %p1384_p7 }
 0x510   : > { %p1391_p13 = por %p1390_p12, %p1389_p11 }
 0x512   : > { %p1392_p0 = pnand %p1391_p13, %p1385_p8 }
 0x514   : > { %1395 = shalt.err (!%p1392_p0)
}
 0x515   : > { %s1470_s0 = smov 128   ;;  %s1471_s27 = smov 8  }
 0x516   : > { %s1841_s22 = scalar_lea.sflag [#allocation3], %s1670_s21  ;;  %s1842_s24 = sshll.u32 %s1544_s13, 8 }
 0x517   : > { %1277 = dma.vmem_to_hbm [thread:$0]  (%p1561_p5), %s1721_s26, 256, %s1729_s17, %s1841_s22, %s1470_s0, %s1470_s0, %s1471_s27  }
 0x518   : > { %s1763_s23 = scalar_lea.hbm %s1826_s8, %s1842_s24  ;;  %s989_s14 = scalar_lea.sflag [#allocation5], %s1670_s21 }
 0x519   : > { %s1396_s1 = scalar_lea.vmem %s1719_s25, 256  ;;  %s1472_s2 = smov [#allocation4]  }
 0x51a   : > { %p1397_p1 = scmp.ne.s32.totalorder %s1719_s25, %s1396_s1  ;;  %s1400_s3 = sshll.u32 %s1472_s2, 4  ;;  %s1401_s3 = int_to_ptr.vmem [resolvable:$false] %s1400_s3 }
 0x51b   : > { %s1402_s4 = scalar_lea.vmem %s1401_s3, 512  ;;  %p1403_p4 = scmp.lt.s32.totalorder %s1719_s25, %s1401_s3 }
 0x51c   : > { %p1398_p2 = pnand %p1397_p1, %p1561_p5  ;;  %p1404_p7 = scmp.lt.s32.totalorder %s1402_s4, %s1396_s1 }
 0x51e   : > { %p1399_p3 = pneg %p1398_p2  ;;  %p1405_p8 = por %p1404_p7, %p1403_p4 }
 0x520   : > { %p1406_p9 = pnand %p1405_p8, %p1399_p3 }
 0x522   : > { %1409 = shalt.err (!%p1406_p9)
}
 0x523   : > { %s1410_s13 = scalar_lea.hbm %s1763_s23, 256  ;;  %s1414_s2 = scalar_lea.hbm %s1826_s8, 512 }
 0x524   : > { %p1411_p10 = scmp.ne.s32.totalorder %s1763_s23, %s1410_s13  ;;  %p1415_p13 = scmp.lt.u32.totalorder %s1763_s23, %s1826_s8 }
 0x525   : > { %p1416_p0 = scmp.lt.u32.totalorder %s1414_s2, %s1410_s13  ;;  %p1418_p2 = scmp.lt.u32.totalorder %s1410_s13, %s1763_s23 }
 0x526   : > { %p1412_p11 = pnand %p1411_p10, %p1561_p5 }
 0x527   : > { %p1417_p1 = por %p1416_p0, %p1415_p13 }
 0x528   : > { %p1413_p12 = pneg %p1412_p11 }
 0x529   : > { %p1419_p3 = por %p1418_p2, %p1417_p1 }
 0x52b   : > { %p1420_p4 = pnand %p1419_p3, %p1413_p12 }
 0x52d   : > { %1423 = shalt.err (!%p1420_p4)
}
 0x52e   : > { %1278 = dma.vmem_to_hbm [thread:$0]  (%p1561_p5), %s1719_s25, 256, %s1763_s23, %s989_s14, %s1470_s0, %s1470_s0, %s1471_s27   ;;  %vm981_vm15 = vcmask 516352  }
 0x52f   : > { %s423_s19 = scalar_lea.vmem %s1827_s9, %s1588_s29 }
 0x56f   : > { %v841_v3 = vpop.xlane.xlu0 %840 }
 0x570   : > { %v1201_v5 = vmul.f32 -1.442695, %v841_v3 }
 0x572   : > { %1360 = vpow2.f32 %v1201_v5 }
 0x573   : > { %v844_v22 = vpop.xlane.xlu0 %843 }
 0x574   : > { %v1202_v23 = vmul.f32 -1.442695, %v844_v22 }
 0x576   : > { %1362 = vpow2.f32 %v1202_v23 }
 0x57c   : > { %v1361_v24 = vpop.eup %1360 }
 0x57d   : > { %v851_v25 = vadd.f32 1.0, %v1361_v24 }
 0x57f   : > { %1364 = vrcp.f32 %v851_v25 }
 0x580   : > { %v1363_v27 = vpop.eup %1362 }
 0x581   : > { %v852_v28 = vadd.f32 1.0, %v1363_v27 }
 0x583   : > { %1366 = vrcp.f32 %v852_v28 }
 0x589   : > { %v1365_v30 = vpop.eup %1364 }
 0x58a   : > { %v857_v31 = vmul.f32 %v1365_v30, %v1696_v26  ;;  %v979_v26 = vpop.permute.xlu1 %978 }
 0x58c   : > { %v859_v35 = vsel %vm441_vm3, %v857_v31, 0.0 }
 0x58d   : > { %v1367_v33 = vpop.eup %1366 }
 0x58e   : > { %v858_v34 = vmul.f32 %v1367_v33, %v1700_v29 }
 0x590   : > { %v860_v36 = vsel %vm748_vm14, %v858_v34, 0.0 }
 0x591   : > { %v861_v37 = vadd.f32 %v860_v36, %v859_v35 }
 0x593   : > { %v862_v38 = vrot.slane %v861_v37, 4 }
 0x595   : > { %v863_v39 = vadd.f32 %v862_v38, %v861_v37 }
 0x597   : > { %v864_v40 = vrot.slane %v863_v39, 2 }
 0x599   : > { %v865_v41 = vadd.f32 %v864_v40, %v863_v39 }
 0x59b   : > { %v866_v20 = vrot.slane %v865_v41, 1 }
 0x59d   : > { %v867_v42 = vadd.f32 %v866_v20, %v865_v41 }
 0x59f   : > { %868 = vst.msk [vmem:[%s423_s19] sm:$0x1] %vm748_vm14, %v867_v42 }
 0x5a0   : > { %982 = vst.msk [vmem:[%s423_s19] sm:$0x1] %vm981_vm15, %v979_v26 }
 0x5a1 PF: > { %p1288_p5 = scmp.ge.s32.totalorder %s1462_s12, 2  ;;  %s1039_s21 = sand.u32 1, %s1450_s30  }
 0x5a2   : > { %s1040_s25 = scalar_lea.sflag [#allocation3], %s1039_s21 }
 0x5a3   : > { %p1282_p7 = pnand %p1288_p5, %p1565_p6 }
 0x5a5   : > { %1441 = dma.done.wait (!%p1282_p7), %s1040_s25, 256  }
 0x5a6   : > { %1443 = vsyncadd (!%p1282_p7), %s1040_s25, 4294967040  ;;  %s1049_s0 = scalar_lea.sflag [#allocation5], %s1039_s21 }
 0x5a7   : > { %1445 = dma.done.wait (!%p1282_p7), %s1049_s0, 256  }
 0x5a8   : > { %1447 = vsyncadd (!%p1282_p7), %s1049_s0, 4294967040  ;;  %p23_p8 = scmp.ge.s32.totalorder %s1548_s15, 4   ;;  %s1843_s30 = smov %s1454_s10 }
 0x5a9   : > { %s1844_s10 = smov %s1458_s11  ;;  %s1845_s11 = smov %s1559_s18 }
 0x5aa   : > { %s1846_s12 = smov %s1548_s15  ;;  %25 = sbr.rel (!%p23_p8) target bundleno = 11 (0xb), region = 124 }
 0x5b1   :  { %1060 = vsyncpa [#allocation3], 1 }
 0x5b2   :  { %1062 = vsyncpa [#allocation3 + $0x1], 1 }
 0x5b3   :  { %1063 = vsyncpa [#allocation5], 1 }
 0x5b4   :  { %1065 = vsyncpa [#allocation5 + $0x1], 1 }

</bundles_post_ra>
